<compile_context>
chip_gen: v7x
topology: tpu7x:2x2x1
jax: 0.10.0
libtpu: 0.0.40
codegen_flags: <defaults>
</compile_context>

<pallas_src>
import functools

import numpy as np

import jax
import jax.numpy as jnp
from jax import lax
from jax.experimental import pallas as pl
from jax.experimental.pallas import tpu as pltpu


# Geometry implied by the module (fc expects 24*8*8 -> two 2x2 pools -> 32x32 input).
H = W = 32
C1, C2 = 12, 24            # conv1 / conv2 output channels
HP1, WP1 = 16, 16          # spatial size after pool1
HP2, WP2 = 8, 8            # spatial size after pool2
L1 = WP1 * C1              # 192: pooled-conv1 slab lane width  (w*12 + c)
N1 = 2 * L1                # 384: conv1 matmul output lanes (parity*192 + w*12 + c)
L2 = WP2 * C2              # 192: pooled-conv2 slab lane width  (w*24 + c)
N2 = 2 * L2                # 384: conv2 matmul output lanes (parity*192 + w*24 + c)
NPAD = 128                 # lane-padded fc output width (num_classes <= 128)


# ----------------------------------------------------------------------------
# Fused kernel: conv1+relu+pool -> conv2+relu+pool -> fc, BT images per step.
# ----------------------------------------------------------------------------
def _fused_cnn_kernel(x_ref, m1_ref, b1_ref, m2_ref, b2_ref, g_ref, fcb_ref,
                      o_ref):
    f32 = jnp.float32
    rows1 = x_ref.shape[0]          # BT * 32
    bt = rows1 // H
    rows2 = bt * HP1                # BT * 16
    rows3 = bt * HP2                # BT * 8

    x = x_ref[...]                                            # (BT*32, W*Cin)

    # ------------------ conv1 (3x3, pad 1) + bias + ReLU -------------------
    # Width taps/padding are folded into the banded matrices m1[ky]; vertical
    # taps are XLU sublane rolls of the per-ky matmul outputs, with per-image
    # boundary rows masked to zero (this is the height padding).
    y1 = lax.broadcasted_iota(jnp.int32, (rows1, 1), 0) % H
    acc1 = jnp.dot(x, m1_ref[1], preferred_element_type=f32) + b1_ref[...]
    s0 = jnp.dot(x, m1_ref[0], preferred_element_type=f32)
    acc1 = acc1 + jnp.where(y1 == 0, 0.0, pltpu.roll(s0, shift=1, axis=0))
    s2 = jnp.dot(x, m1_ref[2], preferred_element_type=f32)
    acc1 = acc1 + jnp.where(y1 == H - 1, 0.0,
                            pltpu.roll(s2, shift=rows1 - 1, axis=0))
    acc1 = jnp.maximum(acc1, 0.0)                             # (BT*32, 384)

    # ------------------ 2x2 max pool #1 ------------------------------------
    # Width pairs live in the two 192-lane halves, height pairs in adjacent
    # rows (32 rows per image, even, so pairs never cross images).
    wp1 = jnp.maximum(acc1[:, :L1], acc1[:, L1:])             # (BT*32, 192)
    p1 = jnp.max(wp1.reshape(rows2, 2, L1), axis=1)           # (BT*16, 192)

    # ------------------ conv2 (3x3, pad 1) + bias + ReLU --------------------
    y2 = lax.broadcasted_iota(jnp.int32, (rows2, 1), 0) % HP1
    acc2 = jnp.dot(p1, m2_ref[1], preferred_element_type=f32) + b2_ref[...]
    t0 = jnp.dot(p1, m2_ref[0], preferred_element_type=f32)
    acc2 = acc2 + jnp.where(y2 == 0, 0.0, pltpu.roll(t0, shift=1, axis=0))
    t2 = jnp.dot(p1, m2_ref[2], preferred_element_type=f32)
    acc2 = acc2 + jnp.where(y2 == HP1 - 1, 0.0,
                            pltpu.roll(t2, shift=rows2 - 1, axis=0))
    acc2 = jnp.maximum(acc2, 0.0)                             # (BT*16, 384)

    # ------------------ 2x2 max pool #2 ------------------------------------
    wp2 = jnp.maximum(acc2[:, :L2], acc2[:, L2:])             # (BT*16, 192)
    p2 = jnp.max(wp2.reshape(rows3, 2, L2), axis=1)           # (BT*8, 192)

    # ------------------ fc (lane-padded to 128 output lanes) ----------------
    # Eight independent M=BT*8 matmuls, one per feature row h; each activation
    # row keeps only its own h's product, then the 8 rows of every image are
    # reduced.  Removes the old dependent chain of M=1, N=10 matmuls without a
    # lane-changing reshape; padded fc columns are zero.
    hrow = lax.broadcasted_iota(jnp.int32, (rows3, 1), 0) % HP2
    per_row = jnp.zeros((rows3, NPAD), f32)
    for h in range(HP2):
        ph = jnp.dot(p2, g_ref[h], preferred_element_type=f32)   # (BT*8, 128)
        per_row = per_row + jnp.where(hrow == h, ph, 0.0)
    logits = jnp.sum(per_row.reshape(bt, HP2, NPAD), axis=1) + fcb_ref[...]
    o_ref[0] = logits.astype(o_ref.dtype)                     # (BT, 128)


# ----------------------------------------------------------------------------
# One-time parameter preparation (hoisted out of the forward pass).
# ----------------------------------------------------------------------------
def prepare_params(params):
    """Transform PyTorch-layout params into the kernel's banded operands."""
    w1 = np.asarray(params["conv1_w"], np.float32)       # (12, Cin, 3, 3)
    w2 = np.asarray(params["conv2_w"], np.float32)       # (24, 12, 3, 3)
    fcw = np.asarray(params["fc_w"], np.float32)         # (O, 1536)
    num_classes = fcw.shape[0]
    cin = w1.shape[1]
    assert num_classes <= NPAD

    # conv1 banded matrices: m1[ky, x_in*cin + ci, parity*192 + (x_out//2)*12 + co]
    m1 = np.zeros((3, W * cin, N1), np.float32)
    for ky in range(3):
        for kx in range(3):
            for xo in range(W):
                xi = xo + kx - 1
                if 0 <= xi < W:
                    lane = (xo % 2) * L1 + (xo // 2) * C1
                    m1[ky, xi * cin:(xi + 1) * cin, lane:lane + C1] = w1[:, :, ky, kx].T

    # conv2 banded matrices: m2[ky, x_in*12 + ci, parity*192 + (x_out//2)*24 + co]
    m2 = np.zeros((3, WP1 * C1, N2), np.float32)
    for ky in range(3):
        for kx in range(3):
            for xo in range(WP1):
                xi = xo + kx - 1
                if 0 <= xi < WP1:
                    lane = (xo % 2) * L2 + (xo // 2) * C2
                    m2[ky, xi * C1:(xi + 1) * C1, lane:lane + C2] = w2[:, :, ky, kx].T

    # fc weights permuted from PyTorch flatten order (c*64 + h*8 + w) to the
    # kernel's (h, w*24 + c) layout and zero-padded to 128 output lanes.
    g = fcw.reshape(num_classes, C2, HP2, WP2).transpose(2, 3, 1, 0)  # (h,w,c,O)
    g = np.ascontiguousarray(g.reshape(HP2, WP2 * C2, num_classes))
    g_pad = np.zeros((HP2, WP2 * C2, NPAD), np.float32)
    g_pad[:, :, :num_classes] = g

    fcb = np.zeros((1, NPAD), np.float32)
    fcb[0, :num_classes] = np.asarray(params["fc_b"], np.float32)

    return {
        "m1": jnp.asarray(m1),
        "b1": jnp.asarray(np.tile(np.asarray(params["conv1_b"], np.float32),
                                  2 * WP1).reshape(1, N1)),
        "m2": jnp.asarray(m2),
        "b2": jnp.asarray(np.tile(np.asarray(params["conv2_b"], np.float32),
                                  2 * WP2).reshape(1, N2)),
        "g": jnp.asarray(g_pad),
        "fcb": jnp.asarray(fcb),
    }


# ----------------------------------------------------------------------------
# Forward pass (single fused pallas_call, batch-tiled grid).
# ----------------------------------------------------------------------------
@functools.partial(jax.jit, static_argnames=("num_classes", "bt"))
def model_forward(x_nchw, prepped, *, num_classes, bt=4):
    B, cin, h, w = x_nchw.shape
    assert (h, w) == (H, W), "Model geometry requires 32x32 spatial input."

    bt = min(bt, B)                       # batch tile (images per grid step)
    bp = ((B + bt - 1) // bt) * bt        # batch padded to a multiple of bt
    grid_len = bp // bt

    # NCHW -> lane-dense slab: rows = (image, y), lanes = x*Cin + ci.
    x_slab = jnp.transpose(x_nchw, (0, 2, 3, 1)).reshape(B, H, W * cin)
    if bp != B:
        x_slab = jnp.pad(x_slab, ((0, bp - B), (0, 0), (0, 0)))
    x_slab = x_slab.reshape(bp * H, W * cin)

    flops = bp * 2 * (3 * H * (W * cin) * N1
                      + 3 * HP1 * (WP1 * C1) * N2
                      + HP2 * HP2 * L2 * NPAD)
    bytes_accessed = 4 * (int(x_slab.size)
                          + sum(int(v.size) for v in prepped.values())
                          + bp * NPAD)

    out = pl.pallas_call(
        _fused_cnn_kernel,
        grid=(grid_len,),
        in_specs=[
            pl.BlockSpec((bt * H, W * cin), lambda b: (b, 0)),          # x slab
            pl.BlockSpec((3, W * cin, N1), lambda b: (0, 0, 0)),        # m1
            pl.BlockSpec((1, N1), lambda b: (0, 0)),                    # b1 row
            pl.BlockSpec((3, WP1 * C1, N2), lambda b: (0, 0, 0)),       # m2
            pl.BlockSpec((1, N2), lambda b: (0, 0)),                    # b2 row
            pl.BlockSpec((HP2, WP2 * C2, NPAD), lambda b: (0, 0, 0)),   # fc w
            pl.BlockSpec((1, NPAD), lambda b: (0, 0)),                  # fc bias
        ],
        out_specs=pl.BlockSpec((1, bt, NPAD), lambda b: (b, 0, 0)),
        out_shape=jax.ShapeDtypeStruct((grid_len, bt, NPAD), jnp.float32),
        compiler_params=pltpu.CompilerParams(dimension_semantics=("parallel",)),
        cost_estimate=pl.CostEstimate(flops=flops, transcendentals=0,
                                      bytes_accessed=bytes_accessed),
    )(x_slab, prepped["m1"], prepped["b1"], prepped["m2"], prepped["b2"],
      prepped["g"], prepped["fcb"])

    return out.reshape(bp, NPAD)[:B, :num_classes]


# ----------------------------------------------------------------------------
# Init (PyTorch-layout params) and a plain-JAX reference for self-checking.
# ----------------------------------------------------------------------------
def init_params(key, num_channels, num_classes):
    ks = jax.random.split(key, 6)
    return {
        "conv1_w": 0.05 * jax.random.normal(ks[0], (12, num_channels, 3, 3), jnp.float32),
        "conv1_b": 0.05 * jax.random.normal(ks[1], (12,), jnp.float32),
        "conv2_w": 0.05 * jax.random.normal(ks[2], (24, 12, 3, 3), jnp.float32),
        "conv2_b": 0.05 * jax.random.normal(ks[3], (24,), jnp.float32),
        "fc_w":    0.05 * jax.random.normal(ks[4], (num_classes, 24 * 8 * 8), jnp.float32),
        "fc_b":    0.05 * jax.random.normal(ks[5], (num_classes,), jnp.float32),
    }


def _reference_forward(x_nchw, params):
    """Pure-JAX (non-Pallas) replica of Model.forward, for verification."""
    B = x_nchw.shape[0]

    def conv_relu_pool(x_nhwc, w_oihw, b):
        hh, ww = x_nhwc.shape[1], x_nhwc.shape[2]
        cout = w_oihw.shape[0]
        xp = jnp.pad(x_nhwc, ((0, 0), (1, 1), (1, 1), (0, 0)))
        wk = jnp.transpose(w_oihw, (2, 3, 1, 0))          # (3,3,cin,cout)
        acc = jnp.zeros((B, hh, ww, cout), jnp.float32)
        for dy in range(3):
            for dx in range(3):
                acc = acc + jnp.einsum("bhwc,cd->bhwd",
                                       xp[:, dy:dy + hh, dx:dx + ww, :], wk[dy, dx])
        acc = jnp.maximum(acc + b, 0.0)
        acc = jnp.max(acc.reshape(B, hh, ww // 2, 2, cout), axis=3)
        acc = jnp.max(acc.reshape(B, hh // 2, 2, ww // 2, cout), axis=2)
        return acc

    x = jnp.transpose(x_nchw, (0, 2, 3, 1))
    x = conv_relu_pool(x, params["conv1_w"], params["conv1_b"])
    x = conv_relu_pool(x, params["conv2_w"], params["conv2_b"])
    x = jnp.transpose(x, (0, 3, 1, 2)).reshape(B, -1)      # NCHW flatten
    return x @ params["fc_w"].T + params["fc_b"]


if __name__ == "__main__":
    num_channels, num_classes = 3, 10
    key = jax.random.PRNGKey(0)
    k_x, k_p = jax.random.split(key)
    # Two 2x2 maxpools before the 24*8*8 flatten imply a 32x32 spatial input.
    # batch=8 with bt=4 -> a 2-step parallel grid (keeps both v7x TCs busy).
    batch = 8
    x = jax.random.normal(k_x, (batch, num_channels, H, W), jnp.float32)

    params = init_params(k_p, num_channels, num_classes)
    prepped = prepare_params(params)          # one-time weight preprocessing

    out = jax.block_until_ready(
        model_forward(x, prepped, num_classes=num_classes, bt=4))
    assert out.shape == (batch, num_classes) and out.dtype == jnp.float32

    ref = jax.block_until_ready(_reference_forward(x, params))
    max_err = float(jnp.max(jnp.abs(out - ref)))
    assert max_err < 1e-4, f"mismatch vs reference: {max_err}"

    print("KERNEL_OK")
</pallas_src>

<mosaic_0001>
module attributes {stable_mosaic.version = 11 : i64} {
  func.func @_fused_cnn_kernel(%arg0: i32, %arg1: memref<128x96xf32, #tpu.memory_space<vmem>>, %arg2: memref<3x96x384xf32, #tpu.memory_space<vmem>>, %arg3: memref<1x384xf32, #tpu.memory_space<vmem>>, %arg4: memref<3x192x384xf32, #tpu.memory_space<vmem>>, %arg5: memref<1x384xf32, #tpu.memory_space<vmem>>, %arg6: memref<8x192x128xf32, #tpu.memory_space<vmem>>, %arg7: memref<1x128xf32, #tpu.memory_space<vmem>>, %arg8: memref<1x4x128xf32, #tpu.memory_space<vmem>>) attributes {dimension_semantics = [#tpu.dimension_semantics<parallel>], iteration_bounds = array<i64: 2>, scalar_prefetch = 0 : i64, scratch_operands = 0 : i64, tpu.core_type = #tpu.core_type<tc>, window_params = [{transform_indices = @transform_0, window_bounds = array<i64: 128, 96>}, {pipeline_mode = #tpu.pipeline_mode<synchronous>, transform_indices = @transform_1, window_bounds = array<i64: 3, 96, 384>}, {pipeline_mode = #tpu.pipeline_mode<synchronous>, transform_indices = @transform_2, window_bounds = array<i64: 1, 384>}, {pipeline_mode = #tpu.pipeline_mode<synchronous>, transform_indices = @transform_3, window_bounds = array<i64: 3, 192, 384>}, {pipeline_mode = #tpu.pipeline_mode<synchronous>, transform_indices = @transform_4, window_bounds = array<i64: 1, 384>}, {pipeline_mode = #tpu.pipeline_mode<synchronous>, transform_indices = @transform_5, window_bounds = array<i64: 8, 192, 128>}, {pipeline_mode = #tpu.pipeline_mode<synchronous>, transform_indices = @transform_6, window_bounds = array<i64: 1, 128>}, {transform_indices = @transform_7, window_bounds = array<i64: 1, 4, 128>}]} {
    %c0 = arith.constant 0 : index
    %c0_0 = arith.constant 0 : index
    %0 = vector.load %arg1[%c0, %c0_0] : memref<128x96xf32, #tpu.memory_space<vmem>>, vector<128x96xf32>
    %1 = tpu.iota {dimensions = array<i32: 0>} : vector<128x1xi32>
    %c32_i32 = arith.constant 32 : i32
    %c0_i32 = arith.constant 0 : i32
    %2 = arith.cmpi eq, %c32_i32, %c0_i32 : i32
    %c1_i32 = arith.constant 1 : i32
    %3 = arith.select %2, %c1_i32, %c32_i32 : i32
    %4 = vector.broadcast %3 : i32 to vector<128x1xi32>
    %5 = arith.remsi %1, %4 : vector<128x1xi32>
    %c0_i32_1 = arith.constant 0 : i32
    %6 = vector.broadcast %c0_i32_1 : i32 to vector<128x1xi32>
    %7 = arith.cmpi ne, %5, %6 : vector<128x1xi32>
    %c0_i32_2 = arith.constant 0 : i32
    %8 = vector.broadcast %c0_i32_2 : i32 to vector<128x1xi32>
    %9 = arith.cmpi slt, %5, %8 : vector<128x1xi32>
    %c0_i32_3 = arith.constant 0 : i32
    %10 = arith.cmpi slt, %3, %c0_i32_3 : i32
    %11 = vector.broadcast %10 : i1 to vector<128x1xi1>
    %12 = vector.broadcast %11 : vector<128x1xi1> to vector<128x1xi1>
    %13 = arith.xori %9, %12 : vector<128x1xi1>
    %14 = arith.andi %13, %7 : vector<128x1xi1>
    %15 = vector.broadcast %3 : i32 to vector<128x1xi32>
    %16 = arith.addi %5, %15 : vector<128x1xi32>
    %17 = arith.select %14, %16, %5 : vector<128x1xi1>, vector<128x1xi32>
    %c1 = arith.constant 1 : index
    %c0_4 = arith.constant 0 : index
    %c0_5 = arith.constant 0 : index
    %18 = vector.load %arg2[%c1, %c0_4, %c0_5] : memref<3x96x384xf32, #tpu.memory_space<vmem>>, vector<1x96x384xf32>
    %19 = vector.shape_cast %18 : vector<1x96x384xf32> to vector<96x384xf32>
    %cst = arith.constant dense<0.000000e+00> : vector<128x384xf32>
    %20 = tpu.matmul %0, %19, %cst {dimension_numbers = #tpu.dot_dimension_numbers<[1], [0], [0], [1], [0, 0, 1, 1], [], []>} : vector<128x96xf32>, vector<96x384xf32>, vector<128x384xf32> -> vector<128x384xf32>
    %c0_6 = arith.constant 0 : index
    %c0_7 = arith.constant 0 : index
    %21 = vector.load %arg3[%c0_6, %c0_7] : memref<1x384xf32, #tpu.memory_space<vmem>>, vector<1x384xf32>
    %22 = vector.broadcast %21 : vector<1x384xf32> to vector<128x384xf32>
    %23 = arith.addf %20, %22 : vector<128x384xf32>
    %c0_8 = arith.constant 0 : index
    %c0_9 = arith.constant 0 : index
    %c0_10 = arith.constant 0 : index
    %24 = vector.load %arg2[%c0_8, %c0_9, %c0_10] : memref<3x96x384xf32, #tpu.memory_space<vmem>>, vector<1x96x384xf32>
    %25 = vector.shape_cast %24 : vector<1x96x384xf32> to vector<96x384xf32>
    %cst_11 = arith.constant dense<0.000000e+00> : vector<128x384xf32>
    %26 = tpu.matmul %0, %25, %cst_11 {dimension_numbers = #tpu.dot_dimension_numbers<[1], [0], [0], [1], [0, 0, 1, 1], [], []>} : vector<128x96xf32>, vector<96x384xf32>, vector<128x384xf32> -> vector<128x384xf32>
    %c0_i32_12 = arith.constant 0 : i32
    %27 = vector.broadcast %c0_i32_12 : i32 to vector<128x1xi32>
    %28 = arith.cmpi eq, %17, %27 : vector<128x1xi32>
    %c1_i32_13 = arith.constant 1 : i32
    %29 = tpu.dynamic_rotate %26 by %c1_i32_13 dim 0 : vector<128x384xf32>, i32 -> vector<128x384xf32>
    %cst_14 = arith.constant 0.000000e+00 : f32
    %30 = vector.shape_cast %28 : vector<128x1xi1> to vector<128x1xi1>
    %31 = vector.broadcast %30 : vector<128x1xi1> to vector<128x384xi1>
    %32 = vector.broadcast %cst_14 : f32 to vector<128x384xf32>
    %33 = arith.select %31, %32, %29 : vector<128x384xi1>, vector<128x384xf32>
    %34 = arith.addf %23, %33 : vector<128x384xf32>
    %c2 = arith.constant 2 : index
    %c0_15 = arith.constant 0 : index
    %c0_16 = arith.constant 0 : index
    %35 = vector.load %arg2[%c2, %c0_15, %c0_16] : memref<3x96x384xf32, #tpu.memory_space<vmem>>, vector<1x96x384xf32>
    %36 = vector.shape_cast %35 : vector<1x96x384xf32> to vector<96x384xf32>
    %cst_17 = arith.constant dense<0.000000e+00> : vector<128x384xf32>
    %37 = tpu.matmul %0, %36, %cst_17 {dimension_numbers = #tpu.dot_dimension_numbers<[1], [0], [0], [1], [0, 0, 1, 1], [], []>} : vector<128x96xf32>, vector<96x384xf32>, vector<128x384xf32> -> vector<128x384xf32>
    %c31_i32 = arith.constant 31 : i32
    %38 = vector.broadcast %c31_i32 : i32 to vector<128x1xi32>
    %39 = arith.cmpi eq, %17, %38 : vector<128x1xi32>
    %c127_i32 = arith.constant 127 : i32
    %40 = tpu.dynamic_rotate %37 by %c127_i32 dim 0 : vector<128x384xf32>, i32 -> vector<128x384xf32>
    %cst_18 = arith.constant 0.000000e+00 : f32
    %41 = vector.shape_cast %39 : vector<128x1xi1> to vector<128x1xi1>
    %42 = vector.broadcast %41 : vector<128x1xi1> to vector<128x384xi1>
    %43 = vector.broadcast %cst_18 : f32 to vector<128x384xf32>
    %44 = arith.select %42, %43, %40 : vector<128x384xi1>, vector<128x384xf32>
    %45 = arith.addf %34, %44 : vector<128x384xf32>
    %cst_19 = arith.constant 0.000000e+00 : f32
    %46 = vector.broadcast %cst_19 : f32 to vector<128x384xf32>
    %47 = arith.maximumf %45, %46 : vector<128x384xf32>
    %48 = vector.extract_strided_slice %47 {offsets = [0, 0], sizes = [128, 192], strides = [1, 1]} : vector<128x384xf32> to vector<128x192xf32>
    %49 = vector.extract_strided_slice %47 {offsets = [0, 192], sizes = [128, 192], strides = [1, 1]} : vector<128x384xf32> to vector<128x192xf32>
    %50 = arith.maximumf %48, %49 : vector<128x192xf32>
    %51 = vector.shape_cast %50 : vector<128x192xf32> to vector<64x2x192xf32>
    %cst_20 = arith.constant dense<0xFF800000> : vector<64x192xf32>
    %52 = vector.multi_reduction <maximumf>, %51, %cst_20 [1] : vector<64x2x192xf32> to vector<64x192xf32>
    %53 = tpu.iota {dimensions = array<i32: 0>} : vector<64x1xi32>
    %c16_i32 = arith.constant 16 : i32
    %c0_i32_21 = arith.constant 0 : i32
    %54 = arith.cmpi eq, %c16_i32, %c0_i32_21 : i32
    %c1_i32_22 = arith.constant 1 : i32
    %55 = arith.select %54, %c1_i32_22, %c16_i32 : i32
    %56 = vector.broadcast %55 : i32 to vector<64x1xi32>
    %57 = arith.remsi %53, %56 : vector<64x1xi32>
    %c0_i32_23 = arith.constant 0 : i32
    %58 = vector.broadcast %c0_i32_23 : i32 to vector<64x1xi32>
    %59 = arith.cmpi ne, %57, %58 : vector<64x1xi32>
    %c0_i32_24 = arith.constant 0 : i32
    %60 = vector.broadcast %c0_i32_24 : i32 to vector<64x1xi32>
    %61 = arith.cmpi slt, %57, %60 : vector<64x1xi32>
    %c0_i32_25 = arith.constant 0 : i32
    %62 = arith.cmpi slt, %55, %c0_i32_25 : i32
    %63 = vector.broadcast %62 : i1 to vector<64x1xi1>
    %64 = vector.broadcast %63 : vector<64x1xi1> to vector<64x1xi1>
    %65 = arith.xori %61, %64 : vector<64x1xi1>
    %66 = arith.andi %65, %59 : vector<64x1xi1>
    %67 = vector.broadcast %55 : i32 to vector<64x1xi32>
    %68 = arith.addi %57, %67 : vector<64x1xi32>
    %69 = arith.select %66, %68, %57 : vector<64x1xi1>, vector<64x1xi32>
    %c1_26 = arith.constant 1 : index
    %c0_27 = arith.constant 0 : index
    %c0_28 = arith.constant 0 : index
    %70 = vector.load %arg4[%c1_26, %c0_27, %c0_28] : memref<3x192x384xf32, #tpu.memory_space<vmem>>, vector<1x192x384xf32>
    %71 = vector.shape_cast %70 : vector<1x192x384xf32> to vector<192x384xf32>
    %cst_29 = arith.constant dense<0.000000e+00> : vector<64x384xf32>
    %72 = tpu.matmul %52, %71, %cst_29 {dimension_numbers = #tpu.dot_dimension_numbers<[1], [0], [0], [1], [0, 0, 1, 1], [], []>} : vector<64x192xf32>, vector<192x384xf32>, vector<64x384xf32> -> vector<64x384xf32>
    %c0_30 = arith.constant 0 : index
    %c0_31 = arith.constant 0 : index
    %73 = vector.load %arg5[%c0_30, %c0_31] : memref<1x384xf32, #tpu.memory_space<vmem>>, vector<1x384xf32>
    %74 = vector.broadcast %73 : vector<1x384xf32> to vector<64x384xf32>
    %75 = arith.addf %72, %74 : vector<64x384xf32>
    %c0_32 = arith.constant 0 : index
    %c0_33 = arith.constant 0 : index
    %c0_34 = arith.constant 0 : index
    %76 = vector.load %arg4[%c0_32, %c0_33, %c0_34] : memref<3x192x384xf32, #tpu.memory_space<vmem>>, vector<1x192x384xf32>
    %77 = vector.shape_cast %76 : vector<1x192x384xf32> to vector<192x384xf32>
    %cst_35 = arith.constant dense<0.000000e+00> : vector<64x384xf32>
    %78 = tpu.matmul %52, %77, %cst_35 {dimension_numbers = #tpu.dot_dimension_numbers<[1], [0], [0], [1], [0, 0, 1, 1], [], []>} : vector<64x192xf32>, vector<192x384xf32>, vector<64x384xf32> -> vector<64x384xf32>
    %c0_i32_36 = arith.constant 0 : i32
    %79 = vector.broadcast %c0_i32_36 : i32 to vector<64x1xi32>
    %80 = arith.cmpi eq, %69, %79 : vector<64x1xi32>
    %c1_i32_37 = arith.constant 1 : i32
    %81 = tpu.dynamic_rotate %78 by %c1_i32_37 dim 0 : vector<64x384xf32>, i32 -> vector<64x384xf32>
    %cst_38 = arith.constant 0.000000e+00 : f32
    %82 = vector.shape_cast %80 : vector<64x1xi1> to vector<64x1xi1>
    %83 = vector.broadcast %82 : vector<64x1xi1> to vector<64x384xi1>
    %84 = vector.broadcast %cst_38 : f32 to vector<64x384xf32>
    %85 = arith.select %83, %84, %81 : vector<64x384xi1>, vector<64x384xf32>
    %86 = arith.addf %75, %85 : vector<64x384xf32>
    %c2_39 = arith.constant 2 : index
    %c0_40 = arith.constant 0 : index
    %c0_41 = arith.constant 0 : index
    %87 = vector.load %arg4[%c2_39, %c0_40, %c0_41] : memref<3x192x384xf32, #tpu.memory_space<vmem>>, vector<1x192x384xf32>
    %88 = vector.shape_cast %87 : vector<1x192x384xf32> to vector<192x384xf32>
    %cst_42 = arith.constant dense<0.000000e+00> : vector<64x384xf32>
    %89 = tpu.matmul %52, %88, %cst_42 {dimension_numbers = #tpu.dot_dimension_numbers<[1], [0], [0], [1], [0, 0, 1, 1], [], []>} : vector<64x192xf32>, vector<192x384xf32>, vector<64x384xf32> -> vector<64x384xf32>
    %c15_i32 = arith.constant 15 : i32
    %90 = vector.broadcast %c15_i32 : i32 to vector<64x1xi32>
    %91 = arith.cmpi eq, %69, %90 : vector<64x1xi32>
    %c63_i32 = arith.constant 63 : i32
    %92 = tpu.dynamic_rotate %89 by %c63_i32 dim 0 : vector<64x384xf32>, i32 -> vector<64x384xf32>
    %cst_43 = arith.constant 0.000000e+00 : f32
    %93 = vector.shape_cast %91 : vector<64x1xi1> to vector<64x1xi1>
    %94 = vector.broadcast %93 : vector<64x1xi1> to vector<64x384xi1>
    %95 = vector.broadcast %cst_43 : f32 to vector<64x384xf32>
    %96 = arith.select %94, %95, %92 : vector<64x384xi1>, vector<64x384xf32>
    %97 = arith.addf %86, %96 : vector<64x384xf32>
    %cst_44 = arith.constant 0.000000e+00 : f32
    %98 = vector.broadcast %cst_44 : f32 to vector<64x384xf32>
    %99 = arith.maximumf %97, %98 : vector<64x384xf32>
    %100 = vector.extract_strided_slice %99 {offsets = [0, 0], sizes = [64, 192], strides = [1, 1]} : vector<64x384xf32> to vector<64x192xf32>
    %101 = vector.extract_strided_slice %99 {offsets = [0, 192], sizes = [64, 192], strides = [1, 1]} : vector<64x384xf32> to vector<64x192xf32>
    %102 = arith.maximumf %100, %101 : vector<64x192xf32>
    %103 = vector.shape_cast %102 : vector<64x192xf32> to vector<32x2x192xf32>
    %cst_45 = arith.constant dense<0xFF800000> : vector<32x192xf32>
    %104 = vector.multi_reduction <maximumf>, %103, %cst_45 [1] : vector<32x2x192xf32> to vector<32x192xf32>
    %105 = tpu.iota {dimensions = array<i32: 0>} : vector<32x1xi32>
    %c8_i32 = arith.constant 8 : i32
    %c0_i32_46 = arith.constant 0 : i32
    %106 = arith.cmpi eq, %c8_i32, %c0_i32_46 : i32
    %c1_i32_47 = arith.constant 1 : i32
    %107 = arith.select %106, %c1_i32_47, %c8_i32 : i32
    %108 = vector.broadcast %107 : i32 to vector<32x1xi32>
    %109 = arith.remsi %105, %108 : vector<32x1xi32>
    %c0_i32_48 = arith.constant 0 : i32
    %110 = vector.broadcast %c0_i32_48 : i32 to vector<32x1xi32>
    %111 = arith.cmpi ne, %109, %110 : vector<32x1xi32>
    %c0_i32_49 = arith.constant 0 : i32
    %112 = vector.broadcast %c0_i32_49 : i32 to vector<32x1xi32>
    %113 = arith.cmpi slt, %109, %112 : vector<32x1xi32>
    %c0_i32_50 = arith.constant 0 : i32
    %114 = arith.cmpi slt, %107, %c0_i32_50 : i32
    %115 = vector.broadcast %114 : i1 to vector<32x1xi1>
    %116 = vector.broadcast %115 : vector<32x1xi1> to vector<32x1xi1>
    %117 = arith.xori %113, %116 : vector<32x1xi1>
    %118 = arith.andi %117, %111 : vector<32x1xi1>
    %119 = vector.broadcast %107 : i32 to vector<32x1xi32>
    %120 = arith.addi %109, %119 : vector<32x1xi32>
    %121 = arith.select %118, %120, %109 : vector<32x1xi1>, vector<32x1xi32>
    %cst_51 = arith.constant 0.000000e+00 : f32
    %122 = vector.broadcast %cst_51 : f32 to vector<32x128xf32>
    %c0_52 = arith.constant 0 : index
    %c0_53 = arith.constant 0 : index
    %c0_54 = arith.constant 0 : index
    %123 = vector.load %arg6[%c0_52, %c0_53, %c0_54] : memref<8x192x128xf32, #tpu.memory_space<vmem>>, vector<1x192x128xf32>
    %124 = vector.shape_cast %123 : vector<1x192x128xf32> to vector<192x128xf32>
    %cst_55 = arith.constant dense<0.000000e+00> : vector<32x128xf32>
    %125 = tpu.matmul %104, %124, %cst_55 {dimension_numbers = #tpu.dot_dimension_numbers<[1], [0], [0], [1], [0, 0, 1, 1], [], []>} : vector<32x192xf32>, vector<192x128xf32>, vector<32x128xf32> -> vector<32x128xf32>
    %c0_i32_56 = arith.constant 0 : i32
    %126 = vector.broadcast %c0_i32_56 : i32 to vector<32x1xi32>
    %127 = arith.cmpi eq, %121, %126 : vector<32x1xi32>
    %cst_57 = arith.constant 0.000000e+00 : f32
    %128 = vector.shape_cast %127 : vector<32x1xi1> to vector<32x1xi1>
    %129 = vector.broadcast %128 : vector<32x1xi1> to vector<32x128xi1>
    %130 = vector.broadcast %cst_57 : f32 to vector<32x128xf32>
    %131 = arith.select %129, %125, %130 : vector<32x128xi1>, vector<32x128xf32>
    %132 = arith.addf %122, %131 : vector<32x128xf32>
    %c1_58 = arith.constant 1 : index
    %c0_59 = arith.constant 0 : index
    %c0_60 = arith.constant 0 : index
    %133 = vector.load %arg6[%c1_58, %c0_59, %c0_60] : memref<8x192x128xf32, #tpu.memory_space<vmem>>, vector<1x192x128xf32>
    %134 = vector.shape_cast %133 : vector<1x192x128xf32> to vector<192x128xf32>
    %cst_61 = arith.constant dense<0.000000e+00> : vector<32x128xf32>
    %135 = tpu.matmul %104, %134, %cst_61 {dimension_numbers = #tpu.dot_dimension_numbers<[1], [0], [0], [1], [0, 0, 1, 1], [], []>} : vector<32x192xf32>, vector<192x128xf32>, vector<32x128xf32> -> vector<32x128xf32>
    %c1_i32_62 = arith.constant 1 : i32
    %136 = vector.broadcast %c1_i32_62 : i32 to vector<32x1xi32>
    %137 = arith.cmpi eq, %121, %136 : vector<32x1xi32>
    %cst_63 = arith.constant 0.000000e+00 : f32
    %138 = vector.shape_cast %137 : vector<32x1xi1> to vector<32x1xi1>
    %139 = vector.broadcast %138 : vector<32x1xi1> to vector<32x128xi1>
    %140 = vector.broadcast %cst_63 : f32 to vector<32x128xf32>
    %141 = arith.select %139, %135, %140 : vector<32x128xi1>, vector<32x128xf32>
    %142 = arith.addf %132, %141 : vector<32x128xf32>
    %c2_64 = arith.constant 2 : index
    %c0_65 = arith.constant 0 : index
    %c0_66 = arith.constant 0 : index
    %143 = vector.load %arg6[%c2_64, %c0_65, %c0_66] : memref<8x192x128xf32, #tpu.memory_space<vmem>>, vector<1x192x128xf32>
    %144 = vector.shape_cast %143 : vector<1x192x128xf32> to vector<192x128xf32>
    %cst_67 = arith.constant dense<0.000000e+00> : vector<32x128xf32>
    %145 = tpu.matmul %104, %144, %cst_67 {dimension_numbers = #tpu.dot_dimension_numbers<[1], [0], [0], [1], [0, 0, 1, 1], [], []>} : vector<32x192xf32>, vector<192x128xf32>, vector<32x128xf32> -> vector<32x128xf32>
    %c2_i32 = arith.constant 2 : i32
    %146 = vector.broadcast %c2_i32 : i32 to vector<32x1xi32>
    %147 = arith.cmpi eq, %121, %146 : vector<32x1xi32>
    %cst_68 = arith.constant 0.000000e+00 : f32
    %148 = vector.shape_cast %147 : vector<32x1xi1> to vector<32x1xi1>
    %149 = vector.broadcast %148 : vector<32x1xi1> to vector<32x128xi1>
    %150 = vector.broadcast %cst_68 : f32 to vector<32x128xf32>
    %151 = arith.select %149, %145, %150 : vector<32x128xi1>, vector<32x128xf32>
    %152 = arith.addf %142, %151 : vector<32x128xf32>
    %c3 = arith.constant 3 : index
    %c0_69 = arith.constant 0 : index
    %c0_70 = arith.constant 0 : index
    %153 = vector.load %arg6[%c3, %c0_69, %c0_70] : memref<8x192x128xf32, #tpu.memory_space<vmem>>, vector<1x192x128xf32>
    %154 = vector.shape_cast %153 : vector<1x192x128xf32> to vector<192x128xf32>
    %cst_71 = arith.constant dense<0.000000e+00> : vector<32x128xf32>
    %155 = tpu.matmul %104, %154, %cst_71 {dimension_numbers = #tpu.dot_dimension_numbers<[1], [0], [0], [1], [0, 0, 1, 1], [], []>} : vector<32x192xf32>, vector<192x128xf32>, vector<32x128xf32> -> vector<32x128xf32>
    %c3_i32 = arith.constant 3 : i32
    %156 = vector.broadcast %c3_i32 : i32 to vector<32x1xi32>
    %157 = arith.cmpi eq, %121, %156 : vector<32x1xi32>
    %cst_72 = arith.constant 0.000000e+00 : f32
    %158 = vector.shape_cast %157 : vector<32x1xi1> to vector<32x1xi1>
    %159 = vector.broadcast %158 : vector<32x1xi1> to vector<32x128xi1>
    %160 = vector.broadcast %cst_72 : f32 to vector<32x128xf32>
    %161 = arith.select %159, %155, %160 : vector<32x128xi1>, vector<32x128xf32>
    %162 = arith.addf %152, %161 : vector<32x128xf32>
    %c4 = arith.constant 4 : index
    %c0_73 = arith.constant 0 : index
    %c0_74 = arith.constant 0 : index
    %163 = vector.load %arg6[%c4, %c0_73, %c0_74] : memref<8x192x128xf32, #tpu.memory_space<vmem>>, vector<1x192x128xf32>
    %164 = vector.shape_cast %163 : vector<1x192x128xf32> to vector<192x128xf32>
    %cst_75 = arith.constant dense<0.000000e+00> : vector<32x128xf32>
    %165 = tpu.matmul %104, %164, %cst_75 {dimension_numbers = #tpu.dot_dimension_numbers<[1], [0], [0], [1], [0, 0, 1, 1], [], []>} : vector<32x192xf32>, vector<192x128xf32>, vector<32x128xf32> -> vector<32x128xf32>
    %c4_i32 = arith.constant 4 : i32
    %166 = vector.broadcast %c4_i32 : i32 to vector<32x1xi32>
    %167 = arith.cmpi eq, %121, %166 : vector<32x1xi32>
    %cst_76 = arith.constant 0.000000e+00 : f32
    %168 = vector.shape_cast %167 : vector<32x1xi1> to vector<32x1xi1>
    %169 = vector.broadcast %168 : vector<32x1xi1> to vector<32x128xi1>
    %170 = vector.broadcast %cst_76 : f32 to vector<32x128xf32>
    %171 = arith.select %169, %165, %170 : vector<32x128xi1>, vector<32x128xf32>
    %172 = arith.addf %162, %171 : vector<32x128xf32>
    %c5 = arith.constant 5 : index
    %c0_77 = arith.constant 0 : index
    %c0_78 = arith.constant 0 : index
    %173 = vector.load %arg6[%c5, %c0_77, %c0_78] : memref<8x192x128xf32, #tpu.memory_space<vmem>>, vector<1x192x128xf32>
    %174 = vector.shape_cast %173 : vector<1x192x128xf32> to vector<192x128xf32>
    %cst_79 = arith.constant dense<0.000000e+00> : vector<32x128xf32>
    %175 = tpu.matmul %104, %174, %cst_79 {dimension_numbers = #tpu.dot_dimension_numbers<[1], [0], [0], [1], [0, 0, 1, 1], [], []>} : vector<32x192xf32>, vector<192x128xf32>, vector<32x128xf32> -> vector<32x128xf32>
    %c5_i32 = arith.constant 5 : i32
    %176 = vector.broadcast %c5_i32 : i32 to vector<32x1xi32>
    %177 = arith.cmpi eq, %121, %176 : vector<32x1xi32>
    %cst_80 = arith.constant 0.000000e+00 : f32
    %178 = vector.shape_cast %177 : vector<32x1xi1> to vector<32x1xi1>
    %179 = vector.broadcast %178 : vector<32x1xi1> to vector<32x128xi1>
    %180 = vector.broadcast %cst_80 : f32 to vector<32x128xf32>
    %181 = arith.select %179, %175, %180 : vector<32x128xi1>, vector<32x128xf32>
    %182 = arith.addf %172, %181 : vector<32x128xf32>
    %c6 = arith.constant 6 : index
    %c0_81 = arith.constant 0 : index
    %c0_82 = arith.constant 0 : index
    %183 = vector.load %arg6[%c6, %c0_81, %c0_82] : memref<8x192x128xf32, #tpu.memory_space<vmem>>, vector<1x192x128xf32>
    %184 = vector.shape_cast %183 : vector<1x192x128xf32> to vector<192x128xf32>
    %cst_83 = arith.constant dense<0.000000e+00> : vector<32x128xf32>
    %185 = tpu.matmul %104, %184, %cst_83 {dimension_numbers = #tpu.dot_dimension_numbers<[1], [0], [0], [1], [0, 0, 1, 1], [], []>} : vector<32x192xf32>, vector<192x128xf32>, vector<32x128xf32> -> vector<32x128xf32>
    %c6_i32 = arith.constant 6 : i32
    %186 = vector.broadcast %c6_i32 : i32 to vector<32x1xi32>
    %187 = arith.cmpi eq, %121, %186 : vector<32x1xi32>
    %cst_84 = arith.constant 0.000000e+00 : f32
    %188 = vector.shape_cast %187 : vector<32x1xi1> to vector<32x1xi1>
    %189 = vector.broadcast %188 : vector<32x1xi1> to vector<32x128xi1>
    %190 = vector.broadcast %cst_84 : f32 to vector<32x128xf32>
    %191 = arith.select %189, %185, %190 : vector<32x128xi1>, vector<32x128xf32>
    %192 = arith.addf %182, %191 : vector<32x128xf32>
    %c7 = arith.constant 7 : index
    %c0_85 = arith.constant 0 : index
    %c0_86 = arith.constant 0 : index
    %193 = vector.load %arg6[%c7, %c0_85, %c0_86] : memref<8x192x128xf32, #tpu.memory_space<vmem>>, vector<1x192x128xf32>
    %194 = vector.shape_cast %193 : vector<1x192x128xf32> to vector<192x128xf32>
    %cst_87 = arith.constant dense<0.000000e+00> : vector<32x128xf32>
    %195 = tpu.matmul %104, %194, %cst_87 {dimension_numbers = #tpu.dot_dimension_numbers<[1], [0], [0], [1], [0, 0, 1, 1], [], []>} : vector<32x192xf32>, vector<192x128xf32>, vector<32x128xf32> -> vector<32x128xf32>
    %c7_i32 = arith.constant 7 : i32
    %196 = vector.broadcast %c7_i32 : i32 to vector<32x1xi32>
    %197 = arith.cmpi eq, %121, %196 : vector<32x1xi32>
    %cst_88 = arith.constant 0.000000e+00 : f32
    %198 = vector.shape_cast %197 : vector<32x1xi1> to vector<32x1xi1>
    %199 = vector.broadcast %198 : vector<32x1xi1> to vector<32x128xi1>
    %200 = vector.broadcast %cst_88 : f32 to vector<32x128xf32>
    %201 = arith.select %199, %195, %200 : vector<32x128xi1>, vector<32x128xf32>
    %202 = arith.addf %192, %201 : vector<32x128xf32>
    %203 = vector.shape_cast %202 : vector<32x128xf32> to vector<4x8x128xf32>
    %cst_89 = arith.constant dense<0.000000e+00> : vector<4x128xf32>
    %204 = vector.multi_reduction <add>, %203, %cst_89 [1] : vector<4x8x128xf32> to vector<4x128xf32>
    %c0_90 = arith.constant 0 : index
    %c0_91 = arith.constant 0 : index
    %205 = vector.load %arg7[%c0_90, %c0_91] : memref<1x128xf32, #tpu.memory_space<vmem>>, vector<1x128xf32>
    %206 = vector.broadcast %205 : vector<1x128xf32> to vector<4x128xf32>
    %207 = arith.addf %204, %206 : vector<4x128xf32>
    %c0_92 = arith.constant 0 : index
    %c0_93 = arith.constant 0 : index
    %c0_94 = arith.constant 0 : index
    %208 = vector.load %arg8[%c0_92, %c0_93, %c0_94] : memref<1x4x128xf32, #tpu.memory_space<vmem>>, vector<1x4x128xf32>
    %209 = vector.shape_cast %208 : vector<1x4x128xf32> to vector<4x128xf32>
    %210 = vector.shape_cast %207 : vector<4x128xf32> to vector<1x4x128xf32>
    tpu.vector_store %arg8[%c0_92, %c0_93, %c0_94], %210 {strides = array<i32>} : memref<1x4x128xf32, #tpu.memory_space<vmem>>, vector<1x4x128xf32>,
    return
  }
  func.func @transform_0(%arg0: i32) -> (i32, i32) {
    %c0_i32 = arith.constant 0 : i32
    %c0_i32_0 = arith.constant 0 : i32
    return %arg0, %c0_i32 : i32, i32
  }
  func.func @transform_1(%arg0: i32) -> (i32, i32, i32) {
    %c0_i32 = arith.constant 0 : i32
    %c0_i32_0 = arith.constant 0 : i32
    %c0_i32_1 = arith.constant 0 : i32
    %c0_i32_2 = arith.constant 0 : i32
    return %c0_i32, %c0_i32_0, %c0_i32_1 : i32, i32, i32
  }
  func.func @transform_2(%arg0: i32) -> (i32, i32) {
    %c0_i32 = arith.constant 0 : i32
    %c0_i32_0 = arith.constant 0 : i32
    %c0_i32_1 = arith.constant 0 : i32
    return %c0_i32, %c0_i32_0 : i32, i32
  }
  func.func @transform_3(%arg0: i32) -> (i32, i32, i32) {
    %c0_i32 = arith.constant 0 : i32
    %c0_i32_0 = arith.constant 0 : i32
    %c0_i32_1 = arith.constant 0 : i32
    %c0_i32_2 = arith.constant 0 : i32
    return %c0_i32, %c0_i32_0, %c0_i32_1 : i32, i32, i32
  }
  func.func @transform_4(%arg0: i32) -> (i32, i32) {
    %c0_i32 = arith.constant 0 : i32
    %c0_i32_0 = arith.constant 0 : i32
    %c0_i32_1 = arith.constant 0 : i32
    return %c0_i32, %c0_i32_0 : i32, i32
  }
  func.func @transform_5(%arg0: i32) -> (i32, i32, i32) {
    %c0_i32 = arith.constant 0 : i32
    %c0_i32_0 = arith.constant 0 : i32
    %c0_i32_1 = arith.constant 0 : i32
    %c0_i32_2 = arith.constant 0 : i32
    return %c0_i32, %c0_i32_0, %c0_i32_1 : i32, i32, i32
  }
  func.func @transform_6(%arg0: i32) -> (i32, i32) {
    %c0_i32 = arith.constant 0 : i32
    %c0_i32_0 = arith.constant 0 : i32
    %c0_i32_1 = arith.constant 0 : i32
    return %c0_i32, %c0_i32_0 : i32, i32
  }
  func.func @transform_7(%arg0: i32) -> (i32, i32, i32) {
    %c0_i32 = arith.constant 0 : i32
    %c0_i32_0 = arith.constant 0 : i32
    %c0_i32_1 = arith.constant 0 : i32
    return %arg0, %c0_i32, %c0_i32_0 : i32, i32, i32
  }
}

</mosaic_0001>

<bundles_post_ra>
// kernel: model_forward.1
= control target key start
LH: loop header
LB: loop body
LE: loop exit
PB: predicated region body
PF: predicated region fallthrough
CT: control target
= control target key end

     0   :  { %12 = vsyncpa [#allocation3], 0  ;;  %s14386_s0 = inlined_call_operand.vmem [shape: f32[256,96], index: 0, kind: input, shape index: {}]   ;;  %s14387_s1 = inlined_call_operand.vmem [shape: f32[3,96,384], index: 1, kind: input, shape index: {}]   ;;  %s14388_s2 = inlined_call_operand.vmem [shape: f32[1,384], index: 2, kind: input, shape index: {}]   ;;  %s14389_s3 = inlined_call_operand.vmem [shape: f32[3,192,384], index: 3, kind: input, shape index: {}]   ;;  %s14390_s4 = inlined_call_operand.vmem [shape: f32[1,384], index: 4, kind: input, shape index: {}]   ;;  %s14391_s5 = inlined_call_operand.hbm [shape: f32[8,192,128], index: 5, kind: input, shape index: {}]   ;;  %s14392_s6 = inlined_call_operand.vmem [shape: f32[1,128], index: 6, kind: input, shape index: {}]   ;;  %s14393_s7 = inlined_call_operand.hbm [shape: f32[2,4,128], index: 7, kind: output, shape index: {}]  }
   0x1   :  { %13 = vsyncpa [#allocation4], 0 }
   0x2   :  { %15 = vsyncpa [#allocation4 + $0x1], 0  ;;  %s9583_s24 = smov 0   ;;  %s9585_s25 = smov 0  }
   0x3   :  { %s9587_s26 = smov 0   ;;  %s9589_s27 = smov 0  }
   0x4 LB: > { %s9604_s28 = sadd.s32 4294967295, %s9533_s27   ;;  %s8065_s29 = sadd.s32 4294967294, %s9533_s27   ;;  %s9533_s27 = sphi %s9589_s27, %s14840_s27   ;;  %s9529_s26 = sphi %s9587_s26, %s14839_s26   ;;  %s9525_s25 = sphi %s9585_s25, %s14838_s25   ;;  %s9521_s24 = sphi %s9583_s24, %s14837_s24  }
   0x5   : > { %s9608_s30 = sadd.s32 1, %s9533_s27   ;;  %s180_s8 = sadd.s32 1, %s9529_s26 }
   0x6   : > { %s177_s9 = ssub.s32 %s9533_s27, %s9608_s30  ;;  %p190_p0 = scmp.ne.s32.totalorder %s9529_s26, %s9525_s25 }
   0x7   : > { %p178_p1 = scmp.eq.s32.totalorder %s177_s9, 0  ;;  %p191_p2 = scmp.eq.s32.totalorder %s9604_s28, 1 }
   0x8   : > { %p196_p3 = scmp.ne.s32.totalorder %s9525_s25, %s9521_s24  ;;  %p197_p4 = scmp.eq.s32.totalorder %s8065_s29, 1 }
   0x9   : > { %s9619_s10 = scalar_select %p178_p1, %s9529_s26, %s180_s8  }
   0xa   : > { %p9621_p5 = por %p191_p2, %p190_p0  ;;  %p9625_p6 = por %p197_p4, %p196_p3 }
   0xb   : > { %p8066_p7 = scmp.ge.s32.totalorder %s9533_s27, 1  ;;  %p204_p8 = scmp.lt.s32.totalorder %s9533_s27, 3 }
   0xc   : > { %s14478_s11 = scalar_select %p9621_p5, 1, 0 }
   0xd   : > { %s14479_s12 = scalar_select %p9625_p6, 1, 0 }
   0xe   : > { %p14394_p9 = scmp.eq.s32.totalorder %s9604_s28, 0  ;;  %p9632_p10 = pnand %p8066_p7, %p204_p8 }
   0xf   : > { %s9535_s14 = smov [#allocation2]   ;;  %s9439_s19 = scalar_lea.hbm %s14391_s5, 24576 }
  0x10   : > { %s14480_s13 = scalar_select %p9632_p10, 1, 0 }
  0x11   : > { %s228_s15 = sshll.u32 %s9535_s14, 4  ;;  %p9389_p11 = pneg %p9632_p10  ;;  %s229_s15 = int_to_ptr.vmem [resolvable:$true] %s228_s15 }
  0x12   : > { %p9440_p13 = scmp.ne.s32.totalorder %s14391_s5, %s9439_s19  ;;  %p9446_p3 = scmp.lt.u32.totalorder %s9439_s19, %s14391_s5 }
  0x13   : > { %p9640_p12 = pnand %p14394_p9, %p9389_p11 }
  0x15   : > { %p9441_p0 = pneg %p9640_p12 }
  0x17   : > { %p9442_p1 = pnand %p9441_p0, %p9440_p13 }
  0x19   : > { %p9443_p2 = pneg %p9442_p1 }
  0x1b   : > { %p9448_p4 = pnand %p9446_p3, %p9443_p2 }
  0x1d   : > { %9451 = shalt.err (!%p9448_p4)
}
  0x1e   : > { %s9452_s29 = scalar_lea.vmem %s229_s15, 24576  ;;  %p9460_p9 = scmp.lt.s32.totalorder %s229_s15, %s229_s15 }
  0x1f   : > { %p9453_p7 = scmp.ne.s32.totalorder %s229_s15, %s9452_s29  ;;  %p9461_p6 = scmp.lt.s32.totalorder %s9452_s29, %s9452_s29 }
  0x21   : > { %p9455_p8 = pnand %p9453_p7, %p9441_p0  ;;  %p9462_p5 = por %p9461_p6, %p9460_p9 }
  0x23   : > { %p9456_p11 = pneg %p9455_p8 }
  0x25   : > { %p9463_p10 = pnand %p9462_p5, %p9456_p11 }
  0x27   : > { %9466 = shalt.err (!%p9463_p10)
}
  0x28   : > { %s9536_s8 = smov 128   ;;  %s9537_s9 = smov 8  }
  0x29   : > { %9392 = dma.hbm_to_vmem [thread:$0]  (!%p9640_p12), %s14391_s5, 24576, %s229_s15, [#allocation3], %s9536_s8, %s9536_s8, %s9537_s9  }
  0x2a   : > { %p14482_p13 = scmp.ne.s32.totalorder %s14480_s13, 0 }
  0x2c   : > { %256 = sbr.rel (%p14482_p13) target bundleno = 1838 (0x72e), region = 48 }
  0x33   : > { %p14483_p1 = scmp.eq.s32.totalorder %s9604_s28, 0 }
  0x35   : > { %9512 = dma.done.wait (%p14483_p1), [#allocation3], 24576   ;;  %p14484_p0 = pmov %p14483_p1 }
  0x36   : > { %v9538_v0 = vmov 0.0   ;;  %s8072_s18 = sshll.u32 %s9604_s28, 4  ;;  %v8075_v1 = vld [vmem:[%s14387_s1 + $0x128] sm:$0xff]  ;;  %v8078_v2 = vld [vmem:[%s14387_s1 + $0x140] sm:$0xff]  ;;  %v8076_v3 = vld [vmem:[%s14387_s1 + $0x130] sm:$0xff]  ;;  %vm573_vm0 = vcmask 785408  }
  0x37   : > { %9514 = vsyncadd (%p14484_p0), [#allocation3], 4294942720  ;;  %686 = vmatprep.mubr.f32.mxu0 %v9538_v0  ;;  %p289_p5 = scmp.lt.s32.totalorder %s8072_s18, 31  ;;  %v8699_v4 = vpack.c.bf16 %v8078_v2, %v8075_v1  ;;  %v8079_v5 = vld [vmem:[%s14387_s1 + $0x148] sm:$0xff]  ;;  %v8074_v6 = vld [vmem:[%s14387_s1 + $0x120] sm:$0xff]  ;;  %vm2239_vm11 = vcmask 523264  }
  0x38   : > { %v8077_v7 = vld [vmem:[%s14387_s1 + $0x138] sm:$0xff]  ;;  %v8723_v8 = vpack.c.bf16 %v8079_v5, %v8076_v3  ;;  %v8084_v11 = vld [vmem:[%s14387_s1 + $0x170] sm:$0xff]  ;;  %v8082_v12 = vld [vmem:[%s14387_s1 + $0x160] sm:$0xff]  ;;  %vm3280_vm12 = vcmask 1041408   ;;  %vm3288_vm13 = vcmask 517120   ;;  %vm4492_vm14 = vcmask 1041409  }
  0x39   : > { %v8701_v9 = vpack.c.bf16 %v8077_v7, %v8074_v6  ;;  %v8081_v10 = vld [vmem:[%s14387_s1 + $0x158] sm:$0xff]  ;;  %s14842_s18 = smov (!%p289_p5, %s8072_s18), 31  ;;  %8700 = vmatprep.subr.bf16.mxu0 %v8699_v4  ;;  %v8080_v15 = vld [vmem:[%s14387_s1 + $0x150] sm:$0xff]  ;;  %v8083_v16 = vld [vmem:[%s14387_s1 + $0x168] sm:$0xff]  ;;  %vm4494_vm15 = vcmask 1042434   ;;  %s285_s17 = sand.u32 1, %s9525_s25  }
  0x3a   : > { %v8703_v13 = vpack.c.bf16 %v8084_v11, %v8081_v10  ;;  %v8085_v14 = vld [vmem:[%s14387_s1 + $0x178] sm:$0xff]  ;;  %8724 = vmatprep.subr.bf16.mxu1 %v8723_v8  ;;  %v8705_v18 = vpack.c.bf16 %v8083_v16, %v8080_v15  ;;  %v8087_v19 = vld [vmem:[%s14387_s1 + $0x188] sm:$0xff]  ;;  %v8090_v20 = vld [vmem:[%s14387_s1 + $0x1a0] sm:$0xff]  ;;  %s8073_s19 = sshll.u32 %s14842_s18, 3  ;;  %s8071_s16 = sshll.u32 %s285_s17, 2 }
  0x3b   : > { %8702 = vmatpush1.bf16.msra.mxu0 %v8701_v9  ;;  %v8727_v17 = vpack.c.bf16 %v8085_v14, %v8082_v12  ;;  %v8088_v21 = vld [vmem:[%s14387_s1 + $0x190] sm:$0xff]  ;;  %8726 = vmatpush3.bf16.msra.mxu1 %v8723_v8  ;;  %v8707_v22 = vpack.c.bf16 %v8090_v20, %v8087_v19  ;;  %v8091_v23 = vld [vmem:[%s14387_s1 + $0x1a8] sm:$0xff]  ;;  %v8086_v24 = vld [vmem:[%s14387_s1 + $0x180] sm:$0xff]  ;;  %s9746_s14 = scalar_lea.vmem %s14386_s0, %s8073_s19  ;;  %s8468_s15 = sshll.u32 %s9604_s28, 6 }
  0x3c   : > { %8704 = vmatprep.subr.bf16.mxu0 %v8703_v13  ;;  %v8089_v25 = vld [vmem:[%s14387_s1 + $0x198] sm:$0xff]  ;;  %v8731_v26 = vpack.c.bf16 %v8091_v23, %v8088_v21  ;;  %v8096_v28 = vld [vmem:[%s14387_s1 + $0x1d0] sm:$0xff]  ;;  %v8094_v29 = vld [vmem:[%s14387_s1 + $0x1c0] sm:$0xff]  ;;  %s287_s20 = scalar_lea.vmem [#allocation5], %s8071_s16  ;;  %s14343_s23 = scalar_lea.hbm %s14393_s7, %s8468_s15 }
  0x3d   : > { %8728 = vmatprep.subr.bf16.mxu1 %v8727_v17  ;;  %v8093_v27 = vld [vmem:[%s14387_s1 + $0x1b8] sm:$0xff]  ;;  %v8709_v31 = vpack.c.bf16 %v8089_v25, %v8086_v24  ;;  %v8092_v33 = vld [vmem:[%s14387_s1 + $0x1b0] sm:$0xff]  ;;  %v8095_v34 = vld [vmem:[%s14387_s1 + $0x1c8] sm:$0xff]  ;;  %s7994_s13 = sshll.u32 %s287_s20, 4  ;;  %s7981_s19 = scalar_lea.sflag [#allocation4], %s285_s17  ;;  %s14345_s13 = int_to_ptr.vmem [resolvable:$true] %s7994_s13 }
  0x3e   : > { %v8097_v30 = vld [vmem:[%s14387_s1 + $0x1d8] sm:$0xff]  ;;  %v8711_v32 = vpack.c.bf16 %v8096_v28, %v8093_v27  ;;  %v8099_v36 = vld [vmem:[%s14387_s1 + $0x1e8] sm:$0xff]  ;;  %v8102_v37 = vld [vmem:[%s14387_s1 + $0x200] sm:$0xff]  ;;  %v8713_v40 = vpack.c.bf16 %v8095_v34, %v8092_v33  ;;  %s9467_s29 = scalar_lea.vmem %s14345_s13, 64  ;;  %p14835_p9 = scmp.ne.s32.totalorder %s14478_s11, 0 }
  0x3f   : > { %8706 = vmatpush1.bf16.msra.mxu0 %v8705_v18  ;;  %8730 = vmatpush3.bf16.msra.mxu1 %v8727_v17  ;;  %v8735_v35 = vpack.c.bf16 %v8097_v30, %v8094_v29  ;;  %v8100_v38 = vld [vmem:[%s14387_s1 + $0x1f0] sm:$0xff]  ;;  %v8103_v39 = vld [vmem:[%s14387_s1 + $0x208] sm:$0xff]  ;;  %v9761_v41 = vld [vmem:[%s9746_s14] sm:$0xff]  ;;  %v8715_v42 = vpack.c.bf16 %v8102_v37, %v8099_v36  ;;  %p9468_p6 = scmp.ne.s32.totalorder %s14345_s13, %s9467_s29  ;;  %s9542_s28 = smov [#allocation5]  }
  0x40   : > { %8708 = vmatprep.subr.bf16.mxu0 %v8707_v22  ;;  %8732 = vmatprep.subr.bf16.mxu1 %v8731_v26  ;;  %v8098_v43 = vld [vmem:[%s14387_s1 + $0x1e0] sm:$0xff]  ;;  %v8101_v44 = vld [vmem:[%s14387_s1 + $0x1f8] sm:$0xff]  ;;  %v8739_v45 = vpack.c.bf16 %v8103_v39, %v8100_v38  ;;  %v8108_v47 = vld [vmem:[%s14387_s1 + $0x230] sm:$0xff]  ;;  %s9471_s8 = sshll.u32 %s9542_s28, 4  ;;  %s9472_s8 = int_to_ptr.vmem [resolvable:$false] %s9471_s8 }
  0x41   : > { %v8105_v46 = vld [vmem:[%s14387_s1 + $0x218] sm:$0xff]  ;;  %8579 = vmatprep.mubr.msk.f32.mxu1 %vm573_vm0, %v9761_v41  ;;  %v8106_v48 = vld [vmem:[%s14387_s1 + $0x220] sm:$0xff]  ;;  %v8717_v50 = vpack.c.bf16 %v8101_v44, %v8098_v43  ;;  %v8104_v52 = vld [vmem:[%s14387_s1 + $0x210] sm:$0xff]  ;;  %p9469_p10 = pnand %p9468_p6, %p14835_p9  ;;  %s9473_s18 = scalar_lea.vmem %s9472_s8, 128 }
  0x42   : > { %v8109_v49 = vld [vmem:[%s14387_s1 + $0x238] sm:$0xff]  ;;  %v8719_v51 = vpack.c.bf16 %v8108_v47, %v8105_v46  ;;  %v8107_v53 = vld [vmem:[%s14387_s1 + $0x228] sm:$0xff]  ;;  %v930_v55 = vld [vmem:[%s14387_s1 + $0x10] sm:$0xff]  ;;  %p9474_p2 = scmp.lt.s32.totalorder %s14345_s13, %s9472_s8  ;;  %p9475_p3 = scmp.lt.s32.totalorder %s9473_s18, %s9467_s29 }
  0x43   : > { %8710 = vmatpush1.bf16.msra.mxu0 %v8709_v31  ;;  %8734 = vmatpush3.bf16.msra.mxu1 %v8731_v26  ;;  %v8743_v54 = vpack.c.bf16 %v8109_v49, %v8106_v48  ;;  %v933_v56 = vld [vmem:[%s14387_s1 + $0x28] sm:$0xff]  ;;  %v932_v58 = vld [vmem:[%s14387_s1 + $0x20] sm:$0xff]  ;;  %v8721_v59 = vpack.c.bf16 %v8107_v53, %v8104_v52  ;;  %v931_v63 = vld [vmem:[%s14387_s1 + $0x18] sm:$0xff]  ;;  %p9470_p12 = pneg %p9469_p10 }
  0x44   : > { %8712 = vmatprep.subr.bf16.mxu0 %v8711_v32  ;;  %8736 = vmatprep.subr.bf16.mxu1 %v8735_v35  ;;  %v929_v57 = vld [vmem:[%s14387_s1 + $0x8] sm:$0xff]  ;;  %v8771_v60 = vpack.c.bf16 %v933_v56, %v930_v55  ;;  %v928_v62 = vld [vmem:[%s14387_s1] sm:$0xff]  ;;  %v935_v1 = vld [vmem:[%s14387_s1 + $0x38] sm:$0xff]  ;;  %p9476_p4 = por %p9475_p3, %p9474_p2 }
  0x45   : > { %v8747_v61 = vpack.c.bf16 %v932_v58, %v929_v57  ;;  %v938_v2 = vld [vmem:[%s14387_s1 + $0x50] sm:$0xff]  ;;  %v936_v3 = vld [vmem:[%s14387_s1 + $0x40] sm:$0xff]  ;;  %v939_v4 = vld [vmem:[%s14387_s1 + $0x58] sm:$0xff]  ;;  %v8749_v6 = vpack.c.bf16 %v931_v63, %v928_v62 }
  0x46   : > { %v9820_v5 = vld [vmem:[%s9746_s14 + $0x8] sm:$0xff]  ;;  %v8751_v7 = vpack.c.bf16 %v938_v2, %v935_v1  ;;  %v934_v8 = vld [vmem:[%s14387_s1 + $0x30] sm:$0xff]  ;;  %v8775_v11 = vpack.c.bf16 %v939_v4, %v936_v3  ;;  %v944_v13 = vld [vmem:[%s14387_s1 + $0x80] sm:$0xff]  ;;  %p9477_p7 = pnand %p9476_p4, %p9470_p12 }
  0x47   : > { %8714 = vmatpush1.bf16.msra.mxu0 %v8713_v40  ;;  %8738 = vmatpush3.bf16.msra.mxu1 %v8735_v35  ;;  %v937_v9 = vld [vmem:[%s14387_s1 + $0x48] sm:$0xff]  ;;  %v9831_v10 = vld [vmem:[%s9746_s14 + $0x10] sm:$0xff]  ;;  %v9849_v16 = vld [vmem:[%s9746_s14 + $0x18] sm:$0xff] }
  0x48   : > { %8716 = vmatprep.subr.bf16.mxu0 %v8715_v42  ;;  %8740 = vmatprep.subr.bf16.mxu1 %v8739_v45  ;;  %v941_v12 = vld [vmem:[%s14387_s1 + $0x68] sm:$0xff]  ;;  %v942_v14 = vld [vmem:[%s14387_s1 + $0x70] sm:$0xff]  ;;  %v8753_v17 = vpack.c.bf16 %v937_v9, %v934_v8  ;;  %v9854_v18 = vld [vmem:[%s9746_s14 + $0x20] sm:$0xff] }
  0x49   : > { %v945_v15 = vld [vmem:[%s14387_s1 + $0x88] sm:$0xff]  ;;  %v8755_v19 = vpack.c.bf16 %v944_v13, %v941_v12  ;;  %v940_v20 = vld [vmem:[%s14387_s1 + $0x60] sm:$0xff]  ;;  %v943_v21 = vld [vmem:[%s14387_s1 + $0x78] sm:$0xff] }
  0x4a   : > { %v947_v22 = vld [vmem:[%s14387_s1 + $0x98] sm:$0xff]  ;;  %v950_v23 = vld [vmem:[%s14387_s1 + $0xb0] sm:$0xff]  ;;  %v8779_v24 = vpack.c.bf16 %v945_v15, %v942_v14  ;;  %v948_v25 = vld [vmem:[%s14387_s1 + $0xa0] sm:$0xff]  ;;  %v8757_v28 = vpack.c.bf16 %v943_v21, %v940_v20 }
  0x4b   : > { %8718 = vmatpush1.bf16.msra.mxu0 %v8717_v50  ;;  %8742 = vmatpush3.bf16.msra.mxu1 %v8739_v45  ;;  %v951_v26 = vld [vmem:[%s14387_s1 + $0xb8] sm:$0xff]  ;;  %v9882_v27 = vld [vmem:[%s9746_s14 + $0x28] sm:$0xff]  ;;  %v9885_v29 = vld [vmem:[%s9746_s14 + $0x30] sm:$0xff]  ;;  %v8759_v30 = vpack.c.bf16 %v950_v23, %v947_v22 }
  0x4c   : > { %8720 = vmatprep.subr.bf16.mxu0 %v8719_v51  ;;  %8744 = vmatprep.subr.bf16.mxu1 %v8743_v54  ;;  %v946_v31 = vld [vmem:[%s14387_s1 + $0x90] sm:$0xff]  ;;  %v949_v32 = vld [vmem:[%s14387_s1 + $0xa8] sm:$0xff]  ;;  %v956_v34 = vld [vmem:[%s14387_s1 + $0xe0] sm:$0xff]  ;;  %v8783_v35 = vpack.c.bf16 %v951_v26, %v948_v25 }
  0x4d   : > { %v953_v33 = vld [vmem:[%s14387_s1 + $0xc8] sm:$0xff]  ;;  %v954_v36 = vld [vmem:[%s14387_s1 + $0xd0] sm:$0xff]  ;;  %v9913_v38 = vld [vmem:[%s9746_s14 + $0x38] sm:$0xff]  ;;  %v8761_v39 = vpack.c.bf16 %v949_v32, %v946_v31 }
  0x4e   : > { %v957_v37 = vld [vmem:[%s14387_s1 + $0xe8] sm:$0xff]  ;;  %v9916_v40 = vld [vmem:[%s9746_s14 + $0x40] sm:$0xff]  ;;  %v8763_v42 = vpack.c.bf16 %v956_v34, %v953_v33  ;;  %v955_v44 = vld [vmem:[%s14387_s1 + $0xd8] sm:$0xff] }
  0x4f   : > { %8722 = vmatpush1.bf16.msra.mxu0 %v8721_v59  ;;  %8746 = vmatpush3.bf16.msra.mxu1 %v8743_v54  ;;  %v952_v43 = vld [vmem:[%s14387_s1 + $0xc0] sm:$0xff]  ;;  %v959_v45 = vld [vmem:[%s14387_s1 + $0xf8] sm:$0xff]  ;;  %v962_v46 = vld [vmem:[%s14387_s1 + $0x110] sm:$0xff]  ;;  %v8787_v47 = vpack.c.bf16 %v957_v37, %v954_v36 }
  0x50   : > { %8772 = vmatprep.subr.bf16.mxu0 %v8771_v60  ;;  %8748 = vmatprep.subr.bf16.mxu1 %v8747_v61  ;;  %v960_v48 = vld [vmem:[%s14387_s1 + $0x100] sm:$0xff]  ;;  %v963_v49 = vld [vmem:[%s14387_s1 + $0x118] sm:$0xff]  ;;  %v9944_v50 = vld [vmem:[%s9746_s14 + $0x48] sm:$0xff]  ;;  %v8765_v51 = vpack.c.bf16 %v955_v44, %v952_v43  ;;  %v8767_v53 = vpack.c.bf16 %v962_v46, %v959_v45 }
  0x51   : > { %v9947_v52 = vld [vmem:[%s9746_s14 + $0x50] sm:$0xff]  ;;  %v961_v55 = vld [vmem:[%s14387_s1 + $0x108] sm:$0xff]  ;;  %v8791_v58 = vpack.c.bf16 %v963_v49, %v960_v48  ;;  %v9975_v61 = vld [vmem:[%s9746_s14 + $0x58] sm:$0xff] }
  0x52   : > { %8110 = vmatmul.mubr.msk.f32.vlgmr.msra.gmra.mrb[0].mxu0 %vm573_vm0, %v9761_v41  ;;  %8580 = vmatmul.mubr.msk.f32.vlgmr.msra.gmra.mrb[0].mxu1 %vm573_vm0, %v9820_v5  ;;  %v958_v54 = vld [vmem:[%s14387_s1 + $0xf0] sm:$0xff]  ;;  %v8179_v57 = vld [vmem:[%s14387_s1 + $0x268] sm:$0xff]  ;;  %v9978_v63 = vld [vmem:[%s9746_s14 + $0x60] sm:$0xff] }
  0x53   : > { %8774 = vmatpush3.bf16.msra.mxu0 %v8771_v60  ;;  %8750 = vmatpush1.bf16.msra.mxu1 %v8749_v6  ;;  %v8176_v56 = vld [vmem:[%s14387_s1 + $0x250] sm:$0xff]  ;;  %v8175_v59 = vld [vmem:[%s14387_s1 + $0x248] sm:$0xff]  ;;  %v8178_v60 = vld [vmem:[%s14387_s1 + $0x260] sm:$0xff]  ;;  %v8769_v62 = vpack.c.bf16 %v961_v55, %v958_v54 }
  0x54   : > { %692 = vmatprep.mubr.f32.mxu0 %v9538_v0  ;;  %8582 = vmatprep.mubr.msk.f32.mxu1 %vm573_vm0, %v9831_v10  ;;  %v8819_v1 = vpack.c.bf16 %v8179_v57, %v8176_v56  ;;  %v8795_v2 = vpack.c.bf16 %v8178_v60, %v8175_v59  ;;  %v9988_v3 = vld [vmem:[%s9746_s14 + $0x68] sm:$0xff]  ;;  %v9991_v4 = vld [vmem:[%s9746_s14 + $0x70] sm:$0xff]  ;;  %v10001_v6 = vld [vmem:[%s9746_s14 + $0x78] sm:$0xff]  ;;  %s9540_s14 = smov 64  }
  0x55   : > { %8752 = vmatprep.subr.bf16.mxu1 %v8751_v7  ;;  %8776 = vmatprep.subr.bf16.mxu0 %v8775_v11  ;;  %v8182_v7 = vld [vmem:[%s14387_s1 + $0x280] sm:$0xff]  ;;  %v8185_v8 = vld [vmem:[%s14387_s1 + $0x298] sm:$0xff]  ;;  %v8191_v12 = vld [vmem:[%s14387_s1 + $0x2c8] sm:$0xff] }
  0x56   : > { %8111 = vmatmul.mubr.msk.f32.gmra.mrb[2].mxu0 %vm573_vm0, %v9820_v5  ;;  %8583 = vmatmul.mubr.msk.f32.gmra.mrb[2].mxu1 %vm573_vm0, %v9849_v16  ;;  %v8823_v9 = vpack.c.bf16 %v8185_v8, %v8182_v7  ;;  %v8194_v14 = vld [vmem:[%s14387_s1 + $0x2e0] sm:$0xff]  ;;  %v8197_v15 = vld [vmem:[%s14387_s1 + $0x2f8] sm:$0xff]  ;;  %v8203_v20 = vld [vmem:[%s14387_s1 + $0x328] sm:$0xff] }
  0x57   : > { %698 = vmatprep.mubr.f32.mxu0 %v9538_v0  ;;  %8585 = vmatprep.mubr.msk.f32.mxu1 %vm573_vm0, %v9854_v18  ;;  %v8206_v22 = vld [vmem:[%s14387_s1 + $0x340] sm:$0xff]  ;;  %v8209_v23 = vld [vmem:[%s14387_s1 + $0x358] sm:$0xff]  ;;  %v8180_v33 = vld [vmem:[%s14387_s1 + $0x270] sm:$0xff] }
  0x58   : > { %8754 = vmatpush1.bf16.msra.mxu1 %v8753_v17  ;;  %8778 = vmatpush3.bf16.msra.mxu0 %v8775_v11  ;;  %v8188_v11 = vld [vmem:[%s14387_s1 + $0x2b0] sm:$0xff]  ;;  %v8831_v17 = vpack.c.bf16 %v8197_v15, %v8194_v14  ;;  %v8174_v25 = vld [vmem:[%s14387_s1 + $0x240] sm:$0xff]  ;;  %v8177_v26 = vld [vmem:[%s14387_s1 + $0x258] sm:$0xff] }
  0x59   : > { %8756 = vmatprep.subr.bf16.mxu1 %v8755_v19  ;;  %8780 = vmatprep.subr.bf16.mxu0 %v8779_v24  ;;  %v8827_v13 = vpack.c.bf16 %v8191_v12, %v8188_v11  ;;  %v8200_v19 = vld [vmem:[%s14387_s1 + $0x310] sm:$0xff]  ;;  %v8797_v31 = vpack.c.bf16 %v8177_v26, %v8174_v25  ;;  %v8183_v34 = vld [vmem:[%s14387_s1 + $0x288] sm:$0xff]  ;;  %v8190_v36 = vld [vmem:[%s14387_s1 + $0x2c0] sm:$0xff] }
  0x5a   : > { %8112 = vmatmul.mubr.msk.f32.gmra.mrb[4].mxu0 %vm573_vm0, %v9831_v10  ;;  %8586 = vmatmul.mubr.msk.f32.gmra.mrb[4].mxu1 %vm573_vm0, %v9882_v27  ;;  %v8835_v21 = vpack.c.bf16 %v8203_v20, %v8200_v19  ;;  %v8801_v37 = vpack.c.bf16 %v8183_v34, %v8180_v33  ;;  %v8189_v43 = vld [vmem:[%s14387_s1 + $0x2b8] sm:$0xff]  ;;  %v8196_v45 = vld [vmem:[%s14387_s1 + $0x2f0] sm:$0xff]  ;;  %v8195_v49 = vld [vmem:[%s14387_s1 + $0x2e8] sm:$0xff] }
  0x5b   : > { %704 = vmatprep.mubr.f32.mxu0 %v9538_v0  ;;  %8588 = vmatprep.mubr.msk.f32.mxu1 %vm573_vm0, %v9885_v29  ;;  %v8193_v44 = vld [vmem:[%s14387_s1 + $0x2d8] sm:$0xff]  ;;  %v8192_v48 = vld [vmem:[%s14387_s1 + $0x2d0] sm:$0xff]  ;;  %v8198_v56 = vld [vmem:[%s14387_s1 + $0x300] sm:$0xff] }
  0x5c   : > { %8758 = vmatpush1.bf16.msra.mxu1 %v8757_v28  ;;  %8782 = vmatpush3.bf16.msra.mxu0 %v8779_v24  ;;  %v8839_v24 = vpack.c.bf16 %v8209_v23, %v8206_v22  ;;  %v8181_v28 = vld [vmem:[%s14387_s1 + $0x278] sm:$0xff]  ;;  %v8809_v54 = vpack.c.bf16 %v8195_v49, %v8192_v48  ;;  %v8208_v59 = vld [vmem:[%s14387_s1 + $0x350] sm:$0xff] }
  0x5d   : > { %8760 = vmatprep.subr.bf16.mxu1 %v8759_v30  ;;  %8784 = vmatprep.subr.bf16.mxu0 %v8783_v35  ;;  %v8184_v30 = vld [vmem:[%s14387_s1 + $0x290] sm:$0xff]  ;;  %v8201_v57 = vld [vmem:[%s14387_s1 + $0x318] sm:$0xff] }
  0x5e   : > { %8113 = vmatmul.mubr.msk.f32.gmra.mrb[6].mxu0 %vm573_vm0, %v9849_v16  ;;  %8589 = vmatmul.mubr.msk.f32.gmra.mrb[6].mxu1 %vm573_vm0, %v9913_v38  ;;  %v8799_v32 = vpack.c.bf16 %v8184_v30, %v8181_v28  ;;  %v8813_v60 = vpack.c.bf16 %v8201_v57, %v8198_v56 }
  0x5f   : > { %710 = vmatprep.mubr.f32.mxu0 %v9538_v0  ;;  %8591 = vmatprep.mubr.msk.f32.mxu1 %vm573_vm0, %v9916_v40 }
  0x60   : > { %8762 = vmatpush1.bf16.msra.mxu1 %v8761_v39  ;;  %8786 = vmatpush3.bf16.msra.mxu0 %v8783_v35  ;;  %v8187_v35 = vld [vmem:[%s14387_s1 + $0x2a8] sm:$0xff] }
  0x61   : > { %8764 = vmatprep.subr.bf16.mxu1 %v8763_v42  ;;  %8788 = vmatprep.subr.bf16.mxu0 %v8787_v47  ;;  %v8803_v39 = vpack.c.bf16 %v8190_v36, %v8187_v35  ;;  %v8186_v42 = vld [vmem:[%s14387_s1 + $0x2a0] sm:$0xff] }
  0x62   : > { %8114 = vmatmul.mubr.msk.f32.gmra.mrb[8].mxu0 %vm573_vm0, %v9854_v18  ;;  %8592 = vmatmul.mubr.msk.f32.gmra.mrb[8].mxu1 %vm573_vm0, %v9944_v50  ;;  %v8805_v46 = vpack.c.bf16 %v8189_v43, %v8186_v42 }
  0x63   : > { %716 = vmatprep.mubr.f32.mxu0 %v9538_v0  ;;  %8594 = vmatprep.mubr.msk.f32.mxu1 %vm573_vm0, %v9947_v52 }
  0x64   : > { %8766 = vmatpush1.bf16.msra.mxu1 %v8765_v51  ;;  %8790 = vmatpush3.bf16.msra.mxu0 %v8787_v47  ;;  %v8807_v47 = vpack.c.bf16 %v8196_v45, %v8193_v44  ;;  %v8199_v51 = vld [vmem:[%s14387_s1 + $0x308] sm:$0xff] }
  0x65   : > { %8768 = vmatprep.subr.bf16.mxu1 %v8767_v53  ;;  %8792 = vmatprep.subr.bf16.mxu0 %v8791_v58  ;;  %v8202_v53 = vld [vmem:[%s14387_s1 + $0x320] sm:$0xff] }
  0x66   : > { %8115 = vmatmul.mubr.msk.f32.gmra.mrb[10].mxu0 %vm573_vm0, %v9882_v27  ;;  %8595 = vmatmul.mubr.msk.f32.gmra.mrb[10].mxu1 %vm573_vm0, %v9975_v61  ;;  %v8811_v55 = vpack.c.bf16 %v8202_v53, %v8199_v51 }
  0x67   : > { %722 = vmatprep.mubr.f32.mxu0 %v9538_v0  ;;  %8597 = vmatprep.mubr.msk.f32.mxu1 %vm573_vm0, %v9978_v63 }
  0x68   : > { %8770 = vmatpush1.bf16.msra.mxu1 %v8769_v62  ;;  %8794 = vmatpush3.bf16.msra.mxu0 %v8791_v58  ;;  %v8205_v58 = vld [vmem:[%s14387_s1 + $0x338] sm:$0xff] }
  0x69   : > { %8820 = vmatprep.subr.bf16.mxu1 %v8819_v1  ;;  %8796 = vmatprep.subr.bf16.mxu0 %v8795_v2  ;;  %v8815_v62 = vpack.c.bf16 %v8208_v59, %v8205_v58  ;;  %v8207_v2 = vld [vmem:[%s14387_s1 + $0x348] sm:$0xff] }
  0x6a   : > { %8116 = vmatmul.mubr.msk.f32.gmra.mrb[12].mxu0 %vm573_vm0, %v9885_v29  ;;  %8598 = vmatmul.mubr.msk.f32.gmra.mrb[12].mxu1 %vm573_vm0, %v9988_v3 }
  0x6b   : > { %728 = vmatprep.mubr.f32.mxu0 %v9538_v0  ;;  %8600 = vmatprep.mubr.msk.f32.mxu1 %vm573_vm0, %v9991_v4 }
  0x6e   : > { %8117 = vmatmul.mubr.msk.f32.gmra.mrb[14].mxu0 %vm573_vm0, %v9913_v38  ;;  %8601 = vmatmul.mubr.msk.f32.gmra.mrb[14].mxu1 %vm573_vm0, %v10001_v6 }
  0x6f   : > { %734 = vmatprep.mubr.f32.mxu0 %v9538_v0  ;;  %1028 = vmatprep.mubr.f32.mxu1 %v9538_v0 }
  0x72   : > { %8118 = vmatmul.mubr.msk.f32.gmra.mrb[16].mxu0 %vm573_vm0, %v9916_v40  ;;  %8142 = vmatmul.mubr.msk.f32.vlgmr.msra.gmra.mrb[16].mxu1 %vm573_vm0, %v9761_v41 }
  0x73   : > { %740 = vmatprep.mubr.f32.mxu0 %v9538_v0  ;;  %8822 = vmatpush3.bf16.msra.mxu1 %v8819_v1  ;;  %v8204_v1 = vld [vmem:[%s14387_s1 + $0x330] sm:$0xff] }
  0x74   : > { %1034 = vmatprep.mubr.f32.mxu1 %v9538_v0  ;;  %8824 = vmatprep.subr.bf16.mxu1 %v8823_v9  ;;  %v8817_v7 = vpack.c.bf16 %v8207_v2, %v8204_v1 }
  0x76   : > { %8119 = vmatmul.mubr.msk.f32.gmra.mrb[18].mxu0 %vm573_vm0, %v9944_v50  ;;  %8143 = vmatmul.mubr.msk.f32.gmra.mrb[18].mxu1 %vm573_vm0, %v9820_v5 }
  0x77   : > { %746 = vmatprep.mubr.f32.mxu0 %v9538_v0  ;;  %1040 = vmatprep.mubr.f32.mxu1 %v9538_v0 }
  0x78   : > { %8826 = vmatpush3.bf16.msra.mxu1 %v8823_v9 }
  0x79   : > { %8828 = vmatprep.subr.bf16.mxu1 %v8827_v13 }
  0x7a   : > { %8120 = vmatmul.mubr.msk.f32.gmra.mrb[20].mxu0 %vm573_vm0, %v9947_v52  ;;  %8144 = vmatmul.mubr.msk.f32.gmra.mrb[20].mxu1 %vm573_vm0, %v9831_v10 }
  0x7b   : > { %752 = vmatprep.mubr.f32.mxu0 %v9538_v0  ;;  %1046 = vmatprep.mubr.f32.mxu1 %v9538_v0 }
  0x7c   : > { %8830 = vmatpush3.bf16.msra.mxu1 %v8827_v13 }
  0x7d   : > { %8832 = vmatprep.subr.bf16.mxu1 %v8831_v17 }
  0x7e   : > { %8121 = vmatmul.mubr.msk.f32.gmra.mrb[22].mxu0 %vm573_vm0, %v9975_v61  ;;  %8145 = vmatmul.mubr.msk.f32.gmra.mrb[22].mxu1 %vm573_vm0, %v9849_v16 }
  0x7f   : > { %758 = vmatprep.mubr.f32.mxu0 %v9538_v0  ;;  %1052 = vmatprep.mubr.f32.mxu1 %v9538_v0 }
  0x80   : > { %8834 = vmatpush3.bf16.msra.mxu1 %v8831_v17 }
  0x81   : > { %8836 = vmatprep.subr.bf16.mxu1 %v8835_v21 }
  0x82   : > { %8122 = vmatmul.mubr.msk.f32.gmra.mrb[24].mxu0 %vm573_vm0, %v9978_v63  ;;  %8146 = vmatmul.mubr.msk.f32.gmra.mrb[24].mxu1 %vm573_vm0, %v9854_v18 }
  0x83   : > { %764 = vmatprep.mubr.f32.mxu0 %v9538_v0  ;;  %1058 = vmatprep.mubr.f32.mxu1 %v9538_v0 }
  0x84   : > { %8838 = vmatpush3.bf16.msra.mxu1 %v8835_v21 }
  0x85   : > { %8840 = vmatprep.subr.bf16.mxu1 %v8839_v24 }
  0x86   : > { %8123 = vmatmul.mubr.msk.f32.gmra.mrb[26].mxu0 %vm573_vm0, %v9988_v3  ;;  %8147 = vmatmul.mubr.msk.f32.gmra.mrb[26].mxu1 %vm573_vm0, %v9882_v27 }
  0x87   : > { %770 = vmatprep.mubr.f32.mxu0 %v9538_v0  ;;  %1064 = vmatprep.mubr.f32.mxu1 %v9538_v0 }
  0x88   : > { %8842 = vmatpush3.bf16.msra.mxu1 %v8839_v24 }
  0x8a   : > { %8124 = vmatmul.mubr.msk.f32.gmra.mrb[28].mxu0 %vm573_vm0, %v9991_v4  ;;  %8148 = vmatmul.mubr.msk.f32.gmra.mrb[28].mxu1 %vm573_vm0, %v9885_v29 }
  0x8b   : > { %776 = vmatprep.mubr.f32.mxu0 %v9538_v0  ;;  %1070 = vmatprep.mubr.f32.mxu1 %v9538_v0 }
  0x8e   : > { %8125 = vmatmul.mubr.msk.f32.gmra.mrb[30].mxu0 %vm573_vm0, %v10001_v6  ;;  %8149 = vmatmul.mubr.msk.f32.gmra.mrb[30].mxu1 %vm573_vm0, %v9913_v38 }
  0x8f   : > { %8627 = vmatprep.mubr.msk.f32.mxu0 %vm573_vm0, %v9761_v41  ;;  %1076 = vmatprep.mubr.f32.mxu1 %v9538_v0 }
  0x92   : > { %8628 = vmatmul.mubr.msk.f32.vlgmr.msra.gmra.mrb[32].mxu0 %vm573_vm0, %v9820_v5  ;;  %8150 = vmatmul.mubr.msk.f32.gmra.mrb[32].mxu1 %vm573_vm0, %v9916_v40 }
  0x93   : > { %8798 = vmatpush1.bf16.msra.mxu0 %v8797_v31  ;;  %1082 = vmatprep.mubr.f32.mxu1 %v9538_v0 }
  0x94   : > { %8630 = vmatprep.mubr.msk.f32.mxu0 %vm573_vm0, %v9831_v10  ;;  %8800 = vmatprep.subr.bf16.mxu0 %v8799_v32 }
  0x96   : > { %8631 = vmatmul.mubr.msk.f32.gmra.mrb[34].mxu0 %vm573_vm0, %v9849_v16  ;;  %8151 = vmatmul.mubr.msk.f32.gmra.mrb[34].mxu1 %vm573_vm0, %v9944_v50 }
  0x97   : > { %8633 = vmatprep.mubr.msk.f32.mxu0 %vm573_vm0, %v9854_v18  ;;  %1088 = vmatprep.mubr.f32.mxu1 %v9538_v0 }
  0x98   : > { %8802 = vmatpush1.bf16.msra.mxu0 %v8801_v37 }
  0x99   : > { %8804 = vmatprep.subr.bf16.mxu0 %v8803_v39 }
  0x9a   : > { %8634 = vmatmul.mubr.msk.f32.gmra.mrb[36].mxu0 %vm573_vm0, %v9882_v27  ;;  %8152 = vmatmul.mubr.msk.f32.gmra.mrb[36].mxu1 %vm573_vm0, %v9947_v52 }
  0x9b   : > { %8636 = vmatprep.mubr.msk.f32.mxu0 %vm573_vm0, %v9885_v29  ;;  %1094 = vmatprep.mubr.f32.mxu1 %v9538_v0 }
  0x9c   : > { %8806 = vmatpush1.bf16.msra.mxu0 %v8805_v46 }
  0x9d   : > { %8808 = vmatprep.subr.bf16.mxu0 %v8807_v47 }
  0x9e   : > { %8637 = vmatmul.mubr.msk.f32.gmra.mrb[38].mxu0 %vm573_vm0, %v9913_v38  ;;  %8153 = vmatmul.mubr.msk.f32.gmra.mrb[38].mxu1 %vm573_vm0, %v9975_v61 }
  0x9f   : > { %8639 = vmatprep.mubr.msk.f32.mxu0 %vm573_vm0, %v9916_v40  ;;  %1100 = vmatprep.mubr.f32.mxu1 %v9538_v0 }
  0xa0   : > { %8810 = vmatpush1.bf16.msra.mxu0 %v8809_v54 }
  0xa1   : > { %8812 = vmatprep.subr.bf16.mxu0 %v8811_v55 }
  0xa2   : > { %8640 = vmatmul.mubr.msk.f32.gmra.mrb[40].mxu0 %vm573_vm0, %v9944_v50  ;;  %8154 = vmatmul.mubr.msk.f32.gmra.mrb[40].mxu1 %vm573_vm0, %v9978_v63 }
  0xa3   : > { %8642 = vmatprep.mubr.msk.f32.mxu0 %vm573_vm0, %v9947_v52  ;;  %1106 = vmatprep.mubr.f32.mxu1 %v9538_v0 }
  0xa4   : > { %8814 = vmatpush1.bf16.msra.mxu0 %v8813_v60 }
  0xa5   : > { %8816 = vmatprep.subr.bf16.mxu0 %v8815_v62 }
  0xa6   : > { %8643 = vmatmul.mubr.msk.f32.gmra.mrb[42].mxu0 %vm573_vm0, %v9975_v61  ;;  %8155 = vmatmul.mubr.msk.f32.gmra.mrb[42].mxu1 %vm573_vm0, %v9988_v3 }
  0xa7   : > { %8645 = vmatprep.mubr.msk.f32.mxu0 %vm573_vm0, %v9978_v63  ;;  %1112 = vmatprep.mubr.f32.mxu1 %v9538_v0 }
  0xa8   : > { %8818 = vmatpush1.bf16.msra.mxu0 %v8817_v7 }
  0xaa   : > { %8646 = vmatmul.mubr.msk.f32.gmra.mrb[44].mxu0 %vm573_vm0, %v9988_v3  ;;  %8156 = vmatmul.mubr.msk.f32.gmra.mrb[44].mxu1 %vm573_vm0, %v9991_v4 }
  0xab   : > { %8648 = vmatprep.mubr.msk.f32.mxu0 %vm573_vm0, %v9991_v4  ;;  %1118 = vmatprep.mubr.f32.mxu1 %v9538_v0 }
  0xae   : > { %8649 = vmatmul.mubr.msk.f32.gmra.mrb[46].mxu0 %vm573_vm0, %v10001_v6  ;;  %8157 = vmatmul.mubr.msk.f32.gmra.mrb[46].mxu1 %vm573_vm0, %v10001_v6 }
  0xaf   : > { %1612 = vmatprep.mubr.f32.mxu0 %v9538_v0  ;;  %8675 = vmatprep.mubr.msk.f32.mxu1 %vm573_vm0, %v9761_v41 }
  0xb2   : > { %8210 = vmatmul.mubr.msk.f32.vlgmr.msra.gmra.mrb[48].mxu0 %vm573_vm0, %v9761_v41  ;;  %8676 = vmatmul.mubr.msk.f32.vlgmr.msra.gmra.mrb[48].mxu1 %vm573_vm0, %v9820_v5  ;;  %v310_v41 = vlaneseq }
  0xb3   : > { %1618 = vmatprep.mubr.f32.mxu0 %v9538_v0  ;;  %8678 = vmatprep.mubr.msk.f32.mxu1 %vm573_vm0, %v9831_v10 }
  0xb6   : > { %8211 = vmatmul.mubr.msk.f32.gmra.mrb[50].mxu0 %vm573_vm0, %v9820_v5  ;;  %8679 = vmatmul.mubr.msk.f32.gmra.mrb[50].mxu1 %vm573_vm0, %v9849_v16  ;;  %v10287_v5 = vshrl.u32 %v310_v41, 7 }
  0xb7   : > { %1624 = vmatprep.mubr.f32.mxu0 %v9538_v0  ;;  %8681 = vmatprep.mubr.msk.f32.mxu1 %vm573_vm0, %v9854_v18 }
  0xb8   : > { %14485 = vst [vmem:[#allocation8_spill] sm:$0xff] %v10287_v5  ;;  %v14397_v48 = vsub.s32 1, %v10287_v5  ;;  %vm1334_vm1 = vcmp.lt.s32.totalorder %v10287_v5, 1  ;;  %vm1918_vm6 = vcmp.lt.s32.totalorder %v10287_v5, 7 }
  0xba   : > { %8212 = vmatmul.mubr.msk.f32.gmra.mrb[52].mxu0 %vm573_vm0, %v9831_v10  ;;  %8682 = vmatmul.mubr.msk.f32.gmra.mrb[52].mxu1 %vm573_vm0, %v9882_v27  ;;  %v14398_v10 = vsub.s32 0, %v10287_v5 }
  0xbb   : > { %1630 = vmatprep.mubr.f32.mxu0 %v9538_v0  ;;  %8684 = vmatprep.mubr.msk.f32.mxu1 %vm573_vm0, %v9885_v29 }
  0xbe   : > { %8213 = vmatmul.mubr.msk.f32.gmra.mrb[54].mxu0 %vm573_vm0, %v9849_v16  ;;  %8685 = vmatmul.mubr.msk.f32.gmra.mrb[54].mxu1 %vm573_vm0, %v9913_v38  ;;  %v10293_v16 = vld [vmem:[%s14388_s2] sm:$0x7] }
  0xbf   : > { %1636 = vmatprep.mubr.f32.mxu0 %v9538_v0  ;;  %8687 = vmatprep.mubr.msk.f32.mxu1 %vm573_vm0, %v9916_v40  ;;  %v10387_v56 = vrot.slane %v10293_v16, %v14397_v48  ;;  %v8250_v48 = vld [vmem:[%s14389_s3 + $0x280] sm:$0xff] }
  0xc2   : > { %8214 = vmatmul.mubr.msk.f32.gmra.mrb[56].mxu0 %vm573_vm0, %v9854_v18  ;;  %8688 = vmatmul.mubr.msk.f32.gmra.mrb[56].mxu1 %vm573_vm0, %v9944_v50  ;;  %v10298_v18 = vrot.slane %v10293_v16, %v14398_v10  ;;  %v8253_v10 = vld [vmem:[%s14389_s3 + $0x298] sm:$0xff] }
  0xc3   : > { %1642 = vmatprep.mubr.f32.mxu0 %v9538_v0  ;;  %8690 = vmatprep.mubr.msk.f32.mxu1 %vm573_vm0, %v9947_v52 }
  0xc6   : > { %8215 = vmatmul.mubr.msk.f32.gmra.mrb[58].mxu0 %vm573_vm0, %v9882_v27  ;;  %8691 = vmatmul.mubr.msk.f32.gmra.mrb[58].mxu1 %vm573_vm0, %v9975_v61 }
  0xc7   : > { %1648 = vmatprep.mubr.f32.mxu0 %v9538_v0  ;;  %8693 = vmatprep.mubr.msk.f32.mxu1 %vm573_vm0, %v9978_v63 }
  0xca   : > { %8216 = vmatmul.mubr.msk.f32.gmra.mrb[60].mxu0 %vm573_vm0, %v9885_v29  ;;  %8694 = vmatmul.mubr.msk.f32.gmra.mrb[60].mxu1 %vm573_vm0, %v9988_v3 }
  0xcb   : > { %1654 = vmatprep.mubr.f32.mxu0 %v9538_v0  ;;  %8696 = vmatprep.mubr.msk.f32.mxu1 %vm573_vm0, %v9991_v4 }
  0xce   : > { %8217 = vmatmul.mubr.msk.f32.gmra.mrb[62].mxu0 %vm573_vm0, %v9913_v38  ;;  %8697 = vmatmul.mubr.msk.f32.gmra.mrb[62].mxu1 %vm573_vm0, %v10001_v6 }
  0xcf   : > { %1660 = vmatprep.mubr.f32.mxu0 %v9538_v0 }
  0xd2   : > { %8218 = vmatmul.mubr.msk.f32.gmra.mrb[64].mxu0 %vm573_vm0, %v9916_v40 }
  0xd3   : > { %1666 = vmatprep.mubr.f32.mxu0 %v9538_v0 }
  0xd6   : > { %8219 = vmatmul.mubr.msk.f32.gmra.mrb[66].mxu0 %vm573_vm0, %v9944_v50 }
  0xd7   : > { %1672 = vmatprep.mubr.f32.mxu0 %v9538_v0 }
  0xda   : > { %8220 = vmatmul.mubr.msk.f32.gmra.mrb[68].mxu0 %vm573_vm0, %v9947_v52 }
  0xdb   : > { %1678 = vmatprep.mubr.f32.mxu0 %v9538_v0 }
  0xde   : > { %8221 = vmatmul.mubr.msk.f32.gmra.mrb[70].mxu0 %vm573_vm0, %v9975_v61 }
  0xdf   : > { %1684 = vmatprep.mubr.f32.mxu0 %v9538_v0 }
  0xe2   : > { %8222 = vmatmul.mubr.msk.f32.gmra.mrb[72].mxu0 %vm573_vm0, %v9978_v63 }
  0xe3   : > { %1690 = vmatprep.mubr.f32.mxu0 %v9538_v0 }
  0xe6   : > { %8223 = vmatmul.mubr.msk.f32.gmra.mrb[74].mxu0 %vm573_vm0, %v9988_v3 }
  0xe7   : > { %1696 = vmatprep.mubr.f32.mxu0 %v9538_v0 }
  0xea   : > { %8224 = vmatmul.mubr.msk.f32.gmra.mrb[76].mxu0 %vm573_vm0, %v9991_v4 }
  0xeb   : > { %1702 = vmatprep.mubr.f32.mxu0 %v9538_v0 }
  0xee   : > { %8225 = vmatmul.mubr.msk.f32.gmra.mrb[78].mxu0 %vm573_vm0, %v10001_v6  ;;  %vm4496_vm0 = vcmask 1043459  }
 0x125   : > { %v688_v27 = vpop.f32.mrb[0].mxu0  ;;  %v10305_v38 = vpop.f32.mrb[0].mxu1 }
 0x126   : > { %v10301_v0 = vadd.f32 %v688_v27, %v10298_v18  ;;  %v10303_v29 = vpop.f32.mrb[1].mxu0  ;;  %v10307_v40 = vpop.f32.mrb[1].mxu1 }
 0x128   : > { %14486 = vst [vmem:[#allocation9_spill] sm:$0xff] %v10301_v0 }
 0x129   : > { %v694_v50 = vpop.f32.mrb[2].mxu0  ;;  %v10310_v63 = vpop.f32.mrb[2].mxu1 }
 0x12a   : > { %v695_v52 = vadd.f32 %v694_v50, %v10298_v18  ;;  %v696_v61 = vpop.f32.mrb[3].mxu0  ;;  %v10312_v3 = vpop.f32.mrb[3].mxu1 }
 0x12b   : > { %v697_v1 = vadd.f32 %v696_v61, %v10387_v56  ;;  %v10408_v61 = vadd.s32 32, %v10287_v5 }
 0x12d   : > { %v700_v4 = vpop.f32.mrb[4].mxu0  ;;  %v10319_v9 = vpop.f32.mrb[4].mxu1  ;;  %14489 = vst [vmem:[#allocation12_spill] sm:$0xff] %v10408_v61 }
 0x12e   : > { %v10315_v6 = vadd.f32 %v700_v4, %v10298_v18  ;;  %v10317_v8 = vpop.f32.mrb[5].mxu0  ;;  %v10321_v11 = vpop.f32.mrb[5].mxu1 }
 0x131   : > { %v706_v12 = vpop.f32.mrb[6].mxu0  ;;  %v10328_v15 = vpop.f32.mrb[6].mxu1 }
 0x132   : > { %v10324_v13 = vadd.f32 %v706_v12, %v10298_v18  ;;  %v10326_v14 = vpop.f32.mrb[7].mxu0  ;;  %v10330_v17 = vpop.f32.mrb[7].mxu1 }
 0x135   : > { %v712_v19 = vpop.f32.mrb[8].mxu0  ;;  %v10337_v22 = vpop.f32.mrb[8].mxu1 }
 0x136   : > { %v10333_v20 = vadd.f32 %v712_v19, %v10298_v18  ;;  %v10335_v21 = vpop.f32.mrb[9].mxu0  ;;  %v10339_v23 = vpop.f32.mrb[9].mxu1 }
 0x139   : > { %v718_v24 = vpop.f32.mrb[10].mxu0  ;;  %v10346_v28 = vpop.f32.mrb[10].mxu1 }
 0x13a   : > { %v10342_v25 = vadd.f32 %v718_v24, %v10298_v18  ;;  %v10344_v26 = vpop.f32.mrb[11].mxu0  ;;  %v10348_v30 = vpop.f32.mrb[11].mxu1 }
 0x13d   : > { %v724_v31 = vpop.f32.mrb[12].mxu0  ;;  %v10355_v34 = vpop.f32.mrb[12].mxu1 }
 0x13e   : > { %v10351_v32 = vadd.f32 %v724_v31, %v10298_v18  ;;  %v10353_v33 = vpop.f32.mrb[13].mxu0  ;;  %v10357_v35 = vpop.f32.mrb[13].mxu1 }
 0x141   : > { %v730_v36 = vpop.f32.mrb[14].mxu0  ;;  %v10364_v42 = vpop.f32.mrb[14].mxu1 }
 0x142   : > { %v10360_v37 = vadd.f32 %v730_v36, %v10298_v18  ;;  %v10362_v39 = vpop.f32.mrb[15].mxu0  ;;  %v10366_v43 = vpop.f32.mrb[15].mxu1  ;;  %v8247_v36 = vld [vmem:[%s14389_s3 + $0x268] sm:$0xff] }
 0x145   : > { %v736_v44 = vpop.f32.mrb[16].mxu0  ;;  %v10373_v47 = vpop.f32.mrb[16].mxu1 }
 0x146   : > { %v10369_v45 = vadd.f32 %v736_v44, %v10298_v18  ;;  %v10371_v46 = vpop.f32.mrb[17].mxu0  ;;  %v10376_v49 = vpop.f32.mrb[17].mxu1  ;;  %v14400_v57 = vrot.slane %v10373_v47, 7  ;;  %v8243_v44 = vld [vmem:[%s14389_s3 + $0x248] sm:$0xff] }
 0x147   : > { %14487 = vst [vmem:[#allocation10_spill] sm:$0xff] %v10376_v49  ;;  %v14399_v60 = vrot.slane %v10376_v49, 7 }
 0x149   : > { %v742_v51 = vpop.f32.mrb[18].mxu0  ;;  %v1036_v54 = vpop.f32.mrb[18].mxu1 }
 0x14a   : > { %v10379_v53 = vadd.f32 %v742_v51, %v10298_v18  ;;  %v10382_v55 = vpop.f32.mrb[19].mxu0  ;;  %v1289_v58 = vrot.slane %v1036_v54, 7  ;;  %v1038_v59 = vpop.f32.mrb[19].mxu1  ;;  %v14401_v54 = vmov 0.0|0.0  }
 0x14b   : > { %v1290_v62 = vrot.slane %v1038_v59, 7  ;;  %8891 = vmatprep.subr.bf16.mxu0 %v14401_v54 }
 0x14c   : > { %v1377_v2 = vsel %vm1334_vm1, %v14400_v57, %v1289_v58  ;;  %v8252_v57 = vld [vmem:[%s14389_s3 + $0x290] sm:$0xff] }
 0x14d   : > { %v748_v7 = vpop.f32.mrb[20].mxu0  ;;  %v10396_v41 = vadd.f32 %v1377_v2, %v695_v52  ;;  %v1378_v27 = vsel %vm1334_vm1, %v14399_v60, %v1290_v62  ;;  %v1042_v4 = vpop.f32.mrb[20].mxu1  ;;  %v8244_v52 = vld [vmem:[%s14389_s3 + $0x250] sm:$0xff]  ;;  %v8242_v2 = vld [vmem:[%s14389_s3 + $0x240] sm:$0xff]  ;;  %v8249_v60 = vld [vmem:[%s14389_s3 + $0x278] sm:$0xff] }
 0x14e   : > { %v10403_v50 = vadd.f32 %v748_v7, %v10298_v18  ;;  %v10405_v12 = vpop.f32.mrb[21].mxu0  ;;  %v10410_v19 = vadd.f32 %v1378_v27, %v697_v1  ;;  %v1292_v24 = vrot.slane %v1042_v4, 7  ;;  %v1044_v31 = vpop.f32.mrb[21].mxu1  ;;  %v8892_v59 = vpack.c.bf16 %v8247_v36, %v8244_v52  ;;  %v8246_v1 = vld [vmem:[%s14389_s3 + $0x260] sm:$0xff]  ;;  %v8245_v7 = vld [vmem:[%s14389_s3 + $0x258] sm:$0xff] }
 0x14f   : > { %14488 = vst [vmem:[#allocation11_spill] sm:$0xff] %v10396_v41  ;;  %v1293_v51 = vrot.slane %v1044_v31, 7  ;;  %v703_v27 = vadd.f32 %v10317_v8, %v10387_v56  ;;  %v8843_v52 = vpack.c.bf16 %v8246_v1, %v8243_v44  ;;  %v8845_v36 = vpack.c.bf16 %v8245_v7, %v8242_v2 }
 0x150   : > { %14490 = vst [vmem:[#allocation13_spill] sm:$0xff] %v10410_v19  ;;  %v1374_v4 = vsel %vm1334_vm1, %v1289_v58, %v1292_v24  ;;  %8893 = vmatpush1.bf16.msra.mxu0 %v8892_v59  ;;  %v8895_v7 = vpack.c.bf16 %v8253_v10, %v8250_v48  ;;  %v14492_v10 = vmov 0.0|0.0   ;;  %v8847_v48 = vpack.c.bf16 %v8252_v57, %v8249_v60 }
 0x151   : > { %v754_v31 = vpop.f32.mrb[22].mxu0  ;;  %v10445_v8 = vadd.f32 %v1374_v4, %v10315_v6  ;;  %v1375_v58 = vsel %vm1334_vm1, %v1290_v62, %v1293_v51  ;;  %v1048_v1 = vpop.f32.mrb[22].mxu1  ;;  %v8248_v6 = vld [vmem:[%s14389_s3 + $0x270] sm:$0xff]  ;;  %v8251_v62 = vld [vmem:[%s14389_s3 + $0x288] sm:$0xff]  ;;  %8844 = vmatprep.subr.bf16.mxu1 %v8843_v52  ;;  %8894 = vmatprep.subr.bf16.mxu0 %v14492_v10  ;;  %v709_v19 = vadd.f32 %v10326_v14, %v10387_v56 }
 0x152   : > { %v10450_v44 = vadd.f32 %v754_v31, %v10298_v18  ;;  %v10452_v2 = vpop.f32.mrb[23].mxu0  ;;  %v10463_v4 = vadd.f32 %v1375_v58, %v703_v27  ;;  %v1295_v31 = vrot.slane %v1048_v1, 7  ;;  %v1050_v54 = vpop.f32.mrb[23].mxu1  ;;  %8846 = vmatpush1.bf16.msra.mxu1 %v8845_v36  ;;  %v8849_v41 = vpack.c.bf16 %v8251_v62, %v8248_v6 }
 0x153   : > { %14491 = vst [vmem:[#allocation14_spill] sm:$0xff] %v10445_v8  ;;  %v359_v8 = vand.u32 31, %v10408_v61  ;;  %v1296_v59 = vrot.slane %v1050_v54, 7  ;;  %8848 = vmatprep.subr.bf16.mxu1 %v8847_v48  ;;  %v757_v14 = vadd.f32 %v10452_v2, %v10387_v56 }
 0x154   : > { %v1371_v49 = vsel %vm1334_vm1, %v1292_v24, %v1295_v31  ;;  %8896 = vmatpush1.bf16.msra.mxu0 %v8895_v7 }
 0x155   : > { %v760_v0 = vpop.f32.mrb[24].mxu0  ;;  %v10472_v27 = vadd.f32 %v1371_v49, %v10324_v13  ;;  %v1372_v52 = vsel %vm1334_vm1, %v1293_v51, %v1296_v59  ;;  %v1054_v57 = vpop.f32.mrb[24].mxu1  ;;  %vm10483_vm2 = vcmp.eq.s32.totalorder %v359_v8, 0  ;;  %8897 = vmatprep.subr.bf16.mxu0 %v14492_v10  ;;  %v715_v51 = vadd.f32 %v10335_v21, %v10387_v56 }
 0x156   : > { %v10477_v58 = vadd.f32 %v760_v0, %v10298_v18  ;;  %v10479_v60 = vpop.f32.mrb[25].mxu0  ;;  %v10481_v54 = vadd.f32 %v1372_v52, %v709_v19  ;;  %v1298_v24 = vrot.slane %v1054_v57, 7  ;;  %v1056_v36 = vpop.f32.mrb[25].mxu1  ;;  %8850 = vmatpush1.bf16.msra.mxu1 %v8849_v41 }
 0x157   : > { %14493 = vst [vmem:[#allocation15_spill] sm:$0xff] %v10472_v27  ;;  %v1299_v13 = vrot.slane %v1056_v36, 7 }
 0x158   : > { %v1368_v0 = vsel %vm1334_vm1, %v1295_v31, %v1298_v24 }
 0x159   : > { %v766_v49 = vpop.f32.mrb[26].mxu0  ;;  %v1427_v19 = vsel %vm10483_vm2, 0.0, %v1368_v0  ;;  %v1369_v8 = vsel %vm1334_vm1, %v1296_v59, %v1299_v13  ;;  %v1060_v7 = vpop.f32.mrb[26].mxu1  ;;  %v721_v59 = vadd.f32 %v10344_v26, %v10387_v56 }
 0x15a   : > { %v10497_v1 = vadd.f32 %v766_v49, %v10298_v18  ;;  %v10499_v6 = vpop.f32.mrb[27].mxu0  ;;  %v10502_v41 = vadd.f32 %v1427_v19, %v10333_v20  ;;  %v1428_v62 = vsel %vm10483_vm2, 0.0, %v1369_v8  ;;  %v1301_v31 = vrot.slane %v1060_v7, 7  ;;  %v1062_v21 = vpop.f32.mrb[27].mxu1 }
 0x15b   : > { %v1302_v48 = vrot.slane %v1062_v21, 7  ;;  %v10506_v52 = vadd.f32 %v1428_v62, %v715_v51  ;;  %v319_v51 = vadd.s32 64, %v10287_v5 }
 0x15c   : > { %14496 = vst [vmem:[#allocation16_spill] sm:$0xff] %v10502_v41  ;;  %v1365_v57 = vsel %vm1334_vm1, %v1298_v24, %v1301_v31  ;;  %v14502_v41 = vsub.s32 2, %v10287_v5 }
 0x15d   : > { %14497 = vst [vmem:[#allocation17_spill] sm:$0xff] %v10506_v52  ;;  %v772_v36 = vpop.f32.mrb[28].mxu0  ;;  %v10513_v0 = vadd.f32 %v1365_v57, %v10342_v25  ;;  %v1366_v20 = vsel %vm1334_vm1, %v1299_v13, %v1302_v48  ;;  %v1066_v19 = vpop.f32.mrb[28].mxu1  ;;  %v727_v25 = vadd.f32 %v10353_v33, %v10387_v56 }
 0x15e   : > { %v10518_v49 = vadd.f32 %v772_v36, %v10298_v18  ;;  %v10520_v8 = vpop.f32.mrb[29].mxu0  ;;  %v10523_v7 = vadd.f32 %v1366_v20, %v721_v59  ;;  %v1304_v26 = vrot.slane %v1066_v19, 7  ;;  %v1068_v62 = vpop.f32.mrb[29].mxu1 }
 0x15f   : > { %14498 = vst [vmem:[#allocation18_spill] sm:$0xff] %v10513_v0  ;;  %v1305_v21 = vrot.slane %v1068_v62, 7  ;;  %v387_v62 = vand.u32 31, %v319_v51 }
 0x160   : > { %14499 = vst [vmem:[#allocation19_spill] sm:$0xff] %v10523_v7  ;;  %v1362_v13 = vsel %vm1334_vm1, %v1301_v31, %v1304_v26  ;;  %v323_v31 = vadd.s32 96, %v10287_v5 }
 0x161   : > { %v778_v57 = vpop.f32.mrb[30].mxu0  ;;  %v10531_v36 = vadd.f32 %v1362_v13, %v10351_v32  ;;  %v1363_v61 = vsel %vm1334_vm1, %v1302_v48, %v1305_v21  ;;  %v1072_v20 = vpop.f32.mrb[30].mxu1  ;;  %v10546_v32 = vrot.slane %v10293_v16, %v14502_v41  ;;  %vm10557_vm3 = vcmp.eq.s32.totalorder %v387_v62, 0 }
 0x162   : > { %v10536_v59 = vadd.f32 %v778_v57, %v10298_v18  ;;  %v10538_v19 = vpop.f32.mrb[31].mxu0  ;;  %v10540_v24 = vadd.f32 %v1363_v61, %v727_v25  ;;  %v1307_v33 = vrot.slane %v1072_v20, 7  ;;  %v1074_v0 = vpop.f32.mrb[31].mxu1  ;;  %v733_v18 = vadd.f32 %v10362_v39, %v10387_v56 }
 0x163   : > { %14500 = vst [vmem:[#allocation20_spill] sm:$0xff] %v10531_v36  ;;  %v1308_v13 = vrot.slane %v1074_v0, 7  ;;  %v415_v27 = vand.u32 31, %v323_v31  ;;  %v10570_v62 = vadd.s32 24, %v10287_v5 }
 0x164   : > { %14501 = vst [vmem:[#allocation21_spill] sm:$0xff] %v10540_v24  ;;  %v1359_v48 = vsel %vm1334_vm1, %v1304_v26, %v1307_v33 }
 0x165   : > { %v8629_v57 = vpop.f32.mrb[32].mxu0  ;;  %v10553_v61 = vadd.f32 %v1359_v48, %v10360_v37  ;;  %v1360_v51 = vsel %vm1334_vm1, %v1305_v21, %v1308_v13  ;;  %v1078_v25 = vpop.f32.mrb[32].mxu1  ;;  %v855_v37 = vadd.f32 %v10305_v38, %v10546_v32  ;;  %14507 = vst [vmem:[#allocation24_spill] sm:$0xff] %v10570_v62  ;;  %vm10620_vm4 = vcmp.eq.s32.totalorder %v415_v27, 0 }
 0x166   : > { %v1291_v16 = vrot.slane %v8629_v57, 7  ;;  %v10561_v41 = vpop.f32.mrb[33].mxu0  ;;  %v10563_v0 = vadd.f32 %v1360_v51, %v733_v18  ;;  %v1310_v39 = vrot.slane %v1078_v25, 7  ;;  %v1080_v36 = vpop.f32.mrb[33].mxu1  ;;  %v10574_v57 = vadd.f32 %v10303_v29, %v10387_v56 }
 0x167   : > { %14503 = vst [vmem:[#allocation22_spill] sm:$0xff] %v10553_v61  ;;  %v14405_v26 = vrot.slane %v10561_v41, 7  ;;  %v1311_v48 = vrot.slane %v1080_v36, 7  ;;  %v739_v18 = vadd.f32 %v10371_v46, %v10387_v56 }
 0x168   : > { %14506 = vst [vmem:[#allocation23_spill] sm:$0xff] %v10563_v0  ;;  %v1356_v51 = vsel %vm1334_vm1, %v1307_v33, %v1310_v39 }
 0x169   : > { %v8632_v31 = vpop.f32.mrb[34].mxu0  ;;  %v1379_v38 = vsel %vm1334_vm1, %v14405_v26, %v1291_v16  ;;  %v1439_v36 = vsel %vm10557_vm3, 0.0, %v1356_v51  ;;  %v1357_v25 = vsel %vm1334_vm1, %v1308_v13, %v1311_v48  ;;  %v1084_v29 = vpop.f32.mrb[34].mxu1  ;;  %v865_v51 = vadd.f32 %v10310_v63, %v10546_v32 }
 0x16a   : > { %v1297_v21 = vrot.slane %v8632_v31, 7  ;;  %v1201_v61 = vpop.f32.mrb[35].mxu0  ;;  %v10588_v0 = vadd.f32 %v1379_v38, %v855_v37  ;;  %v10591_v46 = vadd.f32 %v1439_v36, %v10369_v45  ;;  %v1440_v33 = vsel %vm10557_vm3, 0.0, %v1357_v25  ;;  %v1086_v7 = vpop.f32.mrb[35].mxu1 }
 0x16b   : > { %v1313_v24 = vrot.slane %v1084_v29, 7  ;;  %v1294_v26 = vrot.slane %v1201_v61, 7  ;;  %v860_v13 = vadd.f32 %v10312_v3, %v10546_v32  ;;  %v1314_v52 = vrot.slane %v1086_v7, 7 }
 0x16c   : > { %14508 = vst [vmem:[#allocation25_spill] sm:$0xff] %v10591_v46  ;;  %v10599_v31 = vadd.f32 %v1440_v33, %v739_v18  ;;  %v745_v37 = vadd.f32 %v10382_v55, %v10387_v56 }
 0x16d   : > { %v1353_v45 = vsel %vm1334_vm1, %v1310_v39, %v1313_v24  ;;  %v1373_v38 = vsel %vm1334_vm1, %v1294_v26, %v1297_v21  ;;  %v1376_v61 = vsel %vm1334_vm1, %v1291_v16, %v1294_v26  ;;  %v8635_v36 = vpop.f32.mrb[36].mxu0  ;;  %v1354_v3 = vsel %vm1334_vm1, %v1311_v48, %v1314_v52  ;;  %v1090_v55 = vpop.f32.mrb[36].mxu1 }
 0x16e   : > { %14509 = vst [vmem:[#allocation26_spill] sm:$0xff] %v10599_v31  ;;  %v10610_v63 = vadd.f32 %v1353_v45, %v10379_v53  ;;  %v10614_v7 = vadd.f32 %v1376_v61, %v860_v13  ;;  %v10616_v18 = vadd.f32 %v1373_v38, %v865_v51  ;;  %v1211_v25 = vpop.f32.mrb[37].mxu0  ;;  %v10618_v39 = vadd.f32 %v1354_v3, %v745_v37  ;;  %v1092_v46 = vpop.f32.mrb[37].mxu1 }
 0x16f   : > { %v1316_v29 = vrot.slane %v1090_v55, 7  ;;  %v1303_v33 = vrot.slane %v8635_v36, 7  ;;  %v1300_v31 = vrot.slane %v1211_v25, 7  ;;  %v10626_v53 = vadd.f32 %v10307_v40, %v10546_v32 }
 0x170   : > { %v875_v26 = vadd.f32 %v10319_v9, %v10546_v32  ;;  %v870_v48 = vadd.f32 %v10321_v11, %v10546_v32  ;;  %v1317_v51 = vrot.slane %v1092_v46, 7  ;;  %v751_v13 = vadd.f32 %v10405_v12, %v10387_v56 }
 0x171   : > { %v1350_v27 = vsel %vm1334_vm1, %v1313_v24, %v1316_v29  ;;  %v1367_v37 = vsel %vm1334_vm1, %v1300_v31, %v1303_v33  ;;  %v1370_v40 = vsel %vm1334_vm1, %v1297_v21, %v1300_v31  ;;  %v8638_v45 = vpop.f32.mrb[38].mxu0  ;;  %v1096_v46 = vpop.f32.mrb[38].mxu1  ;;  %v880_v31 = vadd.f32 %v10330_v17, %v10546_v32 }
 0x172   : > { %v10641_v38 = vadd.f32 %v1350_v27, %v10403_v50  ;;  %v1351_v9 = vsel %vm1334_vm1, %v1314_v52, %v1317_v51  ;;  %v1429_v11 = vsel %vm10483_vm2, 0.0, %v1370_v40  ;;  %v10647_v12 = vadd.f32 %v1367_v37, %v875_v26  ;;  %v1221_v24 = vpop.f32.mrb[39].mxu0  ;;  %v1098_v55 = vpop.f32.mrb[39].mxu1 }
 0x173   : > { %v10649_v61 = vadd.f32 %v1351_v9, %v751_v13  ;;  %v1319_v36 = vrot.slane %v1096_v46, 7  ;;  %v1309_v3 = vrot.slane %v8638_v45, 7  ;;  %v1306_v21 = vrot.slane %v1221_v24, 7 }
 0x174   : > { %v885_v50 = vadd.f32 %v10328_v15, %v10546_v32  ;;  %v1320_v52 = vrot.slane %v1098_v55, 7  ;;  %v10655_v25 = vadd.f32 %v1429_v11, %v870_v48  ;;  %v781_v16 = vadd.f32 %v10538_v19, %v10387_v56 }
 0x175   : > { %v1347_v26 = vsel %vm1334_vm1, %v1316_v29, %v1319_v36  ;;  %v1361_v13 = vsel %vm1334_vm1, %v1306_v21, %v1309_v3  ;;  %v1364_v27 = vsel %vm1334_vm1, %v1303_v33, %v1306_v21  ;;  %v8641_v37 = vpop.f32.mrb[40].mxu0  ;;  %v1102_v2 = vpop.f32.mrb[40].mxu1  ;;  %v895_v33 = vadd.f32 %v10337_v22, %v10546_v32 }
 0x176   : > { %v10666_v15 = vadd.f32 %v1347_v26, %v10450_v44  ;;  %v1348_v17 = vsel %vm1334_vm1, %v1317_v51, %v1320_v52  ;;  %v10670_v48 = vadd.f32 %v1364_v27, %v880_v31  ;;  %v10672_v40 = vadd.f32 %v1361_v13, %v885_v50  ;;  %v1231_v45 = vpop.f32.mrb[41].mxu0  ;;  %v1104_v46 = vpop.f32.mrb[41].mxu1 }
 0x177   : > { %v10674_v29 = vadd.f32 %v1348_v17, %v757_v14  ;;  %v1322_v9 = vrot.slane %v1102_v2, 7  ;;  %v1315_v11 = vrot.slane %v8641_v37, 7  ;;  %v1312_v24 = vrot.slane %v1231_v45, 7 }
 0x178   : > { %v890_v44 = vadd.f32 %v10339_v23, %v10546_v32  ;;  %v905_v51 = vadd.f32 %v10346_v28, %v10546_v32  ;;  %v1323_v55 = vrot.slane %v1104_v46, 7  ;;  %v763_v21 = vadd.f32 %v10479_v60, %v10387_v56 }
 0x179   : > { %v1344_v50 = vsel %vm1334_vm1, %v1319_v36, %v1322_v9  ;;  %v1355_v31 = vsel %vm1334_vm1, %v1312_v24, %v1315_v11  ;;  %v1358_v14 = vsel %vm1334_vm1, %v1309_v3, %v1312_v24  ;;  %v8644_v22 = vpop.f32.mrb[42].mxu0  ;;  %v1108_v13 = vpop.f32.mrb[42].mxu1  ;;  %v14512_v45 = vand.u32 31, %v10287_v5 }
 0x17a   : > { %v1451_v23 = vsel %vm10620_vm4, 0.0, %v1344_v50  ;;  %v1345_v28 = vsel %vm1334_vm1, %v1320_v52, %v1323_v55  ;;  %v1441_v26 = vsel %vm10557_vm3, 0.0, %v1358_v14  ;;  %v10696_v60 = vadd.f32 %v1355_v31, %v895_v33  ;;  %v1241_v36 = vpop.f32.mrb[43].mxu0  ;;  %v1110_v2 = vpop.f32.mrb[43].mxu1 }
 0x17b   : > { %v10699_v27 = vadd.f32 %v1451_v23, %v10477_v58  ;;  %v1452_v3 = vsel %vm10620_vm4, 0.0, %v1345_v28  ;;  %v1325_v37 = vrot.slane %v1108_v13, 7  ;;  %v1321_v17 = vrot.slane %v8644_v22, 7 }
 0x17c   : > { %vm10705_vm5 = vcmp.eq.s32.totalorder %v14512_v45, 0  ;;  %v1326_v20 = vrot.slane %v1110_v2, 7  ;;  %v1318_v46 = vrot.slane %v1241_v36, 7  ;;  %v10709_v24 = vadd.f32 %v1441_v26, %v890_v44 }
 0x17d   : > { %v10711_v33 = vadd.f32 %v1452_v3, %v763_v21  ;;  %v900_v58 = vadd.f32 %v10348_v30, %v10546_v32  ;;  %v915_v50 = vadd.f32 %v10355_v34, %v10546_v32  ;;  %v769_v31 = vadd.f32 %v10499_v6, %v10387_v56  ;;  %v8647_v22 = vpop.f32.mrb[44].mxu0  ;;  %v1114_v34 = vpop.f32.mrb[44].mxu1 }
 0x17e   : > { %v1341_v14 = vsel %vm1334_vm1, %v1322_v9, %v1325_v37  ;;  %v1342_v44 = vsel %vm1334_vm1, %v1323_v55, %v1326_v20  ;;  %v1349_v21 = vsel %vm1334_vm1, %v1318_v46, %v1321_v17  ;;  %v1352_v30 = vsel %vm1334_vm1, %v1315_v11, %v1318_v46  ;;  %v1251_v28 = vpop.f32.mrb[45].mxu0 }
 0x17f   : > { %v10722_v23 = vadd.f32 %v1341_v14, %v10497_v1  ;;  %v10730_v26 = vadd.f32 %v1342_v44, %v769_v31  ;;  %v10732_v6 = vadd.f32 %v1352_v30, %v900_v58  ;;  %v10734_v9 = vadd.f32 %v1349_v21, %v905_v51  ;;  %v1116_v1 = vpop.f32.mrb[45].mxu1 }
 0x180   : > { %v1328_v13 = vrot.slane %v1114_v34, 7  ;;  %v910_v36 = vadd.f32 %v10357_v35, %v10546_v32  ;;  %v1327_v55 = vrot.slane %v8647_v22, 7  ;;  %v1329_v3 = vrot.slane %v1116_v1, 7 }
 0x181   : > { %14515 = vst [vmem:[#allocation27_spill] sm:$0xff] %v10722_v23  ;;  %v1324_v2 = vrot.slane %v1251_v28, 7  ;;  %v925_v11 = vadd.f32 %v10364_v42, %v10546_v32  ;;  %v920_v45 = vadd.f32 %v10366_v43, %v10546_v32  ;;  %v775_v51 = vadd.f32 %v10520_v8, %v10387_v56  ;;  %v8650_v58 = vpop.f32.mrb[46].mxu0  ;;  %v1120_v43 = vpop.f32.mrb[46].mxu1  ;;  %v8259_v28 = vld [vmem:[%s14389_s3 + $0x2c8] sm:$0xff] }
 0x182   : > { %v1338_v46 = vsel %vm1334_vm1, %v1325_v37, %v1328_v13  ;;  %v1339_v31 = vsel %vm1334_vm1, %v1326_v20, %v1329_v3  ;;  %v1261_v32 = vpop.f32.mrb[47].mxu0  ;;  %v1122_v44 = vpop.f32.mrb[47].mxu1  ;;  %v1333_v21 = vrot.slane %v8650_v58, 7  ;;  %v14517_v1 = vrot.slane %v10373_v47, 7 }
 0x183   : > { %v10748_v35 = vadd.f32 %v1338_v46, %v10518_v49  ;;  %v1343_v14 = vsel %vm1334_vm1, %v1324_v2, %v1327_v55  ;;  %v1346_v42 = vsel %vm1334_vm1, %v1321_v17, %v1324_v2  ;;  %v10756_v22 = vadd.f32 %v1339_v31, %v775_v51  ;;  %v8256_v17 = vld [vmem:[%s14389_s3 + $0x2b0] sm:$0xff] }
 0x184   : > { %v1453_v8 = vsel %vm10620_vm4, 0.0, %v1346_v42  ;;  %v10760_v37 = vadd.f32 %v1343_v14, %v915_v50  ;;  %v1331_v49 = vrot.slane %v1120_v43, 7  ;;  %v1332_v30 = vrot.slane %v1122_v44, 7  ;;  %v14520_v14 = vld [vmem:[#allocation9_spill] sm:$0xff]  ;;  %v14521_v43 = vld [vmem:[#allocation10_spill] sm:$0xff]  ;;  %v8258_v44 = vld [vmem:[%s14389_s3 + $0x2c0] sm:$0xff] }
 0x185   : > { %14516 = vst [vmem:[#allocation28_spill] sm:$0xff] %v10748_v35  ;;  %v1330_v20 = vrot.slane %v1261_v32, 7  ;;  %v10762_v34 = vadd.f32 %v1453_v8, %v910_v36  ;;  %v10778_v2 = vpop.f32.mrb[48].mxu0  ;;  %v8898_v51 = vpack.c.bf16 %v8259_v28, %v8256_v17  ;;  %v14519_v31 = vrot.slane %v10561_v41, 7  ;;  %v8677_v19 = vpop.f32.mrb[48].mxu1  ;;  %v14537_v35 = vld [vmem:[#allocation19_spill] sm:$0xff] }
 0x186   : > { %v1335_v50 = vsel %vm1334_vm1, %v1328_v13, %v1331_v49  ;;  %v1380_v36 = vsel %vm1334_vm1, %v1331_v49, %v14517_v1  ;;  %v1336_v47 = vsel %vm1334_vm1, %v1329_v3, %v1332_v30  ;;  %v10791_v13 = vpop.f32.mrb[49].mxu0  ;;  %v14522_v32 = vrot.slane %v14521_v43, 7  ;;  %v10804_v49 = vpop.f32.mrb[49].mxu1  ;;  %v8255_v3 = vld [vmem:[%s14389_s3 + $0x2a8] sm:$0xff] }
 0x187   : > { %v1415_v46 = vsel %vm10705_vm5, 0.0, %v1380_v36  ;;  %v10783_v58 = vadd.f32 %v1335_v50, %v10536_v59  ;;  %v1382_v56 = vsel %vm1334_vm1, %v1333_v21, %v14519_v31  ;;  %v10800_v8 = vadd.f32 %v1336_v47, %v781_v16  ;;  %8899 = vmatpush1.bf16.msra.mxu0 %v8898_v51 }
 0x188   : > { %v10794_v42 = vadd.f32 %v1415_v46, %v14520_v14  ;;  %v1381_v59 = vsel %vm1334_vm1, %v1332_v30, %v14522_v32  ;;  %v1337_v41 = vsel %vm1334_vm1, %v1330_v20, %v1333_v21  ;;  %v1340_v30 = vsel %vm1334_vm1, %v1327_v55, %v1330_v20  ;;  %8900 = vmatprep.subr.bf16.mxu0 %v14492_v10  ;;  %v8254_v46 = vld [vmem:[%s14389_s3 + $0x2a0] sm:$0xff]  ;;  %v8257_v55 = vld [vmem:[%s14389_s3 + $0x2b8] sm:$0xff] }
 0x189   : > { %14518 = vst [vmem:[#allocation29_spill] sm:$0xff] %v10783_v58  ;;  %v1416_v17 = vsel %vm10705_vm5, 0.0, %v1381_v59  ;;  %v10816_v28 = vadd.f32 %v1337_v41, %v925_v11  ;;  %v14407_v21 = vrot.slane %v10778_v2, 1  ;;  %v10820_v16 = vadd.f32 %v1340_v30, %v920_v45  ;;  %v1620_v51 = vpop.f32.mrb[50].mxu0  ;;  %v8680_v20 = vpop.f32.mrb[50].mxu1 }
 0x18a   : > { %v1875_v50 = vrot.slane %v8677_v19, 1  ;;  %v14406_v1 = vrot.slane %v10791_v13, 1  ;;  %v14408_v36 = vrot.slane %v10804_v49, 1  ;;  %v1873_v11 = vrot.slane %v1620_v51, 1  ;;  %v1622_v31 = vpop.f32.mrb[51].mxu0  ;;  %v1785_v32 = vpop.f32.mrb[51].mxu1 }
 0x18b   : > { %v1417_v45 = vsel %vm10705_vm5, 0.0, %v1382_v56  ;;  %v1464_v47 = vadd.f32 %v1416_v17, %v10574_v57  ;;  %v8851_v19 = vpack.c.bf16 %v8258_v44, %v8255_v3  ;;  %v1881_v14 = vrot.slane %v8680_v20, 1 }
 0x18c   : > { %v1874_v43 = vrot.slane %v1622_v31, 1  ;;  %v1465_v59 = vadd.f32 %v1417_v45, %v10626_v53  ;;  %v1963_v41 = vsel %vm1918_vm6, %v14408_v36, %v1875_v50  ;;  %v10842_v30 = vsel %vm1918_vm6, %v14407_v21, %v1873_v11 }
 0x18d   : > { %v1878_v52 = vrot.slane %v1785_v32, 1  ;;  %v352_v57 = vand.u32 31, %v10570_v62  ;;  %8852 = vmatprep.subr.bf16.mxu1 %v8851_v19  ;;  %v8853_v56 = vpack.c.bf16 %v8257_v55, %v8254_v46  ;;  %v1626_v3 = vpop.f32.mrb[52].mxu0  ;;  %v10850_v17 = vadd.s32 56, %v10287_v5  ;;  %v8683_v31 = vpop.f32.mrb[52].mxu1 }
 0x18e   : > { %v1962_v53 = vsel %vm1918_vm6, %v14406_v1, %v1874_v43  ;;  %v2049_v44 = vadd.f32 %v1963_v41, %v1465_v59  ;;  %v1876_v20 = vrot.slane %v1626_v3, 1  ;;  %v1628_v45 = vpop.f32.mrb[53].mxu0  ;;  %v1887_v55 = vrot.slane %v8683_v31, 1  ;;  %v1795_v32 = vpop.f32.mrb[53].mxu1 }
 0x18f   : > { %14523 = vst [vmem:[#allocation9_spill] sm:$0xff] %v10850_v17  ;;  %v1957_v51 = vsel %vm1918_vm6, %v1878_v52, %v1881_v14  ;;  %v1960_v19 = vsel %vm1918_vm6, %v1875_v50, %v1878_v52  ;;  %v10856_v46 = vadd.f32 %v1962_v53, %v1464_v47  ;;  %8854 = vmatpush1.bf16.msra.mxu1 %v8853_v56  ;;  %v1877_v21 = vrot.slane %v1628_v45, 1 }
 0x190   : > { %v2097_v1 = vmax.f32 %v2049_v44, 0.0  ;;  %v2052_v59 = vadd.f32 %v1960_v19, %v10588_v0  ;;  %v10861_v41 = vsel %vm1918_vm6, %v1873_v11, %v1876_v20  ;;  %v1884_v36 = vrot.slane %v1795_v32, 1  ;;  %v14526_v19 = vld [vmem:[#allocation13_spill] sm:$0xff] }
 0x191   : > { %vm10863_vm7 = vcmp.eq.s32.totalorder %v352_v57, 31  ;;  %v2055_v50 = vadd.f32 %v1957_v51, %v10614_v7  ;;  %v1959_v47 = vsel %vm1918_vm6, %v1874_v43, %v1877_v21  ;;  %v1632_v52 = vpop.f32.mrb[54].mxu0  ;;  %v380_v11 = vand.u32 31, %v10850_v17  ;;  %v8686_v7 = vpop.f32.mrb[54].mxu1 }
 0x192   : > { %2177 = vrot.lane.b32.xlu0 %v2097_v1, %s9540_s14  ;;  %v2100_v56 = vmax.f32 %v2052_v59, 0.0  ;;  %v1951_v57 = vsel %vm1918_vm6, %v1884_v36, %v1887_v55  ;;  %v1954_v53 = vsel %vm1918_vm6, %v1881_v14, %v1884_v36  ;;  %v1879_v44 = vrot.slane %v1632_v52, 1  ;;  %v1634_v51 = vpop.f32.mrb[55].mxu0  ;;  %v1805_v45 = vpop.f32.mrb[55].mxu1 }
 0x193   : > { %v322_v1 = vadd.s32 88, %v10287_v5  ;;  %v1893_v31 = vrot.slane %v8686_v7, 1  ;;  %v1880_v43 = vrot.slane %v1634_v51, 1  ;;  %v10880_v32 = vadd.f32 %v1959_v47, %v14526_v19 }
 0x194   : > { %2181 = vrot.lane.b32.xlu1 %v2100_v56, %s9540_s14  ;;  %v10883_v59 = vadd.f32 %v1951_v57, %v10655_v25  ;;  %v10887_v0 = vsel %vm1918_vm6, %v1876_v20, %v1879_v44  ;;  %v1890_v36 = vrot.slane %v1805_v45, 1  ;;  %v2010_v14 = vsel %vm10863_vm7, 0.0, %v1954_v53 }
 0x195   : > { %v1956_v52 = vsel %vm1918_vm6, %v1877_v21, %v1880_v43  ;;  %v14527_v56 = vmax.f32 %v10856_v46, 0.0  ;;  %v1638_v47 = vpop.f32.mrb[56].mxu0  ;;  %v2103_v7 = vmax.f32 %v2055_v50, 0.0  ;;  %v10897_v25 = vadd.f32 %v2010_v14, %v10616_v18  ;;  %v8689_v51 = vpop.f32.mrb[56].mxu1 }
 0x196   : > { %vm10899_vm8 = vcmp.eq.s32.totalorder %v380_v11, 31  ;;  %v1945_v20 = vsel %vm1918_vm6, %v1890_v36, %v1893_v31  ;;  %v1948_v53 = vsel %vm1918_vm6, %v1887_v55, %v1890_v36  ;;  %v1882_v21 = vrot.slane %v1638_v47, 1  ;;  %v1640_v45 = vpop.f32.mrb[57].mxu0 }
 0x197   : > { %2175 = vrot.lane.b32.xlu0 %v14527_v56, %s9540_s14  ;;  %v10908_v19 = vadd.f32 %v1956_v52, %v10463_v4  ;;  %v1899_v50 = vrot.slane %v8689_v51, 1  ;;  %v1815_v56 = vpop.f32.mrb[57].mxu1  ;;  %v1883_v18 = vrot.slane %v1640_v45, 1  ;;  %v10912_v11 = vadd.f32 %v1948_v53, %v10647_v12 }
 0x198   : > { %2185 = vrot.lane.b32.xlu1 %v2103_v7, %s9540_s14  ;;  %v408_v14 = vand.u32 31, %v322_v1  ;;  %v10916_v17 = vsel %vm1918_vm6, %v1879_v44, %v1882_v21  ;;  %v1896_v55 = vrot.slane %v1815_v56, 1  ;;  %v10920_v47 = vadd.f32 %v1945_v20, %v10670_v48 }
 0x199   : > { %14530 = vst [vmem:[#allocation10_spill] sm:$0xff] %v10908_v19  ;;  %v14412_v36 = vmax.f32 %v10908_v19, 0.0  ;;  %v1953_v52 = vsel %vm1918_vm6, %v1880_v43, %v1883_v18  ;;  %v1644_v12 = vpop.f32.mrb[58].mxu0  ;;  %v14413_v1 = vmax.f32 %v10880_v32, 0.0  ;;  %v326_v7 = vadd.s32 120, %v10287_v5  ;;  %v8692_v20 = vpop.f32.mrb[58].mxu1 }
 0x19a   : > { %v1939_v44 = vsel %vm1918_vm6, %v1896_v55, %v1899_v50  ;;  %v1942_v53 = vsel %vm1918_vm6, %v1893_v31, %v1896_v55  ;;  %v1885_v48 = vrot.slane %v1644_v12, 1  ;;  %v1646_v51 = vpop.f32.mrb[59].mxu0  ;;  %v2009_v43 = vsel %vm10863_vm7, 0.0, %v1953_v52  ;;  %v1825_v4 = vpop.f32.mrb[59].mxu1  ;;  %v8300_v31 = vld [vmem:[%s14389_s3 + $0x410] sm:$0xff] }
 0x19b   : > { %2183 = vrot.lane.b32.xlu0 %v14412_v36, %s9540_s14  ;;  %v1905_v45 = vrot.slane %v8692_v20, 1  ;;  %v1886_v56 = vrot.slane %v1646_v51, 1  ;;  %v10942_v62 = vadd.f32 %v2009_v43, %v10481_v54  ;;  %vm10944_vm9 = vcmp.eq.s32.totalorder %v408_v14, 31 }
 0x19c   : > { %2179 = vrot.lane.b32.xlu1 %v14413_v1, %s9540_s14  ;;  %v10950_v55 = vsel %vm1918_vm6, %v1882_v21, %v1885_v48  ;;  %v1902_v12 = vrot.slane %v1825_v4, 1  ;;  %v10953_v52 = vadd.f32 %v1939_v44, %v10709_v24  ;;  %v2022_v20 = vsel %vm10899_vm8, 0.0, %v1942_v53  ;;  %v14534_v1 = vld [vmem:[#allocation17_spill] sm:$0xff] }
 0x19d   : > { %14531 = vst [vmem:[#allocation13_spill] sm:$0xff] %v10942_v62  ;;  %v1950_v51 = vsel %vm1918_vm6, %v1883_v18, %v1886_v56  ;;  %v1650_v54 = vpop.f32.mrb[60].mxu0  ;;  %v2109_v14 = vmax.f32 %v10883_v59, 0.0  ;;  %v10962_v36 = vadd.f32 %v2022_v20, %v10672_v40  ;;  %v8695_v44 = vpop.f32.mrb[60].mxu1  ;;  %v8262_v59 = vld [vmem:[%s14389_s3 + $0x2e0] sm:$0xff]  ;;  %v8265_v40 = vld [vmem:[%s14389_s3 + $0x2f8] sm:$0xff] }
 0x19e   : > { %v1933_v21 = vsel %vm1918_vm6, %v1902_v12, %v1905_v45  ;;  %v1936_v24 = vsel %vm1918_vm6, %v1899_v50, %v1902_v12  ;;  %v1888_v4 = vrot.slane %v1650_v54, 1  ;;  %v1652_v53 = vpop.f32.mrb[61].mxu0  ;;  %v10969_v58 = vadd.f32 %v1950_v51, %v14534_v1  ;;  %v1835_v43 = vpop.f32.mrb[61].mxu1 }
 0x19f   : > { %v1911_v18 = vrot.slane %v8695_v44, 1  ;;  %v1889_v20 = vrot.slane %v1652_v53, 1  ;;  %v14536_v50 = vmax.f32 %v10942_v62, 0.0  ;;  %v2106_v1 = vmax.f32 %v10897_v25, 0.0 }
 0x1a0   : > { %14535 = vst [vmem:[#allocation17_spill] sm:$0xff] %v10969_v58  ;;  %2193 = vrot.lane.b32.xlu1 %v2109_v14, %s9540_s14  ;;  %v436_v12 = vand.u32 31, %v326_v7  ;;  %v10984_v51 = vsel %vm1918_vm6, %v1885_v48, %v1888_v4  ;;  %v1908_v54 = vrot.slane %v1835_v43, 1  ;;  %v10988_v44 = vadd.f32 %v1936_v24, %v10696_v60 }
 0x1a1   : > { %2187 = vrot.lane.b32.xlu0 %v14536_v50, %s9540_s14  ;;  %v1947_v14 = vsel %vm1918_vm6, %v1886_v56, %v1889_v20  ;;  %v1656_v53 = vpop.f32.mrb[62].mxu0  ;;  %v10993_v23 = vadd.f32 %v1933_v21, %v10732_v6  ;;  %v10997_v25 = vadd.f32 %v10842_v30, %v10794_v42  ;;  %v8901_v7 = vpack.c.bf16 %v8265_v40, %v8262_v59  ;;  %v8698_v24 = vpop.f32.mrb[62].mxu1 }
 0x1a2   : > { %v1927_v48 = vsel %vm1918_vm6, %v1908_v54, %v1911_v18  ;;  %v1930_v43 = vsel %vm1918_vm6, %v1905_v45, %v1908_v54  ;;  %v1891_v60 = vrot.slane %v1656_v53, 1  ;;  %v1658_v50 = vpop.f32.mrb[63].mxu0  ;;  %v11004_v56 = vadd.f32 %v1947_v14, %v14537_v35  ;;  %v1845_v21 = vpop.f32.mrb[63].mxu1 }
 0x1a3   : > { %v1917_v62 = vrot.slane %v8698_v24, 1  ;;  %v1892_v6 = vrot.slane %v1658_v50, 1  ;;  %v14539_v42 = vmax.f32 %v10969_v58, 0.0  ;;  %vm11010_vm10 = vcmp.eq.s32.totalorder %v436_v12, 31  ;;  %8902 = vmatpush1.bf16.msra.mxu0 %v8901_v7  ;;  %v14544_v24 = vld [vmem:[#allocation21_spill] sm:$0xff]  ;;  %v14555_v58 = vld [vmem:[#allocation18_spill] sm:$0xff] }
 0x1a4   : > { %14538 = vst [vmem:[#allocation19_spill] sm:$0xff] %v11004_v56  ;;  %2189 = vrot.lane.b32.xlu1 %v2106_v1, %s9540_s14  ;;  %v14540_v30 = vmov 0  ;;  %v11016_v45 = vsel %vm1918_vm6, %v1888_v4, %v1891_v60  ;;  %v1914_v59 = vrot.slane %v1845_v21, 1  ;;  %v14415_v35 = vmax.f32 %v11004_v56, 0.0  ;;  %8903 = vmatprep.subr.bf16.mxu0 %v14492_v10 }
 0x1a5   : > { %2191 = vrot.lane.b32.xlu0 %v14539_v42, %s9540_s14  ;;  %v14541_v30 = vsel %vm11010_vm10, 4294967295, %v14540_v30  ;;  %v11020_v40 = vadd.f32 %v1927_v48, %v10762_v34  ;;  %v14543_v1 = vrot.slane %v10804_v49, 1  ;;  %v1944_v12 = vsel %vm1918_vm6, %v1889_v20, %v1892_v6  ;;  %v1662_v14 = vpop.f32.mrb[64].mxu0 }
 0x1a6   : > { %14542 = vst [vmem:[#allocation30_spill] sm:$0xff] %v14541_v30  ;;  %v2112_v53 = vmax.f32 %v10912_v11, 0.0  ;;  %v2034_v4 = vsel %vm10944_vm9, 0.0, %v1930_v43  ;;  %v1921_v34 = vsel %vm1918_vm6, %v1914_v59, %v1917_v62  ;;  %v1924_v49 = vsel %vm1918_vm6, %v1911_v18, %v1914_v59  ;;  %v1664_v48 = vpop.f32.mrb[65].mxu0  ;;  %v8261_v18 = vld [vmem:[%s14389_s3 + $0x2d8] sm:$0xff]  ;;  %v8260_v59 = vld [vmem:[%s14389_s3 + $0x2d0] sm:$0xff] }
 0x1a7   : > { %v1966_v54 = vsel %vm1918_vm6, %v1917_v62, %v14543_v1  ;;  %v1894_v7 = vrot.slane %v1662_v14, 1  ;;  %v11037_v50 = vadd.f32 %v1944_v12, %v14544_v24  ;;  %v1895_v20 = vrot.slane %v1664_v48, 1  ;;  %v8267_v14 = vld [vmem:[%s14389_s3 + $0x308] sm:$0xff] }
 0x1a8   : > { %2197 = vrot.lane.b32.xlu1 %v2112_v53, %s9540_s14  ;;  %v11044_v11 = vadd.f32 %v2034_v4, %v10734_v9  ;;  %v11047_v62 = vadd.f32 %v1924_v49, %v10760_v37  ;;  %v11058_v42 = vadd.f32 %v1921_v34, %v10820_v16  ;;  %v2046_v9 = vsel %vm11010_vm10, 0.0, %v1966_v54  ;;  %v8264_v37 = vld [vmem:[%s14389_s3 + $0x2f0] sm:$0xff]  ;;  %v8270_v53 = vld [vmem:[%s14389_s3 + $0x320] sm:$0xff]  ;;  %v8269_v16 = vld [vmem:[%s14389_s3 + $0x318] sm:$0xff] }
 0x1a9   : > { %14545 = vst [vmem:[#allocation21_spill] sm:$0xff] %v11037_v50  ;;  %2195 = vrot.lane.b32.xlu0 %v14415_v35, %s9540_s14  ;;  %v11054_v43 = vsel %vm1918_vm6, %v1891_v60, %v1894_v7  ;;  %v14416_v21 = vmax.f32 %v11037_v50, 0.0  ;;  %v8263_v60 = vld [vmem:[%s14389_s3 + $0x2e8] sm:$0xff]  ;;  %v1941_v1 = vsel %vm1918_vm6, %v1892_v6, %v1895_v20  ;;  %v1668_v54 = vpop.f32.mrb[66].mxu0  ;;  %v2115_v12 = vmax.f32 %v10920_v47, 0.0  ;;  %v8268_v47 = vld [vmem:[%s14389_s3 + $0x310] sm:$0xff] }
 0x1aa   : > { %v1897_v4 = vrot.slane %v1668_v54, 1  ;;  %v1670_v34 = vpop.f32.mrb[67].mxu0  ;;  %v2021_v49 = vsel %vm10899_vm8, 0.0, %v1941_v1  ;;  %v11086_v48 = vadd.f32 %v2046_v9, %v10816_v28  ;;  %v8271_v6 = vld [vmem:[%s14389_s3 + $0x328] sm:$0xff]  ;;  %v14546_v54 = vld [vmem:[#allocation23_spill] sm:$0xff]  ;;  %v8855_v28 = vpack.c.bf16 %v8264_v37, %v8261_v18  ;;  %v8273_v18 = vld [vmem:[%s14389_s3 + $0x338] sm:$0xff] }
 0x1ab   : > { %v1898_v24 = vrot.slane %v1670_v34, 1  ;;  %v11099_v1 = vadd.f32 %v2021_v49, %v14546_v54  ;;  %v8857_v9 = vpack.c.bf16 %v8263_v60, %v8260_v59  ;;  %v8266_v35 = vld [vmem:[%s14389_s3 + $0x300] sm:$0xff]  ;;  %v2121_v34 = vmax.f32 %v10953_v52, 0.0  ;;  %v8276_v52 = vld [vmem:[%s14389_s3 + $0x350] sm:$0xff] }
 0x1ac   : > { %2201 = vrot.lane.b32.xlu1 %v2115_v12, %s9540_s14  ;;  %v11109_v12 = vsel %vm1918_vm6, %v1894_v7, %v1897_v4  ;;  %8856 = vmatprep.subr.bf16.mxu1 %v8855_v28  ;;  %v8904_v49 = vpack.c.bf16 %v8271_v6, %v8268_v47  ;;  %v14548_v54 = vld [vmem:[#allocation11_spill] sm:$0xff]  ;;  %v14549_v28 = vld [vmem:[#allocation26_spill] sm:$0xff]  ;;  %v11183_v19 = vadd.f32 %v10984_v51, %v14555_v58  ;;  %vm4498_vm2 = vcmask 1044484  }
 0x1ad   : > { %2199 = vrot.lane.b32.xlu0 %v14416_v21, %s9540_s14  ;;  %14547 = vst [vmem:[#allocation23_spill] sm:$0xff] %v11099_v1  ;;  %v8859_v21 = vpack.c.bf16 %v8270_v53, %v8267_v14  ;;  %v1938_v37 = vsel %vm1918_vm6, %v1895_v20, %v1898_v24  ;;  %v1674_v59 = vpop.f32.mrb[68].mxu0  ;;  %v11120_v50 = vadd.f32 %v10861_v41, %v14548_v54  ;;  %v8274_v7 = vld [vmem:[%s14389_s3 + $0x340] sm:$0xff]  ;;  %v8277_v20 = vld [vmem:[%s14389_s3 + $0x358] sm:$0xff]  ;;  %v14551_v56 = vmax.f32 %v11099_v1, 0.0 }
 0x1ae   : > { %v1900_v14 = vrot.slane %v1674_v59, 1  ;;  %v1676_v53 = vpop.f32.mrb[69].mxu0  ;;  %v11132_v47 = vadd.f32 %v1938_v37, %v14549_v28  ;;  %8858 = vmatpush1.bf16.msra.mxu1 %v8857_v9  ;;  %v8861_v41 = vpack.c.bf16 %v8269_v16, %v8266_v35  ;;  %v14550_v6 = vld [vmem:[#allocation14_spill] sm:$0xff]  ;;  %v8272_v59 = vld [vmem:[%s14389_s3 + $0x330] sm:$0xff]  ;;  %v8275_v9 = vld [vmem:[%s14389_s3 + $0x348] sm:$0xff]  ;;  %8905 = vmatpush1.bf16.msra.mxu0 %v8904_v49  ;;  %v8863_v16 = vpack.c.bf16 %v8276_v52, %v8273_v18 }
 0x1af   : > { %v11136_v54 = vadd.f32 %v10887_v0, %v14550_v6  ;;  %v1901_v60 = vrot.slane %v1676_v53, 1  ;;  %8860 = vmatprep.subr.bf16.mxu1 %v8859_v21  ;;  %v8282_v37 = vld [vmem:[%s14389_s3 + $0x380] sm:$0xff]  ;;  %8906 = vmatprep.subr.bf16.mxu0 %v14492_v10  ;;  %v8280_v21 = vld [vmem:[%s14389_s3 + $0x370] sm:$0xff]  ;;  %v8283_v18 = vld [vmem:[%s14389_s3 + $0x388] sm:$0xff]  ;;  %v14553_v52 = vsel %vm10863_vm7, 0.0, %v10916_v17  ;;  %v8865_v1 = vpack.c.bf16 %v8275_v9, %v8272_v59 }
 0x1b0   : > { %2209 = vrot.lane.b32.xlu1 %v2121_v34, %s9540_s14  ;;  %v1934_v35 = vsel %vm1918_vm6, %v1897_v4, %v1900_v14  ;;  %v8907_v34 = vpack.c.bf16 %v8277_v20, %v8274_v7  ;;  %v2118_v4 = vmax.f32 %v10962_v36, 0.0  ;;  %v14552_v49 = vld [vmem:[#allocation15_spill] sm:$0xff]  ;;  %v14556_v17 = vmax.f32 %v11132_v47, 0.0 }
 0x1b1   : > { %2203 = vrot.lane.b32.xlu0 %v14551_v56, %s9540_s14  ;;  %v8279_v56 = vld [vmem:[%s14389_s3 + $0x368] sm:$0xff]  ;;  %v1935_v53 = vsel %vm1918_vm6, %v1898_v24, %v1901_v60  ;;  %v1680_v28 = vpop.f32.mrb[70].mxu0  ;;  %v11172_v7 = vadd.f32 %v14553_v52, %v14552_v49  ;;  %v8910_v9 = vpack.c.bf16 %v8283_v18, %v8280_v21  ;;  %v2124_v49 = vmax.f32 %v10988_v44, 0.0 }
 0x1b2   : > { %v14554_v24 = vld [vmem:[#allocation16_spill] sm:$0xff]  ;;  %v1903_v20 = vrot.slane %v1680_v28, 1  ;;  %v1682_v6 = vpop.f32.mrb[71].mxu0  ;;  %v11179_v0 = vadd.f32 %v1935_v53, %v10618_v39  ;;  %8862 = vmatpush1.bf16.msra.mxu1 %v8861_v41  ;;  %v8278_v28 = vld [vmem:[%s14389_s3 + $0x360] sm:$0xff]  ;;  %v8281_v39 = vld [vmem:[%s14389_s3 + $0x378] sm:$0xff]  ;;  %8908 = vmatpush1.bf16.msra.mxu0 %v8907_v34  ;;  %v11220_v34 = vadd.f32 %v1934_v35, %v10610_v63  ;;  %v2127_v35 = vmax.f32 %v10993_v23, 0.0 }
 0x1b3   : > { %v11176_v36 = vadd.f32 %v10950_v55, %v14554_v24  ;;  %v1904_v3 = vrot.slane %v1682_v6, 1  ;;  %v8867_v55 = vpack.c.bf16 %v8282_v37, %v8279_v56  ;;  %v14557_v41 = vld [vmem:[#allocation20_spill] sm:$0xff]  ;;  %8864 = vmatprep.subr.bf16.mxu1 %v8863_v16  ;;  %v14558_v56 = vld [vmem:[#allocation22_spill] sm:$0xff]  ;;  %v14559_v37 = vsel %vm10899_vm8, 0.0, %v11054_v43  ;;  %8909 = vmatprep.subr.bf16.mxu0 %v14492_v10 }
 0x1b4   : > { %2205 = vrot.lane.b32.xlu1 %v2118_v4, %s9540_s14  ;;  %v11197_v58 = vadd.f32 %v11016_v45, %v14557_v41  ;;  %v11201_v51 = vsel %vm1918_vm6, %v1900_v14, %v1903_v20  ;;  %v14428_v59 = vmax.f32 %v11179_v0, 0.0  ;;  %v11209_v53 = vadd.f32 %v14559_v37, %v14558_v56  ;;  %v14560_v14 = vld [vmem:[#allocation25_spill] sm:$0xff] }
 0x1b5   : > { %2207 = vrot.lane.b32.xlu0 %v14556_v17, %s9540_s14  ;;  %v1932_v45 = vsel %vm1918_vm6, %v1901_v60, %v1904_v3  ;;  %v1686_v4 = vpop.f32.mrb[72].mxu0  ;;  %v11217_v16 = vadd.f32 %v11109_v12, %v14560_v14  ;;  %v8869_v18 = vpack.c.bf16 %v8281_v39, %v8278_v28  ;;  %v2133_v28 = vmax.f32 %v11020_v40, 0.0 }
 0x1b6   : > { %v1906_v57 = vrot.slane %v1686_v4, 1  ;;  %v1688_v21 = vpop.f32.mrb[73].mxu0  ;;  %v11223_v43 = vadd.f32 %v1932_v45, %v10649_v61  ;;  %8866 = vmatpush1.bf16.msra.mxu1 %v8865_v1  ;;  %8911 = vmatpush1.bf16.msra.mxu0 %v8910_v9  ;;  %vm4500_vm3 = vcmask 1045509   ;;  %vm4502_vm4 = vcmask 1046534  }
 0x1b7   : > { %v1907_v60 = vrot.slane %v1688_v21, 1  ;;  %8868 = vmatprep.subr.bf16.mxu1 %v8867_v55  ;;  %8912 = vmatprep.subr.bf16.mxu0 %v14492_v10  ;;  %vm4504_vm5 = vcmask 1047559  }
 0x1b8   : > { %14561 = vst [vmem:[#allocation11_spill] sm:$0xff] %v11223_v43  ;;  %2213 = vrot.lane.b32.xlu1 %v2124_v49, %s9540_s14  ;;  %v11231_v44 = vsel %vm1918_vm6, %v1903_v20, %v1906_v57  ;;  %v14427_v63 = vmax.f32 %v11223_v43, 0.0 }
 0x1b9   : > { %2211 = vrot.lane.b32.xlu0 %v14428_v59, %s9540_s14  ;;  %v2032_v61 = vsel %vm10944_vm9, 0.0, %v11231_v44  ;;  %v1929_v1 = vsel %vm1918_vm6, %v1904_v3, %v1907_v60  ;;  %v1692_v12 = vpop.f32.mrb[74].mxu0  ;;  %v8296_v44 = vld [vmem:[%s14389_s3 + $0x3f0] sm:$0xff] }
 0x1ba   : > { %v1909_v52 = vrot.slane %v1692_v12, 1  ;;  %v1694_v24 = vpop.f32.mrb[75].mxu0  ;;  %v2033_v20 = vsel %vm10944_vm9, 0.0, %v1929_v1  ;;  %8870 = vmatpush1.bf16.msra.mxu1 %v8869_v18 }
 0x1bb   : > { %v1910_v6 = vrot.slane %v1694_v24, 1  ;;  %v11248_v3 = vadd.f32 %v2033_v20, %v10674_v29 }
 0x1bc   : > { %2217 = vrot.lane.b32.xlu1 %v2127_v35, %s9540_s14  ;;  %v11252_v23 = vsel %vm1918_vm6, %v1906_v57, %v1909_v52  ;;  %v14569_v35 = vrot.slane %v10791_v13, 1 }
 0x1bd   : > { %2215 = vrot.lane.b32.xlu0 %v14427_v63, %s9540_s14  ;;  %14562 = vst [vmem:[#allocation26_spill] sm:$0xff] %v11248_v3  ;;  %v1926_v17 = vsel %vm1918_vm6, %v1907_v60, %v1910_v6  ;;  %v1698_v55 = vpop.f32.mrb[76].mxu0  ;;  %v14425_v39 = vmax.f32 %v11248_v3, 0.0  ;;  %v14567_v60 = vrot.slane %v10778_v2, 1  ;;  %v2136_v2 = vmax.f32 %v11047_v62, 0.0 }
 0x1be   : > { %v1912_v41 = vrot.slane %v1698_v55, 1  ;;  %v1700_v9 = vpop.f32.mrb[77].mxu0  ;;  %v11259_v56 = vadd.f32 %v1926_v17, %v10711_v33  ;;  %v2130_v33 = vmax.f32 %v11044_v11, 0.0  ;;  %v2139_v17 = vmax.f32 %v11058_v42, 0.0  ;;  %v8285_v55 = vld [vmem:[%s14389_s3 + $0x398] sm:$0xff]  ;;  %v8284_v42 = vld [vmem:[%s14389_s3 + $0x390] sm:$0xff] }
 0x1bf   : > { %v1913_v37 = vrot.slane %v1700_v9, 1 }
 0x1c0   : > { %14563 = vst [vmem:[#allocation14_spill] sm:$0xff] %v11259_v56  ;;  %2225 = vrot.lane.b32.xlu1 %v2133_v28, %s9540_s14  ;;  %v11267_v29 = vsel %vm1918_vm6, %v1909_v52, %v1912_v41  ;;  %v14426_v40 = vmax.f32 %v11259_v56, 0.0 }
 0x1c1   : > { %2219 = vrot.lane.b32.xlu0 %v14425_v39, %s9540_s14  ;;  %14564 = vst [vmem:[#allocation15_spill] sm:$0xff] %v11267_v29  ;;  %v1923_v45 = vsel %vm1918_vm6, %v1910_v6, %v1913_v37  ;;  %v1704_v4 = vpop.f32.mrb[78].mxu0 }
 0x1c2   : > { %v1915_v49 = vrot.slane %v1704_v4, 1  ;;  %v1706_v14 = vpop.f32.mrb[79].mxu0  ;;  %v11274_v57 = vadd.f32 %v1923_v45, %v10730_v26  ;;  %v11346_v4 = vadd.f32 %v11201_v51, %v10641_v38  ;;  %v8292_v38 = vld [vmem:[%s14389_s3 + $0x3d0] sm:$0xff] }
 0x1c3   : > { %v1916_v21 = vrot.slane %v1706_v14, 1 }
 0x1c4   : > { %14565 = vst [vmem:[#allocation16_spill] sm:$0xff] %v11274_v57  ;;  %2221 = vrot.lane.b32.xlu1 %v2130_v33, %s9540_s14  ;;  %v11282_v18 = vsel %vm1918_vm6, %v1912_v41, %v1915_v49  ;;  %v11288_v11 = vsel %vm1918_vm6, %v1915_v49, %v14567_v60  ;;  %v14424_v26 = vmax.f32 %v11274_v57, 0.0  ;;  %v8287_v41 = vld [vmem:[%s14389_s3 + $0x3a8] sm:$0xff]  ;;  %14572 = vst [vmem:[#allocation31_spill] sm:$0xff] %v11346_v4  ;;  %v8294_v49 = vld [vmem:[%s14389_s3 + $0x3e0] sm:$0xff] }
 0x1c5   : > { %2223 = vrot.lane.b32.xlu0 %v14426_v40, %s9540_s14  ;;  %14566 = vst [vmem:[#allocation18_spill] sm:$0xff] %v11282_v18  ;;  %14568 = vst [vmem:[#allocation20_spill] sm:$0xff] %v11288_v11  ;;  %v1920_v12 = vsel %vm1918_vm6, %v1913_v37, %v1916_v21  ;;  %v1965_v52 = vsel %vm1918_vm6, %v1916_v21, %v14569_v35  ;;  %v8873_v9 = vpack.c.bf16 %v8287_v41, %v8284_v42  ;;  %v8289_v37 = vld [vmem:[%s14389_s3 + $0x3b8] sm:$0xff]  ;;  %v8291_v33 = vld [vmem:[%s14389_s3 + $0x3c8] sm:$0xff] }
 0x1c6   : > { %v11302_v24 = vadd.f32 %v1920_v12, %v10756_v22  ;;  %v2045_v20 = vsel %vm11010_vm10, 0.0, %v1965_v52  ;;  %v2142_v22 = vmax.f32 %v11086_v48, 0.0  ;;  %v8286_v48 = vld [vmem:[%s14389_s3 + $0x3a0] sm:$0xff]  ;;  %v8875_v14 = vpack.c.bf16 %v8294_v49, %v8291_v33  ;;  %v8293_v60 = vld [vmem:[%s14389_s3 + $0x3d8] sm:$0xff]  ;;  %v8295_v12 = vld [vmem:[%s14389_s3 + $0x3e8] sm:$0xff] }
 0x1c7   : > { %v11311_v6 = vadd.f32 %v2045_v20, %v10800_v8  ;;  %v8288_v8 = vld [vmem:[%s14389_s3 + $0x3b0] sm:$0xff]  ;;  %v8913_v45 = vpack.c.bf16 %v8289_v37, %v8286_v48  ;;  %v8290_v21 = vld [vmem:[%s14389_s3 + $0x3c0] sm:$0xff]  ;;  %v11371_v35 = vadd.f32 %v2032_v61, %v10666_v15  ;;  %v8916_v52 = vpack.c.bf16 %v8295_v12, %v8292_v38  ;;  %v8297_v20 = vld [vmem:[%s14389_s3 + $0x3f8] sm:$0xff] }
 0x1c8   : > { %14570 = vst [vmem:[#allocation22_spill] sm:$0xff] %v11302_v24  ;;  %2229 = vrot.lane.b32.xlu1 %v2136_v2, %s9540_s14  ;;  %v14423_v13 = vmax.f32 %v11302_v24, 0.0  ;;  %v8871_v28 = vpack.c.bf16 %v8288_v8, %v8285_v55  ;;  %v8877_v51 = vpack.c.bf16 %v8293_v60, %v8290_v21  ;;  %v11375_v2 = vadd.f32 %v11252_v23, %v10699_v27  ;;  %v8299_v27 = vld [vmem:[%s14389_s3 + $0x408] sm:$0xff]  ;;  %v8298_v61 = vld [vmem:[%s14389_s3 + $0x400] sm:$0xff]  ;;  %v8305_v41 = vld [vmem:[%s14389_s3 + $0x438] sm:$0xff] }
 0x1c9   : > { %2227 = vrot.lane.b32.xlu0 %v14424_v26, %s9540_s14  ;;  %14571 = vst [vmem:[#allocation25_spill] sm:$0xff] %v11311_v6  ;;  %v14422_v62 = vmax.f32 %v11311_v6, 0.0  ;;  %8914 = vmatpush1.bf16.msra.mxu0 %v8913_v45  ;;  %14573 = vst [vmem:[#allocation32_spill] sm:$0xff] %v11371_v35  ;;  %v8879_v15 = vpack.c.bf16 %v8300_v31, %v8297_v20  ;;  %v8881_v23 = vpack.c.bf16 %v8299_v27, %v8296_v44  ;;  %v8303_v55 = vld [vmem:[%s14389_s3 + $0x428] sm:$0xff]  ;;  %v8306_v8 = vld [vmem:[%s14389_s3 + $0x440] sm:$0xff] }
 0x1ca   : > { %8872 = vmatprep.subr.bf16.mxu1 %v8871_v28  ;;  %8915 = vmatprep.subr.bf16.mxu0 %v14492_v10  ;;  %14574 = vst [vmem:[#allocation33_spill] sm:$0xff] %v11375_v2  ;;  %v8883_v28 = vpack.c.bf16 %v8306_v8, %v8303_v55  ;;  %v8302_v42 = vld [vmem:[%s14389_s3 + $0x420] sm:$0xff]  ;;  %v8304_v48 = vld [vmem:[%s14389_s3 + $0x430] sm:$0xff]  ;;  %v8307_v37 = vld [vmem:[%s14389_s3 + $0x448] sm:$0xff]  ;;  %v9541_v33 = vmov 1983009808  }
 0x1cb   : > { %8874 = vmatpush1.bf16.msra.mxu1 %v8873_v9  ;;  %v8885_v9 = vpack.c.bf16 %v8305_v41, %v8302_v42  ;;  %v8922_v45 = vpack.c.bf16 %v8307_v37, %v8304_v48  ;;  %v2355_v49 = vunpack.c.l.s4 %v9541_v33  ;;  %v14577_v33 = vmax.f32 %v10880_v32, 0.0 }
 0x1cc   : > { %2233 = vrot.lane.b32.xlu1 %v2139_v17, %s9540_s14  ;;  %8876 = vmatprep.subr.bf16.mxu1 %v8875_v14  ;;  %v8301_v17 = vld [vmem:[%s14389_s3 + $0x418] sm:$0xff] }
 0x1cd   : > { %2231 = vrot.lane.b32.xlu0 %v14423_v13, %s9540_s14  ;;  %8917 = vmatpush1.bf16.msra.mxu0 %v8916_v52  ;;  %v2356_v60 = vunpack.c.0.s8 %v2355_v49  ;;  %v14575_v52 = vmax.f32 %v10856_v46, 0.0  ;;  %v2101_v46 = vmax.f32 %v11136_v54, 0.0 }
 0x1ce   : > { %8918 = vmatprep.subr.bf16.mxu0 %v14492_v10 }
 0x1cf   : > { %8878 = vmatpush1.bf16.msra.mxu1 %v8877_v51  ;;  %v2095_v51 = vmax.f32 %v10997_v25, 0.0  ;;  %v11421_v31 = vsub.s32 %v2356_v60, %v10287_v5 }
 0x1d0   : > { %2237 = vrot.lane.b32.xlu1 %v2142_v22, %s9540_s14  ;;  %8880 = vmatprep.subr.bf16.mxu1 %v8879_v15  ;;  %v8919_v22 = vpack.c.bf16 %v8301_v17, %v8298_v61 }
 0x1d1   : > { %2235 = vrot.lane.b32.xlu0 %v14422_v62, %s9540_s14  ;;  %14576 = vst [vmem:[#allocation34_spill] sm:$0xff] %v11421_v31 }
 0x1d2   : > { %8920 = vmatpush1.bf16.msra.mxu0 %v8919_v22 }
 0x1d3   : > { %8882 = vmatpush1.bf16.msra.mxu1 %v8881_v23  ;;  %8921 = vmatprep.subr.bf16.mxu0 %v14492_v10  ;;  %v2098_v23 = vmax.f32 %v11120_v50, 0.0 }
 0x1d4   : > { %8884 = vmatprep.subr.bf16.mxu1 %v8883_v28 }
 0x1d6   : > { %8923 = vmatpush1.bf16.msra.mxu0 %v8922_v45 }
 0x1d7   : > { %8886 = vmatpush1.bf16.msra.mxu1 %v8885_v9  ;;  %8924 = vmatprep.subr.bf16.mxu0 %v14492_v10 }
 0x204   : > { %v2178_v14 = vpop.permute.xlu0 %2177 }
 0x205   : > { %v2289_v20 = vmax.f32 %v14575_v52, %v2178_v14 }
 0x206   : > { %v2182_v21 = vpop.permute.xlu1 %2181 }
 0x207   : > { %v11438_v54 = vmax.f32 %v14577_v33, %v2182_v21 }
 0x209   : > { %v2176_v38 = vpop.permute.xlu0 %2175 }
 0x20a   : > { %v2240_v12 = vsel %vm2239_vm11, %v2176_v38, %v2178_v14  ;;  %v11423_v44 = vpop.permute.xlu1 %2185 }
 0x20b   : > { %v2288_v15 = vmax.f32 %v2095_v51, %v2240_v12 }
 0x20d   : > { %v2352_v27 = vcombine.low %v2288_v15, %v2289_v20  ;;  %v2353_v61 = vcombine.high %v2288_v15, %v2289_v20  ;;  %v2184_v45 = vpop.permute.xlu0 %2183 }
 0x20e   : > { %v2180_v22 = vpop.permute.xlu1 %2179  ;;  %v2242_v32 = vsel %vm2239_vm11, %v2184_v45, %v11423_v44 }
 0x20f   : > { %v2360_v17 = vrot.slane %v2352_v27, %v11421_v31  ;;  %v2367_v25 = vrot.slane %v2353_v61, %v11421_v31  ;;  %v2241_v8 = vsel %vm2239_vm11, %v2180_v22, %v2182_v21 }
 0x210   : > { %v2290_v27 = vmax.f32 %v2098_v23, %v2241_v8 }
 0x211   : > { %v2368_v48 = vcombine.high %v2360_v17, %v2360_v17  ;;  %v2369_v9 = vcombine.high %v2367_v25, %v2367_v25  ;;  %v2646_v50 = vrot.slane %v2360_v17, %v11421_v31  ;;  %v2662_v37 = vrot.slane %v2367_v25, %v11421_v31 }
 0x213   : > { %v2647_v38 = vcombine.high %v2646_v50, %v2646_v50  ;;  %v2654_v51 = vrot.slane %v2368_v48, %v11421_v31  ;;  %v2663_v12 = vcombine.high %v2662_v37, %v2662_v37  ;;  %v2670_v52 = vrot.slane %v2369_v9, %v11421_v31 }
 0x214   : > { %v3281_v20 = vsel %vm3280_vm12, %v2646_v50, -inf  ;;  %v3310_v15 = vsel %vm3280_vm12, %v2662_v37, -inf }
 0x215   : > { %v2655_v21 = vcombine.high %v2654_v51, %v2654_v51  ;;  %v2671_v61 = vcombine.high %v2670_v52, %v2670_v52  ;;  %v3282_v17 = vrot.slane %v3281_v20, 4  ;;  %v3289_v25 = vsel %vm3288_vm13, %v2647_v38, -inf }
 0x216   : > { %v3290_v22 = vrot.slane %v3289_v25, 4  ;;  %v3296_v33 = vsel %vm3280_vm12, %v2654_v51, -inf  ;;  %v3311_v48 = vrot.slane %v3310_v15, 4  ;;  %v3317_v62 = vsel %vm3288_vm13, %v2663_v12, -inf }
 0x217   : > { %v3283_v9 = vmax.f32 %v3281_v20, %v3282_v17  ;;  %v3297_v1 = vrot.slane %v3296_v33, 4  ;;  %v3303_v50 = vsel %vm3288_vm13, %v2655_v21, -inf  ;;  %v3318_v37 = vrot.slane %v3317_v62, 4 }
 0x218   : > { %v3291_v23 = vmax.f32 %v3289_v25, %v3290_v22  ;;  %v3304_v8 = vrot.slane %v3303_v50, 4  ;;  %v3312_v13 = vmax.f32 %v3310_v15, %v3311_v48  ;;  %v3324_v45 = vsel %vm3280_vm12, %v2670_v52, -inf }
 0x219   : > { %v3284_v26 = vrot.slane %v3283_v9, 2  ;;  %v3298_v39 = vmax.f32 %v3296_v33, %v3297_v1  ;;  %v3319_v40 = vmax.f32 %v3317_v62, %v3318_v37  ;;  %v3325_v38 = vrot.slane %v3324_v45, 4 }
 0x21a   : > { %v3292_v63 = vrot.slane %v3291_v23, 2  ;;  %v3305_v60 = vmax.f32 %v3303_v50, %v3304_v8  ;;  %v3313_v51 = vrot.slane %v3312_v13, 2  ;;  %v3331_v59 = vsel %vm3288_vm13, %v2671_v61, -inf }
 0x21b   : > { %v3285_v12 = vmax.f32 %v3283_v9, %v3284_v26  ;;  %v3299_v20 = vrot.slane %v3298_v39, 2  ;;  %v3320_v17 = vrot.slane %v3319_v40, 2  ;;  %v3326_v14 = vmax.f32 %v3324_v45, %v3325_v38 }
 0x21c   : > { %v3293_v21 = vmax.f32 %v3291_v23, %v3292_v63  ;;  %v3306_v49 = vrot.slane %v3305_v60, 2  ;;  %v3332_v25 = vrot.slane %v3331_v59, 4  ;;  %v11455_v22 = vmax.f32 %v2101_v46, %v2242_v32  ;;  %v14578_v63 = vld [vmem:[#allocation10_spill] sm:$0xff] }
 0x21d   : > { %v3300_v15 = vmax.f32 %v3298_v39, %v3299_v20  ;;  %v3327_v52 = vrot.slane %v3326_v14, 2  ;;  %v2370_v1 = vcombine.low %v2290_v27, %v11438_v54  ;;  %v2371_v62 = vcombine.high %v2290_v27, %v11438_v54 }
 0x21e   : > { %v3286_v33 = vrot.slane %v3285_v12, 1  ;;  %v3314_v48 = vmax.f32 %v3312_v13, %v3313_v51  ;;  %v11459_v50 = vmax.f32 %v3319_v40, %v3320_v17  ;;  %v3333_v61 = vmax.f32 %v3331_v59, %v3332_v25 }
 0x21f   : > { %v3294_v26 = vrot.slane %v3293_v21, 1  ;;  %v11461_v9 = vmax.f32 %v3305_v60, %v3306_v49  ;;  %v14579_v37 = vmax.f32 %v14578_v63, 0.0  ;;  %v3301_v39 = vrot.slane %v3300_v15, 1 }
 0x220   : > { %v3328_v32 = vmax.f32 %v3326_v14, %v3327_v52  ;;  %v3334_v27 = vrot.slane %v3333_v61, 2  ;;  %v2378_v40 = vrot.slane %v2370_v1, %v11421_v31  ;;  %v3287_v49 = vmax.f32 %v3285_v12, %v3286_v33 }
 0x221   : > { %v2293_v23 = vmax.f32 %v14579_v37, %v11423_v44  ;;  %v3315_v60 = vrot.slane %v3314_v48, 1  ;;  %v3322_v45 = vrot.slane %v11459_v50, 1  ;;  %v2385_v44 = vrot.slane %v2371_v62, %v11421_v31 }
 0x222   : > { %v11474_v38 = vmax.f32 %v3293_v21, %v3294_v26  ;;  %v3308_v14 = vrot.slane %v11461_v9, 1  ;;  %v2386_v51 = vcombine.high %v2378_v40, %v2378_v40  ;;  %v2678_v20 = vrot.slane %v2378_v40, %v11421_v31 }
 0x223   : > { %v2388_v59 = vcombine.low %v11455_v22, %v2293_v23  ;;  %v2389_v13 = vcombine.high %v11455_v22, %v2293_v23  ;;  %v3302_v17 = vmax.f32 %v3300_v15, %v3301_v39  ;;  %v3329_v25 = vrot.slane %v3328_v32, 1 }
 0x224   : > { %v2387_v52 = vcombine.high %v2385_v44, %v2385_v44  ;;  %v2694_v1 = vrot.slane %v2385_v44, %v11421_v31  ;;  %v3335_v22 = vmax.f32 %v3333_v61, %v3334_v27  ;;  %v2679_v12 = vcombine.high %v2678_v20, %v2678_v20 }
 0x225   : > { %v2686_v33 = vrot.slane %v2386_v51, %v11421_v31  ;;  %v3338_v63 = vsel %vm3280_vm12, %v2678_v20, -inf  ;;  %v2396_v37 = vrot.slane %v2388_v59, %v11421_v31 }
 0x226   : > { %v2695_v62 = vcombine.high %v2694_v1, %v2694_v1  ;;  %v2702_v21 = vrot.slane %v2387_v52, %v11421_v31  ;;  %v3339_v26 = vrot.slane %v3338_v63, 4  ;;  %v3345_v40 = vsel %vm3288_vm13, %v2679_v12, -inf }
 0x227   : > { %v2687_v23 = vcombine.high %v2686_v33, %v2686_v33  ;;  %v3352_v15 = vsel %vm3280_vm12, %v2686_v33, -inf  ;;  %v3366_v39 = vsel %vm3280_vm12, %v2694_v1, -inf  ;;  %v3346_v27 = vrot.slane %v3345_v40, 4 }
 0x228   : > { %v2703_v44 = vcombine.high %v2702_v21, %v2702_v21  ;;  %v3340_v61 = vmax.f32 %v3338_v63, %v3339_v26  ;;  %v3353_v54 = vrot.slane %v3352_v15, 4  ;;  %v3367_v20 = vrot.slane %v3366_v39, 4 }
 0x229   : > { %v3359_v51 = vsel %vm3288_vm13, %v2687_v23, -inf  ;;  %v3373_v8 = vsel %vm3288_vm13, %v2695_v62, -inf  ;;  %v3380_v52 = vsel %vm3280_vm12, %v2702_v21, -inf  ;;  %v3347_v59 = vmax.f32 %v3345_v40, %v3346_v27 }
 0x22a   : > { %v3341_v46 = vrot.slane %v3340_v61, 2  ;;  %v3354_v41 = vmax.f32 %v3352_v15, %v3353_v54  ;;  %v3360_v42 = vrot.slane %v3359_v51, 4  ;;  %v3336_v12 = vrot.slane %v3335_v22, 1 }
 0x22b   : > { %v3368_v28 = vmax.f32 %v3366_v39, %v3367_v20  ;;  %v3374_v33 = vrot.slane %v3373_v8, 4  ;;  %v3381_v55 = vrot.slane %v3380_v52, 4  ;;  %v3348_v63 = vrot.slane %v3347_v59, 2 }
 0x22c   : > { %v11489_v1 = vmax.f32 %v3340_v61, %v3341_v46  ;;  %v3355_v26 = vrot.slane %v3354_v41, 2  ;;  %v3387_v5 = vsel %vm3288_vm13, %v2703_v44, -inf  ;;  %v11492_v23 = vmax.f32 %v3314_v48, %v3315_v60 }
 0x22d   : > { %v11494_v6 = vmax.f32 %v3359_v51, %v3360_v42  ;;  %v3369_v62 = vrot.slane %v3368_v28, 2  ;;  %v2403_v21 = vrot.slane %v2389_v13, %v11421_v31  ;;  %v11498_v54 = vmax.f32 %v11459_v50, %v3322_v45 }
 0x22e   : > { %14580 = vst [vmem:[#allocation10_spill] sm:$0xff] %v11492_v23  ;;  %v11500_v40 = vmax.f32 %v3373_v8, %v3374_v33  ;;  %v11502_v15 = vmax.f32 %v3380_v52, %v3381_v55  ;;  %v2404_v46 = vcombine.high %v2396_v37, %v2396_v37  ;;  %v11505_v39 = vmax.f32 %v11461_v9, %v3308_v14  ;;  %v2194_v52 = vpop.permute.xlu1 %2193 }
 0x22f   : > { %v11507_v61 = vmax.f32 %v3328_v32, %v3329_v25  ;;  %v11510_v48 = vsel %vm4492_vm14, %v3302_v17, %v3287_v49  ;;  %v3388_v42 = vrot.slane %v3387_v5, 4  ;;  %v11512_v60 = vmax.f32 %v3335_v22, %v3336_v12  ;;  %v2188_v49 = vpop.permute.xlu0 %2187 }
 0x230   : > { %14581 = vst [vmem:[#allocation35_spill] sm:$0xff] %v11502_v15  ;;  %14583 = vst [vmem:[#allocation37_spill] sm:$0xff] %v11510_v48  ;;  %v3343_v13 = vrot.slane %v11489_v1, 1  ;;  %v11515_v50 = vmax.f32 %v3347_v59, %v3348_v63  ;;  %v11517_v8 = vmax.f32 %v3354_v41, %v3355_v26  ;;  %v3362_v55 = vrot.slane %v11494_v6, 2 }
 0x231   : > { %14582 = vst [vmem:[#allocation36_spill] sm:$0xff] %v11507_v61  ;;  %v11520_v45 = vmax.f32 %v3368_v28, %v3369_v62  ;;  %v2405_v9 = vcombine.high %v2403_v21, %v2403_v21  ;;  %v2710_v32 = vrot.slane %v2396_v37, %v11421_v31  ;;  %v2718_v17 = vrot.slane %v2404_v46, %v11421_v31 }
 0x232   : > { %v2726_v25 = vrot.slane %v2403_v21, %v11421_v31  ;;  %v11527_v22 = vmax.f32 %v3387_v5, %v3388_v42 }
 0x233   : > { %14584 = vst [vmem:[#allocation38_spill] sm:$0xff] %v11520_v45  ;;  %v2711_v44 = vcombine.high %v2710_v32, %v2710_v32  ;;  %v2734_v41 = vrot.slane %v2405_v9, %v11421_v31  ;;  %v3394_v27 = vsel %vm3280_vm12, %v2710_v32, -inf  ;;  %v2719_v28 = vcombine.high %v2718_v17, %v2718_v17 }
 0x234   : > { %v2727_v51 = vcombine.high %v2726_v25, %v2726_v25  ;;  %v3395_v20 = vrot.slane %v3394_v27, 4  ;;  %v3408_v37 = vsel %vm3280_vm12, %v2718_v17, -inf  ;;  %v3422_v63 = vsel %vm3280_vm12, %v2726_v25, -inf }
 0x235   : > { %v2735_v59 = vcombine.high %v2734_v41, %v2734_v41  ;;  %v3401_v12 = vsel %vm3288_vm13, %v2711_v44, -inf  ;;  %v3409_v33 = vrot.slane %v3408_v37, 4  ;;  %v3415_v62 = vsel %vm3288_vm13, %v2719_v28, -inf }
 0x236   : > { %v3396_v26 = vmax.f32 %v3394_v27, %v3395_v20  ;;  %v3402_v5 = vrot.slane %v3401_v12, 4  ;;  %v3423_v21 = vrot.slane %v3422_v63, 4  ;;  %v3416_v42 = vrot.slane %v3415_v62, 4 }
 0x237   : > { %v3410_v46 = vmax.f32 %v3408_v37, %v3409_v33  ;;  %v3429_v9 = vsel %vm3288_vm13, %v2727_v51, -inf  ;;  %v3436_v32 = vsel %vm3280_vm12, %v2734_v41, -inf  ;;  %v3443_v25 = vsel %vm3288_vm13, %v2735_v59, -inf  ;;  %v2190_v37 = vpop.permute.xlu1 %2189  ;;  %v2192_v59 = vpop.permute.xlu0 %2191 }
 0x238   : > { %v3397_v17 = vrot.slane %v3396_v26, 2  ;;  %v3403_v14 = vmax.f32 %v3401_v12, %v3402_v5  ;;  %v3424_v11 = vmax.f32 %v3422_v63, %v3423_v21  ;;  %v3430_v30 = vrot.slane %v3429_v9, 4 }
 0x239   : > { %v3411_v44 = vrot.slane %v3410_v46, 2  ;;  %v3417_v24 = vmax.f32 %v3415_v62, %v3416_v42  ;;  %v3437_v18 = vrot.slane %v3436_v32, 4  ;;  %v3444_v2 = vrot.slane %v3443_v25, 4 }
 0x23a   : > { %v3398_v27 = vmax.f32 %v3396_v26, %v3397_v17  ;;  %v3404_v20 = vrot.slane %v3403_v14, 2  ;;  %v3425_v28 = vrot.slane %v3424_v11, 2  ;;  %v3431_v29 = vmax.f32 %v3429_v9, %v3430_v30 }
 0x23b   : > { %v3412_v33 = vmax.f32 %v3410_v46, %v3411_v44  ;;  %v3418_v57 = vrot.slane %v3417_v24, 2  ;;  %v3438_v51 = vmax.f32 %v3436_v32, %v3437_v18  ;;  %v3350_v41 = vrot.slane %v11515_v50, 1  ;;  %v2198_v44 = vpop.permute.xlu1 %2197  ;;  %v2196_v3 = vpop.permute.xlu0 %2195 }
 0x23c   : > { %v3405_v35 = vmax.f32 %v3403_v14, %v3404_v20  ;;  %v3426_v12 = vmax.f32 %v3424_v11, %v3425_v28  ;;  %v3432_v63 = vrot.slane %v3431_v29, 2  ;;  %v3445_v62 = vmax.f32 %v3443_v25, %v3444_v2  ;;  %v14588_v20 = vld [vmem:[#allocation17_spill] sm:$0xff] }
 0x23d   : > { %v3419_v5 = vmax.f32 %v3417_v24, %v3418_v57  ;;  %v3439_v21 = vrot.slane %v3438_v51, 2  ;;  %v2243_v42 = vsel %vm2239_vm11, %v2188_v49, %v2190_v37  ;;  %v11541_v26 = vmax.f32 %v11489_v1, %v3343_v13 }
 0x23e   : > { %v11545_v46 = vmax.f32 %v11494_v6, %v3362_v55  ;;  %v3413_v18 = vrot.slane %v3412_v33, 1  ;;  %v3399_v9 = vrot.slane %v3398_v27, 1  ;;  %v3433_v32 = vmax.f32 %v3431_v29, %v3432_v63  ;;  %v14590_v63 = vld [vmem:[#allocation13_spill] sm:$0xff] }
 0x23f   : > { %14585 = vst [vmem:[#allocation39_spill] sm:$0xff] %v11541_v26  ;;  %v3440_v14 = vmax.f32 %v3438_v51, %v3439_v21  ;;  %v3446_v11 = vrot.slane %v3445_v62, 2  ;;  %v3406_v24 = vrot.slane %v3405_v35, 1  ;;  %v3427_v2 = vrot.slane %v3426_v12, 1 }
 0x240   : > { %v14586_v49 = vmax.f32 %v11172_v7, 0.0  ;;  %v11551_v1 = vmax.f32 %v11515_v50, %v3350_v41  ;;  %v14587_v13 = vrot.slane %v11500_v40, 2  ;;  %v3420_v55 = vrot.slane %v3419_v5, 1 }
 0x241   : > { %v3447_v29 = vmax.f32 %v3445_v62, %v3446_v11  ;;  %v3414_v25 = vmax.f32 %v3412_v33, %v3413_v18  ;;  %v14589_v28 = vmax.f32 %v14588_v20, 0.0  ;;  %v14591_v21 = vmax.f32 %v14590_v63, 0.0 }
 0x242   : > { %v2294_v17 = vmax.f32 %v14586_v49, %v2243_v42  ;;  %v11556_v6 = vmax.f32 %v11500_v40, %v14587_v13  ;;  %v2244_v7 = vsel %vm2239_vm11, %v2192_v59, %v2194_v52  ;;  %v3400_v42 = vmax.f32 %v3398_v27, %v3399_v9 }
 0x243   : > { %v2297_v51 = vmax.f32 %v14589_v28, %v2194_v52  ;;  %v2295_v57 = vmax.f32 %v14591_v21, %v2190_v37  ;;  %v3434_v49 = vrot.slane %v3433_v32, 1  ;;  %v3441_v50 = vrot.slane %v3440_v14, 1 }
 0x244   : > { %v14592_v41 = vmax.f32 %v11176_v36, 0.0  ;;  %v11565_v40 = vmax.f32 %v3405_v35, %v3406_v24  ;;  %v11567_v13 = vmax.f32 %v3426_v12, %v3427_v2  ;;  %v11569_v18 = vmax.f32 %v3419_v5, %v3420_v55  ;;  %v2202_v35 = vpop.permute.xlu1 %2201 }
 0x245   : > { %v2406_v33 = vcombine.low %v2294_v17, %v2295_v57  ;;  %v2407_v62 = vcombine.high %v2294_v17, %v2295_v57  ;;  %v3448_v11 = vrot.slane %v3447_v29, 1  ;;  %v11572_v52 = vsel %vm4492_vm14, %v3414_v25, %v3400_v42  ;;  %v14599_v57 = vld [vmem:[#allocation19_spill] sm:$0xff] }
 0x246   : > { %v2296_v30 = vmax.f32 %v14592_v41, %v2244_v7  ;;  %14593 = vst [vmem:[#allocation17_spill] sm:$0xff] %v11565_v40  ;;  %14594 = vst [vmem:[#allocation13_spill] sm:$0xff] %v11567_v13  ;;  %v2245_v59 = vsel %vm2239_vm11, %v2196_v3, %v2198_v44  ;;  %v11577_v9 = vmax.f32 %v3433_v32, %v3434_v49  ;;  %v14600_v24 = vmax.f32 %v14599_v57, 0.0 }
 0x247   : > { %14595 = vst [vmem:[#allocation40_spill] sm:$0xff] %v11569_v18  ;;  %14596 = vst [vmem:[#allocation41_spill] sm:$0xff] %v11572_v52  ;;  %v2414_v27 = vrot.slane %v2406_v33, %v11421_v31  ;;  %v2421_v36 = vrot.slane %v2407_v62, %v11421_v31  ;;  %v11579_v12 = vmax.f32 %v3440_v14, %v3441_v50  ;;  %v14602_v32 = vmax.f32 %v11183_v19, 0.0 }
 0x248   : > { %v2424_v20 = vcombine.low %v2296_v30, %v2297_v51  ;;  %v2425_v37 = vcombine.high %v2296_v30, %v2297_v51  ;;  %14597 = vst [vmem:[#allocation42_spill] sm:$0xff] %v11577_v9  ;;  %v11584_v2 = vmax.f32 %v14600_v24, %v2198_v44  ;;  %v11588_v28 = vmax.f32 %v3447_v29, %v3448_v11  ;;  %v14603_v51 = vld [vmem:[#allocation21_spill] sm:$0xff] }
 0x249   : > { %14598 = vst [vmem:[#allocation43_spill] sm:$0xff] %v11579_v12  ;;  %v2422_v30 = vcombine.high %v2414_v27, %v2414_v27  ;;  %v2423_v17 = vcombine.high %v2421_v36, %v2421_v36  ;;  %v2742_v55 = vrot.slane %v2414_v27, %v11421_v31  ;;  %v2758_v25 = vrot.slane %v2421_v36, %v11421_v31 }
 0x24a   : > { %v2432_v5 = vrot.slane %v2424_v20, %v11421_v31  ;;  %14601 = vst [vmem:[#allocation19_spill] sm:$0xff] %v11588_v28  ;;  %v11591_v3 = vrot.slane %v2425_v37, %v11421_v31  ;;  %v11595_v14 = vmax.f32 %v14602_v32, %v2245_v59  ;;  %v14604_v63 = vmax.f32 %v14603_v51, 0.0  ;;  %v2200_v51 = vpop.permute.xlu0 %2199 }
 0x24b   : > { %v2743_v44 = vcombine.high %v2742_v55, %v2742_v55  ;;  %v2750_v7 = vrot.slane %v2422_v30, %v11421_v31  ;;  %v2759_v42 = vcombine.high %v2758_v25, %v2758_v25  ;;  %v2766_v49 = vrot.slane %v2423_v17, %v11421_v31 }
 0x24c   : > { %v11599_v21 = vmax.f32 %v14604_v63, %v2202_v35  ;;  %v3450_v29 = vsel %vm3280_vm12, %v2742_v55, -inf  ;;  %v3478_v50 = vsel %vm3280_vm12, %v2758_v25, -inf  ;;  %v2440_v41 = vcombine.high %v2432_v5, %v2432_v5 }
 0x24d   : > { %v2774_v33 = vrot.slane %v2432_v5, %v11421_v31  ;;  %v2751_v19 = vcombine.high %v2750_v7, %v2750_v7  ;;  %v2767_v62 = vcombine.high %v2766_v49, %v2766_v49  ;;  %v3451_v11 = vrot.slane %v3450_v29, 4 }
 0x24e   : > { %v3457_v20 = vsel %vm3288_vm13, %v2743_v44, -inf  ;;  %v3464_v27 = vsel %vm3280_vm12, %v2750_v7, -inf  ;;  %v3479_v36 = vrot.slane %v3478_v50, 4  ;;  %v3485_v59 = vsel %vm3288_vm13, %v2759_v42, -inf }
 0x24f   : > { %v3458_v37 = vrot.slane %v3457_v20, 4  ;;  %v3452_v57 = vmax.f32 %v3450_v29, %v3451_v11  ;;  %v3465_v24 = vrot.slane %v3464_v27, 4  ;;  %v3471_v30 = vsel %vm3288_vm13, %v2751_v19, -inf }
 0x250   : > { %v3486_v17 = vrot.slane %v3485_v59, 4  ;;  %v3472_v25 = vrot.slane %v3471_v30, 4  ;;  %v3480_v32 = vmax.f32 %v3478_v50, %v3479_v36  ;;  %v3492_v5 = vsel %vm3280_vm12, %v2766_v49, -inf }
 0x251   : > { %v3459_v55 = vmax.f32 %v3457_v20, %v3458_v37  ;;  %v3453_v63 = vrot.slane %v3452_v57, 2  ;;  %v3466_v12 = vmax.f32 %v3464_v27, %v3465_v24  ;;  %v3493_v56 = vrot.slane %v3492_v5, 4  ;;  %v11619_v27 = vpop.permute.xlu1 %2209 }
 0x252   : > { %v3487_v44 = vmax.f32 %v3485_v59, %v3486_v17  ;;  %v3473_v7 = vmax.f32 %v3471_v30, %v3472_v25  ;;  %v3481_v52 = vrot.slane %v3480_v32, 2  ;;  %v3499_v42 = vsel %vm3288_vm13, %v2767_v62, -inf }
 0x253   : > { %v3460_v13 = vrot.slane %v3459_v55, 2  ;;  %v11612_v29 = vmax.f32 %v3452_v57, %v3453_v63  ;;  %v3467_v11 = vrot.slane %v3466_v12, 2  ;;  %v2246_v20 = vsel %vm2239_vm11, %v2200_v51, %v2202_v35 }
 0x254   : > { %v3488_v19 = vrot.slane %v3487_v44, 2  ;;  %v3474_v50 = vrot.slane %v3473_v7, 2  ;;  %v11617_v49 = vmax.f32 %v3480_v32, %v3481_v52  ;;  %v3494_v36 = vmax.f32 %v3492_v5, %v3493_v56 }
 0x255   : > { %v11615_v37 = vmax.f32 %v3459_v55, %v3460_v13  ;;  %v3500_v59 = vrot.slane %v3499_v42, 4  ;;  %v2441_v24 = vcombine.high %v11591_v3, %v11591_v3  ;;  %v2782_v62 = vrot.slane %v2440_v41, %v11421_v31 }
 0x256   : > { %v2790_v57 = vrot.slane %v11591_v3, %v11421_v31  ;;  %v2775_v30 = vcombine.high %v2774_v33, %v2774_v33  ;;  %v14605_v56 = vmax.f32 %v11197_v58, 0.0  ;;  %v3455_v17 = vrot.slane %v11612_v29, 1 }
 0x257   : > { %v11635_v55 = vmax.f32 %v3466_v12, %v3467_v11  ;;  %v11637_v25 = vmax.f32 %v3487_v44, %v3488_v19  ;;  %v14606_v3 = vmax.f32 %v11132_v47, 0.0  ;;  %v3462_v32 = vrot.slane %v11615_v37, 1 }
 0x258   : > { %v11632_v35 = vmax.f32 %v14605_v56, %v2246_v20  ;;  %v11645_v5 = vmax.f32 %v3473_v7, %v3474_v50  ;;  %v3483_v51 = vrot.slane %v11617_v49, 1  ;;  %v3495_v58 = vrot.slane %v3494_v36, 2 }
 0x259   : > { %v11642_v41 = vmax.f32 %v14606_v3, %v11619_v27  ;;  %v11648_v63 = vmax.f32 %v3499_v42, %v3500_v59  ;;  %v2783_v20 = vcombine.high %v2782_v62, %v2782_v62  ;;  %v2791_v56 = vcombine.high %v2790_v57, %v2790_v57 }
 0x25a   : > { %v2798_v12 = vrot.slane %v2441_v24, %v11421_v31  ;;  %v3506_v44 = vsel %vm3280_vm12, %v2774_v33, -inf  ;;  %v3513_v11 = vsel %vm3288_vm13, %v2775_v30, -inf  ;;  %v3520_v47 = vsel %vm3280_vm12, %v2782_v62, -inf }
 0x25b   : > { %v3534_v19 = vsel %vm3280_vm12, %v2790_v57, -inf  ;;  %v3507_v7 = vrot.slane %v3506_v44, 4  ;;  %v3514_v50 = vrot.slane %v3513_v11, 4  ;;  %v3521_v52 = vrot.slane %v3520_v47, 4 }
 0x25c   : > { %v2799_v3 = vcombine.high %v2798_v12, %v2798_v12  ;;  %v3527_v13 = vsel %vm3288_vm13, %v2783_v20, -inf  ;;  %v3535_v42 = vrot.slane %v3534_v19, 4  ;;  %v3541_v59 = vsel %vm3288_vm13, %v2791_v56, -inf }
 0x25d   : > { %v3548_v28 = vsel %vm3280_vm12, %v2798_v12, -inf  ;;  %v3508_v24 = vmax.f32 %v3506_v44, %v3507_v7  ;;  %v3515_v9 = vmax.f32 %v3513_v11, %v3514_v50  ;;  %v3522_v33 = vmax.f32 %v3520_v47, %v3521_v52 }
 0x25e   : > { %v3528_v18 = vrot.slane %v3527_v13, 4  ;;  %v3536_v30 = vmax.f32 %v3534_v19, %v3535_v42  ;;  %v3542_v40 = vrot.slane %v3541_v59, 4  ;;  %v3549_v62 = vrot.slane %v3548_v28, 4 }
 0x25f   : > { %v3555_v57 = vsel %vm3288_vm13, %v2799_v3, -inf  ;;  %v3509_v4 = vrot.slane %v3508_v24, 2  ;;  %v3516_v26 = vrot.slane %v3515_v9, 2  ;;  %v3523_v43 = vrot.slane %v3522_v33, 2 }
 0x260   : > { %v3529_v61 = vmax.f32 %v3527_v13, %v3528_v18  ;;  %v3537_v23 = vrot.slane %v3536_v30, 2  ;;  %v3543_v20 = vmax.f32 %v3541_v59, %v3542_v40  ;;  %v3550_v48 = vmax.f32 %v3548_v28, %v3549_v62 }
 0x261   : > { %v3556_v15 = vrot.slane %v3555_v57, 4  ;;  %v3510_v56 = vmax.f32 %v3508_v24, %v3509_v4  ;;  %v3517_v45 = vmax.f32 %v3515_v9, %v3516_v26  ;;  %v3524_v12 = vmax.f32 %v3522_v33, %v3523_v43 }
 0x262   : > { %v3530_v44 = vrot.slane %v3529_v61, 2  ;;  %v3538_v11 = vmax.f32 %v3536_v30, %v3537_v23  ;;  %v3544_v52 = vrot.slane %v3543_v20, 2  ;;  %v3551_v47 = vrot.slane %v3550_v48, 2 }
 0x263   : > { %v3557_v19 = vmax.f32 %v3555_v57, %v3556_v15  ;;  %v11660_v7 = vmax.f32 %v11612_v29, %v3455_v17  ;;  %v3469_v3 = vrot.slane %v11635_v55, 1  ;;  %v3511_v18 = vrot.slane %v3510_v56, 1 }
 0x264   : > { %v11664_v13 = vmax.f32 %v3494_v36, %v3495_v58  ;;  %v3518_v40 = vrot.slane %v3517_v45, 1  ;;  %v3525_v28 = vrot.slane %v3524_v12, 1  ;;  %v3531_v4 = vmax.f32 %v3529_v61, %v3530_v44 }
 0x265   : > { %14607 = vst [vmem:[#allocation21_spill] sm:$0xff] %v11660_v7  ;;  %v11667_v43 = vmax.f32 %v11615_v37, %v3462_v32  ;;  %v11671_v15 = vmax.f32 %v11617_v49, %v3483_v51  ;;  %v3539_v9 = vrot.slane %v3538_v11, 1  ;;  %v3545_v29 = vmax.f32 %v3543_v20, %v3544_v52 }
 0x266   : > { %v3552_v17 = vmax.f32 %v3550_v48, %v3551_v47  ;;  %v3558_v42 = vrot.slane %v3557_v19, 2  ;;  %v11675_v36 = vmax.f32 %v11635_v55, %v3469_v3  ;;  %v3512_v58 = vmax.f32 %v3510_v56, %v3511_v18 }
 0x267   : > { %14608 = vst [vmem:[#allocation44_spill] sm:$0xff] %v11667_v43  ;;  %14609 = vst [vmem:[#allocation45_spill] sm:$0xff] %v11671_v15  ;;  %v14611_v61 = vcombine.low %v11595_v14, %v11584_v2  ;;  %v14612_v49 = vcombine.high %v11595_v14, %v11584_v2  ;;  %v11685_v51 = vmax.f32 %v3517_v45, %v3518_v40  ;;  %v3532_v24 = vrot.slane %v3531_v4, 1 }
 0x268   : > { %14610 = vst [vmem:[#allocation46_spill] sm:$0xff] %v11675_v36  ;;  %v3526_v59 = vmax.f32 %v3524_v12, %v3525_v28  ;;  %v2460_v48 = vcombine.low %v11632_v35, %v11599_v21  ;;  %v11691_v57 = vmax.f32 %v3538_v11, %v3539_v9  ;;  %v3546_v20 = vrot.slane %v3545_v29, 1 }
 0x269   : > { %v2450_v37 = vrot.slane %v14611_v61, %v11421_v31  ;;  %v2457_v32 = vrot.slane %v14612_v49, %v11421_v31  ;;  %14613 = vst [vmem:[#allocation47_spill] sm:$0xff] %v11685_v51  ;;  %v3553_v56 = vrot.slane %v3552_v17, 1  ;;  %v3559_v44 = vmax.f32 %v3557_v19, %v3558_v42 }
 0x26a   : > { %14614 = vst [vmem:[#allocation48_spill] sm:$0xff] %v11691_v57  ;;  %v2461_v3 = vcombine.high %v11632_v35, %v11599_v21  ;;  %v2468_v18 = vrot.slane %v2460_v48, %v11421_v31 }
 0x26b   : > { %v2458_v55 = vcombine.high %v2450_v37, %v2450_v37  ;;  %v2459_v33 = vcombine.high %v2457_v32, %v2457_v32  ;;  %v2806_v30 = vrot.slane %v2450_v37, %v11421_v31  ;;  %v2822_v62 = vrot.slane %v2457_v32, %v11421_v31 }
 0x26d   : > { %v2807_v2 = vcombine.high %v2806_v30, %v2806_v30  ;;  %v2814_v45 = vrot.slane %v2458_v55, %v11421_v31  ;;  %v2823_v14 = vcombine.high %v2822_v62, %v2822_v62  ;;  %v2830_v12 = vrot.slane %v2459_v33, %v11421_v31 }
 0x26e   : > { %v3562_v52 = vsel %vm3280_vm12, %v2806_v30, -inf  ;;  %v3590_v47 = vsel %vm3280_vm12, %v2822_v62, -inf  ;;  %v3560_v62 = vrot.slane %v3559_v44, 1 }
 0x26f   : > { %v2815_v11 = vcombine.high %v2814_v45, %v2814_v45  ;;  %v2831_v40 = vcombine.high %v2830_v12, %v2830_v12  ;;  %v3563_v28 = vrot.slane %v3562_v52, 4  ;;  %v3569_v19 = vsel %vm3288_vm13, %v2807_v2, -inf }
 0x270   : > { %v3570_v9 = vrot.slane %v3569_v19, 4  ;;  %v3576_v42 = vsel %vm3280_vm12, %v2814_v45, -inf  ;;  %v3591_v61 = vrot.slane %v3590_v47, 4  ;;  %v3597_v37 = vsel %vm3288_vm13, %v2823_v14, -inf }
 0x271   : > { %v3564_v49 = vmax.f32 %v3562_v52, %v3563_v28  ;;  %v3577_v32 = vrot.slane %v3576_v42, 4  ;;  %v3583_v55 = vsel %vm3288_vm13, %v2815_v11, -inf  ;;  %v3598_v33 = vrot.slane %v3597_v37, 4  ;;  %v2206_v28 = vpop.permute.xlu1 %2205 }
 0x272   : > { %v3571_v30 = vmax.f32 %v3569_v19, %v3570_v9  ;;  %v3584_v21 = vrot.slane %v3583_v55, 4  ;;  %v3592_v35 = vmax.f32 %v3590_v47, %v3591_v61  ;;  %v3604_v48 = vsel %vm3280_vm12, %v2830_v12, -inf }
 0x273   : > { %v3565_v50 = vrot.slane %v3564_v49, 2  ;;  %v3578_v26 = vmax.f32 %v3576_v42, %v3577_v32  ;;  %v3599_v2 = vmax.f32 %v3597_v37, %v3598_v33  ;;  %v3605_v51 = vrot.slane %v3604_v48, 4 }
 0x274   : > { %v3572_v23 = vrot.slane %v3571_v30, 2  ;;  %v11705_v57 = vmax.f32 %v3583_v55, %v3584_v21  ;;  %v3593_v45 = vrot.slane %v3592_v35, 2  ;;  %v11707_v14 = vmax.f32 %v3531_v4, %v3532_v24 }
 0x275   : > { %v11710_v52 = vsel %vm4492_vm14, %v3526_v59, %v3512_v58  ;;  %v11712_v11 = vmax.f32 %v3564_v49, %v3565_v50  ;;  %v2475_v47 = vrot.slane %v2461_v3, %v11421_v31  ;;  %v3579_v12 = vrot.slane %v3578_v26, 2  ;;  %v2204_v58 = vpop.permute.xlu0 %2203 }
 0x276   : > { %14615 = vst [vmem:[#allocation49_spill] sm:$0xff] %v11707_v14  ;;  %14616 = vst [vmem:[#allocation50_spill] sm:$0xff] %v11710_v52  ;;  %v3600_v19 = vrot.slane %v3599_v2, 2  ;;  %v11716_v9 = vsel %vm3288_vm13, %v2831_v40, -inf  ;;  %v2476_v42 = vcombine.high %v2468_v18, %v2468_v18  ;;  %v11718_v61 = vmax.f32 %v3545_v29, %v3546_v20 }
 0x277   : > { %v11720_v37 = vmax.f32 %v3552_v17, %v3553_v56  ;;  %v11722_v4 = vmax.f32 %v3559_v44, %v3560_v62  ;;  %v11724_v24 = vmax.f32 %v3571_v30, %v3572_v23  ;;  %v3586_v50 = vrot.slane %v11705_v57, 2 }
 0x278   : > { %14617 = vst [vmem:[#allocation51_spill] sm:$0xff] %v11718_v61  ;;  %v11727_v59 = vmax.f32 %v3592_v35, %v3593_v45  ;;  %v11729_v3 = vmax.f32 %v3604_v48, %v3605_v51  ;;  %v2247_v49 = vsel %vm2239_vm11, %v2204_v58, %v2206_v28  ;;  %v3567_v40 = vrot.slane %v11712_v11, 1 }
 0x279   : > { %14618 = vst [vmem:[#allocation52_spill] sm:$0xff] %v11720_v37  ;;  %14619 = vst [vmem:[#allocation53_spill] sm:$0xff] %v11722_v4  ;;  %v3612_v29 = vrot.slane %v11716_v9, 4  ;;  %v2477_v20 = vcombine.high %v2475_v47, %v2475_v47  ;;  %v2838_v17 = vrot.slane %v2468_v18, %v11421_v31  ;;  %v11735_v56 = vmax.f32 %v3578_v26, %v3579_v12 }
 0x27a   : > { %14620 = vst [vmem:[#allocation54_spill] sm:$0xff] %v11727_v59  ;;  %14621 = vst [vmem:[#allocation55_spill] sm:$0xff] %v11729_v3  ;;  %v11737_v23 = vmax.f32 %v3599_v2, %v3600_v19  ;;  %v2846_v44 = vrot.slane %v2476_v42, %v11421_v31  ;;  %v2854_v32 = vrot.slane %v2475_v47, %v11421_v31  ;;  %v3574_v51 = vrot.slane %v11724_v24, 1 }
 0x27b   : > { %14622 = vst [vmem:[#allocation56_spill] sm:$0xff] %v11735_v56  ;;  %v2839_v55 = vcombine.high %v2838_v17, %v2838_v17  ;;  %v2862_v33 = vrot.slane %v2477_v20, %v11421_v31  ;;  %v3618_v30 = vsel %vm3280_vm12, %v2838_v17, -inf }
 0x27c   : > { %14623 = vst [vmem:[#allocation57_spill] sm:$0xff] %v11737_v23  ;;  %v2847_v21 = vcombine.high %v2846_v44, %v2846_v44  ;;  %v2855_v35 = vcombine.high %v2854_v32, %v2854_v32  ;;  %v3619_v48 = vrot.slane %v3618_v30, 4  ;;  %v3632_v18 = vsel %vm3280_vm12, %v2846_v44, -inf }
 0x27d   : > { %v2863_v26 = vcombine.high %v2862_v33, %v2862_v33  ;;  %v3625_v62 = vsel %vm3288_vm13, %v2839_v55, -inf  ;;  %v3633_v2 = vrot.slane %v3632_v18, 4  ;;  %v3646_v45 = vsel %vm3280_vm12, %v2854_v32, -inf }
 0x27e   : > { %v3620_v12 = vmax.f32 %v3618_v30, %v3619_v48  ;;  %v3626_v47 = vrot.slane %v3625_v62, 4  ;;  %v3639_v19 = vsel %vm3288_vm13, %v2847_v21, -inf  ;;  %v3647_v42 = vrot.slane %v3646_v45, 4 }
 0x27f   : > { %v3634_v58 = vmax.f32 %v3632_v18, %v3633_v2  ;;  %v3640_v20 = vrot.slane %v3639_v19, 4  ;;  %v3653_v17 = vsel %vm3288_vm13, %v2855_v35, -inf  ;;  %v3660_v37 = vsel %vm3280_vm12, %v2862_v33, -inf }
 0x280   : > { %v3621_v52 = vrot.slane %v3620_v12, 2  ;;  %v3627_v23 = vmax.f32 %v3625_v62, %v3626_v47  ;;  %v3648_v44 = vmax.f32 %v3646_v45, %v3647_v42  ;;  %v3654_v4 = vrot.slane %v3653_v17, 4  ;;  %v14625_v45 = vld [vmem:[#allocation23_spill] sm:$0xff] }
 0x281   : > { %v3635_v61 = vrot.slane %v3634_v58, 2  ;;  %v3641_v55 = vmax.f32 %v3639_v19, %v3640_v20  ;;  %v3661_v14 = vrot.slane %v3660_v37, 4  ;;  %v3667_v32 = vsel %vm3288_vm13, %v2863_v26, -inf }
 0x282   : > { %v3622_v30 = vmax.f32 %v3620_v12, %v3621_v52  ;;  %v3628_v48 = vrot.slane %v3627_v23, 2  ;;  %v3649_v15 = vrot.slane %v3648_v44, 2  ;;  %v3655_v21 = vmax.f32 %v3653_v17, %v3654_v4  ;;  %v8309_v17 = vld [vmem:[%s14389_s3 + $0x458] sm:$0xff] }
 0x283   : > { %v3636_v36 = vmax.f32 %v3634_v58, %v3635_v61  ;;  %v3642_v18 = vrot.slane %v3641_v55, 2  ;;  %v3662_v2 = vmax.f32 %v3660_v37, %v3661_v14  ;;  %v3668_v7 = vrot.slane %v3667_v32, 4 }
 0x284   : > { %v3623_v35 = vrot.slane %v3622_v30, 1  ;;  %v3629_v43 = vmax.f32 %v3627_v23, %v3628_v48  ;;  %v14624_v33 = vmax.f32 %v11209_v53, 0.0  ;;  %v14626_v47 = vmax.f32 %v14625_v45, 0.0  ;;  %v2208_v23 = vpop.permute.xlu0 %2207  ;;  %v8313_v48 = vld [vmem:[%s14389_s3 + $0x478] sm:$0xff] }
 0x285   : > { %v3637_v19 = vrot.slane %v3636_v36, 1  ;;  %v11755_v20 = vmax.f32 %v3641_v55, %v3642_v18  ;;  %v3650_v26 = vmax.f32 %v3648_v44, %v3649_v15  ;;  %v3656_v52 = vrot.slane %v3655_v21, 2 }
 0x286   : > { %v2302_v62 = vmax.f32 %v14624_v33, %v2247_v49  ;;  %v2303_v42 = vmax.f32 %v14626_v47, %v2206_v28  ;;  %v11758_v12 = vmax.f32 %v11705_v57, %v3586_v50  ;;  %v3663_v37 = vrot.slane %v3662_v2, 2 }
 0x287   : > { %v11763_v4 = vmax.f32 %v11712_v11, %v3567_v40  ;;  %v11766_v53 = vmax.f32 %v11716_v9, %v3612_v29  ;;  %v3630_v28 = vrot.slane %v3629_v43, 1  ;;  %v3669_v49 = vmax.f32 %v3667_v32, %v3668_v7  ;;  %v8312_v11 = vld [vmem:[%s14389_s3 + $0x470] sm:$0xff] }
 0x288   : > { %v11769_v15 = vmax.f32 %v11724_v24, %v3574_v51  ;;  %v11772_v50 = vmax.f32 %v3622_v30, %v3623_v35  ;;  %v2478_v58 = vcombine.low %v2302_v62, %v2303_v42  ;;  %v11780_v9 = vmax.f32 %v3636_v36, %v3637_v19  ;;  %v8308_v29 = vld [vmem:[%s14389_s3 + $0x450] sm:$0xff]  ;;  %v8311_v51 = vld [vmem:[%s14389_s3 + $0x468] sm:$0xff]  ;;  %v8310_v30 = vld [vmem:[%s14389_s3 + $0x460] sm:$0xff] }
 0x289   : > { %14627 = vst [vmem:[#allocation23_spill] sm:$0xff] %v11763_v4  ;;  %v3651_v40 = vrot.slane %v3650_v26, 1  ;;  %v11783_v24 = vmax.f32 %v3655_v21, %v3656_v52  ;;  %v11791_v44 = vmax.f32 %v3662_v2, %v3663_v37  ;;  %v2479_v55 = vcombine.high %v2302_v62, %v2303_v42 }
 0x28a   : > { %v2486_v32 = vrot.slane %v2478_v58, %v11421_v31  ;;  %v2248_v36 = vsel %vm2239_vm11, %v2208_v23, %v11619_v27  ;;  %v11802_v21 = vmax.f32 %v3629_v43, %v3630_v28  ;;  %v3670_v18 = vrot.slane %v3669_v49, 2 }
 0x28b   : > { %v14629_v2 = vmax.f32 %v11217_v16, 0.0  ;;  %v8887_v33 = vpack.c.bf16 %v8312_v11, %v8309_v17  ;;  %v2493_v62 = vrot.slane %v2479_v55, %v11421_v31  ;;  %v8889_v47 = vpack.c.bf16 %v8311_v51, %v8308_v29 }
 0x28c   : > { %14628 = vst [vmem:[#allocation58_spill] sm:$0xff] %v11802_v21  ;;  %v2494_v45 = vcombine.high %v2486_v32, %v2486_v32  ;;  %v2870_v27 = vrot.slane %v2486_v32, %v11421_v31  ;;  %v11808_v42 = vmax.f32 %v3650_v26, %v3651_v40  ;;  %v3658_v19 = vrot.slane %v11783_v24, 1  ;;  %v2212_v21 = vpop.permute.xlu0 %2211 }
 0x28d   : > { %v2304_v35 = vmax.f32 %v14629_v2, %v2248_v36  ;;  %8888 = vmatprep.subr.bf16.mxu1 %v8887_v33  ;;  %v8925_v43 = vpack.c.bf16 %v8313_v48, %v8310_v30  ;;  %v2495_v37 = vcombine.high %v2493_v62, %v2493_v62  ;;  %v2886_v23 = vrot.slane %v2493_v62, %v11421_v31 }
 0x28e   : > { %14630 = vst [vmem:[#allocation59_spill] sm:$0xff] %v11808_v42  ;;  %v2871_v28 = vcombine.high %v2870_v27, %v2870_v27  ;;  %v2878_v16 = vrot.slane %v2494_v45, %v11421_v31  ;;  %8890 = vmatpush1.bf16.msra.mxu1 %v8889_v47  ;;  %v3665_v58 = vrot.slane %v11791_v44, 1  ;;  %v3671_v17 = vmax.f32 %v3669_v49, %v3670_v18 }
 0x28f   : > { %v2496_v52 = vcombine.low %v2304_v35, %v11642_v41  ;;  %v3674_v11 = vsel %vm3280_vm12, %v2870_v27, -inf  ;;  %v2497_v26 = vcombine.high %v2304_v35, %v11642_v41  ;;  %8926 = vmatpush1.bf16.msra.mxu0 %v8925_v43  ;;  %v2887_v29 = vcombine.high %v2886_v23, %v2886_v23 }
 0x290   : > { %v2879_v40 = vcombine.high %v2878_v16, %v2878_v16  ;;  %v2894_v51 = vrot.slane %v2495_v37, %v11421_v31  ;;  %v3675_v55 = vrot.slane %v3674_v11, 4  ;;  %8975 = vmatprep.subr.bf16.mxu0 %v14492_v10  ;;  %v3681_v32 = vsel %vm3288_vm13, %v2871_v28, -inf }
 0x291   : > { %v3688_v36 = vsel %vm3280_vm12, %v2878_v16, -inf  ;;  %v3702_v30 = vsel %vm3280_vm12, %v2886_v23, -inf  ;;  %v2504_v49 = vrot.slane %v2496_v52, %v11421_v31  ;;  %v3682_v2 = vrot.slane %v3681_v32, 4 }
 0x292   : > { %v2895_v48 = vcombine.high %v2894_v51, %v2894_v51  ;;  %v3676_v18 = vmax.f32 %v3674_v11, %v3675_v55  ;;  %v3689_v41 = vrot.slane %v3688_v36, 4  ;;  %v3695_v35 = vsel %vm3288_vm13, %v2879_v40, -inf }
 0x293   : > { %v3703_v33 = vrot.slane %v3702_v30, 4  ;;  %v3709_v62 = vsel %vm3288_vm13, %v2887_v29, -inf  ;;  %v3716_v45 = vsel %vm3280_vm12, %v2894_v51, -inf  ;;  %v3683_v47 = vmax.f32 %v3681_v32, %v3682_v2 }
 0x294   : > { %v3677_v27 = vrot.slane %v3676_v18, 2  ;;  %v3690_v43 = vmax.f32 %v3688_v36, %v3689_v41  ;;  %v3696_v37 = vrot.slane %v3695_v35, 4  ;;  %v3710_v16 = vrot.slane %v3709_v62, 4 }
 0x295   : > { %v3704_v28 = vmax.f32 %v3702_v30, %v3703_v33  ;;  %v3717_v23 = vrot.slane %v3716_v45, 4  ;;  %v3723_v52 = vsel %vm3288_vm13, %v2895_v48, -inf  ;;  %v3684_v11 = vrot.slane %v3683_v47, 2  ;;  %v11832_v30 = vpop.permute.xlu1 %2213 }
 0x296   : > { %v3678_v61 = vmax.f32 %v3676_v18, %v3677_v27  ;;  %v3691_v55 = vrot.slane %v3690_v43, 2  ;;  %v3697_v14 = vmax.f32 %v3695_v35, %v3696_v37  ;;  %v3672_v57 = vrot.slane %v3671_v17, 1 }
 0x297   : > { %v3705_v40 = vrot.slane %v3704_v28, 2  ;;  %v3711_v7 = vmax.f32 %v3709_v62, %v3710_v16  ;;  %v11827_v42 = vmax.f32 %v3716_v45, %v3717_v23  ;;  %v11829_v51 = vmax.f32 %v3683_v47, %v3684_v11 }
 0x298   : > { %v3679_v29 = vrot.slane %v3678_v61, 1  ;;  %v3724_v32 = vrot.slane %v3723_v52, 4  ;;  %v2511_v36 = vrot.slane %v2497_v26, %v11421_v31  ;;  %v14631_v2 = vrot.slane %v11755_v20, 1 }
 0x299   : > { %v11839_v18 = vmax.f32 %v3690_v43, %v3691_v55  ;;  %v3698_v41 = vrot.slane %v3697_v14, 2  ;;  %v2512_v35 = vcombine.high %v2504_v49, %v2504_v49  ;;  %v11842_v33 = vmax.f32 %v11783_v24, %v3658_v19 }
 0x29a   : > { %v11837_v48 = vmax.f32 %v11755_v20, %v14631_v2  ;;  %v11847_v62 = vsel %vm4492_vm14, %v11780_v9, %v11772_v50  ;;  %v11849_v26 = vmax.f32 %v3704_v28, %v3705_v40  ;;  %v3712_v45 = vrot.slane %v3711_v7, 2 }
 0x29b   : > { %14633 = vst [vmem:[#allocation61_spill] sm:$0xff] %v11842_v33  ;;  %14634 = vst [vmem:[#allocation62_spill] sm:$0xff] %v11847_v62  ;;  %v11852_v27 = vmax.f32 %v11791_v44, %v3665_v58  ;;  %v11854_v20 = vmax.f32 %v3671_v17, %v3672_v57  ;;  %v3719_v47 = vrot.slane %v11827_v42, 2  ;;  %v14637_v43 = vmax.f32 %v11179_v0, 0.0 }
 0x29c   : > { %14632 = vst [vmem:[#allocation60_spill] sm:$0xff] %v11837_v48  ;;  %v11862_v19 = vmax.f32 %v3678_v61, %v3679_v29  ;;  %v3686_v50 = vrot.slane %v11829_v51, 1  ;;  %v11865_v9 = vmax.f32 %v3723_v52, %v3724_v32  ;;  %v2513_v37 = vcombine.high %v2511_v36, %v2511_v36 }
 0x29d   : > { %14635 = vst [vmem:[#allocation63_spill] sm:$0xff] %v11852_v27  ;;  %14636 = vst [vmem:[#allocation64_spill] sm:$0xff] %v11854_v20  ;;  %v11860_v24 = vmax.f32 %v14637_v43, %v11832_v30  ;;  %v3693_v28 = vrot.slane %v11839_v18, 1  ;;  %v11868_v44 = vmax.f32 %v3697_v14, %v3698_v41  ;;  %v2902_v57 = vrot.slane %v2504_v49, %v11421_v31 }
 0x29e   : > { %14638 = vst [vmem:[#allocation65_spill] sm:$0xff] %v11862_v19  ;;  %v2910_v58 = vrot.slane %v2512_v35, %v11421_v31  ;;  %v3707_v17 = vrot.slane %v11849_v26, 1  ;;  %v11873_v0 = vmax.f32 %v3711_v7, %v3712_v45  ;;  %v2918_v61 = vrot.slane %v2511_v36, %v11421_v31 }
 0x29f   : > { %v2926_v16 = vrot.slane %v2513_v37, %v11421_v31  ;;  %v2903_v23 = vcombine.high %v2902_v57, %v2902_v57  ;;  %v3730_v11 = vsel %vm3280_vm12, %v2902_v57, -inf }
 0x2a0   : > { %v2911_v52 = vcombine.high %v2910_v58, %v2910_v58  ;;  %v3744_v55 = vsel %vm3280_vm12, %v2910_v58, -inf  ;;  %v2919_v14 = vcombine.high %v2918_v61, %v2918_v61  ;;  %v3731_v29 = vrot.slane %v3730_v11, 4 }
 0x2a1   : > { %v2927_v40 = vcombine.high %v2926_v16, %v2926_v16  ;;  %v3745_v49 = vrot.slane %v3744_v55, 4  ;;  %v3737_v32 = vsel %vm3288_vm13, %v2903_v23, -inf  ;;  %v3758_v7 = vsel %vm3280_vm12, %v2918_v61, -inf }
 0x2a2   : > { %v3751_v2 = vsel %vm3288_vm13, %v2911_v52, -inf  ;;  %v3772_v36 = vsel %vm3280_vm12, %v2926_v16, -inf  ;;  %v3732_v41 = vmax.f32 %v3730_v11, %v3731_v29  ;;  %v3738_v35 = vrot.slane %v3737_v32, 4 }
 0x2a3   : > { %v3746_v45 = vmax.f32 %v3744_v55, %v3745_v49  ;;  %v3752_v43 = vrot.slane %v3751_v2, 4  ;;  %v3759_v37 = vrot.slane %v3758_v7, 4  ;;  %v3765_v57 = vsel %vm3288_vm13, %v2919_v14, -inf }
 0x2a4   : > { %v3773_v58 = vrot.slane %v3772_v36, 4  ;;  %v3779_v19 = vsel %vm3288_vm13, %v2927_v40, -inf  ;;  %v3733_v27 = vrot.slane %v3732_v41, 2  ;;  %v3739_v62 = vmax.f32 %v3737_v32, %v3738_v35 }
 0x2a5   : > { %v3747_v20 = vrot.slane %v3746_v45, 2  ;;  %v3753_v23 = vmax.f32 %v3751_v2, %v3752_v43  ;;  %v3760_v33 = vmax.f32 %v3758_v7, %v3759_v37  ;;  %v3766_v52 = vrot.slane %v3765_v57, 4 }
 0x2a6   : > { %v3774_v48 = vmax.f32 %v3772_v36, %v3773_v58  ;;  %v3780_v61 = vrot.slane %v3779_v19, 4  ;;  %v3734_v16 = vmax.f32 %v3732_v41, %v3733_v27  ;;  %v3740_v11 = vrot.slane %v3739_v62, 2 }
 0x2a7   : > { %v3748_v29 = vmax.f32 %v3746_v45, %v3747_v20  ;;  %v3754_v55 = vrot.slane %v3753_v23, 2  ;;  %v3761_v49 = vrot.slane %v3760_v33, 2  ;;  %v3767_v4 = vmax.f32 %v3765_v57, %v3766_v52 }
 0x2a8   : > { %v3775_v59 = vrot.slane %v3774_v48, 2  ;;  %v3781_v14 = vmax.f32 %v3779_v19, %v3780_v61  ;;  %v3741_v3 = vmax.f32 %v3739_v62, %v3740_v11  ;;  %v2249_v32 = vsel %vm2239_vm11, %v2212_v21, %v11832_v30 }
 0x2a9   : > { %v3749_v56 = vrot.slane %v3748_v29, 1  ;;  %v3755_v40 = vmax.f32 %v3753_v23, %v3754_v55  ;;  %v3762_v2 = vmax.f32 %v3760_v33, %v3761_v49  ;;  %v3768_v7 = vrot.slane %v3767_v4, 2 }
 0x2aa   : > { %v3776_v35 = vmax.f32 %v3774_v48, %v3775_v59  ;;  %v3782_v36 = vrot.slane %v3781_v14, 2  ;;  %v11888_v43 = vmax.f32 %v11829_v51, %v3686_v50  ;;  %v11891_v27 = vmax.f32 %v11827_v42, %v3719_v47 }
 0x2ab   : > { %v3735_v41 = vrot.slane %v3734_v16, 1  ;;  %v11895_v62 = vmax.f32 %v11839_v18, %v3693_v28  ;;  %v3769_v45 = vmax.f32 %v3767_v4, %v3768_v7  ;;  %v11899_v30 = vmax.f32 %v11849_v26, %v3707_v17 }
 0x2ac   : > { %v3783_v21 = vmax.f32 %v3781_v14, %v3782_v36  ;;  %v3742_v59 = vrot.slane %v3741_v3, 1  ;;  %v3756_v48 = vrot.slane %v3755_v40, 1  ;;  %v14639_v51 = vmax.f32 %v11220_v34, 0.0 }
 0x2ad   : > { %v3750_v47 = vmax.f32 %v3748_v29, %v3749_v56  ;;  %v3763_v50 = vrot.slane %v3762_v2, 1  ;;  %v3777_v37 = vrot.slane %v3776_v35, 1  ;;  %v3736_v57 = vmax.f32 %v3734_v16, %v3735_v41 }
 0x2ae   : > { %v2306_v33 = vmax.f32 %v14639_v51, %v2249_v32  ;;  %v3364_v4 = vrot.slane %v11545_v46, 1  ;;  %v3770_v58 = vrot.slane %v3769_v45, 1  ;;  %v3784_v26 = vrot.slane %v3783_v21, 1 }
 0x2af   : > { %v3378_v17 = vrot.slane %v11556_v6, 1  ;;  %v3390_v23 = vrot.slane %v11527_v22, 2  ;;  %v11909_v34 = vmax.f32 %v3741_v3, %v3742_v59  ;;  %v11911_v52 = vmax.f32 %v3755_v40, %v3756_v48 }
 0x2b0   : > { %v2514_v18 = vcombine.low %v2306_v33, %v11860_v24  ;;  %v2515_v28 = vcombine.high %v2306_v33, %v11860_v24  ;;  %v11915_v16 = vmax.f32 %v3762_v2, %v3763_v50  ;;  %v11917_v11 = vmax.f32 %v3776_v35, %v3777_v37 }
 0x2b1   : > { %v11920_v24 = vsel %vm4492_vm14, %v3750_v47, %v3736_v57  ;;  %v3391_v29 = vmax.f32 %v11527_v22, %v3390_v23  ;;  %v11925_v40 = vmax.f32 %v3769_v45, %v3770_v58  ;;  %v11927_v32 = vmax.f32 %v3783_v21, %v3784_v26 }
 0x2b2   : > { %v2522_v56 = vrot.slane %v2514_v18, %v11421_v31  ;;  %v2529_v61 = vrot.slane %v2515_v28, %v11421_v31  ;;  %14640 = vst [vmem:[#allocation66_spill] sm:$0xff] %v11915_v16  ;;  %14641 = vst [vmem:[#allocation67_spill] sm:$0xff] %v11917_v11  ;;  %v11930_v2 = vmax.f32 %v11545_v46, %v3364_v4 }
 0x2b3   : > { %14642 = vst [vmem:[#allocation68_spill] sm:$0xff] %v11920_v24  ;;  %v11933_v7 = vmax.f32 %v11556_v6, %v3378_v17  ;;  %v3392_v48 = vrot.slane %v3391_v29, 1  ;;  %v4506_v46 = vsel %vm4492_vm14, %v11505_v39, %v11474_v38 }
 0x2b4   : > { %v2530_v55 = vcombine.high %v2522_v56, %v2522_v56  ;;  %v2531_v49 = vcombine.high %v2529_v61, %v2529_v61  ;;  %v2934_v3 = vrot.slane %v2522_v56, %v11421_v31  ;;  %v2950_v14 = vrot.slane %v2529_v61, %v11421_v31 }
 0x2b6   : > { %v2935_v35 = vcombine.high %v2934_v3, %v2934_v3  ;;  %v2942_v36 = vrot.slane %v2530_v55, %v11421_v31  ;;  %v2951_v22 = vcombine.high %v2950_v14, %v2950_v14  ;;  %v2958_v41 = vrot.slane %v2531_v49, %v11421_v31 }
 0x2b7   : > { %v3786_v59 = vsel %vm3280_vm12, %v2934_v3, -inf  ;;  %v3814_v45 = vsel %vm3280_vm12, %v2950_v14, -inf }
 0x2b8   : > { %v2943_v21 = vcombine.high %v2942_v36, %v2942_v36  ;;  %v2959_v51 = vcombine.high %v2958_v41, %v2958_v41  ;;  %v3787_v6 = vrot.slane %v3786_v59, 4  ;;  %v3793_v33 = vsel %vm3288_vm13, %v2935_v35, -inf }
 0x2b9   : > { %v3794_v47 = vrot.slane %v3793_v33, 4  ;;  %v3800_v50 = vsel %vm3280_vm12, %v2942_v36, -inf  ;;  %v3815_v37 = vrot.slane %v3814_v45, 4  ;;  %v3821_v57 = vsel %vm3288_vm13, %v2951_v22, -inf }
 0x2ba   : > { %v3788_v18 = vmax.f32 %v3786_v59, %v3787_v6  ;;  %v3801_v28 = vrot.slane %v3800_v50, 4  ;;  %v3807_v4 = vsel %vm3288_vm13, %v2943_v21, -inf  ;;  %v3822_v58 = vrot.slane %v3821_v57, 4 }
 0x2bb   : > { %v3795_v26 = vmax.f32 %v3793_v33, %v3794_v47  ;;  %v3808_v38 = vrot.slane %v3807_v4, 4  ;;  %v3816_v39 = vmax.f32 %v3814_v45, %v3815_v37  ;;  %v3828_v17 = vsel %vm3280_vm12, %v2958_v41, -inf }
 0x2bc   : > { %v3789_v23 = vrot.slane %v3788_v18, 2  ;;  %v3802_v56 = vmax.f32 %v3800_v50, %v3801_v28  ;;  %v3823_v61 = vmax.f32 %v3821_v57, %v3822_v58  ;;  %v3829_v55 = vrot.slane %v3828_v17, 4  ;;  %v2218_v28 = vpop.permute.xlu1 %2217 }
 0x2bd   : > { %v3796_v49 = vrot.slane %v3795_v26, 2  ;;  %v3809_v3 = vmax.f32 %v3807_v4, %v3808_v38  ;;  %v3817_v14 = vrot.slane %v3816_v39, 2  ;;  %v3835_v35 = vsel %vm3288_vm13, %v2959_v51, -inf  ;;  %v2216_v4 = vpop.permute.xlu0 %2215 }
 0x2be   : > { %v3790_v36 = vmax.f32 %v3788_v18, %v3789_v23  ;;  %v3803_v22 = vrot.slane %v3802_v56, 2  ;;  %v3824_v59 = vrot.slane %v3823_v61, 2  ;;  %v11948_v21 = vmax.f32 %v3828_v17, %v3829_v55  ;;  %v14649_v55 = vld [vmem:[#allocation10_spill] sm:$0xff] }
 0x2bf   : > { %v11950_v6 = vmax.f32 %v3795_v26, %v3796_v49  ;;  %v4507_v41 = vsel %vm4494_vm15, %v11498_v54, %v4506_v46  ;;  %v3810_v45 = vrot.slane %v3809_v3, 2  ;;  %v3393_v33 = vmax.f32 %v3391_v29, %v3392_v48  ;;  %v14644_v48 = vld [vmem:[#allocation38_spill] sm:$0xff] }
 0x2c0   : > { %v14643_v47 = vrot.slane %v11517_v8, 1  ;;  %v3791_v51 = vrot.slane %v3790_v36, 1  ;;  %v11957_v37 = vmax.f32 %v3802_v56, %v3803_v22  ;;  %v11959_v57 = vmax.f32 %v3816_v39, %v3817_v14  ;;  %v14646_v39 = vld [vmem:[#allocation35_spill] sm:$0xff]  ;;  %v14648_v56 = vld [vmem:[#allocation37_spill] sm:$0xff]  ;;  %v14650_v14 = vld [vmem:[#allocation36_spill] sm:$0xff] }
 0x2c1   : > { %v3836_v18 = vrot.slane %v3835_v35, 4  ;;  %v11962_v26 = vmax.f32 %v3823_v61, %v3824_v59  ;;  %v4508_v29 = vsel %vm4496_vm0, %v11512_v60, %v4507_v41  ;;  %v14645_v46 = vrot.slane %v14644_v48, 1  ;;  %v14651_v22 = vld [vmem:[#allocation11_spill] sm:$0xff] }
 0x2c2   : > { %v3358_v50 = vmax.f32 %v11517_v8, %v14643_v47  ;;  %v4509_v8 = vsel %vm4498_vm2, %v11551_v1, %v4508_v29  ;;  %v14647_v17 = vrot.slane %v14646_v39, 2  ;;  %v4495_v61 = vsel %vm4494_vm15, %v14649_v55, %v14648_v56 }
 0x2c3   : > { %v3372_v38 = vmax.f32 %v14644_v48, %v14645_v46  ;;  %v4510_v49 = vsel %vm4500_vm3, %v11930_v2, %v4509_v8  ;;  %v4497_v60 = vsel %vm4496_vm0, %v14650_v14, %v4495_v61  ;;  %v14652_v1 = vmax.f32 %v14651_v22, 0.0  ;;  %v14653_v48 = vld [vmem:[#allocation39_spill] sm:$0xff]  ;;  %v14660_v14 = vld [vmem:[#allocation40_spill] sm:$0xff] }
 0x2c4   : > { %v3384_v23 = vmax.f32 %v14646_v39, %v14647_v17  ;;  %v2250_v41 = vsel %vm2239_vm11, %v2216_v4, %v2218_v28  ;;  %v4511_v47 = vsel %vm4502_vm4, %v11933_v7, %v4510_v49  ;;  %v4499_v46 = vsel %vm4498_vm2, %v14653_v48, %v4497_v60  ;;  %v14654_v39 = vld [vmem:[#allocation31_spill] sm:$0xff]  ;;  %v14659_v49 = vld [vmem:[#allocation17_spill] sm:$0xff] }
 0x2c5   : > { %v2309_v59 = vmax.f32 %v14652_v1, %v2218_v28  ;;  %v14655_v17 = vmax.f32 %v14654_v39, 0.0  ;;  %v11991_v55 = vmax.f32 %v3809_v3, %v3810_v45  ;;  %v11993_v2 = vmax.f32 %v3835_v35, %v3836_v18  ;;  %v14663_v1 = vld [vmem:[#allocation42_spill] sm:$0xff]  ;;  %v14666_v39 = vld [vmem:[#allocation44_spill] sm:$0xff] }
 0x2c6   : > { %v3385_v29 = vrot.slane %v3384_v23, 1  ;;  %v11996_v8 = vsel %vm4504_vm5, %v3393_v33, %v4511_v47  ;;  %v4501_v61 = vsel %vm4500_vm3, %v3358_v50, %v4499_v46  ;;  %v14657_v35 = vrot.slane %v11645_v5, 1 }
 0x2c7   : > { %v2308_v56 = vmax.f32 %v14655_v17, %v2250_v41  ;;  %14656 = vst [vmem:[#allocation38_spill] sm:$0xff] %v11996_v8  ;;  %8314 = vmatprep.mubr.msk.f32.mxu1 %vm2239_vm11, %v11996_v8  ;;  %8322 = vmatprep.mubr.msk.f32.mxu0 %vm2239_vm11, %v11996_v8  ;;  %v4503_v4 = vsel %vm4502_vm4, %v3372_v38, %v4501_v61  ;;  %v14658_v18 = vrot.slane %v11648_v63, 2  ;;  %v14664_v41 = vld [vmem:[#allocation19_spill] sm:$0xff]  ;;  %v14665_v48 = vrot.slane %v11637_v25, 1 }
 0x2c8   : > { %v3386_v7 = vmax.f32 %v3384_v23, %v3385_v29  ;;  %v3477_v33 = vmax.f32 %v11645_v5, %v14657_v35  ;;  %v4520_v60 = vsel %vm4492_vm14, %v14660_v14, %v14659_v49  ;;  %v12016_v22 = vmax.f32 %v3790_v36, %v3791_v51 }
 0x2c9   : > { %v2532_v3 = vcombine.low %v2308_v56, %v2309_v59  ;;  %v2533_v45 = vcombine.high %v2308_v56, %v2309_v59  ;;  %v12011_v50 = vmax.f32 %v11648_v63, %v14658_v18  ;;  %v4521_v59 = vsel %vm4494_vm15, %v14663_v1, %v4520_v60 }
 0x2ca   : > { %14661 = vst [vmem:[#allocation35_spill] sm:$0xff] %v12016_v22  ;;  %v12019_v23 = vsel %vm4504_vm5, %v3386_v7, %v4503_v4  ;;  %v4522_v36 = vsel %vm4496_vm0, %v14664_v41, %v4521_v59  ;;  %v3491_v46 = vmax.f32 %v11637_v25, %v14665_v48 }
 0x2cb   : > { %14662 = vst [vmem:[#allocation37_spill] sm:$0xff] %v12019_v23  ;;  %v2540_v38 = vrot.slane %v2532_v3, %v11421_v31  ;;  %4700 = vmatmul.mubr.f32.vlgmr.msra.gmra.mrb[64].mxu1 %v12019_v23  ;;  %4813 = vmatmul.mubr.f32.vlgmr.msra.gmra.mrb[80].mxu0 %v12019_v23  ;;  %v2547_v63 = vrot.slane %v2533_v45, %v11421_v31  ;;  %v3504_v7 = vrot.slane %v12011_v50, 1 }
 0x2cc   : > { %v4523_v17 = vsel %vm4498_vm2, %v14666_v39, %v4522_v36 }
 0x2cd   : > { %v2548_v47 = vcombine.high %v2540_v38, %v2540_v38  ;;  %v2966_v29 = vrot.slane %v2540_v38, %v11421_v31  ;;  %v2549_v56 = vcombine.high %v2547_v63, %v2547_v63  ;;  %v2982_v61 = vrot.slane %v2547_v63, %v11421_v31 }
 0x2ce   : > { %v4524_v4 = vsel %vm4500_vm3, %v3477_v33, %v4523_v17 }
 0x2cf   : > { %v2967_v3 = vcombine.high %v2966_v29, %v2966_v29  ;;  %v2974_v45 = vrot.slane %v2548_v47, %v11421_v31  ;;  %v3842_v35 = vsel %vm3280_vm12, %v2966_v29, -inf  ;;  %v4525_v18 = vsel %vm4502_vm4, %v3491_v46, %v4524_v4 }
 0x2d0   : > { %v2983_v49 = vcombine.high %v2982_v61, %v2982_v61  ;;  %v2990_v25 = vrot.slane %v2549_v56, %v11421_v31  ;;  %v3843_v14 = vrot.slane %v3842_v35, 4  ;;  %v3870_v60 = vsel %vm3280_vm12, %v2982_v61, -inf }
 0x2d1   : > { %v2975_v38 = vcombine.high %v2974_v45, %v2974_v45  ;;  %v3849_v1 = vsel %vm3288_vm13, %v2967_v3, -inf  ;;  %v3856_v59 = vsel %vm3280_vm12, %v2974_v45, -inf  ;;  %v3871_v63 = vrot.slane %v3870_v60, 4 }
 0x2d2   : > { %v2991_v33 = vcombine.high %v2990_v25, %v2990_v25  ;;  %v3844_v41 = vmax.f32 %v3842_v35, %v3843_v14  ;;  %v3850_v36 = vrot.slane %v3849_v1, 4  ;;  %v3857_v47 = vrot.slane %v3856_v59, 4 }
 0x2d3   : > { %v3863_v29 = vsel %vm3288_vm13, %v2975_v38, -inf  ;;  %v3872_v48 = vmax.f32 %v3870_v60, %v3871_v63  ;;  %v3877_v46 = vsel %vm3288_vm13, %v2983_v49, -inf  ;;  %v3884_v39 = vsel %vm3280_vm12, %v2990_v25, -inf  ;;  %v2226_v49 = vpop.permute.xlu1 %2225 }
 0x2d4   : > { %v3845_v17 = vrot.slane %v3844_v41, 2  ;;  %v3851_v56 = vmax.f32 %v3849_v1, %v3850_v36  ;;  %v3858_v61 = vmax.f32 %v3856_v59, %v3857_v47  ;;  %v3864_v4 = vrot.slane %v3863_v29, 4  ;;  %v14667_v1 = vld [vmem:[#allocation41_spill] sm:$0xff] }
 0x2d5   : > { %v3873_v54 = vrot.slane %v3872_v48, 2  ;;  %v3878_v3 = vrot.slane %v3877_v46, 4  ;;  %v3885_v28 = vrot.slane %v3884_v39, 4  ;;  %v3891_v45 = vsel %vm3288_vm13, %v2991_v33, -inf  ;;  %v14668_v59 = vld [vmem:[#allocation13_spill] sm:$0xff] }
 0x2d6   : > { %v3846_v5 = vmax.f32 %v3844_v41, %v3845_v17  ;;  %v3852_v35 = vrot.slane %v3851_v56, 2  ;;  %v3859_v14 = vrot.slane %v3858_v61, 2  ;;  %v3865_v42 = vmax.f32 %v3863_v29, %v3864_v4  ;;  %v2220_v41 = vpop.permute.xlu0 %2219  ;;  %v4854_v4 = vld [vmem:[%s14389_s3 + $0x8] sm:$0xff] }
 0x2d7   : > { %v3874_v20 = vmax.f32 %v3872_v48, %v3873_v54  ;;  %v3879_v38 = vmax.f32 %v3877_v46, %v3878_v3  ;;  %v3886_v60 = vmax.f32 %v3884_v39, %v3885_v28  ;;  %v3892_v63 = vrot.slane %v3891_v45, 4  ;;  %v4857_v3 = vld [vmem:[%s14389_s3 + $0x20] sm:$0xff] }
 0x2d8   : > { %v3853_v19 = vmax.f32 %v3851_v56, %v3852_v35  ;;  %v3860_v25 = vmax.f32 %v3858_v61, %v3859_v14  ;;  %v3866_v51 = vrot.slane %v3865_v42, 2  ;;  %v4514_v36 = vsel %vm4494_vm15, %v14668_v59, %v14667_v1  ;;  %v14675_v1 = vld [vmem:[#allocation21_spill] sm:$0xff]  ;;  %v2222_v59 = vpop.permute.xlu1 %2221 }
 0x2d9   : > { %v3847_v47 = vrot.slane %v3846_v5, 1  ;;  %v3880_v58 = vrot.slane %v3879_v38, 2  ;;  %v3887_v23 = vrot.slane %v3886_v60, 2  ;;  %v3893_v33 = vmax.f32 %v3891_v45, %v3892_v63  ;;  %v14670_v45 = vld [vmem:[#allocation14_spill] sm:$0xff] }
 0x2da   : > { %v14669_v17 = vrot.slane %v11950_v6, 1  ;;  %v3867_v28 = vmax.f32 %v3865_v42, %v3866_v51  ;;  %v3875_v29 = vrot.slane %v3874_v20, 1  ;;  %v3505_v48 = vmax.f32 %v12011_v50, %v3504_v7  ;;  %v14674_v51 = vld [vmem:[#allocation43_spill] sm:$0xff] }
 0x2db   : > { %v3854_v46 = vrot.slane %v3853_v19, 1  ;;  %v3861_v39 = vrot.slane %v3860_v25, 1  ;;  %v3881_v56 = vmax.f32 %v3879_v38, %v3880_v58  ;;  %v3894_v61 = vrot.slane %v3893_v33, 2 }
 0x2dc   : > { %v12057_v54 = vmax.f32 %v11950_v6, %v14669_v17  ;;  %v14671_v35 = vmax.f32 %v14670_v45, 0.0  ;;  %v12071_v42 = vsel %vm4504_vm5, %v3505_v48, %v4525_v18  ;;  %v14673_v50 = vrot.slane %v11664_v13, 1  ;;  %v4855_v48 = vld [vmem:[%s14389_s3 + $0x10] sm:$0xff]  ;;  %v4858_v45 = vld [vmem:[%s14389_s3 + $0x28] sm:$0xff] }
 0x2dd   : > { %14672 = vst [vmem:[#allocation10_spill] sm:$0xff] %v12071_v42  ;;  %v4515_v7 = vsel %vm4496_vm0, %v14674_v51, %v4514_v36  ;;  %v3848_v14 = vmax.f32 %v3846_v5, %v3847_v47  ;;  %v3868_v38 = vrot.slane %v3867_v28, 1  ;;  %v3888_v63 = vmax.f32 %v3886_v60, %v3887_v23  ;;  %8315 = vmatprep.mubr.msk.f32.mxu1 %vm2239_vm11, %v12071_v42  ;;  %v4856_v5 = vld [vmem:[%s14389_s3 + $0x18] sm:$0xff] }
 0x2de   : > { %v12068_v6 = vmax.f32 %v14671_v35, %v2226_v49  ;;  %v3498_v58 = vmax.f32 %v11664_v13, %v14673_v50  ;;  %8323 = vmatprep.mubr.msk.f32.mxu0 %vm2239_vm11, %v12071_v42  ;;  %v4516_v18 = vsel %vm4498_vm2, %v14675_v1, %v4515_v7  ;;  %v4853_v13 = vld [vmem:[%s14389_s3] sm:$0xff]  ;;  %v12090_v36 = vmax.f32 %v3874_v20, %v3875_v29  ;;  %v14677_v60 = vld [vmem:[#allocation46_spill] sm:$0xff]  ;;  %v14679_v7 = vld [vmem:[#allocation45_spill] sm:$0xff] }
 0x2df   : > { %v3895_v23 = vmax.f32 %v3893_v33, %v3894_v61  ;;  %v4517_v47 = vsel %vm4500_vm3, %v14677_v60, %v4516_v18  ;;  %v8927_v17 = vpack.c.bf16 %v4857_v3, %v4854_v4  ;;  %v12100_v35 = vmax.f32 %v3853_v19, %v3854_v46  ;;  %v2224_v33 = vpop.permute.xlu0 %2223  ;;  %v14681_v4 = vld [vmem:[#allocation26_spill] sm:$0xff] }
 0x2e0   : > { %14676 = vst [vmem:[#allocation36_spill] sm:$0xff] %v12090_v36  ;;  %v3862_v50 = vmax.f32 %v3860_v25, %v3861_v39  ;;  %v3882_v51 = vrot.slane %v3881_v56, 1  ;;  %v4518_v20 = vsel %vm4502_vm4, %v14679_v7, %v4517_v47  ;;  %v2251_v61 = vsel %vm2239_vm11, %v2220_v41, %v2222_v59  ;;  %v14684_v25 = vld [vmem:[#allocation32_spill] sm:$0xff]  ;;  %v4863_v41 = vld [vmem:[%s14389_s3 + $0x50] sm:$0xff] }
 0x2e1   : > { %14678 = vst [vmem:[#allocation11_spill] sm:$0xff] %v12100_v35  ;;  %v12105_v29 = vsel %vm4504_vm5, %v3498_v58, %v4518_v20  ;;  %8928 = vmatprep.subr.bf16.mxu1 %v8927_v17  ;;  %v14682_v3 = vmax.f32 %v14681_v4, 0.0  ;;  %v8929_v18 = vpack.c.bf16 %v4856_v5, %v4853_v13  ;;  %v12110_v60 = vmax.f32 %v3867_v28, %v3868_v38  ;;  %v4860_v58 = vld [vmem:[%s14389_s3 + $0x38] sm:$0xff]  ;;  %v14686_v13 = vld [vmem:[#allocation47_spill] sm:$0xff]  ;;  %v14687_v5 = vld [vmem:[#allocation49_spill] sm:$0xff] }
 0x2e2   : > { %14680 = vst [vmem:[#allocation39_spill] sm:$0xff] %v12105_v29  ;;  %v3889_v19 = vrot.slane %v3888_v63, 1  ;;  %4706 = vmatmul.mubr.f32.gmra.mrb[66].mxu1 %v12105_v29  ;;  %4818 = vmatmul.mubr.f32.gmra.mrb[82].mxu0 %v12105_v29  ;;  %v14685_v46 = vmax.f32 %v14684_v25, 0.0  ;;  %v8976_v47 = vpack.c.bf16 %v4858_v45, %v4855_v48  ;;  %v2252_v28 = vsel %vm2239_vm11, %v2224_v33, %v2226_v49  ;;  %v14689_v20 = vld [vmem:[#allocation33_spill] sm:$0xff]  ;;  %v14691_v49 = vld [vmem:[#allocation51_spill] sm:$0xff] }
 0x2e3   : > { %v2311_v1 = vmax.f32 %v14682_v3, %v2222_v59  ;;  %14683 = vst [vmem:[#allocation31_spill] sm:$0xff] %v12110_v60  ;;  %v3896_v59 = vrot.slane %v3895_v23, 1  ;;  %8930 = vmatpush1.bf16.msra.mxu1 %v8929_v18  ;;  %v3614_v38 = vrot.slane %v11766_v53, 2  ;;  %v4534_v17 = vsel %vm4492_vm14, %v14687_v5, %v14686_v13  ;;  %v2228_v24 = vpop.permute.xlu0 %2227 }
 0x2e4   : > { %v2310_v39 = vmax.f32 %v14685_v46, %v2251_v61  ;;  %v12128_v48 = vsel %vm4492_vm14, %v3862_v50, %v3848_v14  ;;  %8977 = vmatpush1.bf16.msra.mxu0 %v8976_v47  ;;  %v14690_v61 = vmax.f32 %v14689_v20, 0.0  ;;  %v3588_v3 = vrot.slane %v11758_v12, 1 }
 0x2e5   : > { %14688 = vst [vmem:[#allocation17_spill] sm:$0xff] %v12128_v48  ;;  %v12134_v18 = vmax.f32 %v11766_v53, %v3614_v38  ;;  %v4535_v33 = vsel %vm4494_vm15, %v14691_v49, %v4534_v17  ;;  %v8931_v25 = vpack.c.bf16 %v4863_v41, %v4860_v58  ;;  %8978 = vmatprep.subr.bf16.mxu0 %v14492_v10 }
 0x2e6   : > { %v2550_v45 = vcombine.low %v2310_v39, %v2311_v1  ;;  %v2551_v7 = vcombine.high %v2310_v39, %v2311_v1  ;;  %v2312_v4 = vmax.f32 %v14690_v61, %v2252_v28  ;;  %v12139_v46 = vmax.f32 %v3881_v56, %v3882_v51  ;;  %v14695_v28 = vld [vmem:[#allocation53_spill] sm:$0xff] }
 0x2e7   : > { %v12141_v14 = vmax.f32 %v3888_v63, %v3889_v19  ;;  %v12145_v39 = vmax.f32 %v3895_v23, %v3896_v59  ;;  %v4536_v38 = vsel %vm4496_vm0, %v14695_v28, %v4535_v33  ;;  %8932 = vmatprep.subr.bf16.mxu1 %v8931_v25  ;;  %v12154_v51 = vmax.f32 %v11758_v12, %v3588_v3  ;;  %v14696_v19 = vld [vmem:[#allocation57_spill] sm:$0xff] }
 0x2e8   : > { %14692 = vst [vmem:[#allocation40_spill] sm:$0xff] %v12139_v46  ;;  %v2558_v50 = vrot.slane %v2550_v45, %v11421_v31  ;;  %v2565_v1 = vrot.slane %v2551_v7, %v11421_v31  ;;  %v2568_v47 = vcombine.low %v2312_v4, %v12068_v6  ;;  %v2569_v53 = vcombine.high %v2312_v4, %v12068_v6 }
 0x2e9   : > { %14693 = vst [vmem:[#allocation42_spill] sm:$0xff] %v12141_v14  ;;  %14694 = vst [vmem:[#allocation19_spill] sm:$0xff] %v12145_v39  ;;  %v3602_v23 = vrot.slane %v14696_v19, 1  ;;  %v3616_v59 = vrot.slane %v12134_v18, 1  ;;  %v12160_v6 = vsel %vm4498_vm2, %v11769_v15, %v4536_v38 }
 0x2ea   : > { %v2566_v58 = vcombine.high %v2558_v50, %v2558_v50  ;;  %v2567_v41 = vcombine.high %v2565_v1, %v2565_v1  ;;  %v2998_v56 = vrot.slane %v2558_v50, %v11421_v31  ;;  %v3014_v63 = vrot.slane %v2565_v1, %v11421_v31 }
 0x2eb   : > { %v2576_v12 = vrot.slane %v2568_v47, %v11421_v31  ;;  %v2583_v61 = vrot.slane %v2569_v53, %v11421_v31 }
 0x2ec   : > { %v2999_v13 = vcombine.high %v2998_v56, %v2998_v56  ;;  %v3006_v5 = vrot.slane %v2566_v58, %v11421_v31  ;;  %v3015_v17 = vcombine.high %v3014_v63, %v3014_v63  ;;  %v3022_v45 = vrot.slane %v2567_v41, %v11421_v31 }
 0x2ed   : > { %v3898_v7 = vsel %vm3280_vm12, %v2998_v56, -inf  ;;  %v3926_v20 = vsel %vm3280_vm12, %v3014_v63, -inf }
 0x2ee   : > { %v3007_v4 = vcombine.high %v3006_v5, %v3006_v5  ;;  %v3023_v3 = vcombine.high %v3022_v45, %v3022_v45  ;;  %v3899_v49 = vrot.slane %v3898_v7, 4  ;;  %v3905_v15 = vsel %vm3288_vm13, %v2999_v13, -inf }
 0x2ef   : > { %v3906_v33 = vrot.slane %v3905_v15, 4  ;;  %v3912_v25 = vsel %vm3280_vm12, %v3006_v5, -inf  ;;  %v3927_v50 = vrot.slane %v3926_v20, 4  ;;  %v3933_v1 = vsel %vm3288_vm13, %v3015_v17, -inf }
 0x2f0   : > { %v3900_v28 = vmax.f32 %v3898_v7, %v3899_v49  ;;  %v3913_v38 = vrot.slane %v3912_v25, 4  ;;  %v3919_v58 = vsel %vm3288_vm13, %v3007_v4, -inf  ;;  %v3934_v41 = vrot.slane %v3933_v1, 4 }
 0x2f1   : > { %v3907_v56 = vmax.f32 %v3905_v15, %v3906_v33  ;;  %v3920_v47 = vrot.slane %v3919_v58, 4  ;;  %v3928_v63 = vmax.f32 %v3926_v20, %v3927_v50  ;;  %v3940_v53 = vsel %vm3280_vm12, %v3022_v45, -inf  ;;  %v12174_v20 = vpop.permute.xlu1 %2229 }
 0x2f2   : > { %v3901_v29 = vrot.slane %v3900_v28, 2  ;;  %v3914_v42 = vmax.f32 %v3912_v25, %v3913_v38  ;;  %v3935_v8 = vmax.f32 %v3933_v1, %v3934_v41  ;;  %v3941_v13 = vrot.slane %v3940_v53, 4 }
 0x2f3   : > { %v3908_v39 = vrot.slane %v3907_v56, 2  ;;  %v3921_v14 = vmax.f32 %v3919_v58, %v3920_v47  ;;  %v3929_v5 = vrot.slane %v3928_v63, 2  ;;  %v3947_v46 = vsel %vm3288_vm13, %v3023_v3, -inf }
 0x2f4   : > { %v3902_v17 = vmax.f32 %v3900_v28, %v3901_v29  ;;  %v3915_v7 = vrot.slane %v3914_v42, 2  ;;  %v3936_v49 = vrot.slane %v3935_v8, 2  ;;  %v3942_v36 = vmax.f32 %v3940_v53, %v3941_v13  ;;  %v14698_v28 = vld [vmem:[#allocation16_spill] sm:$0xff] }
 0x2f5   : > { %v3909_v4 = vmax.f32 %v3907_v56, %v3908_v39  ;;  %v3922_v48 = vrot.slane %v3921_v14, 2  ;;  %v3930_v15 = vmax.f32 %v3928_v63, %v3929_v5  ;;  %v3948_v33 = vrot.slane %v3947_v46, 4 }
 0x2f6   : > { %v3903_v45 = vrot.slane %v3902_v17, 1  ;;  %v12176_v50 = vmax.f32 %v3914_v42, %v3915_v7  ;;  %v3943_v25 = vrot.slane %v3942_v36, 2  ;;  %v2584_v1 = vcombine.high %v2576_v12, %v2576_v12  ;;  %v14700_v42 = vld [vmem:[#allocation56_spill] sm:$0xff] }
 0x2f7   : > { %v3910_v38 = vrot.slane %v3909_v4, 1  ;;  %v3931_v58 = vrot.slane %v3930_v15, 1  ;;  %v2585_v41 = vcombine.high %v2583_v61, %v2583_v61  ;;  %v12179_v3 = vmax.f32 %v14696_v19, %v3602_v23 }
 0x2f8   : > { %v12181_v29 = vmax.f32 %v3935_v8, %v3936_v49  ;;  %v12184_v39 = vmax.f32 %v12134_v18, %v3616_v59  ;;  %v14699_v56 = vmax.f32 %v14698_v28, 0.0  ;;  %v14701_v63 = vrot.slane %v14700_v42, 1 }
 0x2f9   : > { %v12196_v13 = vmax.f32 %v3902_v17, %v3903_v45  ;;  %v3917_v19 = vrot.slane %v12176_v50, 1  ;;  %v12199_v23 = vmax.f32 %v3921_v14, %v3922_v48  ;;  %v12201_v8 = vmax.f32 %v3947_v46, %v3948_v33 }
 0x2fa   : > { %14697 = vst [vmem:[#allocation44_spill] sm:$0xff] %v12181_v29  ;;  %v12189_v47 = vmax.f32 %v14699_v56, %v12174_v20  ;;  %v12194_v53 = vmax.f32 %v14700_v42, %v14701_v63  ;;  %v12203_v18 = vmax.f32 %v3942_v36, %v3943_v25  ;;  %v3030_v59 = vrot.slane %v2576_v12, %v11421_v31 }
 0x2fb   : > { %14702 = vst [vmem:[#allocation41_spill] sm:$0xff] %v12196_v13  ;;  %14703 = vst [vmem:[#allocation13_spill] sm:$0xff] %v12201_v8  ;;  %v3038_v5 = vrot.slane %v2584_v1, %v11421_v31  ;;  %v3046_v7 = vrot.slane %v2583_v61, %v11421_v31  ;;  %v12208_v49 = vmax.f32 %v3909_v4, %v3910_v38 }
 0x2fc   : > { %v12210_v28 = vmax.f32 %v3930_v15, %v3931_v58  ;;  %v3054_v17 = vrot.slane %v2585_v41, %v11421_v31  ;;  %v4538_v48 = vsel %vm4500_vm3, %v12154_v51, %v12160_v6  ;;  %v3031_v46 = vcombine.high %v3030_v59, %v3030_v59 }
 0x2fd   : > { %14704 = vst [vmem:[#allocation14_spill] sm:$0xff] %v12208_v49  ;;  %v3039_v14 = vcombine.high %v3038_v5, %v3038_v5  ;;  %v3047_v36 = vcombine.high %v3046_v7, %v3046_v7  ;;  %v3954_v33 = vsel %vm3280_vm12, %v3030_v59, -inf  ;;  %v3968_v25 = vsel %vm3280_vm12, %v3038_v5, -inf }
 0x2fe   : > { %14705 = vst [vmem:[#allocation43_spill] sm:$0xff] %v12210_v28  ;;  %v3055_v12 = vcombine.high %v3054_v17, %v3054_v17  ;;  %v3955_v45 = vrot.slane %v3954_v33, 4  ;;  %v3982_v61 = vsel %vm3280_vm12, %v3046_v7, -inf  ;;  %v3961_v4 = vsel %vm3288_vm13, %v3031_v46, -inf }
 0x2ff   : > { %v3969_v15 = vrot.slane %v3968_v25, 4  ;;  %v3975_v1 = vsel %vm3288_vm13, %v3039_v14, -inf  ;;  %v3983_v38 = vrot.slane %v3982_v61, 4  ;;  %v3962_v41 = vrot.slane %v3961_v4, 4 }
 0x300   : > { %v3956_v58 = vmax.f32 %v3954_v33, %v3955_v45  ;;  %v3976_v51 = vrot.slane %v3975_v1, 4  ;;  %v3989_v6 = vsel %vm3288_vm13, %v3047_v36, -inf  ;;  %v3996_v59 = vsel %vm3280_vm12, %v3054_v17, -inf }
 0x301   : > { %v3970_v56 = vmax.f32 %v3968_v25, %v3969_v15  ;;  %v3984_v42 = vmax.f32 %v3982_v61, %v3983_v38  ;;  %v3990_v63 = vrot.slane %v3989_v6, 4  ;;  %v3963_v5 = vmax.f32 %v3961_v4, %v3962_v41 }
 0x302   : > { %v3957_v28 = vrot.slane %v3956_v58, 2  ;;  %v3977_v49 = vmax.f32 %v3975_v1, %v3976_v51  ;;  %v3997_v7 = vrot.slane %v3996_v59, 4  ;;  %v4003_v14 = vsel %vm3288_vm13, %v3055_v12, -inf }
 0x303   : > { %v3971_v13 = vrot.slane %v3970_v56, 2  ;;  %v3985_v46 = vrot.slane %v3984_v42, 2  ;;  %v3991_v60 = vmax.f32 %v3989_v6, %v3990_v63  ;;  %v3964_v33 = vrot.slane %v3963_v5, 2 }
 0x304   : > { %v3958_v35 = vmax.f32 %v3956_v58, %v3957_v28  ;;  %v3978_v45 = vrot.slane %v3977_v49, 2  ;;  %v3998_v22 = vmax.f32 %v3996_v59, %v3997_v7  ;;  %v4004_v61 = vrot.slane %v4003_v14, 4  ;;  %v14706_v28 = vld [vmem:[#allocation55_spill] sm:$0xff] }
 0x305   : > { %v3972_v11 = vmax.f32 %v3970_v56, %v3971_v13  ;;  %v3986_v36 = vmax.f32 %v3984_v42, %v3985_v46  ;;  %v3992_v25 = vrot.slane %v3991_v60, 2  ;;  %v3965_v38 = vmax.f32 %v3963_v5, %v3964_v33  ;;  %v14709_v5 = vld [vmem:[#allocation54_spill] sm:$0xff] }
 0x306   : > { %v3959_v15 = vrot.slane %v3958_v35, 1  ;;  %v3979_v17 = vmax.f32 %v3977_v49, %v3978_v45  ;;  %v3999_v16 = vrot.slane %v3998_v22, 2  ;;  %v4005_v51 = vmax.f32 %v4003_v14, %v4004_v61  ;;  %v4864_v33 = vld [vmem:[%s14389_s3 + $0x58] sm:$0xff] }
 0x307   : > { %v3973_v4 = vrot.slane %v3972_v11, 1  ;;  %v3987_v1 = vrot.slane %v3986_v36, 1  ;;  %v3993_v41 = vmax.f32 %v3991_v60, %v3992_v25  ;;  %v3966_v6 = vrot.slane %v3965_v38, 1  ;;  %v4859_v60 = vld [vmem:[%s14389_s3 + $0x30] sm:$0xff] }
 0x308   : > { %v3980_v63 = vrot.slane %v3979_v17, 1  ;;  %v4000_v12 = vmax.f32 %v3998_v22, %v3999_v16  ;;  %v14707_v58 = vrot.slane %v14706_v28, 2  ;;  %v12228_v13 = vmax.f32 %v12176_v50, %v3917_v19  ;;  %v4862_v16 = vld [vmem:[%s14389_s3 + $0x48] sm:$0xff]  ;;  %v4861_v19 = vld [vmem:[%s14389_s3 + $0x40] sm:$0xff] }
 0x309   : > { %v3994_v56 = vrot.slane %v3993_v41, 1  ;;  %v4006_v42 = vrot.slane %v4005_v51, 2  ;;  %v14710_v49 = vrot.slane %v14709_v5, 1  ;;  %v3960_v22 = vmax.f32 %v3958_v35, %v3959_v15  ;;  %v4866_v35 = vld [vmem:[%s14389_s3 + $0x68] sm:$0xff]  ;;  %v14715_v15 = vld [vmem:[#allocation50_spill] sm:$0xff] }
 0x30a   : > { %v3608_v59 = vmax.f32 %v14706_v28, %v14707_v58  ;;  %14708 = vst [vmem:[#allocation21_spill] sm:$0xff] %v12228_v13  ;;  %v3974_v46 = vmax.f32 %v3972_v11, %v3973_v4  ;;  %v12239_v14 = vmax.f32 %v3986_v36, %v3987_v1  ;;  %v4539_v50 = vsel %vm4502_vm4, %v12179_v3, %v4538_v48  ;;  %v4869_v3 = vld [vmem:[%s14389_s3 + $0x80] sm:$0xff] }
 0x30b   : > { %v3596_v7 = vmax.f32 %v14709_v5, %v14710_v49  ;;  %v12249_v45 = vmax.f32 %v3965_v38, %v3966_v6  ;;  %v12251_v25 = vmax.f32 %v3979_v17, %v3980_v63  ;;  %v4007_v61 = vmax.f32 %v4005_v51, %v4006_v42  ;;  %v14716_v38 = vld [vmem:[#allocation48_spill] sm:$0xff]  ;;  %v4865_v4 = vld [vmem:[%s14389_s3 + $0x60] sm:$0xff]  ;;  %v2234_v5 = vpop.permute.xlu1 %2233  ;;  %v4868_v49 = vld [vmem:[%s14389_s3 + $0x78] sm:$0xff] }
 0x30c   : > { %14711 = vst [vmem:[#allocation46_spill] sm:$0xff] %v12239_v14  ;;  %v12255_v11 = vsel %vm4504_vm5, %v12184_v39, %v4539_v50  ;;  %v4001_v48 = vrot.slane %v4000_v12, 1  ;;  %v3609_v36 = vrot.slane %v3608_v59, 1  ;;  %v4528_v39 = vsel %vm4494_vm15, %v14716_v38, %v14715_v15  ;;  %v14718_v51 = vld [vmem:[#allocation52_spill] sm:$0xff]  ;;  %v14719_v28 = vld [vmem:[#allocation27_spill] sm:$0xff] }
 0x30d   : > { %14712 = vst [vmem:[#allocation45_spill] sm:$0xff] %v12249_v45  ;;  %14713 = vst [vmem:[#allocation26_spill] sm:$0xff] %v12251_v25  ;;  %8316 = vmatprep.mubr.msk.f32.mxu1 %vm2239_vm11, %v12255_v11  ;;  %8324 = vmatprep.mubr.msk.f32.mxu0 %vm2239_vm11, %v12255_v11  ;;  %v8933_v17 = vpack.c.bf16 %v4862_v16, %v4859_v60  ;;  %v12273_v1 = vmax.f32 %v3993_v41, %v3994_v56  ;;  %v14720_v58 = vld [vmem:[#allocation15_spill] sm:$0xff]  ;;  %v4867_v60 = vld [vmem:[%s14389_s3 + $0x70] sm:$0xff]  ;;  %v2232_v56 = vpop.permute.xlu0 %2231  ;;  %v4008_v16 = vrot.slane %v4007_v61, 1 }
 0x30e   : > { %14714 = vst [vmem:[#allocation32_spill] sm:$0xff] %v12255_v11  ;;  %v4529_v6 = vsel %vm4496_vm0, %v14718_v51, %v4528_v39  ;;  %v8979_v63 = vpack.c.bf16 %v4864_v33, %v4861_v19  ;;  %v2086_v42 = vadd.f32 %v14720_v58, %v14719_v28  ;;  %v4870_v41 = vld [vmem:[%s14389_s3 + $0x88] sm:$0xff]  ;;  %v14721_v50 = vld [vmem:[#allocation23_spill] sm:$0xff]  ;;  %v2253_v33 = vsel %vm2239_vm11, %v2228_v24, %v12174_v20  ;;  %v4872_v58 = vld [vmem:[%s14389_s3 + $0x98] sm:$0xff] }
 0x30f   : > { %14717 = vst [vmem:[#allocation47_spill] sm:$0xff] %v12273_v1  ;;  %v4530_v19 = vsel %vm4498_vm2, %v14721_v50, %v4529_v6  ;;  %8934 = vmatpush1.bf16.msra.mxu1 %v8933_v17  ;;  %v8935_v15 = vpack.c.bf16 %v4869_v3, %v4866_v35  ;;  %v12293_v38 = vsel %vm4492_vm14, %v3974_v46, %v3960_v22  ;;  %v4875_v17 = vld [vmem:[%s14389_s3 + $0xb0] sm:$0xff]  ;;  %v4874_v46 = vld [vmem:[%s14389_s3 + $0xa8] sm:$0xff]  ;;  %v14726_v6 = vld [vmem:[#allocation18_spill] sm:$0xff] }
 0x310   : > { %14722 = vst [vmem:[#allocation49_spill] sm:$0xff] %v12293_v38  ;;  %v3610_v39 = vmax.f32 %v3608_v59, %v3609_v36  ;;  %v4531_v51 = vsel %vm4500_vm3, %v12194_v53, %v4530_v19  ;;  %8980 = vmatpush1.bf16.msra.mxu0 %v8979_v63  ;;  %v2134_v28 = vmax.f32 %v2086_v42, 0.0  ;;  %v8937_v59 = vpack.c.bf16 %v4868_v49, %v4865_v4  ;;  %v4871_v53 = vld [vmem:[%s14389_s3 + $0x90] sm:$0xff]  ;;  %v4873_v4 = vld [vmem:[%s14389_s3 + $0xa0] sm:$0xff]  ;;  %v4876_v42 = vld [vmem:[%s14389_s3 + $0xb8] sm:$0xff] }
 0x311   : > { %v4532_v20 = vsel %vm4502_vm4, %v3596_v7, %v4531_v51  ;;  %8936 = vmatprep.subr.bf16.mxu1 %v8935_v15  ;;  %8981 = vmatprep.subr.bf16.mxu0 %v14492_v10  ;;  %v8982_v22 = vpack.c.bf16 %v4870_v41, %v4867_v60  ;;  %v12312_v35 = vmax.f32 %v4000_v12, %v4001_v48  ;;  %v14725_v7 = vld [vmem:[#allocation28_spill] sm:$0xff] }
 0x312   : > { %v12315_v3 = vsel %vm4504_vm5, %v3610_v39, %v4532_v20  ;;  %v2314_v36 = vmax.f32 %v2134_v28, %v2253_v33  ;;  %v2089_v63 = vadd.f32 %v14726_v6, %v14725_v7  ;;  %v12326_v60 = vmax.f32 %v4007_v61, %v4008_v16  ;;  %v2238_v33 = vpop.permute.xlu1 %2237  ;;  %v2236_v39 = vpop.permute.xlu0 %2235  ;;  %v14728_v16 = vld [vmem:[#allocation22_spill] sm:$0xff]  ;;  %v14732_v20 = vld [vmem:[#allocation20_spill] sm:$0xff]  ;;  %v14734_v7 = vld [vmem:[#allocation25_spill] sm:$0xff] }
 0x313   : > { %14723 = vst [vmem:[#allocation33_spill] sm:$0xff] %v12312_v35  ;;  %14724 = vst [vmem:[#allocation51_spill] sm:$0xff] %v12315_v3  ;;  %4712 = vmatmul.mubr.f32.gmra.mrb[68].mxu1 %v12315_v3  ;;  %4823 = vmatmul.mubr.f32.gmra.mrb[84].mxu0 %v12315_v3  ;;  %v2254_v12 = vsel %vm2239_vm11, %v2232_v56, %v2234_v5  ;;  %v8939_v48 = vpack.c.bf16 %v4875_v17, %v4872_v58  ;;  %v14729_v51 = vmax.f32 %v14728_v16, 0.0  ;;  %v14730_v58 = vld [vmem:[#allocation29_spill] sm:$0xff] }
 0x314   : > { %14727 = vst [vmem:[#allocation53_spill] sm:$0xff] %v12326_v60  ;;  %v2586_v41 = vcombine.low %v2314_v36, %v12189_v47  ;;  %v2587_v50 = vcombine.high %v2314_v36, %v12189_v47  ;;  %8938 = vmatpush1.bf16.msra.mxu1 %v8937_v59  ;;  %8983 = vmatpush1.bf16.msra.mxu0 %v8982_v22  ;;  %v2137_v19 = vmax.f32 %v2089_v63, 0.0  ;;  %v14733_v47 = vsel %vm11010_vm10, 0.0, %v14732_v20 }
 0x315   : > { %v8941_v15 = vpack.c.bf16 %v4874_v46, %v4871_v53  ;;  %v2317_v28 = vmax.f32 %v14729_v51, %v2234_v5  ;;  %8940 = vmatprep.subr.bf16.mxu1 %v8939_v48  ;;  %8984 = vmatprep.subr.bf16.mxu0 %v14492_v10  ;;  %v8985_v56 = vpack.c.bf16 %v4876_v42, %v4873_v4  ;;  %v3721_v36 = vrot.slane %v11891_v27, 1 }
 0x316   : > { %v2092_v59 = vadd.f32 %v14733_v47, %v14730_v58  ;;  %v2594_v22 = vrot.slane %v2586_v41, %v11421_v31  ;;  %v2601_v53 = vrot.slane %v2587_v50, %v11421_v31  ;;  %v2316_v46 = vmax.f32 %v2137_v19, %v2254_v12 }
 0x317   : > { %v14735_v6 = vmax.f32 %v14734_v7, 0.0  ;;  %v2255_v63 = vsel %vm2239_vm11, %v2236_v39, %v2238_v33  ;;  %v14736_v4 = vrot.slane %v11868_v44, 1  ;;  %v14737_v58 = vrot.slane %v11865_v9, 2 }
 0x318   : > { %v2602_v16 = vcombine.high %v2594_v22, %v2594_v22  ;;  %v2603_v41 = vcombine.high %v2601_v53, %v2601_v53  ;;  %v3062_v50 = vrot.slane %v2594_v22, %v11421_v31  ;;  %v3078_v12 = vrot.slane %v2601_v53, %v11421_v31  ;;  %8942 = vmatpush1.bf16.msra.mxu1 %v8941_v15 }
 0x319   : > { %v12347_v5 = vmax.f32 %v14735_v6, %v2238_v33  ;;  %v12353_v42 = vmax.f32 %v11868_v44, %v14736_v4  ;;  %v2604_v19 = vcombine.low %v2316_v46, %v2317_v28  ;;  %8986 = vmatpush1.bf16.msra.mxu0 %v8985_v56  ;;  %v2140_v51 = vmax.f32 %v2092_v59, 0.0 }
 0x31a   : > { %v12361_v33 = vmax.f32 %v11865_v9, %v14737_v58  ;;  %v3063_v39 = vcombine.high %v3062_v50, %v3062_v50  ;;  %v3070_v17 = vrot.slane %v2602_v16, %v11421_v31  ;;  %v3079_v20 = vcombine.high %v3078_v12, %v3078_v12  ;;  %8987 = vmatprep.subr.bf16.mxu0 %v14492_v10 }
 0x31b   : > { %v3086_v47 = vrot.slane %v2603_v41, %v11421_v31  ;;  %v4010_v15 = vsel %vm3280_vm12, %v3062_v50, -inf  ;;  %v4038_v56 = vsel %vm3280_vm12, %v3078_v12, -inf  ;;  %v2605_v59 = vcombine.high %v2316_v46, %v2317_v28 }
 0x31c   : > { %v2612_v22 = vrot.slane %v2604_v19, %v11421_v31  ;;  %v3071_v53 = vcombine.high %v3070_v17, %v3070_v17  ;;  %v4011_v7 = vrot.slane %v4010_v15, 4  ;;  %v4017_v6 = vsel %vm3288_vm13, %v3063_v39, -inf }
 0x31d   : > { %v3087_v9 = vcombine.high %v3086_v47, %v3086_v47  ;;  %v4018_v4 = vrot.slane %v4017_v6, 4  ;;  %v4024_v16 = vsel %vm3280_vm12, %v3070_v17, -inf  ;;  %v4039_v58 = vrot.slane %v4038_v56, 4 }
 0x31e   : > { %v4045_v41 = vsel %vm3288_vm13, %v3079_v20, -inf  ;;  %v4012_v61 = vmax.f32 %v4010_v15, %v4011_v7  ;;  %v4025_v24 = vrot.slane %v4024_v16, 4  ;;  %v4031_v50 = vsel %vm3288_vm13, %v3071_v53, -inf }
 0x31f   : > { %v4046_v49 = vrot.slane %v4045_v41, 4  ;;  %v4019_v12 = vmax.f32 %v4017_v6, %v4018_v4  ;;  %v4032_v28 = vrot.slane %v4031_v50, 4  ;;  %v4040_v46 = vmax.f32 %v4038_v56, %v4039_v58 }
 0x320   : > { %v4052_v19 = vsel %vm3280_vm12, %v3086_v47, -inf  ;;  %v4013_v44 = vrot.slane %v4012_v61, 2  ;;  %v4026_v48 = vmax.f32 %v4024_v16, %v4025_v24  ;;  %v4059_v14 = vsel %vm3288_vm13, %v3087_v9, -inf  ;;  %v14739_v9 = vld [vmem:[#allocation58_spill] sm:$0xff] }
 0x321   : > { %v4047_v3 = vmax.f32 %v4045_v41, %v4046_v49  ;;  %v4053_v39 = vrot.slane %v4052_v19, 4  ;;  %v4020_v11 = vrot.slane %v4019_v12, 2  ;;  %v4033_v35 = vmax.f32 %v4031_v50, %v4032_v28 }
 0x322   : > { %v4041_v17 = vrot.slane %v4040_v46, 2  ;;  %v12376_v20 = vmax.f32 %v4012_v61, %v4013_v44  ;;  %v4027_v15 = vrot.slane %v4026_v48, 2  ;;  %v2619_v53 = vrot.slane %v2605_v59, %v11421_v31  ;;  %v14740_v61 = vld [vmem:[#allocation60_spill] sm:$0xff] }
 0x323   : > { %v4048_v7 = vrot.slane %v4047_v3, 2  ;;  %v12379_v6 = vmax.f32 %v4019_v12, %v4020_v11  ;;  %v4034_v56 = vrot.slane %v4033_v35, 2  ;;  %v4060_v4 = vrot.slane %v4059_v14, 4 }
 0x324   : > { %v14738_v47 = vrot.slane %v11873_v0, 1  ;;  %v12386_v49 = vmax.f32 %v2140_v51, %v2255_v63  ;;  %v12392_v44 = vsel %vm4492_vm14, %v14740_v61, %v14739_v9  ;;  %v12395_v59 = vmax.f32 %v11891_v27, %v3721_v36 }
 0x325   : > { %v4015_v11 = vrot.slane %v12376_v20, 1  ;;  %v12398_v58 = vmax.f32 %v4026_v48, %v4027_v15  ;;  %v12400_v41 = vmax.f32 %v4040_v46, %v4041_v17  ;;  %v4022_v63 = vrot.slane %v12379_v6, 1 }
 0x326   : > { %v12384_v24 = vmax.f32 %v11873_v0, %v14738_v47  ;;  %v12402_v0 = vmax.f32 %v4052_v19, %v4053_v39  ;;  %v12405_v51 = vmax.f32 %v4047_v3, %v4048_v7  ;;  %v2620_v50 = vcombine.high %v2612_v22, %v2612_v22 }
 0x327   : > { %14741 = vst [vmem:[#allocation57_spill] sm:$0xff] %v12398_v58  ;;  %v2621_v12 = vcombine.high %v2619_v53, %v2619_v53  ;;  %v12407_v28 = vmax.f32 %v4033_v35, %v4034_v56  ;;  %v12409_v47 = vmax.f32 %v4059_v14, %v4060_v4  ;;  %v3094_v27 = vrot.slane %v2612_v22, %v11421_v31 }
 0x328   : > { %v3110_v36 = vrot.slane %v2619_v53, %v11421_v31  ;;  %v3102_v48 = vrot.slane %v2620_v50, %v11421_v31  ;;  %v2622_v19 = vcombine.low %v12386_v49, %v12347_v5  ;;  %v2623_v3 = vcombine.high %v12386_v49, %v12347_v5 }
 0x329   : > { %14742 = vst [vmem:[#allocation16_spill] sm:$0xff] %v12409_v47  ;;  %v3118_v46 = vrot.slane %v2621_v12, %v11421_v31  ;;  %v3095_v39 = vcombine.high %v3094_v27, %v3094_v27  ;;  %v4066_v35 = vsel %vm3280_vm12, %v3094_v27, -inf }
 0x32a   : > { %v3111_v17 = vcombine.high %v3110_v36, %v3110_v36  ;;  %v4094_v14 = vsel %vm3280_vm12, %v3110_v36, -inf  ;;  %v3103_v15 = vcombine.high %v3102_v48, %v3102_v48  ;;  %v4067_v7 = vrot.slane %v4066_v35, 4 }
 0x32b   : > { %v3119_v22 = vcombine.high %v3118_v46, %v3118_v46  ;;  %v4080_v53 = vsel %vm3280_vm12, %v3102_v48, -inf  ;;  %v4073_v56 = vsel %vm3288_vm13, %v3095_v39, -inf  ;;  %v4095_v9 = vrot.slane %v4094_v14, 4 }
 0x32c   : > { %v4081_v4 = vrot.slane %v4080_v53, 4  ;;  %v4101_v61 = vsel %vm3288_vm13, %v3111_v17, -inf  ;;  %v4068_v50 = vmax.f32 %v4066_v35, %v4067_v7  ;;  %v4074_v12 = vrot.slane %v4073_v56, 4 }
 0x32d   : > { %v4087_v5 = vsel %vm3288_vm13, %v3103_v15, -inf  ;;  %v4102_v49 = vrot.slane %v4101_v61, 4  ;;  %v4096_v38 = vmax.f32 %v4094_v14, %v4095_v9  ;;  %v4108_v36 = vsel %vm3280_vm12, %v3118_v46, -inf }
 0x32e   : > { %v4082_v16 = vmax.f32 %v4080_v53, %v4081_v4  ;;  %v4088_v27 = vrot.slane %v4087_v5, 4  ;;  %v4069_v60 = vrot.slane %v4068_v50, 2  ;;  %v4075_v1 = vmax.f32 %v4073_v56, %v4074_v12 }
 0x32f   : > { %v4103_v25 = vmax.f32 %v4101_v61, %v4102_v49  ;;  %v4109_v48 = vrot.slane %v4108_v36, 4  ;;  %v4097_v13 = vrot.slane %v4096_v38, 2  ;;  %v4115_v58 = vsel %vm3288_vm13, %v3119_v22, -inf }
 0x330   : > { %v4083_v45 = vrot.slane %v4082_v16, 2  ;;  %v4089_v39 = vmax.f32 %v4087_v5, %v4088_v27  ;;  %v4070_v17 = vmax.f32 %v4068_v50, %v4069_v60  ;;  %v4076_v35 = vrot.slane %v4075_v1, 2 }
 0x331   : > { %v4104_v7 = vrot.slane %v4103_v25, 2  ;;  %v4110_v47 = vmax.f32 %v4108_v36, %v4109_v48  ;;  %v4098_v53 = vmax.f32 %v4096_v38, %v4097_v13  ;;  %v4116_v4 = vrot.slane %v4115_v58, 4 }
 0x332   : > { %v4084_v15 = vmax.f32 %v4082_v16, %v4083_v45  ;;  %v4090_v8 = vrot.slane %v4089_v39, 2  ;;  %v4071_v14 = vrot.slane %v4070_v17, 1  ;;  %v4077_v9 = vmax.f32 %v4075_v1, %v4076_v35  ;;  %v14746_v35 = vld [vmem:[#allocation64_spill] sm:$0xff] }
 0x333   : > { %v4105_v46 = vmax.f32 %v4103_v25, %v4104_v7  ;;  %v4111_v29 = vrot.slane %v4110_v47, 2  ;;  %v4099_v12 = vrot.slane %v4098_v53, 1  ;;  %v4117_v49 = vmax.f32 %v4115_v58, %v4116_v4 }
 0x334   : > { %v4085_v56 = vrot.slane %v4084_v15, 1  ;;  %v4091_v61 = vmax.f32 %v4089_v39, %v4090_v8  ;;  %v12428_v5 = vmax.f32 %v12376_v20, %v4015_v11  ;;  %v4078_v22 = vrot.slane %v4077_v9, 1 }
 0x335   : > { %v4106_v60 = vrot.slane %v4105_v46, 1  ;;  %v4112_v50 = vmax.f32 %v4110_v47, %v4111_v29  ;;  %v12431_v27 = vmax.f32 %v12379_v6, %v4022_v63  ;;  %v4118_v13 = vrot.slane %v4117_v49, 2 }
 0x336   : > { %v4092_v45 = vrot.slane %v4091_v61, 1  ;;  %v14743_v38 = vrot.slane %v12361_v33, 1  ;;  %v4072_v1 = vmax.f32 %v4070_v17, %v4071_v14  ;;  %v4086_v8 = vmax.f32 %v4084_v15, %v4085_v56 }
 0x337   : > { %v12438_v16 = vmax.f32 %v4098_v53, %v4099_v12  ;;  %v2630_v20 = vrot.slane %v2622_v19, %v11421_v31  ;;  %v12441_v11 = vmax.f32 %v4077_v9, %v4078_v22  ;;  %v12443_v58 = vmax.f32 %v4105_v46, %v4106_v60 }
 0x338   : > { %v12436_v25 = vmax.f32 %v12361_v33, %v14743_v38  ;;  %v4119_v29 = vmax.f32 %v4117_v49, %v4118_v13  ;;  %v2637_v6 = vrot.slane %v2623_v3, %v11421_v31  ;;  %v4113_v63 = vrot.slane %v4112_v50, 1  ;;  %v14745_v33 = vld [vmem:[#allocation61_spill] sm:$0xff] }
 0x339   : > { %14744 = vst [vmem:[#allocation56_spill] sm:$0xff] %v12438_v16  ;;  %v2638_v47 = vcombine.high %v2630_v20, %v2630_v20  ;;  %v3126_v36 = vrot.slane %v2630_v20, %v11421_v31  ;;  %v4549_v48 = vsel %vm4494_vm15, %v14745_v33, %v12392_v44  ;;  %v12450_v39 = vmax.f32 %v4091_v61, %v4092_v45 }
 0x33a   : > { %v2639_v17 = vcombine.high %v2637_v6, %v2637_v6  ;;  %v3142_v19 = vrot.slane %v2637_v6, %v11421_v31  ;;  %v4550_v7 = vsel %vm4496_vm0, %v14746_v35, %v4549_v48  ;;  %v4120_v14 = vrot.slane %v4119_v29, 1 }
 0x33b   : > { %v3127_v15 = vcombine.high %v3126_v36, %v3126_v36  ;;  %v3134_v53 = vrot.slane %v2638_v47, %v11421_v31  ;;  %v4122_v3 = vsel %vm3280_vm12, %v3126_v36, -inf  ;;  %v4551_v4 = vsel %vm4498_vm2, %v11888_v43, %v4550_v7 }
 0x33c   : > { %v3143_v9 = vcombine.high %v3142_v19, %v3142_v19  ;;  %v3150_v44 = vrot.slane %v2639_v17, %v11421_v31  ;;  %v4123_v46 = vrot.slane %v4122_v3, 4  ;;  %v4150_v49 = vsel %vm3280_vm12, %v3142_v19, -inf }
 0x33d   : > { %v3135_v56 = vcombine.high %v3134_v53, %v3134_v53  ;;  %v4129_v61 = vsel %vm3288_vm13, %v3127_v15, -inf  ;;  %v4136_v12 = vsel %vm3280_vm12, %v3134_v53, -inf  ;;  %v4151_v20 = vrot.slane %v4150_v49, 4 }
 0x33e   : > { %v3151_v22 = vcombine.high %v3150_v44, %v3150_v44  ;;  %v4124_v60 = vmax.f32 %v4122_v3, %v4123_v46  ;;  %v4130_v45 = vrot.slane %v4129_v61, 4  ;;  %v4137_v13 = vrot.slane %v4136_v12, 4 }
 0x33f   : > { %v4143_v38 = vsel %vm3288_vm13, %v3135_v56, -inf  ;;  %v4157_v43 = vsel %vm3288_vm13, %v3143_v9, -inf  ;;  %v4164_v6 = vsel %vm3280_vm12, %v3150_v44, -inf  ;;  %v4152_v17 = vmax.f32 %v4150_v49, %v4151_v20  ;;  %v4880_v20 = vld [vmem:[%s14389_s3 + $0xd8] sm:$0xff] }
 0x340   : > { %v4125_v47 = vrot.slane %v4124_v60, 2  ;;  %v4131_v36 = vmax.f32 %v4129_v61, %v4130_v45  ;;  %v4138_v33 = vmax.f32 %v4136_v12, %v4137_v13  ;;  %v4144_v48 = vrot.slane %v4143_v38, 4 }
 0x341   : > { %v4158_v35 = vrot.slane %v4157_v43, 4  ;;  %v4165_v7 = vrot.slane %v4164_v6, 4  ;;  %v4171_v19 = vsel %vm3288_vm13, %v3151_v22, -inf  ;;  %v12468_v56 = vsel %vm4492_vm14, %v4086_v8, %v4072_v1  ;;  %v4878_v1 = vld [vmem:[%s14389_s3 + $0xc8] sm:$0xff]  ;;  %v4881_v8 = vld [vmem:[%s14389_s3 + $0xe0] sm:$0xff] }
 0x342   : > { %v4126_v15 = vmax.f32 %v4124_v60, %v4125_v47  ;;  %v4132_v53 = vrot.slane %v4131_v36, 2  ;;  %v4139_v3 = vrot.slane %v4138_v33, 2  ;;  %v4145_v46 = vmax.f32 %v4143_v38, %v4144_v48 }
 0x343   : > { %v4153_v31 = vrot.slane %v4152_v17, 2  ;;  %v4159_v9 = vmax.f32 %v4157_v43, %v4158_v35  ;;  %v4172_v16 = vrot.slane %v4171_v19, 4  ;;  %v12470_v44 = vmax.f32 %v4112_v50, %v4113_v63  ;;  %v4877_v50 = vld [vmem:[%s14389_s3 + $0xc0] sm:$0xff]  ;;  %v4879_v43 = vld [vmem:[%s14389_s3 + $0xd0] sm:$0xff] }
 0x344   : > { %v4127_v61 = vrot.slane %v4126_v15, 1  ;;  %v4133_v12 = vmax.f32 %v4131_v36, %v4132_v53  ;;  %v4146_v45 = vrot.slane %v4145_v46, 2  ;;  %v12472_v49 = vmax.f32 %v4119_v29, %v4120_v14  ;;  %v4884_v53 = vld [vmem:[%s14389_s3 + $0xf8] sm:$0xff] }
 0x345   : > { %v12474_v13 = vmax.f32 %v4138_v33, %v4139_v3  ;;  %v4160_v22 = vrot.slane %v4159_v9, 2  ;;  %v12476_v60 = vmax.f32 %v4164_v6, %v4165_v7  ;;  %v12489_v14 = vmax.f32 %v4152_v17, %v4153_v31  ;;  %v4882_v6 = vld [vmem:[%s14389_s3 + $0xe8] sm:$0xff]  ;;  %v14748_v33 = vld [vmem:[#allocation59_spill] sm:$0xff]  ;;  %v14750_v3 = vld [vmem:[#allocation65_spill] sm:$0xff] }
 0x346   : > { %v12487_v63 = vmax.f32 %v4126_v15, %v4127_v61  ;;  %v4134_v29 = vrot.slane %v4133_v12, 1  ;;  %v12491_v38 = vmax.f32 %v4171_v19, %v4172_v16  ;;  %v12502_v47 = vmax.f32 %v4145_v46, %v4146_v45  ;;  %v14747_v16 = vld [vmem:[#allocation62_spill] sm:$0xff]  ;;  %v14749_v7 = vld [vmem:[#allocation63_spill] sm:$0xff] }
 0x347   : > { %v12504_v36 = vmax.f32 %v4159_v9, %v4160_v22  ;;  %v4552_v31 = vsel %vm4500_vm3, %v12353_v42, %v4551_v4  ;;  %v4542_v48 = vsel %vm4494_vm15, %v14748_v33, %v14747_v16  ;;  %v8943_v15 = vpack.c.bf16 %v4881_v8, %v4878_v1  ;;  %v4887_v42 = vld [vmem:[%s14389_s3 + $0x110] sm:$0xff]  ;;  %v4890_v33 = vld [vmem:[%s14389_s3 + $0x128] sm:$0xff] }
 0x348   : > { %v12511_v17 = vmax.f32 %v4133_v12, %v4134_v29  ;;  %v4553_v35 = vsel %vm4502_vm4, %v12384_v24, %v4552_v31  ;;  %v4543_v19 = vsel %vm4496_vm0, %v14749_v7, %v4542_v48  ;;  %v8945_v24 = vpack.c.bf16 %v4880_v20, %v4877_v50  ;;  %v4893_v48 = vld [vmem:[%s14389_s3 + $0x140] sm:$0xff] }
 0x349   : > { %v12525_v4 = vsel %vm4504_vm5, %v12436_v25, %v4553_v35  ;;  %v4544_v46 = vsel %vm4498_vm2, %v14750_v3, %v4543_v19  ;;  %v8988_v9 = vpack.c.bf16 %v4882_v6, %v4879_v43  ;;  %v14751_v12 = vrot.slane %v11991_v55, 1  ;;  %8944 = vmatprep.subr.bf16.mxu1 %v8943_v15  ;;  %v14756_v15 = vld [vmem:[#allocation68_spill] sm:$0xff]  ;;  %v4892_v3 = vld [vmem:[%s14389_s3 + $0x138] sm:$0xff] }
 0x34a   : > { %8317 = vmatprep.mubr.msk.f32.mxu1 %vm2239_vm11, %v12525_v4  ;;  %8325 = vmatprep.mubr.msk.f32.mxu0 %vm2239_vm11, %v12525_v4  ;;  %v4545_v61 = vsel %vm4500_vm3, %v11895_v62, %v4544_v46  ;;  %v14752_v25 = vrot.slane %v11962_v26, 1  ;;  %v3838_v1 = vrot.slane %v11993_v2, 2  ;;  %v4055_v8 = vrot.slane %v12402_v0, 2  ;;  %v4891_v46 = vld [vmem:[%s14389_s3 + $0x130] sm:$0xff] }
 0x34b   : > { %v3813_v45 = vmax.f32 %v11991_v55, %v14751_v12  ;;  %v4546_v50 = vsel %vm4502_vm4, %v11899_v30, %v4545_v61  ;;  %8989 = vmatpush1.bf16.msra.mxu0 %v8988_v9  ;;  %v4562_v62 = vsel %vm4492_vm14, %v11911_v52, %v11909_v34  ;;  %v8947_v29 = vpack.c.bf16 %v4887_v42, %v4884_v53  ;;  %v4883_v55 = vld [vmem:[%s14389_s3 + $0xf0] sm:$0xff]  ;;  %v4886_v34 = vld [vmem:[%s14389_s3 + $0x108] sm:$0xff]  ;;  %v4885_v52 = vld [vmem:[%s14389_s3 + $0x100] sm:$0xff] }
 0x34c   : > { %v3827_v22 = vmax.f32 %v11962_v26, %v14752_v25  ;;  %v4043_v26 = vrot.slane %v12400_v41, 1  ;;  %v12554_v20 = vsel %vm4504_vm5, %v12395_v59, %v4546_v50  ;;  %8946 = vmatpush1.bf16.msra.mxu1 %v8945_v24  ;;  %v3839_v30 = vmax.f32 %v11993_v2, %v3838_v1  ;;  %8990 = vmatprep.subr.bf16.mxu0 %v14492_v10  ;;  %v4888_v59 = vld [vmem:[%s14389_s3 + $0x118] sm:$0xff]  ;;  %v14758_v9 = vld [vmem:[#allocation67_spill] sm:$0xff]  ;;  %v4899_v1 = vld [vmem:[%s14389_s3 + $0x170] sm:$0xff] }
 0x34d   : > { %v4563_v43 = vsel %vm4494_vm15, %v11925_v40, %v4562_v62  ;;  %4718 = vmatmul.mubr.f32.gmra.mrb[70].mxu1 %v12554_v20  ;;  %4828 = vmatmul.mubr.f32.gmra.mrb[86].mxu0 %v12554_v20  ;;  %v14753_v2 = vrot.slane %v11957_v37, 1  ;;  %v14754_v31 = vrot.slane %v11959_v57, 1  ;;  %v3945_v35 = vrot.slane %v12203_v18, 1  ;;  %v14757_v53 = vld [vmem:[#allocation66_spill] sm:$0xff]  ;;  %v12618_v50 = vld [vmem:[%s14389_s3 + $0x150] sm:$0xff] }
 0x34e   : > { %v4564_v40 = vsel %vm4496_vm0, %v11927_v32, %v4563_v43  ;;  %v4889_v32 = vld [vmem:[%s14389_s3 + $0x120] sm:$0xff]  ;;  %v3840_v7 = vrot.slane %v3839_v30, 1  ;;  %8948 = vmatprep.subr.bf16.mxu1 %v8947_v29  ;;  %v4556_v42 = vsel %vm4494_vm15, %v14757_v53, %v14756_v15  ;;  %v8949_v61 = vpack.c.bf16 %v4886_v34, %v4883_v55  ;;  %v4896_v25 = vld [vmem:[%s14389_s3 + $0x158] sm:$0xff]  ;;  %v4898_v34 = vld [vmem:[%s14389_s3 + $0x168] sm:$0xff] }
 0x34f   : > { %v3806_v6 = vmax.f32 %v11957_v37, %v14753_v2  ;;  %v3820_v16 = vmax.f32 %v11959_v57, %v14754_v31  ;;  %v4565_v37 = vsel %vm4498_vm2, %v12057_v54, %v4564_v40  ;;  %v14755_v57 = vrot.slane %v11948_v21, 2  ;;  %v4894_v54 = vld [vmem:[%s14389_s3 + $0x148] sm:$0xff]  ;;  %v14759_v43 = vld [vmem:[#allocation35_spill] sm:$0xff] }
 0x350   : > { %v4566_v24 = vsel %vm4500_vm3, %v3813_v45, %v4565_v37  ;;  %v8991_v12 = vpack.c.bf16 %v4888_v59, %v4885_v52  ;;  %v3841_v62 = vmax.f32 %v3839_v30, %v3840_v7  ;;  %v4897_v52 = vld [vmem:[%s14389_s3 + $0x160] sm:$0xff]  ;;  %v4900_v59 = vld [vmem:[%s14389_s3 + $0x178] sm:$0xff]  ;;  %8950 = vmatpush1.bf16.msra.mxu1 %v8949_v61  ;;  %v8953_v40 = vpack.c.bf16 %v4892_v3, %v4889_v32  ;;  %v4902_v32 = vld [vmem:[%s14389_s3 + $0x188] sm:$0xff] }
 0x351   : > { %v3832_v19 = vmax.f32 %v11948_v21, %v14755_v57  ;;  %v4557_v21 = vsel %vm4496_vm0, %v14758_v9, %v4556_v42  ;;  %v4567_v45 = vsel %vm4502_vm4, %v3827_v22, %v4566_v24  ;;  %v8951_v22 = vpack.c.bf16 %v4893_v48, %v4890_v33  ;;  %v14761_v3 = vld [vmem:[#allocation44_spill] sm:$0xff]  ;;  %v14763_v24 = vld [vmem:[#allocation13_spill] sm:$0xff]  ;;  %v4901_v61 = vld [vmem:[%s14389_s3 + $0x180] sm:$0xff] }
 0x352   : > { %v4558_v55 = vsel %vm4498_vm2, %v14759_v43, %v4557_v21  ;;  %8992 = vmatpush1.bf16.msra.mxu0 %v8991_v12  ;;  %v4036_v2 = vrot.slane %v12407_v28, 1  ;;  %v12635_v31 = vsel %vm4504_vm5, %v3841_v62, %v4567_v45  ;;  %v8994_v57 = vpack.c.bf16 %v4894_v54, %v4891_v46  ;;  %v4904_v12 = vld [vmem:[%s14389_s3 + $0x198] sm:$0xff]  ;;  %v14767_v62 = vld [vmem:[#allocation17_spill] sm:$0xff]  ;;  %v14768_v45 = vld [vmem:[#allocation36_spill] sm:$0xff] }
 0x353   : > { %v3833_v29 = vrot.slane %v3832_v19, 1  ;;  %v4559_v30 = vsel %vm4500_vm3, %v3806_v6, %v4558_v55  ;;  %8993 = vmatprep.subr.bf16.mxu0 %v14492_v10  ;;  %8318 = vmatprep.mubr.msk.f32.mxu1 %vm2239_vm11, %v12635_v31  ;;  %v8955_v6 = vpack.c.bf16 %v4899_v1, %v4896_v25  ;;  %v8957_v33 = vpack.c.bf16 %v4898_v34, %v12618_v50  ;;  %v14766_v25 = vld [vmem:[#allocation31_spill] sm:$0xff]  ;;  %v4903_v43 = vld [vmem:[%s14389_s3 + $0x190] sm:$0xff]  ;;  %v4906_v55 = vld [vmem:[%s14389_s3 + $0x1a8] sm:$0xff] }
 0x354   : > { %v4560_v37 = vsel %vm4502_vm4, %v3820_v16, %v4559_v30  ;;  %8326 = vmatprep.mubr.msk.f32.mxu0 %vm2239_vm11, %v12635_v31  ;;  %v8997_v48 = vpack.c.bf16 %v4900_v59, %v4897_v52  ;;  %v4905_v16 = vld [vmem:[%s14389_s3 + $0x1a0] sm:$0xff]  ;;  %8952 = vmatprep.subr.bf16.mxu1 %v8951_v22  ;;  %v14760_v53 = vrot.slane %v12199_v23, 1  ;;  %v14762_v46 = vrot.slane %v14761_v3, 1  ;;  %v14769_v34 = vld [vmem:[#allocation16_spill] sm:$0xff] }
 0x355   : > { %v3834_v7 = vmax.f32 %v3832_v19, %v3833_v29  ;;  %v4050_v19 = vrot.slane %v12405_v51, 1  ;;  %v14764_v9 = vrot.slane %v14763_v24, 2  ;;  %v3946_v50 = vmax.f32 %v12203_v18, %v3945_v35  ;;  %8954 = vmatpush1.bf16.msra.mxu1 %v8953_v40  ;;  %v14770_v30 = vld [vmem:[#allocation40_spill] sm:$0xff]  ;;  %v14771_v35 = vld [vmem:[#allocation42_spill] sm:$0xff] }
 0x356   : > { %v3925_v42 = vmax.f32 %v12199_v23, %v14760_v53  ;;  %v3939_v54 = vmax.f32 %v14761_v3, %v14762_v46  ;;  %v14765_v23 = vld [vmem:[#allocation11_spill] sm:$0xff]  ;;  %v4570_v29 = vsel %vm4494_vm15, %v14768_v45, %v14767_v62  ;;  %v4062_v52 = vrot.slane %v14769_v34, 2  ;;  %8995 = vmatpush1.bf16.msra.mxu0 %v8994_v57  ;;  %8956 = vmatprep.subr.bf16.mxu1 %v8955_v6  ;;  %v4908_v6 = vld [vmem:[%s14389_s3 + $0x1b8] sm:$0xff] }
 0x357   : > { %v12652_v15 = vsel %vm4504_vm5, %v3834_v7, %v4560_v37  ;;  %v3951_v21 = vmax.f32 %v14763_v24, %v14764_v9  ;;  %v4576_v1 = vsel %vm4492_vm14, %v14766_v25, %v14765_v23  ;;  %v4571_v22 = vsel %vm4496_vm0, %v14771_v35, %v4570_v29  ;;  %v14772_v37 = vld [vmem:[#allocation57_spill] sm:$0xff]  ;;  %8996 = vmatprep.subr.bf16.mxu0 %v14492_v10  ;;  %v14773_v3 = vld [vmem:[#allocation19_spill] sm:$0xff]  ;;  %v14775_v23 = vld [vmem:[#allocation14_spill] sm:$0xff] }
 0x358   : > { %4724 = vmatmul.mubr.f32.gmra.mrb[72].mxu1 %v12652_v15  ;;  %4833 = vmatmul.mubr.f32.gmra.mrb[88].mxu0 %v12652_v15  ;;  %v4577_v18 = vsel %vm4494_vm15, %v14770_v30, %v4576_v1  ;;  %v8959_v7 = vpack.c.bf16 %v4905_v16, %v4902_v32  ;;  %v4029_v53 = vrot.slane %v14772_v37, 1  ;;  %v14774_v24 = vld [vmem:[#allocation41_spill] sm:$0xff]  ;;  %v8961_v57 = vpack.c.bf16 %v4904_v12, %v4901_v61  ;;  %v14777_v29 = vld [vmem:[#allocation43_spill] sm:$0xff]  ;;  %v4910_v35 = vld [vmem:[%s14389_s3 + $0x1c8] sm:$0xff] }
 0x359   : > { %v3952_v59 = vrot.slane %v3951_v21, 1  ;;  %v4578_v46 = vsel %vm4496_vm0, %v14773_v3, %v4577_v18  ;;  %v4572_v40 = vsel %vm4498_vm2, %v14774_v24, %v4571_v22  ;;  %v14776_v1 = vld [vmem:[#allocation21_spill] sm:$0xff]  ;;  %v9000_v32 = vpack.c.bf16 %v4906_v55, %v4903_v43  ;;  %8958 = vmatpush1.bf16.msra.mxu1 %v8957_v33  ;;  %v4909_v3 = vld [vmem:[%s14389_s3 + $0x1c0] sm:$0xff] }
 0x35a   : > { %v4579_v25 = vsel %vm4498_vm2, %v14775_v23, %v4578_v46  ;;  %v4573_v62 = vsel %vm4500_vm3, %v14776_v1, %v4572_v40  ;;  %v4911_v16 = vld [vmem:[%s14389_s3 + $0x1d0] sm:$0xff]  ;;  %v4037_v61 = vmax.f32 %v12407_v28, %v4036_v2  ;;  %v4051_v12 = vmax.f32 %v12405_v51, %v4050_v19  ;;  %8998 = vmatpush1.bf16.msra.mxu0 %v8997_v48  ;;  %v14779_v28 = vld [vmem:[#allocation26_spill] sm:$0xff]  ;;  %v14780_v19 = vld [vmem:[#allocation47_spill] sm:$0xff] }
 0x35b   : > { %v3953_v9 = vmax.f32 %v3951_v21, %v3952_v59  ;;  %v4580_v45 = vsel %vm4500_vm3, %v3925_v42, %v4579_v25  ;;  %v4574_v21 = vsel %vm4502_vm4, %v14777_v29, %v4573_v62  ;;  %v4167_v59 = vrot.slane %v12476_v60, 2  ;;  %8960 = vmatprep.subr.bf16.mxu1 %v8959_v7  ;;  %8999 = vmatprep.subr.bf16.mxu0 %v14492_v10  ;;  %v14778_v51 = vld [vmem:[#allocation45_spill] sm:$0xff]  ;;  %v4912_v46 = vld [vmem:[%s14389_s3 + $0x1d8] sm:$0xff]  ;;  %v4914_v23 = vld [vmem:[%s14389_s3 + $0x1e8] sm:$0xff] }
 0x35c   : > { %v4581_v43 = vsel %vm4502_vm4, %v3939_v54, %v4580_v45  ;;  %v12713_v55 = vsel %vm4504_vm5, %v3946_v50, %v4574_v21  ;;  %v4063_v30 = vmax.f32 %v14769_v34, %v4062_v52  ;;  %v4141_v42 = vrot.slane %v12474_v13, 1  ;;  %v4907_v52 = vld [vmem:[%s14389_s3 + $0x1b0] sm:$0xff]  ;;  %v4917_v25 = vld [vmem:[%s14389_s3 + $0x200] sm:$0xff]  ;;  %v4918_v29 = vld [vmem:[%s14389_s3 + $0x208] sm:$0xff] }
 0x35d   : > { %v12718_v18 = vsel %vm4504_vm5, %v3953_v9, %v4581_v43  ;;  %v4590_v2 = vsel %vm4492_vm14, %v14779_v28, %v14778_v51  ;;  %v8963_v33 = vpack.c.bf16 %v4911_v16, %v4908_v6  ;;  %v4030_v50 = vmax.f32 %v14772_v37, %v4029_v53  ;;  %v14781_v22 = vld [vmem:[#allocation53_spill] sm:$0xff]  ;;  %8962 = vmatpush1.bf16.msra.mxu1 %v8961_v57  ;;  %v4913_v57 = vld [vmem:[%s14389_s3 + $0x1e0] sm:$0xff]  ;;  %v4916_v16 = vld [vmem:[%s14389_s3 + $0x1f8] sm:$0xff] }
 0x35e   : > { %8319 = vmatprep.mubr.msk.f32.mxu1 %vm2239_vm11, %v12718_v18  ;;  %8327 = vmatprep.mubr.msk.f32.mxu0 %vm2239_vm11, %v12718_v18  ;;  %v4064_v48 = vrot.slane %v4063_v30, 1  ;;  %v4591_v54 = vsel %vm4494_vm15, %v14780_v19, %v4590_v2  ;;  %v4044_v34 = vmax.f32 %v12400_v41, %v4043_v26  ;;  %v4056_v37 = vmax.f32 %v12402_v0, %v4055_v8  ;;  %v14782_v41 = vld [vmem:[#allocation49_spill] sm:$0xff]  ;;  %v14783_v26 = vld [vmem:[#allocation46_spill] sm:$0xff] }
 0x35f   : > { %4730 = vmatmul.mubr.f32.gmra.mrb[74].mxu1 %v12713_v55  ;;  %4838 = vmatmul.mubr.f32.gmra.mrb[90].mxu0 %v12713_v55  ;;  %v4592_v7 = vsel %vm4496_vm0, %v14781_v22, %v4591_v54  ;;  %v4584_v53 = vsel %vm4494_vm15, %v14783_v26, %v14782_v41  ;;  %v4148_v24 = vrot.slane %v12502_v47, 1  ;;  %v14784_v8 = vld [vmem:[#allocation33_spill] sm:$0xff]  ;;  %v4174_v1 = vrot.slane %v12491_v38, 2  ;;  %v4922_v22 = vld [vmem:[%s14389_s3 + $0x228] sm:$0xff] }
 0x360   : > { %9001 = vmatpush1.bf16.msra.mxu0 %v9000_v32  ;;  %v4065_v40 = vmax.f32 %v4063_v30, %v4064_v48  ;;  %v4593_v0 = vsel %vm4498_vm2, %v12431_v27, %v4592_v7  ;;  %v4585_v9 = vsel %vm4496_vm0, %v14784_v8, %v4584_v53  ;;  %8964 = vmatprep.subr.bf16.mxu1 %v8963_v33  ;;  %v4057_v27 = vrot.slane %v4056_v37, 1  ;;  %v4915_v45 = vld [vmem:[%s14389_s3 + $0x1f0] sm:$0xff]  ;;  %v4920_v33 = vld [vmem:[%s14389_s3 + $0x218] sm:$0xff] }
 0x361   : > { %v4594_v62 = vsel %vm4500_vm3, %v4037_v61, %v4593_v0  ;;  %9002 = vmatprep.subr.bf16.mxu0 %v14492_v10  ;;  %v4586_v32 = vsel %vm4498_vm2, %v12428_v5, %v4585_v9  ;;  %v8965_v6 = vpack.c.bf16 %v4910_v35, %v4907_v52  ;;  %v9003_v43 = vpack.c.bf16 %v4912_v46, %v4909_v3  ;;  %v4924_v7 = vld [vmem:[%s14389_s3 + $0x238] sm:$0xff] }
 0x362   : > { %v4595_v21 = vsel %vm4502_vm4, %v4051_v12, %v4594_v62  ;;  %v4587_v61 = vsel %vm4500_vm3, %v4030_v50, %v4586_v32  ;;  %v4162_v5 = vrot.slane %v12504_v36, 1  ;;  %v4058_v51 = vmax.f32 %v4056_v37, %v4057_v27  ;;  %v4923_v12 = vld [vmem:[%s14389_s3 + $0x230] sm:$0xff]  ;;  %v8351_v62 = vld [vmem:[%s14389_s3 + $0x4a8] sm:$0xff]  ;;  %v8353_v32 = vld [vmem:[%s14389_s3 + $0x4b8] sm:$0xff] }
 0x363   : > { %v12788_v30 = vsel %vm4504_vm5, %v4065_v40, %v4595_v21  ;;  %v4588_v28 = vsel %vm4502_vm4, %v4044_v34, %v4587_v61  ;;  %v8967_v2 = vpack.c.bf16 %v4917_v25, %v4914_v23  ;;  %v8969_v48 = vpack.c.bf16 %v4916_v16, %v4913_v57  ;;  %v4919_v50 = vld [vmem:[%s14389_s3 + $0x210] sm:$0xff]  ;;  %8966 = vmatpush1.bf16.msra.mxu1 %v8965_v6  ;;  %v8346_v25 = vld [vmem:[%s14389_s3 + $0x480] sm:$0xff]  ;;  %v14786_v16 = vld [vmem:[#allocation38_spill] sm:$0xff] }
 0x364   : > { %8320 = vmatprep.mubr.msk.f32.mxu1 %vm2239_vm11, %v12788_v30  ;;  %8328 = vmatprep.mubr.msk.f32.mxu0 %vm2239_vm11, %v12788_v30  ;;  %v9006_v19 = vpack.c.bf16 %v4918_v29, %v4915_v45  ;;  %v4149_v54 = vmax.f32 %v12502_v47, %v4148_v24  ;;  %v12806_v34 = vsel %vm4504_vm5, %v4058_v51, %v4588_v28  ;;  %v4921_v47 = vld [vmem:[%s14389_s3 + $0x220] sm:$0xff]  ;;  %v4155_v37 = vrot.slane %v12489_v14, 1  ;;  %v8356_v6 = vld [vmem:[%s14389_s3 + $0x4d0] sm:$0xff]  ;;  %v8355_v61 = vld [vmem:[%s14389_s3 + $0x4c8] sm:$0xff] }
 0x365   : > { %9004 = vmatpush1.bf16.msra.mxu0 %v9003_v43  ;;  %v4175_v52 = vmax.f32 %v12491_v38, %v4174_v1  ;;  %v4604_v35 = vsel %vm4492_vm14, %v12450_v39, %v12441_v11  ;;  %4736 = vmatmul.mubr.f32.gmra.mrb[76].mxu1 %v12806_v34  ;;  %v4163_v11 = vmax.f32 %v12504_v36, %v4162_v5  ;;  %v8348_v1 = vld [vmem:[%s14389_s3 + $0x490] sm:$0xff]  ;;  %v8354_v43 = vld [vmem:[%s14389_s3 + $0x4c0] sm:$0xff]  ;;  %v8357_v5 = vld [vmem:[%s14389_s3 + $0x4d8] sm:$0xff] }
 0x366   : > { %4843 = vmatmul.mubr.f32.gmra.mrb[92].mxu0 %v12806_v34  ;;  %v4605_v39 = vsel %vm4494_vm15, %v12443_v58, %v4604_v35  ;;  %v8971_v38 = vpack.c.bf16 %v4923_v12, %v4920_v33  ;;  %8968 = vmatprep.subr.bf16.mxu1 %v8967_v2  ;;  %v4142_v53 = vmax.f32 %v12474_v13, %v4141_v42  ;;  %v14785_v58 = vld [vmem:[#allocation56_spill] sm:$0xff]  ;;  %v8352_v21 = vld [vmem:[%s14389_s3 + $0x4b0] sm:$0xff]  ;;  %v8362_v33 = vld [vmem:[%s14389_s3 + $0x500] sm:$0xff] }
 0x367   : > { %9005 = vmatprep.subr.bf16.mxu0 %v14492_v10  ;;  %v4176_v41 = vrot.slane %v4175_v52, 1  ;;  %v4606_v26 = vsel %vm4496_vm0, %v12472_v49, %v4605_v39  ;;  %v4168_v3 = vmax.f32 %v12476_v60, %v4167_v59  ;;  %v4598_v46 = vsel %vm4494_vm15, %v14785_v58, %v12468_v56  ;;  %8970 = vmatpush1.bf16.msra.mxu1 %v8969_v48  ;;  %v8347_v60 = vld [vmem:[%s14389_s3 + $0x488] sm:$0xff]  ;;  %v14787_v28 = vld [vmem:[#allocation37_spill] sm:$0xff]  ;;  %v14791_v58 = vld [vmem:[#allocation51_spill] sm:$0xff] }
 0x368   : > { %v4607_v36 = vsel %vm4498_vm2, %v12511_v17, %v4606_v26  ;;  %v8973_v24 = vpack.c.bf16 %v4922_v22, %v4919_v50  ;;  %v9009_v40 = vpack.c.bf16 %v4924_v7, %v4921_v47  ;;  %v4599_v13 = vsel %vm4496_vm0, %v12470_v44, %v4598_v46  ;;  %v8350_v17 = vld [vmem:[%s14389_s3 + $0x4a0] sm:$0xff]  ;;  %8972 = vmatprep.subr.bf16.mxu1 %v8971_v38  ;;  %v8359_v2 = vld [vmem:[%s14389_s3 + $0x4e8] sm:$0xff]  ;;  %v8361_v50 = vld [vmem:[%s14389_s3 + $0x4f8] sm:$0xff] }
 0x369   : > { %9007 = vmatpush1.bf16.msra.mxu0 %v9006_v19  ;;  %v4177_v49 = vmax.f32 %v4175_v52, %v4176_v41  ;;  %v4608_v0 = vsel %vm4500_vm3, %v4149_v54, %v4607_v36  ;;  %v4169_v8 = vrot.slane %v4168_v3, 1  ;;  %v4156_v59 = vmax.f32 %v12489_v14, %v4155_v37  ;;  %v8358_v19 = vld [vmem:[%s14389_s3 + $0x4e0] sm:$0xff]  ;;  %v14788_v54 = vld [vmem:[#allocation10_spill] sm:$0xff]  ;;  %v8360_v52 = vld [vmem:[%s14389_s3 + $0x4f0] sm:$0xff] }
 0x36a   : > { %v4609_v56 = vsel %vm4502_vm4, %v4163_v11, %v4608_v0  ;;  %9008 = vmatprep.subr.bf16.mxu0 %v14492_v10  ;;  %v4600_v42 = vsel %vm4498_vm2, %v12487_v63, %v4599_v13  ;;  %v9011_v57 = vpack.c.bf16 %v8350_v17, %v8347_v60  ;;  %v8349_v63 = vld [vmem:[%s14389_s3 + $0x498] sm:$0xff]  ;;  %v9060_v29 = vpack.c.bf16 %v8351_v62, %v8348_v1  ;;  %v8363_v35 = vld [vmem:[%s14389_s3 + $0x508] sm:$0xff]  ;;  %v14789_v47 = vld [vmem:[#allocation39_spill] sm:$0xff] }
 0x36b   : > { %v12856_v44 = vsel %vm4504_vm5, %v4177_v49, %v4609_v56  ;;  %v4170_v9 = vmax.f32 %v4168_v3, %v4169_v8  ;;  %v4601_v23 = vsel %vm4500_vm3, %v4142_v53, %v4600_v42  ;;  %8974 = vmatpush1.bf16.msra.mxu1 %v8973_v24  ;;  %v9013_v45 = vpack.c.bf16 %v8349_v63, %v8346_v25  ;;  %v8365_v7 = vld [vmem:[%s14389_s3 + $0x518] sm:$0xff]  ;;  %v8368_v37 = vld [vmem:[%s14389_s3 + $0x530] sm:$0xff]  ;;  %v14790_v41 = vld [vmem:[#allocation32_spill] sm:$0xff] }
 0x36c   : > { %8321 = vmatprep.mubr.msk.f32.mxu1 %vm2239_vm11, %v12856_v44  ;;  %8329 = vmatprep.mubr.msk.f32.mxu0 %vm2239_vm11, %v12856_v44  ;;  %v4602_v14 = vsel %vm4502_vm4, %v4156_v59, %v4601_v23  ;;  %v9015_v51 = vpack.c.bf16 %v8356_v6, %v8353_v32  ;;  %v9017_v12 = vpack.c.bf16 %v8355_v61, %v8352_v21  ;;  %v8364_v38 = vld [vmem:[%s14389_s3 + $0x510] sm:$0xff]  ;;  %v8367_v26 = vld [vmem:[%s14389_s3 + $0x528] sm:$0xff]  ;;  %v8366_v53 = vld [vmem:[%s14389_s3 + $0x520] sm:$0xff] }
 0x36d   : > { %v12877_v27 = vsel %vm4504_vm5, %v4170_v9, %v4602_v14  ;;  %9010 = vmatpush1.bf16.msra.mxu0 %v9009_v40  ;;  %9012 = vmatprep.subr.bf16.mxu1 %v9011_v57  ;;  %v9063_v48 = vpack.c.bf16 %v8357_v5, %v8354_v43  ;;  %v9019_v22 = vpack.c.bf16 %v8362_v33, %v8359_v2  ;;  %v8369_v3 = vld [vmem:[%s14389_s3 + $0x538] sm:$0xff]  ;;  %v8371_v46 = vld [vmem:[%s14389_s3 + $0x548] sm:$0xff]  ;;  %v8374_v24 = vld [vmem:[%s14389_s3 + $0x560] sm:$0xff] }
 0x36e   : > { %4742 = vmatmul.mubr.f32.gmra.mrb[78].mxu1 %v12877_v27  ;;  %4848 = vmatmul.mubr.f32.gmra.mrb[94].mxu0 %v12877_v27  ;;  %v9021_v11 = vpack.c.bf16 %v8361_v50, %v8358_v19  ;;  %v9066_v39 = vpack.c.bf16 %v8363_v35, %v8360_v52  ;;  %v9023_v36 = vpack.c.bf16 %v8368_v37, %v8365_v7  ;;  %v8370_v0 = vld [vmem:[%s14389_s3 + $0x540] sm:$0xff]  ;;  %v8373_v8 = vld [vmem:[%s14389_s3 + $0x558] sm:$0xff]  ;;  %v8372_v13 = vld [vmem:[%s14389_s3 + $0x550] sm:$0xff] }
 0x36f   : > { %8330 = vmatprep.mubr.msk.f32.mxu1 %vm2239_vm11, %v14786_v16  ;;  %8338 = vmatprep.mubr.msk.f32.mxu0 %vm2239_vm11, %v14786_v16  ;;  %v9025_v40 = vpack.c.bf16 %v8367_v26, %v8364_v38  ;;  %v9069_v49 = vpack.c.bf16 %v8369_v3, %v8366_v53  ;;  %v8375_v60 = vld [vmem:[%s14389_s3 + $0x568] sm:$0xff]  ;;  %v9027_v17 = vpack.c.bf16 %v8374_v24, %v8371_v46  ;;  %v8377_v56 = vld [vmem:[%s14389_s3 + $0x578] sm:$0xff]  ;;  %v8380_v59 = vld [vmem:[%s14389_s3 + $0x590] sm:$0xff] }
 0x370   : > { %9059 = vmatprep.subr.bf16.mxu0 %v14492_v10  ;;  %v9029_v42 = vpack.c.bf16 %v8373_v8, %v8370_v0  ;;  %v9072_v9 = vpack.c.bf16 %v8375_v60, %v8372_v13  ;;  %v8376_v23 = vld [vmem:[%s14389_s3 + $0x570] sm:$0xff]  ;;  %v8379_v25 = vld [vmem:[%s14389_s3 + $0x588] sm:$0xff]  ;;  %v8378_v14 = vld [vmem:[%s14389_s3 + $0x580] sm:$0xff]  ;;  %v9031_v63 = vpack.c.bf16 %v8380_v59, %v8377_v56 }
 0x371   : > { %v8381_v57 = vld [vmem:[%s14389_s3 + $0x598] sm:$0xff]  ;;  %v8383_v1 = vld [vmem:[%s14389_s3 + $0x5a8] sm:$0xff]  ;;  %v8386_v62 = vld [vmem:[%s14389_s3 + $0x5c0] sm:$0xff]  ;;  %v9033_v32 = vpack.c.bf16 %v8379_v25, %v8376_v23 }
 0x372   : > { %4990 = vmatmul.mubr.f32.vlgmr.msra.gmra.mrb[80].mxu1 %v14787_v28  ;;  %5103 = vmatmul.mubr.f32.vlgmr.msra.gmra.mrb[96].mxu0 %v14787_v28  ;;  %v9075_v6 = vpack.c.bf16 %v8381_v57, %v8378_v14  ;;  %v8384_v21 = vld [vmem:[%s14389_s3 + $0x5b0] sm:$0xff]  ;;  %v8387_v61 = vld [vmem:[%s14389_s3 + $0x5c8] sm:$0xff]  ;;  %v9035_v43 = vpack.c.bf16 %v8386_v62, %v8383_v1  ;;  %v8389_v5 = vld [vmem:[%s14389_s3 + $0x5d8] sm:$0xff] }
 0x373   : > { %9014 = vmatpush1.bf16.msra.mxu1 %v9013_v45  ;;  %9061 = vmatpush1.bf16.msra.mxu0 %v9060_v29  ;;  %v8382_v45 = vld [vmem:[%s14389_s3 + $0x5a0] sm:$0xff]  ;;  %v8385_v29 = vld [vmem:[%s14389_s3 + $0x5b8] sm:$0xff]  ;;  %v9078_v33 = vpack.c.bf16 %v8387_v61, %v8384_v21  ;;  %v8395_v35 = vld [vmem:[%s14389_s3 + $0x608] sm:$0xff] }
 0x374   : > { %8331 = vmatprep.mubr.msk.f32.mxu1 %vm2239_vm11, %v14788_v54  ;;  %8339 = vmatprep.mubr.msk.f32.mxu0 %vm2239_vm11, %v14788_v54  ;;  %v9037_v2 = vpack.c.bf16 %v8385_v29, %v8382_v45  ;;  %v8390_v19 = vld [vmem:[%s14389_s3 + $0x5e0] sm:$0xff]  ;;  %v8393_v50 = vld [vmem:[%s14389_s3 + $0x5f8] sm:$0xff]  ;;  %v8396_v38 = vld [vmem:[%s14389_s3 + $0x610] sm:$0xff] }
 0x375   : > { %9016 = vmatprep.subr.bf16.mxu1 %v9015_v51  ;;  %9062 = vmatprep.subr.bf16.mxu0 %v14492_v10  ;;  %v8392_v51 = vld [vmem:[%s14389_s3 + $0x5f0] sm:$0xff]  ;;  %v9081_v37 = vpack.c.bf16 %v8393_v50, %v8390_v19  ;;  %v8399_v26 = vld [vmem:[%s14389_s3 + $0x628] sm:$0xff]  ;;  %v8401_v3 = vld [vmem:[%s14389_s3 + $0x638] sm:$0xff] }
 0x376   : > { %4996 = vmatmul.mubr.f32.gmra.mrb[82].mxu1 %v14789_v47  ;;  %5108 = vmatmul.mubr.f32.gmra.mrb[98].mxu0 %v14789_v47  ;;  %v9039_v52 = vpack.c.bf16 %v8392_v51, %v8389_v5  ;;  %v9084_v24 = vpack.c.bf16 %v8399_v26, %v8396_v38  ;;  %v8403_v0 = vld [vmem:[%s14389_s3 + $0x648] sm:$0xff]  ;;  %v8402_v8 = vld [vmem:[%s14389_s3 + $0x640] sm:$0xff]  ;;  %v8405_v13 = vld [vmem:[%s14389_s3 + $0x658] sm:$0xff] }
 0x377   : > { %9018 = vmatpush1.bf16.msra.mxu1 %v9017_v12  ;;  %9064 = vmatpush1.bf16.msra.mxu0 %v9063_v48  ;;  %v8388_v12 = vld [vmem:[%s14389_s3 + $0x5d0] sm:$0xff]  ;;  %v8391_v48 = vld [vmem:[%s14389_s3 + $0x5e8] sm:$0xff]  ;;  %v8410_v60 = vld [vmem:[%s14389_s3 + $0x680] sm:$0xff]  ;;  %v9087_v56 = vpack.c.bf16 %v8405_v13, %v8402_v8 }
 0x378   : > { %8332 = vmatprep.mubr.msk.f32.mxu1 %vm2239_vm11, %v14790_v41  ;;  %8340 = vmatprep.mubr.msk.f32.mxu0 %vm2239_vm11, %v14790_v41  ;;  %v9041_v7 = vpack.c.bf16 %v8391_v48, %v8388_v12  ;;  %v8406_v59 = vld [vmem:[%s14389_s3 + $0x660] sm:$0xff]  ;;  %v8408_v23 = vld [vmem:[%s14389_s3 + $0x670] sm:$0xff]  ;;  %v8411_v25 = vld [vmem:[%s14389_s3 + $0x688] sm:$0xff] }
 0x379   : > { %9020 = vmatprep.subr.bf16.mxu1 %v9019_v22  ;;  %9065 = vmatprep.subr.bf16.mxu0 %v14492_v10  ;;  %v8398_v22 = vld [vmem:[%s14389_s3 + $0x620] sm:$0xff]  ;;  %v8413_v14 = vld [vmem:[%s14389_s3 + $0x698] sm:$0xff]  ;;  %v8416_v57 = vld [vmem:[%s14389_s3 + $0x6b0] sm:$0xff]  ;;  %v9090_v1 = vpack.c.bf16 %v8411_v25, %v8408_v23 }
 0x37a   : > { %5002 = vmatmul.mubr.f32.gmra.mrb[84].mxu1 %v14791_v58  ;;  %5113 = vmatmul.mubr.f32.gmra.mrb[100].mxu0 %v14791_v58  ;;  %v9043_v53 = vpack.c.bf16 %v8398_v22, %v8395_v35  ;;  %v8412_v62 = vld [vmem:[%s14389_s3 + $0x690] sm:$0xff]  ;;  %v8414_v45 = vld [vmem:[%s14389_s3 + $0x6a0] sm:$0xff]  ;;  %v8417_v29 = vld [vmem:[%s14389_s3 + $0x6b8] sm:$0xff] }
 0x37b   : > { %9022 = vmatpush1.bf16.msra.mxu1 %v9021_v11  ;;  %9067 = vmatpush1.bf16.msra.mxu0 %v9066_v39  ;;  %v8394_v11 = vld [vmem:[%s14389_s3 + $0x600] sm:$0xff]  ;;  %v8397_v39 = vld [vmem:[%s14389_s3 + $0x618] sm:$0xff]  ;;  %v9093_v61 = vpack.c.bf16 %v8417_v29, %v8414_v45  ;;  %v14792_v5 = vld [vmem:[#allocation8_spill] sm:$0xff] }
 0x37c   : > { %8333 = vmatprep.mubr.msk.f32.mxu1 %vm2239_vm11, %v12525_v4  ;;  %8341 = vmatprep.mubr.msk.f32.mxu0 %vm2239_vm11, %v12525_v4  ;;  %v9045_v46 = vpack.c.bf16 %v8397_v39, %v8394_v11  ;;  %v14793_v51 = vsub.s32 0, %v14792_v5  ;;  %v7024_v19 = vld [vmem:[#allocation2 + $0xc0] sm:$0xff]  ;;  %v6764_v35 = vld [vmem:[#allocation2 + $0x10] sm:$0xff]  ;;  %v6765_v22 = vld [vmem:[#allocation2 + $0x18] sm:$0xff] }
 0x37d   : > { %9024 = vmatprep.subr.bf16.mxu1 %v9023_v36  ;;  %9068 = vmatprep.subr.bf16.mxu0 %v14492_v10  ;;  %v8404_v36 = vld [vmem:[%s14389_s3 + $0x650] sm:$0xff]  ;;  %v7027_v39 = vld [vmem:[#allocation2 + $0xd8] sm:$0xff] }
 0x37e   : > { %5008 = vmatmul.mubr.f32.gmra.mrb[86].mxu1 %v12554_v20  ;;  %5118 = vmatmul.mubr.f32.gmra.mrb[102].mxu0 %v12554_v20  ;;  %v7026_v11 = vld [vmem:[#allocation2 + $0xd0] sm:$0xff] }
 0x37f   : > { %9026 = vmatpush1.bf16.msra.mxu1 %v9025_v40  ;;  %9070 = vmatpush1.bf16.msra.mxu0 %v9069_v49  ;;  %v8400_v40 = vld [vmem:[%s14389_s3 + $0x630] sm:$0xff]  ;;  %v9047_v49 = vpack.c.bf16 %v8404_v36, %v8401_v3  ;;  %v9099_v3 = vpack.c.bf16 %v6765_v22, %v6764_v35  ;;  %v9135_v36 = vpack.c.bf16 %v7027_v39, %v7026_v11 }
 0x380   : > { %8334 = vmatprep.mubr.msk.f32.mxu1 %vm2239_vm11, %v12635_v31  ;;  %8342 = vmatprep.mubr.msk.f32.mxu0 %vm2239_vm11, %v12635_v31 }
 0x381   : > { %9028 = vmatprep.subr.bf16.mxu1 %v9027_v17  ;;  %9071 = vmatprep.subr.bf16.mxu0 %v14492_v10  ;;  %v9049_v17 = vpack.c.bf16 %v8403_v0, %v8400_v40  ;;  %v7028_v40 = vld [vmem:[#allocation2 + $0xe0] sm:$0xff] }
 0x382   : > { %5014 = vmatmul.mubr.f32.gmra.mrb[88].mxu1 %v12652_v15  ;;  %5123 = vmatmul.mubr.f32.gmra.mrb[104].mxu0 %v12652_v15 }
 0x383   : > { %9030 = vmatpush1.bf16.msra.mxu1 %v9029_v42  ;;  %9073 = vmatpush1.bf16.msra.mxu0 %v9072_v9  ;;  %v8409_v9 = vld [vmem:[%s14389_s3 + $0x678] sm:$0xff] }
 0x384   : > { %8335 = vmatprep.mubr.msk.f32.mxu1 %vm2239_vm11, %v12718_v18  ;;  %8343 = vmatprep.mubr.msk.f32.mxu0 %vm2239_vm11, %v12718_v18 }
 0x385   : > { %9032 = vmatprep.subr.bf16.mxu1 %v9031_v63  ;;  %9074 = vmatprep.subr.bf16.mxu0 %v14492_v10  ;;  %v9053_v63 = vpack.c.bf16 %v8409_v9, %v8406_v59 }
 0x386   : > { %5020 = vmatmul.mubr.f32.gmra.mrb[90].mxu1 %v12713_v55  ;;  %5128 = vmatmul.mubr.f32.gmra.mrb[106].mxu0 %v12713_v55 }
 0x387   : > { %9034 = vmatpush1.bf16.msra.mxu1 %v9033_v32  ;;  %9076 = vmatpush1.bf16.msra.mxu0 %v9075_v6  ;;  %v9055_v32 = vpack.c.bf16 %v8416_v57, %v8413_v14  ;;  %v8415_v6 = vld [vmem:[%s14389_s3 + $0x6a8] sm:$0xff] }
 0x388   : > { %8336 = vmatprep.mubr.msk.f32.mxu1 %vm2239_vm11, %v12788_v30  ;;  %8344 = vmatprep.mubr.msk.f32.mxu0 %vm2239_vm11, %v12788_v30  ;;  %v9057_v21 = vpack.c.bf16 %v8415_v6, %v8412_v62 }
 0x389   : > { %9036 = vmatprep.subr.bf16.mxu1 %v9035_v43  ;;  %9077 = vmatprep.subr.bf16.mxu0 %v14492_v10  ;;  %v13148_v43 = vld [vmem:[%s14390_s4] sm:$0x7] }
 0x38a   : > { %5026 = vmatmul.mubr.f32.gmra.mrb[92].mxu1 %v12806_v34  ;;  %5133 = vmatmul.mubr.f32.gmra.mrb[108].mxu0 %v12806_v34 }
 0x38b   : > { %9038 = vmatpush1.bf16.msra.mxu1 %v9037_v2  ;;  %9079 = vmatpush1.bf16.msra.mxu0 %v9078_v33  ;;  %v13159_v2 = vrot.slane %v13148_v43, %v14793_v51 }
 0x38c   : > { %8337 = vmatprep.mubr.msk.f32.mxu1 %vm2239_vm11, %v12856_v44  ;;  %8345 = vmatprep.mubr.msk.f32.mxu0 %vm2239_vm11, %v12856_v44 }
 0x38d   : > { %9040 = vmatprep.subr.bf16.mxu1 %v9039_v52  ;;  %9080 = vmatprep.subr.bf16.mxu0 %v14492_v10  ;;  %v7025_v52 = vld [vmem:[#allocation2 + $0xc8] sm:$0xff] }
 0x38e   : > { %5032 = vmatmul.mubr.f32.gmra.mrb[94].mxu1 %v12877_v27  ;;  %5138 = vmatmul.mubr.f32.gmra.mrb[110].mxu0 %v12877_v27 }
 0x38f   : > { %9042 = vmatpush1.bf16.msra.mxu1 %v9041_v7  ;;  %9082 = vmatpush1.bf16.msra.mxu0 %v9081_v37 }
 0x390   : > { %8418 = vmatprep.mubr.msk.f32.mxu1 %vm2239_vm11, %v14786_v16  ;;  %8426 = vmatprep.mubr.msk.f32.mxu0 %vm2239_vm11, %v14786_v16  ;;  %v8407_v16 = vld [vmem:[%s14389_s3 + $0x668] sm:$0xff] }
 0x391   : > { %9044 = vmatprep.subr.bf16.mxu1 %v9043_v53  ;;  %9083 = vmatprep.subr.bf16.mxu0 %v14492_v10  ;;  %v9051_v42 = vpack.c.bf16 %v8410_v60, %v8407_v16 }
 0x393   : > { %9046 = vmatpush1.bf16.msra.mxu1 %v9045_v46  ;;  %9085 = vmatpush1.bf16.msra.mxu0 %v9084_v24  ;;  %v6766_v46 = vld [vmem:[#allocation2 + $0x20] sm:$0xff]  ;;  %v6767_v24 = vld [vmem:[#allocation2 + $0x28] sm:$0xff] }
 0x394   : > { %9048 = vmatprep.subr.bf16.mxu1 %v9047_v49  ;;  %9086 = vmatprep.subr.bf16.mxu0 %v14492_v10  ;;  %v7029_v49 = vld [vmem:[#allocation2 + $0xe8] sm:$0xff]  ;;  %v9102_v0 = vpack.c.bf16 %v6767_v24, %v6766_v46 }
 0x395   : > { %v9138_v8 = vpack.c.bf16 %v7029_v49, %v7028_v40 }
 0x397   : > { %9050 = vmatpush1.bf16.msra.mxu1 %v9049_v17  ;;  %9088 = vmatpush1.bf16.msra.mxu0 %v9087_v56 }
 0x398   : > { %9052 = vmatprep.subr.bf16.mxu1 %v9051_v42  ;;  %9089 = vmatprep.subr.bf16.mxu0 %v14492_v10 }
 0x39b   : > { %9054 = vmatpush1.bf16.msra.mxu1 %v9053_v63  ;;  %9091 = vmatpush1.bf16.msra.mxu0 %v9090_v1 }
 0x39c   : > { %9056 = vmatprep.subr.bf16.mxu1 %v9055_v32  ;;  %9092 = vmatprep.subr.bf16.mxu0 %v14492_v10 }
 0x39e   : > { %v13167_v33 = vpop.f32.mrb[80].mxu0 }
 0x39f   : > { %9058 = vmatpush1.bf16.msra.mxu1 %v9057_v21  ;;  %9094 = vmatpush1.bf16.msra.mxu0 %v9093_v61  ;;  %v4816_v48 = vpop.f32.mrb[81].mxu0 }
 0x3a0   : > { %9095 = vmatprep.subr.bf16.mxu1 %v14492_v10  ;;  %9131 = vmatprep.subr.bf16.mxu0 %v14492_v10 }
 0x3a2   : > { %5401 = vmatmul.mubr.f32.vlgmr.msra.gmra.mrb[96].mxu1 %v14787_v28  ;;  %5514 = vmatmul.mubr.f32.vlgmr.msra.gmra.mrb[112].mxu0 %v14787_v28  ;;  %v4701_v28 = vpop.f32.mrb[64].mxu1 }
 0x3a3   : > { %8419 = vmatprep.mubr.msk.f32.mxu1 %vm2239_vm11, %v14788_v54  ;;  %8427 = vmatprep.mubr.msk.f32.mxu0 %vm2239_vm11, %v14788_v54  ;;  %v13170_v54 = vadd.f32 %v4701_v28, %v13159_v2  ;;  %v13172_v12 = vpop.f32.mrb[65].mxu1  ;;  %v13266_v28 = vadd.s32 16, %v14792_v5 }
 0x3a5   : > { %14794 = vst [vmem:[#allocation55_spill] sm:$0xff] %v13266_v28 }
 0x3a6   : > { %5407 = vmatmul.mubr.f32.gmra.mrb[98].mxu1 %v14789_v47  ;;  %5519 = vmatmul.mubr.f32.gmra.mrb[114].mxu0 %v14789_v47 }
 0x3a7   : > { %8420 = vmatprep.mubr.msk.f32.mxu1 %vm2239_vm11, %v14790_v41  ;;  %8428 = vmatprep.mubr.msk.f32.mxu0 %vm2239_vm11, %v14790_v41  ;;  %v6762_v41 = vld [vmem:[#allocation2] sm:$0xff] }
 0x3aa   : > { %5413 = vmatmul.mubr.f32.gmra.mrb[100].mxu1 %v14791_v58  ;;  %5524 = vmatmul.mubr.f32.gmra.mrb[116].mxu0 %v14791_v58  ;;  %v6763_v58 = vld [vmem:[#allocation2 + $0x8] sm:$0xff] }
 0x3ab   : > { %8421 = vmatprep.mubr.msk.f32.mxu1 %vm2239_vm11, %v12525_v4  ;;  %8429 = vmatprep.mubr.msk.f32.mxu0 %vm2239_vm11, %v12525_v4  ;;  %v9096_v50 = vpack.c.bf16 %v6763_v58, %v6762_v41 }
 0x3ad   : > { %9097 = vmatpush1.bf16.msra.mxu1 %v9096_v50 }
 0x3ae   : > { %5419 = vmatmul.mubr.f32.gmra.mrb[102].mxu1 %v12554_v20  ;;  %5529 = vmatmul.mubr.f32.gmra.mrb[118].mxu0 %v12554_v20 }
 0x3af   : > { %8422 = vmatprep.mubr.msk.f32.mxu1 %vm2239_vm11, %v12635_v31  ;;  %8430 = vmatprep.mubr.msk.f32.mxu0 %vm2239_vm11, %v12635_v31 }
 0x3b0   : > { %9098 = vmatprep.subr.bf16.mxu1 %v14492_v10 }
 0x3b1   : > { %9100 = vmatpush1.bf16.msra.mxu1 %v9099_v3 }
 0x3b2   : > { %5425 = vmatmul.mubr.f32.gmra.mrb[104].mxu1 %v12652_v15  ;;  %5534 = vmatmul.mubr.f32.gmra.mrb[120].mxu0 %v12652_v15 }
 0x3b3   : > { %8423 = vmatprep.mubr.msk.f32.mxu1 %vm2239_vm11, %v12718_v18  ;;  %8431 = vmatprep.mubr.msk.f32.mxu0 %vm2239_vm11, %v12718_v18 }
 0x3b4   : > { %9101 = vmatprep.subr.bf16.mxu1 %v14492_v10 }
 0x3b5   : > { %v4707_v4 = vpop.f32.mrb[66].mxu1  ;;  %v13204_v20 = vpop.f32.mrb[82].mxu0  ;;  %9103 = vmatpush1.bf16.msra.mxu1 %v9102_v0 }
 0x3b6   : > { %5431 = vmatmul.mubr.f32.gmra.mrb[106].mxu1 %v12713_v55  ;;  %5539 = vmatmul.mubr.f32.gmra.mrb[122].mxu0 %v12713_v55  ;;  %v13207_v31 = vadd.f32 %v4707_v4, %v13159_v2  ;;  %v13209_v15 = vpop.f32.mrb[67].mxu1  ;;  %v4821_v55 = vpop.f32.mrb[83].mxu0 }
 0x3b7   : > { %8424 = vmatprep.mubr.msk.f32.mxu1 %vm2239_vm11, %v12788_v30  ;;  %8432 = vmatprep.mubr.msk.f32.mxu0 %vm2239_vm11, %v12788_v30  ;;  %v14795_v55 = vsub.s32 2, %v14792_v5 }
 0x3b8   : > { %9104 = vmatprep.subr.bf16.mxu1 %v14492_v10 }
 0x3ba   : > { %5437 = vmatmul.mubr.f32.gmra.mrb[108].mxu1 %v12806_v34  ;;  %5544 = vmatmul.mubr.f32.gmra.mrb[124].mxu0 %v12806_v34 }
 0x3bb   : > { %8425 = vmatprep.mubr.msk.f32.mxu1 %vm2239_vm11, %v12856_v44  ;;  %8433 = vmatprep.mubr.msk.f32.mxu0 %vm2239_vm11, %v12856_v44 }
 0x3be   : > { %5443 = vmatmul.mubr.f32.gmra.mrb[110].mxu1 %v12877_v27  ;;  %5549 = vmatmul.mubr.f32.gmra.mrb[126].mxu0 %v12877_v27  ;;  %v9132_v27 = vpack.c.bf16 %v7025_v52, %v7024_v19  ;;  %v4196_v19 = vand.u32 15, %v13266_v28 }
 0x3c0   : > { %9133 = vmatpush1.bf16.msra.mxu0 %v9132_v27  ;;  %vm13307_vm7 = vcmp.eq.s32.totalorder %v4196_v19, 0 }
 0x3c1   : > { %9134 = vmatprep.subr.bf16.mxu0 %v14492_v10 }
 0x3c4   : > { %9136 = vmatpush1.bf16.msra.mxu0 %v9135_v36 }
 0x3c5   : > { %9137 = vmatprep.subr.bf16.mxu0 %v14492_v10 }
 0x3c8   : > { %9139 = vmatpush1.bf16.msra.mxu0 %v9138_v8 }
 0x3c9   : > { %9140 = vmatprep.subr.bf16.mxu0 %v14492_v10 }
 0x3e6   : > { %v4713_v18 = vpop.f32.mrb[68].mxu1  ;;  %v13213_v30 = vpop.f32.mrb[84].mxu0 }
 0x3e7   : > { %v13216_v34 = vadd.f32 %v4713_v18, %v13159_v2  ;;  %v13218_v44 = vpop.f32.mrb[69].mxu1  ;;  %v4826_v47 = vpop.f32.mrb[85].mxu0  ;;  %v13273_v18 = vrot.slane %v13148_v43, %v14795_v55 }
 0x3e9   : > { %v4820_v11 = vadd.f32 %v13204_v20, %v13273_v18 }
 0x420   : > { %v4719_v7 = vpop.f32.mrb[70].mxu1  ;;  %v13220_v37 = vpop.f32.mrb[86].mxu0 }
 0x421   : > { %v13223_v38 = vadd.f32 %v4719_v7, %v13159_v2  ;;  %v13225_v26 = vpop.f32.mrb[71].mxu1  ;;  %v4831_v53 = vpop.f32.mrb[87].mxu0 }
 0x42b   : > { %v4725_v13 = vpop.f32.mrb[72].mxu1  ;;  %v13231_v16 = vpop.f32.mrb[88].mxu0 }
 0x42c   : > { %v13234_v60 = vadd.f32 %v4725_v13, %v13159_v2  ;;  %v13236_v17 = vpop.f32.mrb[73].mxu1  ;;  %v4836_v56 = vpop.f32.mrb[89].mxu0 }
 0x432   : > { %v4731_v59 = vpop.f32.mrb[74].mxu1  ;;  %v13240_v42 = vpop.f32.mrb[90].mxu0 }
 0x433   : > { %v13243_v9 = vadd.f32 %v4731_v59, %v13159_v2  ;;  %v13245_v23 = vpop.f32.mrb[75].mxu1  ;;  %v4841_v25 = vpop.f32.mrb[91].mxu0 }
 0x434   : > { %v14799_v25 = vld [vmem:[#allocation12_spill] sm:$0xff] }
 0x438   : > { %v4737_v14 = vpop.f32.mrb[76].mxu1 }
 0x439   : > { %v13247_v57 = vpop.f32.mrb[92].mxu0  ;;  %v13250_v63 = vadd.f32 %v4737_v14, %v13159_v2  ;;  %v13252_v1 = vpop.f32.mrb[77].mxu1  ;;  %v4210_v14 = vand.u32 15, %v14799_v25 }
 0x43a   : > { %v4846_v62 = vpop.f32.mrb[93].mxu0 }
 0x43b   : > { %v4825_v62 = vadd.f32 %v13213_v30, %v13273_v18  ;;  %vm13353_vm8 = vcmp.eq.s32.totalorder %v4210_v14, 0  ;;  %v4182_v14 = vand.u32 15, %v14792_v5 }
 0x43d   : > { %vm13406_vm10 = vcmp.eq.s32.totalorder %v4182_v14, 0 }
 0x441   : > { %v4743_v32 = vpop.f32.mrb[78].mxu1  ;;  %v13254_v6 = vpop.f32.mrb[94].mxu0 }
 0x442   : > { %v13257_v45 = vadd.f32 %v4743_v32, %v13159_v2  ;;  %v13259_v29 = vpop.f32.mrb[79].mxu1  ;;  %v4851_v21 = vpop.f32.mrb[95].mxu0  ;;  %v14796_v2 = vsub.s32 1, %v14792_v5 }
 0x444   : > { %v13278_v47 = vrot.slane %v13148_v43, %v14796_v2 }
 0x445   : > { %v13261_v61 = vpop.f32.mrb[80].mxu1  ;;  %v13263_v51 = vpop.f32.mrb[96].mxu0 }
 0x446   : > { %v13268_v48 = vpop.f32.mrb[81].mxu1  ;;  %v5106_v4 = vpop.f32.mrb[97].mxu0  ;;  %v5151_v50 = vrot.slane %v13261_v61, 7  ;;  %v5153_v52 = vrot.slane %v13263_v51, 7  ;;  %v4710_v43 = vadd.f32 %v13209_v15, %v13278_v47  ;;  %v4716_v55 = vadd.f32 %v13218_v44, %v13278_v47 }
 0x447   : > { %v5152_v39 = vrot.slane %v13268_v48, 7  ;;  %v317_v4 = vadd.s32 48, %v14792_v5 }
 0x449   : > { %v4997_v41 = vpop.f32.mrb[82].mxu1  ;;  %v5109_v58 = vpop.f32.mrb[98].mxu0 }
 0x44a   : > { %v5154_v35 = vrot.slane %v4997_v41, 7  ;;  %v5156_v22 = vrot.slane %v5109_v58, 7  ;;  %v4999_v7 = vpop.f32.mrb[83].mxu1  ;;  %v5111_v27 = vpop.f32.mrb[99].mxu0 }
 0x44b   : > { %v5155_v53 = vrot.slane %v4999_v7, 7 }
 0x44c   : > { %v5193_v3 = vsel %vm1334_vm1, %v5151_v50, %v5154_v35  ;;  %v5195_v36 = vsel %vm1334_vm1, %v5153_v52, %v5156_v22 }
 0x44d   : > { %v13297_v46 = vadd.f32 %v5193_v3, %v13207_v31  ;;  %v13299_v20 = vadd.f32 %v5195_v36, %v4820_v11  ;;  %v5194_v15 = vsel %vm1334_vm1, %v5152_v39, %v5155_v53  ;;  %v5003_v24 = vpop.f32.mrb[84].mxu1  ;;  %v5114_v40 = vpop.f32.mrb[100].mxu0 }
 0x44e   : > { %v13305_v49 = vadd.f32 %v5194_v15, %v4710_v43  ;;  %v5157_v8 = vrot.slane %v5003_v24, 7  ;;  %v5159_v13 = vrot.slane %v5114_v40, 7  ;;  %v5005_v56 = vpop.f32.mrb[85].mxu1  ;;  %v5116_v31 = vpop.f32.mrb[101].mxu0  ;;  %v4830_v43 = vadd.f32 %v13220_v37, %v13273_v18 }
 0x44f   : > { %v5158_v59 = vrot.slane %v5005_v56, 7 }
 0x450   : > { %v5190_v32 = vsel %vm1334_vm1, %v5154_v35, %v5157_v8  ;;  %v5192_v21 = vsel %vm1334_vm1, %v5156_v22, %v5159_v13 }
 0x451   : > { %v5221_v2 = vsel %vm13307_vm7, 0.0, %v5190_v32  ;;  %v5223_v41 = vsel %vm13307_vm7, 0.0, %v5192_v21  ;;  %v5191_v30 = vsel %vm1334_vm1, %v5155_v53, %v5158_v59  ;;  %v5009_v58 = vpop.f32.mrb[86].mxu1  ;;  %v5119_v19 = vpop.f32.mrb[102].mxu0  ;;  %v4722_v53 = vadd.f32 %v13225_v26, %v13278_v47 }
 0x452   : > { %v13328_v35 = vadd.f32 %v5221_v2, %v13216_v34  ;;  %v5222_v22 = vsel %vm13307_vm7, 0.0, %v5191_v30  ;;  %v5160_v7 = vrot.slane %v5009_v58, 7  ;;  %v5162_v27 = vrot.slane %v5119_v19, 7  ;;  %v5011_v44 = vpop.f32.mrb[87].mxu1  ;;  %v5121_v11 = vpop.f32.mrb[103].mxu0 }
 0x453   : > { %v5161_v3 = vrot.slane %v5011_v44, 7  ;;  %v13334_v36 = vadd.f32 %v5223_v41, %v4825_v62  ;;  %v13336_v15 = vadd.f32 %v5222_v22, %v4716_v55  ;;  %v4835_v55 = vadd.f32 %v13231_v16, %v13273_v18 }
 0x454   : > { %v5187_v34 = vsel %vm1334_vm1, %v5157_v8, %v5160_v7  ;;  %v5189_v24 = vsel %vm1334_vm1, %v5159_v13, %v5162_v27  ;;  %v4728_v41 = vadd.f32 %v13236_v17, %v13278_v47 }
 0x455   : > { %v13345_v40 = vadd.f32 %v5187_v34, %v13223_v38  ;;  %v13347_v0 = vadd.f32 %v5189_v24, %v4830_v43  ;;  %v5188_v37 = vsel %vm1334_vm1, %v5158_v59, %v5161_v3  ;;  %v5015_v56 = vpop.f32.mrb[88].mxu1  ;;  %v5124_v31 = vpop.f32.mrb[104].mxu0  ;;  %v4224_v38 = vand.u32 15, %v317_v4 }
 0x456   : > { %v13351_v25 = vadd.f32 %v5188_v37, %v4722_v53  ;;  %v5163_v8 = vrot.slane %v5015_v56, 7  ;;  %v5165_v62 = vrot.slane %v5124_v31, 7  ;;  %v5017_v32 = vpop.f32.mrb[89].mxu1  ;;  %v5126_v13 = vpop.f32.mrb[105].mxu0  ;;  %v4840_v43 = vadd.f32 %v13240_v42, %v13273_v18 }
 0x457   : > { %v5164_v21 = vrot.slane %v5017_v32, 7  ;;  %vm13398_vm9 = vcmp.eq.s32.totalorder %v4224_v38, 0  ;;  %v4845_v38 = vadd.f32 %v13247_v57, %v13273_v18 }
 0x458   : > { %v5184_v59 = vsel %vm1334_vm1, %v5160_v7, %v5163_v8  ;;  %v5186_v2 = vsel %vm1334_vm1, %v5162_v27, %v5165_v62 }
 0x459   : > { %v5227_v30 = vsel %vm13353_vm8, 0.0, %v5184_v59  ;;  %v5229_v4 = vsel %vm13353_vm8, 0.0, %v5186_v2  ;;  %v5185_v16 = vsel %vm1334_vm1, %v5161_v3, %v5164_v21  ;;  %v5021_v58 = vpop.f32.mrb[90].mxu1  ;;  %v5129_v19 = vpop.f32.mrb[106].mxu0  ;;  %v4734_v3 = vadd.f32 %v13245_v23, %v13278_v47 }
 0x45a   : > { %v13373_v22 = vadd.f32 %v5227_v30, %v13234_v60  ;;  %v5228_v7 = vsel %vm13353_vm8, 0.0, %v5185_v16  ;;  %v5166_v27 = vrot.slane %v5021_v58, 7  ;;  %v5168_v44 = vrot.slane %v5129_v19, 7  ;;  %v5023_v17 = vpop.f32.mrb[91].mxu1  ;;  %v5131_v11 = vpop.f32.mrb[107].mxu0 }
 0x45b   : > { %v5167_v53 = vrot.slane %v5023_v17, 7  ;;  %v13379_v34 = vadd.f32 %v5229_v4, %v4835_v55  ;;  %v13381_v24 = vadd.f32 %v5228_v7, %v4728_v41  ;;  %v4704_v2 = vadd.f32 %v13172_v12, %v13278_v47 }
 0x45c   : > { %v5181_v60 = vsel %vm1334_vm1, %v5163_v8, %v5166_v27  ;;  %v5183_v37 = vsel %vm1334_vm1, %v5165_v62, %v5168_v44  ;;  %v4740_v30 = vadd.f32 %v13252_v1, %v13278_v47  ;;  %v4850_v12 = vadd.f32 %v13254_v6, %v13273_v18 }
 0x45d   : > { %v13390_v56 = vadd.f32 %v5181_v60, %v13243_v9  ;;  %v13392_v31 = vadd.f32 %v5183_v37, %v4840_v43  ;;  %v5182_v42 = vsel %vm1334_vm1, %v5164_v21, %v5167_v53  ;;  %v5027_v26 = vpop.f32.mrb[92].mxu1  ;;  %v5134_v32 = vpop.f32.mrb[108].mxu0  ;;  %v4815_v9 = vadd.f32 %v13167_v33, %v13273_v18 }
 0x45e   : > { %v13396_v13 = vadd.f32 %v5182_v42, %v4734_v3  ;;  %v5169_v8 = vrot.slane %v5027_v26, 7  ;;  %v5171_v55 = vrot.slane %v5134_v32, 7  ;;  %v5029_v59 = vpop.f32.mrb[93].mxu1  ;;  %v5136_v62 = vpop.f32.mrb[109].mxu0  ;;  %v4746_v17 = vadd.f32 %v13259_v29, %v13278_v47 }
 0x45f   : > { %v5170_v41 = vrot.slane %v5029_v59, 7  ;;  %v7030_v59 = vld [vmem:[#allocation2 + $0xf0] sm:$0xff] }
 0x460   : > { %v5178_v4 = vsel %vm1334_vm1, %v5166_v27, %v5169_v8  ;;  %v5180_v33 = vsel %vm1334_vm1, %v5168_v44, %v5171_v55 }
 0x461   : > { %v5233_v14 = vsel %vm13398_vm9, 0.0, %v5178_v4  ;;  %v5235_v16 = vsel %vm13398_vm9, 0.0, %v5180_v33  ;;  %v5179_v57 = vsel %vm1334_vm1, %v5167_v53, %v5170_v41  ;;  %v5033_v58 = vpop.f32.mrb[94].mxu1  ;;  %v5139_v1 = vpop.f32.mrb[110].mxu0 }
 0x462   : > { %v13427_v19 = vadd.f32 %v5233_v14, %v13250_v63  ;;  %v5234_v7 = vsel %vm13398_vm9, 0.0, %v5179_v57  ;;  %v5172_v27 = vrot.slane %v5033_v58, 7  ;;  %v5174_v44 = vrot.slane %v5139_v1, 7  ;;  %v5035_v6 = vpop.f32.mrb[95].mxu1  ;;  %v5141_v18 = vpop.f32.mrb[111].mxu0 }
 0x463   : > { %v5173_v11 = vrot.slane %v5035_v6, 7  ;;  %v13433_v43 = vadd.f32 %v5235_v16, %v4845_v38  ;;  %v13435_v3 = vadd.f32 %v5234_v7, %v4740_v30  ;;  %v7031_v38 = vld [vmem:[#allocation2 + $0xf8] sm:$0xff] }
 0x464   : > { %v5175_v53 = vsel %vm1334_vm1, %v5169_v8, %v5172_v27  ;;  %v5196_v63 = vsel %vm1334_vm1, %v5172_v27, %v5151_v50  ;;  %v5177_v60 = vsel %vm1334_vm1, %v5171_v55, %v5174_v44  ;;  %v5198_v29 = vsel %vm1334_vm1, %v5174_v44, %v5153_v52  ;;  %v6768_v8 = vld [vmem:[#allocation2 + $0x30] sm:$0xff]  ;;  %v6769_v55 = vld [vmem:[#allocation2 + $0x38] sm:$0xff] }
 0x465   : > { %v5215_v47 = vsel %vm13406_vm10, 0.0, %v5196_v63  ;;  %v13452_v37 = vadd.f32 %v5175_v53, %v13257_v45  ;;  %v5217_v61 = vsel %vm13406_vm10, 0.0, %v5198_v29  ;;  %v13456_v42 = vadd.f32 %v5177_v60, %v4850_v12 }
 0x466   : > { %v5239_v50 = vadd.f32 %v5215_v47, %v13170_v54  ;;  %v5176_v26 = vsel %vm1334_vm1, %v5170_v41, %v5173_v11  ;;  %v5197_v51 = vsel %vm1334_vm1, %v5173_v11, %v5152_v39  ;;  %v5241_v52 = vadd.f32 %v5217_v61, %v4815_v9 }
 0x467   : > { %v5216_v45 = vsel %vm13406_vm10, 0.0, %v5197_v51  ;;  %v13467_v32 = vadd.f32 %v5176_v26, %v4746_v17  ;;  %v13474_v41 = vadd.s32 8, %v14792_v5  ;;  %v9105_v48 = vpack.c.bf16 %v6769_v55, %v6768_v8 }
 0x468   : > { %v5240_v23 = vadd.f32 %v5216_v45, %v4704_v2  ;;  %v9141_v21 = vpack.c.bf16 %v7031_v38, %v7030_v59  ;;  %v14809_v38 = vld [vmem:[#allocation24_spill] sm:$0xff] }
 0x469   : > { %14806 = vst [vmem:[#allocation54_spill] sm:$0xff] %v13474_v41  ;;  %9106 = vmatpush1.bf16.msra.mxu1 %v9105_v48  ;;  %v4189_v4 = vand.u32 15, %v13474_v41 }
 0x46a   : > { %9142 = vmatpush1.bf16.msra.mxu0 %v9141_v21  ;;  %9107 = vmatprep.subr.bf16.mxu1 %v14492_v10 }
 0x46b   : > { %9143 = vmatprep.subr.bf16.mxu0 %v14492_v10  ;;  %vm13498_vm1 = vcmp.eq.s32.totalorder %v4189_v4, 15 }
 0x475   : > { %v13469_v62 = vpop.f32.mrb[96].mxu1  ;;  %v13471_v54 = vpop.f32.mrb[112].mxu0 }
 0x476   : > { %v13476_v39 = vpop.f32.mrb[97].mxu1  ;;  %v5517_v9 = vpop.f32.mrb[113].mxu0  ;;  %v5562_v33 = vrot.slane %v13469_v62, 1  ;;  %v5564_v12 = vrot.slane %v13471_v54, 1 }
 0x477   : > { %v5563_v1 = vrot.slane %v13476_v39, 1  ;;  %v4203_v9 = vand.u32 15, %v14809_v38 }
 0x479   : > { %v5408_v2 = vpop.f32.mrb[98].mxu1  ;;  %v5520_v30 = vpop.f32.mrb[114].mxu0  ;;  %vm13536_vm7 = vcmp.eq.s32.totalorder %v4203_v9, 15 }
 0x47a   : > { %v5565_v14 = vrot.slane %v5408_v2, 1  ;;  %v5567_v16 = vrot.slane %v5520_v30, 1  ;;  %v5410_v57 = vpop.f32.mrb[99].mxu1  ;;  %v5522_v58 = vpop.f32.mrb[115].mxu0 }
 0x47b   : > { %v5566_v7 = vrot.slane %v5410_v57, 1 }
 0x47c   : > { %v5604_v27 = vsel %vm1918_vm6, %v5562_v33, %v5565_v14  ;;  %v5606_v44 = vsel %vm1918_vm6, %v5564_v12, %v5567_v16 }
 0x47d   : > { %v5605_v6 = vsel %vm1918_vm6, %v5563_v1, %v5566_v7  ;;  %v5414_v18 = vpop.f32.mrb[100].mxu1  ;;  %v5525_v17 = vpop.f32.mrb[116].mxu0  ;;  %v5652_v11 = vadd.f32 %v5606_v44, %v5241_v52  ;;  %v13496_v53 = vadd.f32 %v5604_v27, %v5239_v50 }
 0x47e   : > { %v5568_v60 = vrot.slane %v5414_v18, 1  ;;  %v5570_v29 = vrot.slane %v5525_v17, 1  ;;  %v5416_v47 = vpop.f32.mrb[101].mxu1  ;;  %v5527_v61 = vpop.f32.mrb[117].mxu0  ;;  %v13502_v26 = vadd.f32 %v5605_v6, %v5240_v23  ;;  %v316_v17 = vadd.s32 40, %v14792_v5 }
 0x47f   : > { %v5569_v51 = vrot.slane %v5416_v47, 1  ;;  %v5676_v45 = vmax.f32 %v5652_v11, 0.0 }
 0x480   : > { %v5601_v8 = vsel %vm1918_vm6, %v5565_v14, %v5568_v60  ;;  %v5603_v52 = vsel %vm1918_vm6, %v5567_v16, %v5570_v29  ;;  %v5675_v50 = vmax.f32 %v13502_v26, 0.0 }
 0x481   : > { %v5629_v55 = vsel %vm13498_vm1, 0.0, %v5601_v8  ;;  %v5602_v59 = vsel %vm1918_vm6, %v5566_v7, %v5569_v51  ;;  %v5530_v48 = vpop.f32.mrb[118].mxu0  ;;  %5716 = vrot.lane.b32.xlu1 %v5676_v45, %s9540_s14  ;;  %v5420_v23 = vpop.f32.mrb[102].mxu1  ;;  %v5631_v21 = vsel %vm13498_vm1, 0.0, %v5603_v52 }
 0x482   : > { %v5573_v2 = vrot.slane %v5530_v48, 1  ;;  %v5571_v30 = vrot.slane %v5420_v23, 1  ;;  %v5422_v4 = vpop.f32.mrb[103].mxu1  ;;  %v5532_v14 = vpop.f32.mrb[119].mxu0  ;;  %5714 = vrot.lane.b32.xlu0 %v5675_v50, %s9540_s14  ;;  %v5655_v16 = vadd.f32 %v5631_v21, %v13299_v20  ;;  %v5630_v57 = vsel %vm13498_vm1, 0.0, %v5602_v59 }
 0x483   : > { %v5572_v58 = vrot.slane %v5422_v4, 1  ;;  %v13524_v7 = vadd.f32 %v5630_v57, %v13305_v49  ;;  %v13527_v27 = vadd.f32 %v5629_v55, %v13297_v46  ;;  %v4217_v23 = vand.u32 15, %v316_v17 }
 0x484   : > { %v5600_v44 = vsel %vm1918_vm6, %v5570_v29, %v5573_v2  ;;  %v5598_v6 = vsel %vm1918_vm6, %v5568_v60, %v5571_v30  ;;  %v5679_v18 = vmax.f32 %v5655_v16, 0.0 }
 0x485   : > { %v5599_v20 = vsel %vm1918_vm6, %v5569_v51, %v5572_v58  ;;  %v5426_v11 = vpop.f32.mrb[104].mxu1  ;;  %v5535_v49 = vpop.f32.mrb[120].mxu0  ;;  %v5678_v46 = vmax.f32 %v13524_v7, 0.0  ;;  %v5658_v47 = vadd.f32 %v5600_v44, %v13334_v36  ;;  %v13547_v51 = vadd.f32 %v5598_v6, %v13328_v35 }
 0x486   : > { %v5574_v29 = vrot.slane %v5426_v11, 1  ;;  %v5576_v61 = vrot.slane %v5535_v49, 1  ;;  %v5537_v45 = vpop.f32.mrb[121].mxu0  ;;  %5720 = vrot.lane.b32.xlu1 %v5679_v18, %s9540_s14  ;;  %v5428_v60 = vpop.f32.mrb[105].mxu1  ;;  %v13544_v8 = vadd.f32 %v5599_v20, %v13336_v15  ;;  %vm13580_vm8 = vcmp.eq.s32.totalorder %v4217_v23, 15 }
 0x487   : > { %v5575_v52 = vrot.slane %v5428_v60, 1  ;;  %5718 = vrot.lane.b32.xlu0 %v5678_v46, %s9540_s14  ;;  %v5682_v55 = vmax.f32 %v5658_v47, 0.0 }
 0x488   : > { %v5595_v36 = vsel %vm1918_vm6, %v5571_v30, %v5574_v29  ;;  %v5597_v59 = vsel %vm1918_vm6, %v5573_v2, %v5576_v61  ;;  %v5681_v48 = vmax.f32 %v13544_v8, 0.0 }
 0x489   : > { %v5635_v15 = vsel %vm13536_vm7, 0.0, %v5595_v36  ;;  %v5596_v35 = vsel %vm1918_vm6, %v5572_v58, %v5575_v52  ;;  %v5432_v9 = vpop.f32.mrb[106].mxu1  ;;  %v5540_v21 = vpop.f32.mrb[122].mxu0  ;;  %v5637_v4 = vsel %vm13536_vm7, 0.0, %v5597_v59 }
 0x48a   : > { %v5577_v14 = vrot.slane %v5432_v9, 1  ;;  %v5579_v16 = vrot.slane %v5540_v21, 1  ;;  %v5542_v30 = vpop.f32.mrb[123].mxu0  ;;  %5724 = vrot.lane.b32.xlu1 %v5682_v55, %s9540_s14  ;;  %v5434_v2 = vpop.f32.mrb[107].mxu1  ;;  %v5661_v57 = vadd.f32 %v5637_v4, %v13347_v0  ;;  %v5636_v44 = vsel %vm13536_vm7, 0.0, %v5596_v35 }
 0x48b   : > { %v5578_v6 = vrot.slane %v5434_v2, 1  ;;  %5722 = vrot.lane.b32.xlu0 %v5681_v48, %s9540_s14  ;;  %v13571_v58 = vadd.f32 %v5636_v44, %v13351_v25  ;;  %v13574_v18 = vadd.f32 %v5635_v15, %v13345_v40  ;;  %v14814_v40 = vld [vmem:[#allocation9_spill] sm:$0xff] }
 0x48c   : > { %v5592_v17 = vsel %vm1918_vm6, %v5574_v29, %v5577_v14  ;;  %v5594_v0 = vsel %vm1918_vm6, %v5576_v61, %v5579_v16  ;;  %v5685_v11 = vmax.f32 %v5661_v57, 0.0  ;;  %v4231_v45 = vand.u32 15, %v14814_v40  ;;  %v7033_v40 = vld [vmem:[#allocation2 + $0x108] sm:$0xff] }
 0x48d   : > { %v5593_v63 = vsel %vm1918_vm6, %v5575_v52, %v5578_v6  ;;  %v5438_v49 = vpop.f32.mrb[108].mxu1  ;;  %v5545_v25 = vpop.f32.mrb[124].mxu0  ;;  %v5684_v47 = vmax.f32 %v13571_v58, 0.0  ;;  %v5664_v60 = vadd.f32 %v5594_v0, %v13379_v34  ;;  %v13594_v23 = vadd.f32 %v5592_v17, %v13373_v22 }
 0x48e   : > { %v5580_v29 = vrot.slane %v5438_v49, 1  ;;  %v5582_v55 = vrot.slane %v5545_v25, 1  ;;  %v5547_v36 = vpop.f32.mrb[125].mxu0  ;;  %5728 = vrot.lane.b32.xlu1 %v5685_v11, %s9540_s14  ;;  %v5440_v61 = vpop.f32.mrb[109].mxu1  ;;  %v13591_v59 = vadd.f32 %v5593_v63, %v13381_v24  ;;  %vm13608_vm9 = vcmp.eq.s32.totalorder %v4231_v45, 15  ;;  %v7032_v63 = vld [vmem:[#allocation2 + $0x100] sm:$0xff] }
 0x48f   : > { %v5581_v52 = vrot.slane %v5440_v61, 1  ;;  %5726 = vrot.lane.b32.xlu0 %v5684_v47, %s9540_s14  ;;  %v5688_v15 = vmax.f32 %v5664_v60, 0.0  ;;  %v6770_v45 = vld [vmem:[#allocation2 + $0x40] sm:$0xff] }
 0x490   : > { %v5589_v34 = vsel %vm1918_vm6, %v5577_v14, %v5580_v29  ;;  %v5591_v35 = vsel %vm1918_vm6, %v5579_v16, %v5582_v55  ;;  %v5687_v9 = vmax.f32 %v13591_v59, 0.0 }
 0x491   : > { %v5641_v24 = vsel %vm13580_vm8, 0.0, %v5589_v34  ;;  %v5590_v22 = vsel %vm1918_vm6, %v5578_v6, %v5581_v52  ;;  %v5444_v21 = vpop.f32.mrb[110].mxu1  ;;  %v5550_v30 = vpop.f32.mrb[126].mxu0  ;;  %v5643_v14 = vsel %vm13580_vm8, 0.0, %v5591_v35 }
 0x492   : > { %v5583_v2 = vrot.slane %v5444_v21, 1  ;;  %v5585_v57 = vrot.slane %v5550_v30, 1  ;;  %v5552_v16 = vpop.f32.mrb[127].mxu0  ;;  %5732 = vrot.lane.b32.xlu1 %v5688_v15, %s9540_s14  ;;  %v5446_v44 = vpop.f32.mrb[111].mxu1  ;;  %v5667_v17 = vadd.f32 %v5643_v14, %v13392_v31  ;;  %v5642_v6 = vsel %vm13580_vm8, 0.0, %v5590_v22  ;;  %v6773_v21 = vld [vmem:[#allocation2 + $0x58] sm:$0xff] }
 0x493   : > { %v5584_v0 = vrot.slane %v5446_v44, 1  ;;  %5730 = vrot.lane.b32.xlu0 %v5687_v9, %s9540_s14  ;;  %v13622_v11 = vadd.f32 %v5642_v6, %v13396_v13  ;;  %v13625_v49 = vadd.f32 %v5641_v24, %v13390_v56  ;;  %v6771_v56 = vld [vmem:[#allocation2 + $0x48] sm:$0xff]  ;;  %v6772_v24 = vld [vmem:[#allocation2 + $0x50] sm:$0xff]  ;;  %v7036_v30 = vld [vmem:[#allocation2 + $0x120] sm:$0xff] }
 0x494   : > { %v5586_v25 = vsel %vm1918_vm6, %v5580_v29, %v5583_v2  ;;  %v5607_v31 = vsel %vm1918_vm6, %v5583_v2, %v5562_v33  ;;  %v5588_v20 = vsel %vm1918_vm6, %v5582_v55, %v5585_v57  ;;  %v5609_v13 = vsel %vm1918_vm6, %v5585_v57, %v5564_v12  ;;  %v7037_v14 = vld [vmem:[#allocation2 + $0x128] sm:$0xff]  ;;  %v6774_v2 = vld [vmem:[#allocation2 + $0x60] sm:$0xff]  ;;  %v7039_v6 = vld [vmem:[#allocation2 + $0x138] sm:$0xff] }
 0x495   : > { %v5647_v60 = vsel %vm13608_vm9, 0.0, %v5607_v31  ;;  %v5587_v62 = vsel %vm1918_vm6, %v5581_v52, %v5584_v0  ;;  %v5608_v33 = vsel %vm1918_vm6, %v5584_v0, %v5563_v1  ;;  %v5691_v29 = vmax.f32 %v5667_v17, 0.0  ;;  %v6775_v16 = vld [vmem:[#allocation2 + $0x68] sm:$0xff]  ;;  %v7038_v17 = vld [vmem:[#allocation2 + $0x130] sm:$0xff] }
 0x496   : > { %v5690_v54 = vmax.f32 %v13622_v11, 0.0  ;;  %v5670_v55 = vadd.f32 %v5588_v20, %v13433_v43  ;;  %v13650_v12 = vadd.f32 %v5587_v62, %v13435_v3  ;;  %v5649_v36 = vsel %vm13608_vm9, 0.0, %v5609_v13  ;;  %v6776_v0 = vld [vmem:[#allocation2 + $0x70] sm:$0xff]  ;;  %v7040_v20 = vld [vmem:[#allocation2 + $0x140] sm:$0xff]  ;;  %v7041_v13 = vld [vmem:[#allocation2 + $0x148] sm:$0xff] }
 0x497   : > { %5736 = vrot.lane.b32.xlu1 %v5691_v29, %s9540_s14  ;;  %v5673_v61 = vadd.f32 %v5649_v36, %v13456_v42  ;;  %v5648_v39 = vsel %vm13608_vm9, 0.0, %v5608_v33  ;;  %v9144_v52 = vpack.c.bf16 %v7033_v40, %v7032_v63  ;;  %v9108_v1 = vpack.c.bf16 %v6771_v56, %v6770_v45  ;;  %v6778_v40 = vld [vmem:[#allocation2 + $0x80] sm:$0xff]  ;;  %v6779_v56 = vld [vmem:[#allocation2 + $0x88] sm:$0xff]  ;;  %v7042_v62 = vld [vmem:[#allocation2 + $0x150] sm:$0xff] }
 0x498   : > { %5734 = vrot.lane.b32.xlu0 %v5690_v54, %s9540_s14  ;;  %v5694_v43 = vmax.f32 %v5670_v55, 0.0  ;;  %v14474_v3 = vmax.f32 %v13650_v12, 0.0  ;;  %v13663_v15 = vadd.f32 %v5648_v39, %v13467_v32  ;;  %v13666_v34 = vadd.f32 %v5586_v25, %v13427_v19  ;;  %v7034_v19 = vld [vmem:[#allocation2 + $0x110] sm:$0xff]  ;;  %v6777_v25 = vld [vmem:[#allocation2 + $0x78] sm:$0xff]  ;;  %v7044_v39 = vld [vmem:[#allocation2 + $0x160] sm:$0xff] }
 0x499   : > { %9145 = vmatpush1.bf16.msra.mxu0 %v9144_v52  ;;  %9109 = vmatpush1.bf16.msra.mxu1 %v9108_v1  ;;  %v13669_v42 = vadd.f32 %v5647_v60, %v13452_v37  ;;  %v5697_v32 = vmax.f32 %v5673_v61, 0.0  ;;  %v7035_v37 = vld [vmem:[#allocation2 + $0x118] sm:$0xff]  ;;  %v9111_v4 = vpack.c.bf16 %v6773_v21, %v6772_v24  ;;  %v9150_v57 = vpack.c.bf16 %v7037_v14, %v7036_v30  ;;  %v6780_v29 = vld [vmem:[#allocation2 + $0x90] sm:$0xff]  ;;  %v7045_v52 = vld [vmem:[#allocation2 + $0x168] sm:$0xff] }
 0x49a   : > { %9110 = vmatprep.subr.bf16.mxu1 %v14492_v10  ;;  %9146 = vmatprep.subr.bf16.mxu0 %v14492_v10  ;;  %v14473_v35 = vmax.f32 %v13663_v15, 0.0  ;;  %v9147_v22 = vpack.c.bf16 %v7035_v37, %v7034_v19  ;;  %v9114_v44 = vpack.c.bf16 %v6775_v16, %v6774_v2  ;;  %v9153_v63 = vpack.c.bf16 %v7039_v6, %v7038_v17  ;;  %v7043_v33 = vld [vmem:[#allocation2 + $0x158] sm:$0xff]  ;;  %v6782_v1 = vld [vmem:[#allocation2 + $0xa0] sm:$0xff] }
 0x49b   : > { %5740 = vrot.lane.b32.xlu1 %v5694_v43, %s9540_s14  ;;  %v9117_v31 = vpack.c.bf16 %v6777_v25, %v6776_v0  ;;  %v9156_v45 = vpack.c.bf16 %v7041_v13, %v7040_v20  ;;  %v9120_v60 = vpack.c.bf16 %v6779_v56, %v6778_v40  ;;  %v9159_v55 = vpack.c.bf16 %v7043_v33, %v7042_v62  ;;  %v6781_v36 = vld [vmem:[#allocation2 + $0x98] sm:$0xff] }
 0x49c   : > { %5738 = vrot.lane.b32.xlu0 %v14474_v3, %s9540_s14  ;;  %v9123_v61 = vpack.c.bf16 %v6781_v36, %v6780_v29  ;;  %v9162_v43 = vpack.c.bf16 %v7045_v52, %v7044_v39  ;;  %v5677_v16 = vmax.f32 %v13527_v27, 0.0  ;;  %v14817_v17 = vld [vmem:[#allocation34_spill] sm:$0xff] }
 0x49d   : > { %9148 = vmatpush1.bf16.msra.mxu0 %v9147_v22  ;;  %9112 = vmatpush1.bf16.msra.mxu1 %v9111_v4  ;;  %v5674_v22 = vmax.f32 %v13496_v53, 0.0 }
 0x49e   : > { %9149 = vmatprep.subr.bf16.mxu0 %v14492_v10  ;;  %9113 = vmatprep.subr.bf16.mxu1 %v14492_v10 }
 0x49f   : > { %5744 = vrot.lane.b32.xlu1 %v5697_v32, %s9540_s14  ;;  %v6783_v32 = vld [vmem:[#allocation2 + $0xa8] sm:$0xff] }
 0x4a0   : > { %5742 = vrot.lane.b32.xlu0 %v14473_v35, %s9540_s14  ;;  %v9126_v19 = vpack.c.bf16 %v6783_v32, %v6782_v1 }
 0x4a1   : > { %9151 = vmatpush1.bf16.msra.mxu0 %v9150_v57  ;;  %9115 = vmatpush1.bf16.msra.mxu1 %v9114_v44 }
 0x4a2   : > { %9152 = vmatprep.subr.bf16.mxu0 %v14492_v10  ;;  %9116 = vmatprep.subr.bf16.mxu1 %v14492_v10 }
 0x4a5   : > { %9154 = vmatpush1.bf16.msra.mxu0 %v9153_v63  ;;  %9118 = vmatpush1.bf16.msra.mxu1 %v9117_v31 }
 0x4a6   : > { %9155 = vmatprep.subr.bf16.mxu0 %v14492_v10  ;;  %9119 = vmatprep.subr.bf16.mxu1 %v14492_v10 }
 0x4a9   : > { %9157 = vmatpush1.bf16.msra.mxu0 %v9156_v45  ;;  %9121 = vmatpush1.bf16.msra.mxu1 %v9120_v60 }
 0x4aa   : > { %9158 = vmatprep.subr.bf16.mxu0 %v14492_v10  ;;  %9122 = vmatprep.subr.bf16.mxu1 %v14492_v10 }
 0x4ad   : > { %9160 = vmatpush1.bf16.msra.mxu0 %v9159_v55  ;;  %9124 = vmatpush1.bf16.msra.mxu1 %v9123_v61 }
 0x4ae   : > { %9161 = vmatprep.subr.bf16.mxu0 %v14492_v10  ;;  %9125 = vmatprep.subr.bf16.mxu1 %v14492_v10 }
 0x4b1   : > { %9163 = vmatpush1.bf16.msra.mxu0 %v9162_v43  ;;  %9127 = vmatpush1.bf16.msra.mxu1 %v9126_v19 }
 0x4b2   : > { %9164 = vmatprep.subr.bf16.mxu0 %v14492_v10  ;;  %9128 = vmatprep.subr.bf16.mxu1 %v14492_v10 }
 0x4f3   : > { %v5717_v37 = vpop.permute.xlu1 %5716 }
 0x4f4   : > { %v5715_v24 = vpop.permute.xlu0 %5714  ;;  %v5771_v4 = vmax.f32 %v5675_v50, %v5717_v37 }
 0x4f5   : > { %v5746_v21 = vsel %vm2239_vm11, %v5715_v24, %v5717_v37 }
 0x4f6   : > { %v5770_v30 = vmax.f32 %v5674_v22, %v5746_v21 }
 0x4f8   : > { %v5802_v14 = vcombine.low %v5770_v30, %v5771_v4  ;;  %v5803_v2 = vcombine.high %v5770_v30, %v5771_v4  ;;  %v5721_v57 = vpop.permute.xlu1 %5720 }
 0x4f9   : > { %v5719_v44 = vpop.permute.xlu0 %5718  ;;  %v5773_v53 = vmax.f32 %v5678_v46, %v5721_v57 }
 0x4fa   : > { %v5810_v6 = vrot.slane %v5802_v14, %v14817_v17  ;;  %v5817_v0 = vrot.slane %v5803_v2, %v14817_v17  ;;  %v5747_v63 = vsel %vm2239_vm11, %v5719_v44, %v5721_v57 }
 0x4fb   : > { %v5772_v25 = vmax.f32 %v5677_v16, %v5747_v63 }
 0x4fc   : > { %v5818_v31 = vcombine.high %v5810_v6, %v5810_v6  ;;  %v5819_v26 = vcombine.high %v5817_v0, %v5817_v0  ;;  %v5952_v50 = vrot.slane %v5810_v6, %v14817_v17  ;;  %v5968_v20 = vrot.slane %v5817_v0, %v14817_v17 }
 0x4fd   : > { %v5820_v13 = vcombine.low %v5772_v25, %v5773_v53  ;;  %v5821_v7 = vcombine.high %v5772_v25, %v5773_v53 }
 0x4fe   : > { %v5953_v40 = vcombine.high %v5952_v50, %v5952_v50  ;;  %v5960_v27 = vrot.slane %v5818_v31, %v14817_v17  ;;  %v5969_v45 = vcombine.high %v5968_v20, %v5968_v20  ;;  %v5976_v56 = vrot.slane %v5819_v26, %v14817_v17 }
 0x4ff   : > { %v6266_v60 = vsel %vm3280_vm12, %v5952_v50, -inf  ;;  %v6294_v62 = vsel %vm3280_vm12, %v5968_v20, -inf  ;;  %v5828_v46 = vrot.slane %v5820_v13, %v14817_v17 }
 0x500   : > { %v5961_v33 = vcombine.high %v5960_v27, %v5960_v27  ;;  %v5977_v29 = vcombine.high %v5976_v56, %v5976_v56  ;;  %v6267_v55 = vrot.slane %v6266_v60, 4  ;;  %v6273_v36 = vsel %vm3288_vm13, %v5953_v40, -inf }
 0x501   : > { %v6274_v61 = vrot.slane %v6273_v36, 4  ;;  %v6280_v39 = vsel %vm3280_vm12, %v5960_v27, -inf  ;;  %v6295_v52 = vrot.slane %v6294_v62, 4  ;;  %v6301_v1 = vsel %vm3288_vm13, %v5969_v45, -inf }
 0x502   : > { %v6268_v43 = vmax.f32 %v6266_v60, %v6267_v55  ;;  %v6281_v32 = vrot.slane %v6280_v39, 4  ;;  %v6287_v19 = vsel %vm3288_vm13, %v5961_v33, -inf  ;;  %v6302_v37 = vrot.slane %v6301_v1, 4 }
 0x503   : > { %v6275_v24 = vmax.f32 %v6273_v36, %v6274_v61  ;;  %v6288_v22 = vrot.slane %v6287_v19, 4  ;;  %v6296_v21 = vmax.f32 %v6294_v62, %v6295_v52  ;;  %v6308_v4 = vsel %vm3280_vm12, %v5976_v56, -inf }
 0x504   : > { %v6269_v30 = vrot.slane %v6268_v43, 2  ;;  %v6282_v14 = vmax.f32 %v6280_v39, %v6281_v32  ;;  %v6303_v2 = vmax.f32 %v6301_v1, %v6302_v37  ;;  %v6309_v57 = vrot.slane %v6308_v4, 4 }
 0x505   : > { %v6276_v16 = vrot.slane %v6275_v24, 2  ;;  %v6289_v44 = vmax.f32 %v6287_v19, %v6288_v22  ;;  %v6297_v6 = vrot.slane %v6296_v21, 2  ;;  %v6315_v0 = vsel %vm3288_vm13, %v5977_v29, -inf }
 0x506   : > { %v6270_v63 = vmax.f32 %v6268_v43, %v6269_v30  ;;  %v6283_v53 = vrot.slane %v6282_v14, 2  ;;  %v6304_v25 = vrot.slane %v6303_v2, 2  ;;  %v6310_v31 = vmax.f32 %v6308_v4, %v6309_v57 }
 0x507   : > { %v6277_v26 = vmax.f32 %v6275_v24, %v6276_v16  ;;  %v6290_v50 = vrot.slane %v6289_v44, 2  ;;  %v6298_v20 = vmax.f32 %v6296_v21, %v6297_v6  ;;  %v6316_v13 = vrot.slane %v6315_v0, 4 }
 0x508   : > { %v6271_v40 = vrot.slane %v6270_v63, 1  ;;  %v6284_v27 = vmax.f32 %v6282_v14, %v6283_v53  ;;  %v6305_v45 = vmax.f32 %v6303_v2, %v6304_v25  ;;  %v6311_v56 = vrot.slane %v6310_v31, 2 }
 0x509   : > { %v6291_v60 = vmax.f32 %v6289_v44, %v6290_v50  ;;  %v6317_v62 = vmax.f32 %v6315_v0, %v6316_v13  ;;  %v5835_v33 = vrot.slane %v5821_v7, %v14817_v17  ;;  %v5680_v55 = vmax.f32 %v13547_v51, 0.0 }
 0x50a   : > { %v6278_v36 = vrot.slane %v6277_v26, 1  ;;  %v6285_v29 = vrot.slane %v6284_v27, 1  ;;  %v6312_v61 = vmax.f32 %v6310_v31, %v6311_v56  ;;  %v5683_v39 = vmax.f32 %v13574_v18, 0.0 }
 0x50b   : > { %v6272_v52 = vmax.f32 %v6270_v63, %v6271_v40  ;;  %v6292_v1 = vrot.slane %v6291_v60, 1  ;;  %v6299_v43 = vrot.slane %v6298_v20, 1  ;;  %v6306_v32 = vrot.slane %v6305_v45, 1 }
 0x50c   : > { %v6286_v19 = vmax.f32 %v6284_v27, %v6285_v29  ;;  %v6313_v37 = vrot.slane %v6312_v61, 1  ;;  %v6318_v24 = vrot.slane %v6317_v62, 2  ;;  %v5836_v22 = vcombine.high %v5828_v46, %v5828_v46 }
 0x50d   : > { %v5837_v21 = vcombine.high %v5835_v33, %v5835_v33  ;;  %v5984_v4 = vrot.slane %v5828_v46, %v14817_v17  ;;  %v5686_v7 = vmax.f32 %v13594_v23, 0.0  ;;  %v6279_v14 = vmax.f32 %v6277_v26, %v6278_v36 }
 0x50e   : > { %v6850_v2 = vsel %vm4492_vm14, %v6286_v19, %v6272_v52  ;;  %v5992_v57 = vrot.slane %v5836_v22, %v14817_v17  ;;  %v6000_v16 = vrot.slane %v5835_v33, %v14817_v17  ;;  %v6293_v44 = vmax.f32 %v6291_v60, %v6292_v1  ;;  %v5723_v60 = vpop.permute.xlu0 %5722 }
 0x50f   : > { %v6300_v6 = vmax.f32 %v6298_v20, %v6299_v43  ;;  %v6307_v0 = vmax.f32 %v6305_v45, %v6306_v32  ;;  %v5985_v63 = vcombine.high %v5984_v4, %v5984_v4  ;;  %v6314_v53 = vmax.f32 %v6312_v61, %v6313_v37  ;;  %v5725_v45 = vpop.permute.xlu1 %5724 }
 0x510   : > { %v6319_v25 = vmax.f32 %v6317_v62, %v6318_v24  ;;  %v5993_v31 = vcombine.high %v5992_v57, %v5992_v57  ;;  %v6001_v50 = vcombine.high %v6000_v16, %v6000_v16  ;;  %v6008_v13 = vrot.slane %v5837_v21, %v14817_v17 }
 0x511   : > { %v6851_v46 = vsel %vm4494_vm15, %v6300_v6, %v6850_v2  ;;  %v6322_v26 = vsel %vm3280_vm12, %v5984_v4, -inf  ;;  %v6329_v40 = vsel %vm3288_vm13, %v5985_v63, -inf  ;;  %v6336_v33 = vsel %vm3280_vm12, %v5992_v57, -inf }
 0x512   : > { %v6323_v27 = vrot.slane %v6322_v26, 4  ;;  %v6330_v56 = vrot.slane %v6329_v40, 4  ;;  %v6343_v20 = vsel %vm3288_vm13, %v5993_v31, -inf  ;;  %v6857_v62 = vsel %vm4492_vm14, %v6293_v44, %v6279_v14 }
 0x513   : > { %v6009_v36 = vcombine.high %v6008_v13, %v6008_v13  ;;  %v6337_v29 = vrot.slane %v6336_v33, 4  ;;  %v6344_v61 = vrot.slane %v6343_v20, 4  ;;  %v6350_v43 = vsel %vm3280_vm12, %v6000_v16, -inf }
 0x514   : > { %v6324_v52 = vmax.f32 %v6322_v26, %v6323_v27  ;;  %v6331_v1 = vmax.f32 %v6329_v40, %v6330_v56  ;;  %v6357_v32 = vsel %vm3288_vm13, %v6001_v50, -inf  ;;  %v6351_v24 = vrot.slane %v6350_v43, 4  ;;  %v5729_v27 = vpop.permute.xlu1 %5728  ;;  %v5727_v50 = vpop.permute.xlu0 %5726 }
 0x515   : > { %v6338_v19 = vmax.f32 %v6336_v33, %v6337_v29  ;;  %v6345_v37 = vmax.f32 %v6343_v20, %v6344_v61  ;;  %v6358_v22 = vrot.slane %v6357_v32, 4  ;;  %v6364_v2 = vsel %vm3280_vm12, %v6008_v13, -inf }
 0x516   : > { %v6325_v21 = vrot.slane %v6324_v52, 2  ;;  %v6332_v4 = vrot.slane %v6331_v1, 2  ;;  %v6371_v57 = vsel %vm3288_vm13, %v6009_v36, -inf  ;;  %v6352_v6 = vmax.f32 %v6350_v43, %v6351_v24 }
 0x517   : > { %v6339_v14 = vrot.slane %v6338_v19, 2  ;;  %v6346_v44 = vrot.slane %v6345_v37, 2  ;;  %v6359_v63 = vmax.f32 %v6357_v32, %v6358_v22  ;;  %v6365_v40 = vrot.slane %v6364_v2, 4 }
 0x518   : > { %v6326_v31 = vmax.f32 %v6324_v52, %v6325_v21  ;;  %v6333_v26 = vmax.f32 %v6331_v1, %v6332_v4  ;;  %v6372_v16 = vrot.slane %v6371_v57, 4  ;;  %v6320_v56 = vrot.slane %v6319_v25, 1 }
 0x519   : > { %v6852_v33 = vsel %vm4496_vm0, %v6314_v53, %v6851_v46  ;;  %v6353_v20 = vrot.slane %v6352_v6, 2  ;;  %v6360_v29 = vrot.slane %v6359_v63, 2  ;;  %v6858_v61 = vsel %vm4494_vm15, %v6307_v0, %v6857_v62 }
 0x51a   : > { %v6327_v13 = vrot.slane %v6326_v31, 1  ;;  %v6366_v35 = vmax.f32 %v6364_v2, %v6365_v40  ;;  %v6373_v36 = vmax.f32 %v6371_v57, %v6372_v16  ;;  %v6334_v30 = vrot.slane %v6333_v26, 1  ;;  %v5731_v57 = vpop.permute.xlu0 %5730 }
 0x51b   : > { %v6340_v3 = vmax.f32 %v6338_v19, %v6339_v14  ;;  %v6347_v43 = vmax.f32 %v6345_v37, %v6346_v44  ;;  %v6354_v32 = vmax.f32 %v6352_v6, %v6353_v20  ;;  %v6361_v1 = vmax.f32 %v6359_v63, %v6360_v29  ;;  %v5733_v37 = vpop.permute.xlu1 %5732 }
 0x51c   : > { %v6328_v52 = vmax.f32 %v6326_v31, %v6327_v13  ;;  %v6367_v24 = vrot.slane %v6366_v35, 2  ;;  %v6374_v22 = vrot.slane %v6373_v36, 2  ;;  %v6321_v21 = vmax.f32 %v6319_v25, %v6320_v56 }
 0x51d   : > { %v5775_v4 = vmax.f32 %v5681_v48, %v5725_v45  ;;  %v5748_v19 = vsel %vm2239_vm11, %v5723_v60, %v5725_v45  ;;  %v6341_v25 = vrot.slane %v6340_v3, 1  ;;  %v6348_v44 = vrot.slane %v6347_v43, 1 }
 0x51e   : > { %v6368_v0 = vmax.f32 %v6366_v35, %v6367_v24  ;;  %v6375_v62 = vmax.f32 %v6373_v36, %v6374_v22  ;;  %v13744_v2 = vsel %vm4498_vm2, %v6328_v52, %v6852_v33  ;;  %v13748_v14 = vsel %vm4496_vm0, %v6321_v21, %v6858_v61 }
 0x51f   : > { %v5774_v8 = vmax.f32 %v5680_v55, %v5748_v19  ;;  %v13752_v48 = vmax.f32 %v6333_v26, %v6334_v30  ;;  %v6355_v6 = vrot.slane %v6354_v32, 1  ;;  %v6362_v35 = vrot.slane %v6361_v1, 1 }
 0x520   : > { %v5749_v63 = vsel %vm2239_vm11, %v5727_v50, %v5729_v27  ;;  %v5750_v60 = vsel %vm2239_vm11, %v5731_v57, %v5733_v37  ;;  %v6369_v16 = vrot.slane %v6368_v0, 1  ;;  %v6376_v56 = vrot.slane %v6375_v62, 1 }
 0x521   : > { %v5838_v31 = vcombine.low %v5774_v8, %v5775_v4  ;;  %v5839_v40 = vcombine.high %v5774_v8, %v5775_v4  ;;  %v5776_v45 = vmax.f32 %v5683_v39, %v5749_v63  ;;  %v5777_v33 = vmax.f32 %v5684_v47, %v5729_v27 }
 0x522   : > { %v13762_v51 = vmax.f32 %v5686_v7, %v5750_v60  ;;  %v13764_v55 = vmax.f32 %v6340_v3, %v6341_v25  ;;  %v13766_v30 = vmax.f32 %v6347_v43, %v6348_v44  ;;  %v13770_v39 = vmax.f32 %v6354_v32, %v6355_v6 }
 0x523   : > { %v5846_v26 = vrot.slane %v5838_v31, %v14817_v17  ;;  %v5853_v18 = vrot.slane %v5839_v40, %v14817_v17  ;;  %v5856_v50 = vcombine.low %v5776_v45, %v5777_v33  ;;  %v5857_v20 = vcombine.high %v5776_v45, %v5777_v33 }
 0x524   : > { %v13774_v58 = vmax.f32 %v5687_v9, %v5733_v37  ;;  %v13778_v27 = vmax.f32 %v6361_v1, %v6362_v35  ;;  %v13780_v29 = vmax.f32 %v6368_v0, %v6369_v16  ;;  %v13782_v61 = vmax.f32 %v6375_v62, %v6376_v56 }
 0x525   : > { %v5854_v47 = vcombine.high %v5846_v26, %v5846_v26  ;;  %v5855_v23 = vcombine.high %v5853_v18, %v5853_v18  ;;  %v6016_v7 = vrot.slane %v5846_v26, %v14817_v17  ;;  %v6032_v3 = vrot.slane %v5853_v18, %v14817_v17 }
 0x526   : > { %v5874_v13 = vcombine.low %v13762_v51, %v13774_v58  ;;  %v5864_v1 = vrot.slane %v5856_v50, %v14817_v17  ;;  %v5871_v24 = vrot.slane %v5857_v20, %v14817_v17 }
 0x527   : > { %v6017_v36 = vcombine.high %v6016_v7, %v6016_v7  ;;  %v6024_v59 = vrot.slane %v5854_v47, %v14817_v17  ;;  %v6033_v9 = vcombine.high %v6032_v3, %v6032_v3  ;;  %v6040_v43 = vrot.slane %v5855_v23, %v14817_v17 }
 0x528   : > { %v6378_v32 = vsel %vm3280_vm12, %v6016_v7, -inf  ;;  %v6406_v52 = vsel %vm3280_vm12, %v6032_v3, -inf }
 0x529   : > { %v6025_v22 = vcombine.high %v6024_v59, %v6024_v59  ;;  %v6041_v21 = vcombine.high %v6040_v43, %v6040_v43  ;;  %v6379_v4 = vrot.slane %v6378_v32, 4  ;;  %v6385_v0 = vsel %vm3288_vm13, %v6017_v36, -inf }
 0x52a   : > { %v6386_v62 = vrot.slane %v6385_v0, 4  ;;  %v6392_v19 = vsel %vm3280_vm12, %v6024_v59, -inf  ;;  %v6407_v37 = vrot.slane %v6406_v52, 4  ;;  %v6413_v57 = vsel %vm3288_vm13, %v6033_v9, -inf }
 0x52b   : > { %v6380_v25 = vmax.f32 %v6378_v32, %v6379_v4  ;;  %v6393_v44 = vrot.slane %v6392_v19, 4  ;;  %v6399_v8 = vsel %vm3288_vm13, %v6025_v22, -inf  ;;  %v6414_v6 = vrot.slane %v6413_v57, 4 }
 0x52c   : > { %v6387_v35 = vmax.f32 %v6385_v0, %v6386_v62  ;;  %v6400_v63 = vrot.slane %v6399_v8, 4  ;;  %v6408_v31 = vmax.f32 %v6406_v52, %v6407_v37  ;;  %v6420_v40 = vsel %vm3280_vm12, %v6040_v43, -inf }
 0x52d   : > { %v6381_v45 = vrot.slane %v6380_v25, 2  ;;  %v6394_v60 = vmax.f32 %v6392_v19, %v6393_v44  ;;  %v6415_v16 = vmax.f32 %v6413_v57, %v6414_v6  ;;  %v6421_v56 = vrot.slane %v6420_v40, 4 }
 0x52e   : > { %v6388_v33 = vrot.slane %v6387_v35, 2  ;;  %v6401_v26 = vmax.f32 %v6399_v8, %v6400_v63  ;;  %v6409_v18 = vrot.slane %v6408_v31, 2  ;;  %v6427_v50 = vsel %vm3288_vm13, %v6041_v21, -inf }
 0x52f   : > { %v6382_v20 = vmax.f32 %v6380_v25, %v6381_v45  ;;  %v6395_v47 = vrot.slane %v6394_v60, 2  ;;  %v6416_v23 = vrot.slane %v6415_v16, 2  ;;  %v6422_v7 = vmax.f32 %v6420_v40, %v6421_v56 }
 0x530   : > { %v6389_v3 = vmax.f32 %v6387_v35, %v6388_v33  ;;  %v6402_v36 = vrot.slane %v6401_v26, 2  ;;  %v6410_v59 = vmax.f32 %v6408_v31, %v6409_v18  ;;  %v6428_v9 = vrot.slane %v6427_v50, 4 }
 0x531   : > { %v6383_v32 = vrot.slane %v6382_v20, 1  ;;  %v6396_v52 = vmax.f32 %v6394_v60, %v6395_v47  ;;  %v6417_v43 = vmax.f32 %v6415_v16, %v6416_v23  ;;  %v6423_v22 = vrot.slane %v6422_v7, 2 }
 0x532   : > { %v6403_v4 = vmax.f32 %v6401_v26, %v6402_v36  ;;  %v6429_v0 = vmax.f32 %v6427_v50, %v6428_v9  ;;  %v5872_v62 = vcombine.high %v5864_v1, %v5864_v1  ;;  %v5875_v19 = vcombine.high %v13762_v51, %v13774_v58 }
 0x533   : > { %v6397_v37 = vrot.slane %v6396_v52, 1  ;;  %v6411_v21 = vrot.slane %v6410_v59, 1  ;;  %v6424_v57 = vmax.f32 %v6422_v7, %v6423_v22  ;;  %v5873_v25 = vcombine.high %v5871_v24, %v5871_v24 }
 0x534   : > { %v6390_v44 = vrot.slane %v6389_v3, 1  ;;  %v6404_v8 = vrot.slane %v6403_v4, 1  ;;  %v6418_v6 = vrot.slane %v6417_v43, 1  ;;  %v6430_v35 = vrot.slane %v6429_v0, 2 }
 0x535   : > { %v6384_v63 = vmax.f32 %v6382_v20, %v6383_v32  ;;  %v6398_v31 = vmax.f32 %v6396_v52, %v6397_v37  ;;  %v6425_v40 = vrot.slane %v6424_v57, 1  ;;  %v6048_v45 = vrot.slane %v5864_v1, %v14817_v17 }
 0x536   : > { %v6431_v60 = vmax.f32 %v6429_v0, %v6430_v35  ;;  %v6056_v16 = vrot.slane %v5872_v62, %v14817_v17  ;;  %v6064_v56 = vrot.slane %v5871_v24, %v14817_v17  ;;  %v13807_v33 = vrot.slane %v5874_v13, %v14817_v17  ;;  %v5737_v35 = vpop.permute.xlu1 %5736 }
 0x537   : > { %v6412_v26 = vmax.f32 %v6410_v59, %v6411_v21  ;;  %v6864_v18 = vsel %vm4492_vm14, %v6398_v31, %v6384_v63  ;;  %v6049_v50 = vcombine.high %v6048_v45, %v6048_v45  ;;  %v6072_v20 = vrot.slane %v5873_v25, %v14817_v17 }
 0x538   : > { %v6391_v47 = vmax.f32 %v6389_v3, %v6390_v44  ;;  %v6405_v23 = vmax.f32 %v6403_v4, %v6404_v8  ;;  %v6419_v1 = vmax.f32 %v6417_v43, %v6418_v6  ;;  %v6057_v7 = vcombine.high %v6056_v16, %v6056_v16 }
 0x539   : > { %v6426_v36 = vmax.f32 %v6424_v57, %v6425_v40  ;;  %v6432_v9 = vrot.slane %v6431_v60, 1  ;;  %v6865_v24 = vsel %vm4494_vm15, %v6412_v26, %v6864_v18  ;;  %v6065_v32 = vcombine.high %v6064_v56, %v6064_v56 }
 0x53a   : > { %v6073_v52 = vcombine.high %v6072_v20, %v6072_v20  ;;  %v6434_v22 = vsel %vm3280_vm12, %v6048_v45, -inf  ;;  %v6441_v13 = vsel %vm3288_vm13, %v6049_v50, -inf  ;;  %v6448_v59 = vsel %vm3280_vm12, %v6056_v16, -inf }
 0x53b   : > { %v6435_v0 = vrot.slane %v6434_v22, 4  ;;  %v6442_v62 = vrot.slane %v6441_v13, 4  ;;  %v6449_v37 = vrot.slane %v6448_v59, 4  ;;  %v6455_v3 = vsel %vm3288_vm13, %v6057_v7, -inf }
 0x53c   : > { %v6871_v43 = vsel %vm4492_vm14, %v6405_v23, %v6391_v47  ;;  %v6456_v4 = vrot.slane %v6455_v3, 4  ;;  %v6462_v21 = vsel %vm3280_vm12, %v6064_v56, -inf  ;;  %v6469_v57 = vsel %vm3288_vm13, %v6065_v32, -inf }
 0x53d   : > { %v6436_v25 = vmax.f32 %v6434_v22, %v6435_v0  ;;  %v6443_v44 = vmax.f32 %v6441_v13, %v6442_v62  ;;  %v6450_v8 = vmax.f32 %v6448_v59, %v6449_v37  ;;  %v6463_v6 = vrot.slane %v6462_v21, 4 }
 0x53e   : > { %v6457_v63 = vmax.f32 %v6455_v3, %v6456_v4  ;;  %v6470_v31 = vrot.slane %v6469_v57, 4  ;;  %v6476_v40 = vsel %vm3280_vm12, %v6072_v20, -inf  ;;  %v6483_v45 = vsel %vm3288_vm13, %v6073_v52, -inf  ;;  %v5735_v52 = vpop.permute.xlu0 %5734 }
 0x53f   : > { %v6437_v16 = vrot.slane %v6436_v25, 2  ;;  %v6444_v26 = vrot.slane %v6443_v44, 2  ;;  %v6451_v18 = vrot.slane %v6450_v8, 2  ;;  %v6464_v50 = vmax.f32 %v6462_v21, %v6463_v6 }
 0x540   : > { %v6458_v47 = vrot.slane %v6457_v63, 2  ;;  %v6471_v23 = vmax.f32 %v6469_v57, %v6470_v31  ;;  %v6477_v56 = vrot.slane %v6476_v40, 4  ;;  %v6484_v7 = vrot.slane %v6483_v45, 4 }
 0x541   : > { %v6438_v32 = vmax.f32 %v6436_v25, %v6437_v16  ;;  %v6445_v22 = vmax.f32 %v6443_v44, %v6444_v26  ;;  %v6452_v13 = vmax.f32 %v6450_v8, %v6451_v18  ;;  %v6465_v59 = vrot.slane %v6464_v50, 2  ;;  %v13831_v25 = vpop.permute.xlu1 %5740 }
 0x542   : > { %v6459_v0 = vmax.f32 %v6457_v63, %v6458_v47  ;;  %v6472_v62 = vrot.slane %v6471_v23, 2  ;;  %v13821_v37 = vmax.f32 %v6476_v40, %v6477_v56  ;;  %v5889_v20 = vrot.slane %v5875_v19, %v14817_v17 }
 0x543   : > { %v6866_v3 = vsel %vm4496_vm0, %v6426_v36, %v6865_v24  ;;  %v6872_v4 = vsel %vm4494_vm15, %v6419_v1, %v6871_v43  ;;  %v6439_v21 = vrot.slane %v6438_v32, 1  ;;  %v13829_v57 = vmax.f32 %v6483_v45, %v6484_v7 }
 0x544   : > { %v6433_v44 = vmax.f32 %v6431_v60, %v6432_v9  ;;  %v6446_v8 = vrot.slane %v6445_v22, 1  ;;  %v6453_v6 = vrot.slane %v6452_v13, 1  ;;  %v13833_v63 = vmax.f32 %v6464_v50, %v6465_v59 }
 0x545   : > { %v6440_v31 = vmax.f32 %v6438_v32, %v6439_v21  ;;  %v6460_v40 = vrot.slane %v6459_v0, 1  ;;  %v13837_v51 = vmax.f32 %v5690_v54, %v5737_v35  ;;  %v5751_v58 = vsel %vm2239_vm11, %v5735_v52, %v5737_v35 }
 0x546   : > { %v13841_v19 = vsel %vm4496_vm0, %v6433_v44, %v6872_v4  ;;  %v13843_v1 = vmax.f32 %v6471_v23, %v6472_v62  ;;  %v6479_v36 = vrot.slane %v13821_v37, 2  ;;  %v14818_v60 = vmax.f32 %v13650_v12, 0.0 }
 0x547   : > { %v6486_v24 = vrot.slane %v13829_v57, 2  ;;  %v13853_v11 = vsel %vm4498_vm2, %v6440_v31, %v6866_v3  ;;  %v5890_v54 = vcombine.high %v13807_v33, %v13807_v33  ;;  %v5891_v43 = vcombine.high %v5889_v20, %v5889_v20 }
 0x548   : > { %v13849_v9 = vmax.f32 %v14818_v60, %v13831_v25  ;;  %v13857_v35 = vmax.f32 %v6445_v22, %v6446_v8  ;;  %v13859_v45 = vmax.f32 %v6452_v13, %v6453_v6  ;;  %v6080_v12 = vrot.slane %v13807_v33, %v14817_v17 }
 0x549   : > { %v13864_v26 = vmax.f32 %v6459_v0, %v6460_v40  ;;  %v6088_v18 = vrot.slane %v5890_v54, %v14817_v17  ;;  %v6096_v50 = vrot.slane %v5889_v20, %v14817_v17  ;;  %v6104_v47 = vrot.slane %v5891_v43, %v14817_v17 }
 0x54a   : > { %v6081_v56 = vcombine.high %v6080_v12, %v6080_v12  ;;  %v6490_v7 = vsel %vm3280_vm12, %v6080_v12, -inf  ;;  %v14819_v32 = vmax.f32 %v13625_v49, 0.0 }
 0x54b   : > { %v6089_v13 = vcombine.high %v6088_v18, %v6088_v18  ;;  %v6097_v59 = vcombine.high %v6096_v50, %v6096_v50  ;;  %v6105_v33 = vcombine.high %v6104_v47, %v6104_v47  ;;  %v6491_v0 = vrot.slane %v6490_v7, 4 }
 0x54c   : > { %v13873_v22 = vmax.f32 %v14819_v32, %v5751_v58  ;;  %v6497_v62 = vsel %vm3288_vm13, %v6081_v56, -inf  ;;  %v6504_v52 = vsel %vm3280_vm12, %v6088_v18, -inf  ;;  %v6518_v20 = vsel %vm3280_vm12, %v6096_v50, -inf }
 0x54d   : > { %v6532_v3 = vsel %vm3280_vm12, %v6104_v47, -inf  ;;  %v6492_v4 = vmax.f32 %v6490_v7, %v6491_v0  ;;  %v6498_v21 = vrot.slane %v6497_v62, 4  ;;  %v6505_v44 = vrot.slane %v6504_v52, 4 }
 0x54e   : > { %v6511_v8 = vsel %vm3288_vm13, %v6089_v13, -inf  ;;  %v6519_v6 = vrot.slane %v6518_v20, 4  ;;  %v6525_v31 = vsel %vm3288_vm13, %v6097_v59, -inf  ;;  %v6533_v40 = vrot.slane %v6532_v3, 4 }
 0x54f   : > { %v6512_v49 = vrot.slane %v6511_v8, 4  ;;  %v6493_v58 = vrot.slane %v6492_v4, 2  ;;  %v6499_v60 = vmax.f32 %v6497_v62, %v6498_v21  ;;  %v6506_v54 = vmax.f32 %v6504_v52, %v6505_v44 }
 0x550   : > { %v6526_v43 = vrot.slane %v6525_v31, 4  ;;  %v6520_v18 = vmax.f32 %v6518_v20, %v6519_v6  ;;  %v6534_v56 = vmax.f32 %v6532_v3, %v6533_v40  ;;  %v6539_v50 = vsel %vm3288_vm13, %v6105_v33, -inf }
 0x551   : > { %v6513_v12 = vmax.f32 %v6511_v8, %v6512_v49  ;;  %v6494_v47 = vmax.f32 %v6492_v4, %v6493_v58  ;;  %v6500_v7 = vrot.slane %v6499_v60, 2  ;;  %v6507_v32 = vrot.slane %v6506_v54, 2 }
 0x552   : > { %v6527_v0 = vmax.f32 %v6525_v31, %v6526_v43  ;;  %v6521_v13 = vrot.slane %v6520_v18, 2  ;;  %v6535_v53 = vrot.slane %v6534_v56, 2  ;;  %v6540_v23 = vrot.slane %v6539_v50, 4 }
 0x553   : > { %v6514_v46 = vrot.slane %v6513_v12, 2  ;;  %v6495_v16 = vrot.slane %v6494_v47, 1  ;;  %v6501_v59 = vmax.f32 %v6499_v60, %v6500_v7  ;;  %v6508_v38 = vmax.f32 %v6506_v54, %v6507_v32 }
 0x554   : > { %v6528_v28 = vrot.slane %v6527_v0, 2  ;;  %v6522_v52 = vmax.f32 %v6520_v18, %v6521_v13  ;;  %v6536_v21 = vmax.f32 %v6534_v56, %v6535_v53  ;;  %v6541_v44 = vmax.f32 %v6539_v50, %v6540_v23  ;;  %v5739_v50 = vpop.permute.xlu0 %5738 }
 0x555   : > { %v6515_v62 = vmax.f32 %v6513_v12, %v6514_v46  ;;  %v13883_v20 = vmax.f32 %v13821_v37, %v6479_v36  ;;  %v6502_v33 = vrot.slane %v6501_v59, 1  ;;  %v6509_v3 = vrot.slane %v6508_v38, 1 }
 0x556   : > { %v6529_v4 = vmax.f32 %v6527_v0, %v6528_v28  ;;  %v13886_v8 = vmax.f32 %v13829_v57, %v6486_v24  ;;  %v6523_v6 = vrot.slane %v6522_v52, 1  ;;  %v6542_v31 = vrot.slane %v6541_v44, 2 }
 0x557   : > { %v6516_v49 = vrot.slane %v6515_v62, 1  ;;  %v6496_v40 = vmax.f32 %v6494_v47, %v6495_v16  ;;  %v6510_v58 = vmax.f32 %v6508_v38, %v6509_v3  ;;  %v6537_v60 = vrot.slane %v6536_v21, 1 }
 0x558   : > { %v5892_v46 = vcombine.low %v13873_v22, %v13837_v51  ;;  %v6503_v53 = vmax.f32 %v6501_v59, %v6502_v33  ;;  %v6530_v54 = vrot.slane %v6529_v4, 1  ;;  %v13890_v37 = vmax.f32 %v6541_v44, %v6542_v31 }
 0x559   : > { %v6517_v23 = vmax.f32 %v6515_v62, %v6516_v49  ;;  %v6524_v36 = vmax.f32 %v6522_v52, %v6523_v6  ;;  %v6878_v28 = vsel %vm4492_vm14, %v6510_v58, %v6496_v40  ;;  %v5893_v57 = vcombine.high %v13873_v22, %v13837_v51 }
 0x55a   : > { %v5900_v24 = vrot.slane %v5892_v46, %v14817_v17  ;;  %v14820_v16 = vrot.slane %v13833_v63, 1  ;;  %v14821_v43 = vrot.slane %v13843_v1, 1  ;;  %v6481_v18 = vrot.slane %v13883_v20, 1 }
 0x55b   : > { %v6488_v56 = vrot.slane %v13886_v8, 1  ;;  %v6879_v47 = vsel %vm4494_vm15, %v6524_v36, %v6878_v28  ;;  %v6885_v51 = vsel %vm4492_vm14, %v6517_v23, %v6503_v53  ;;  %v5907_v22 = vrot.slane %v5893_v57, %v14817_v17 }
 0x55c   : > { %v13899_v38 = vmax.f32 %v13833_v63, %v14820_v16  ;;  %v13904_v12 = vmax.f32 %v13843_v1, %v14821_v43  ;;  %v5908_v7 = vcombine.high %v5900_v24, %v5900_v24  ;;  %v6531_v32 = vmax.f32 %v6529_v4, %v6530_v54 }
 0x55d   : > { %v6538_v63 = vmax.f32 %v6536_v21, %v6537_v60  ;;  %v6544_v0 = vrot.slane %v13890_v37, 1  ;;  %v6112_v13 = vrot.slane %v5900_v24, %v14817_v17  ;;  %v5909_v1 = vcombine.high %v5907_v22, %v5907_v22 }
 0x55e   : > { %v6120_v59 = vrot.slane %v5908_v7, %v14817_v17  ;;  %v6128_v62 = vrot.slane %v5907_v22, %v14817_v17  ;;  %v5752_v52 = vsel %vm2239_vm11, %v5739_v50, %v13831_v25  ;;  %v6886_v33 = vsel %vm4494_vm15, %v6531_v32, %v6885_v51 }
 0x55f   : > { %v6880_v44 = vsel %vm4496_vm0, %v6538_v63, %v6879_v47  ;;  %v6113_v3 = vcombine.high %v6112_v13, %v6112_v13  ;;  %v6546_v4 = vsel %vm3280_vm12, %v6112_v13, -inf  ;;  %v6136_v6 = vrot.slane %v5909_v1, %v14817_v17 }
 0x560   : > { %v6121_v21 = vcombine.high %v6120_v59, %v6120_v59  ;;  %v6129_v49 = vcombine.high %v6128_v62, %v6128_v62  ;;  %v6547_v31 = vrot.slane %v6546_v4, 4  ;;  %v6560_v58 = vsel %vm3280_vm12, %v6120_v59, -inf }
 0x561   : > { %v6553_v40 = vsel %vm3288_vm13, %v6113_v3, -inf  ;;  %v6574_v60 = vsel %vm3280_vm12, %v6128_v62, -inf  ;;  %v14822_v25 = vmax.f32 %v13666_v34, 0.0  ;;  %v6137_v53 = vcombine.high %v6136_v6, %v6136_v6 }
 0x562   : > { %v6548_v23 = vmax.f32 %v6546_v4, %v6547_v31  ;;  %v6554_v54 = vrot.slane %v6553_v40, 4  ;;  %v6561_v36 = vrot.slane %v6560_v58, 4  ;;  %v6567_v28 = vsel %vm3288_vm13, %v6121_v21, -inf }
 0x563   : > { %v5782_v46 = vmax.f32 %v14822_v25, %v5752_v52  ;;  %v6575_v57 = vrot.slane %v6574_v60, 4  ;;  %v6581_v24 = vsel %vm3288_vm13, %v6129_v49, -inf  ;;  %v6588_v16 = vsel %vm3280_vm12, %v6136_v6, -inf }
 0x564   : > { %v6549_v43 = vrot.slane %v6548_v23, 2  ;;  %v6555_v50 = vmax.f32 %v6553_v40, %v6554_v54  ;;  %v6562_v47 = vmax.f32 %v6560_v58, %v6561_v36  ;;  %v6568_v51 = vrot.slane %v6567_v28, 4  ;;  %v5745_v54 = vpop.permute.xlu1 %5744  ;;  %v5743_v36 = vpop.permute.xlu0 %5742 }
 0x565   : > { %v6576_v22 = vmax.f32 %v6574_v60, %v6575_v57  ;;  %v6582_v7 = vrot.slane %v6581_v24, 4  ;;  %v6589_v32 = vrot.slane %v6588_v16, 4  ;;  %v6595_v34 = vsel %vm3288_vm13, %v6137_v53, -inf }
 0x566   : > { %v6550_v63 = vmax.f32 %v6548_v23, %v6549_v43  ;;  %v6556_v13 = vrot.slane %v6555_v50, 2  ;;  %v6563_v1 = vrot.slane %v6562_v47, 2  ;;  %v6569_v59 = vmax.f32 %v6567_v28, %v6568_v51 }
 0x567   : > { %v6577_v62 = vrot.slane %v6576_v22, 2  ;;  %v6583_v52 = vmax.f32 %v6581_v24, %v6582_v7  ;;  %v6590_v3 = vmax.f32 %v6588_v16, %v6589_v32  ;;  %v6596_v4 = vrot.slane %v6595_v34, 4 }
 0x568   : > { %v6551_v21 = vrot.slane %v6550_v63, 1  ;;  %v6557_v49 = vmax.f32 %v6555_v50, %v6556_v13  ;;  %v6564_v6 = vmax.f32 %v6562_v47, %v6563_v1  ;;  %v6570_v31 = vrot.slane %v6569_v59, 2 }
 0x569   : > { %v6578_v40 = vmax.f32 %v6576_v22, %v6577_v62  ;;  %v6584_v58 = vrot.slane %v6583_v52, 2  ;;  %v6591_v25 = vrot.slane %v6590_v3, 2  ;;  %v5910_v60 = vcombine.low %v5782_v46, %v13849_v9  ;;  %v6785_v22 = vld [vmem:[#allocation2 + $0xb8] sm:$0xff] }
 0x56a   : > { %v6552_v53 = vmax.f32 %v6550_v63, %v6551_v21  ;;  %v6558_v23 = vrot.slane %v6557_v49, 1  ;;  %v13931_v57 = vmax.f32 %v6595_v34, %v6596_v4  ;;  %v5911_v28 = vcombine.high %v5782_v46, %v13849_v9  ;;  %v7046_v34 = vld [vmem:[#allocation2 + $0x170] sm:$0xff]  ;;  %v7047_v63 = vld [vmem:[#allocation2 + $0x178] sm:$0xff] }
 0x56b   : > { %v13937_v24 = vmax.f32 %v13883_v20, %v6481_v18  ;;  %v6545_v16 = vmax.f32 %v13890_v37, %v6544_v0  ;;  %v6565_v43 = vrot.slane %v6564_v6, 1  ;;  %v13940_v50 = vmax.f32 %v6569_v59, %v6570_v31  ;;  %v6784_v18 = vld [vmem:[#allocation2 + $0xb0] sm:$0xff] }
 0x56c   : > { %v13945_v47 = vmax.f32 %v13886_v8, %v6488_v56  ;;  %v13948_v51 = vsel %vm4498_vm2, %v6552_v53, %v6880_v44  ;;  %v14823_v9 = vmax.f32 %v13663_v15, 0.0  ;;  %v5753_v20 = vsel %vm2239_vm11, %v5743_v36, %v5745_v54 }
 0x56d   : > { %v13956_v37 = vsel %vm4496_vm0, %v6545_v16, %v6886_v33  ;;  %v6579_v0 = vrot.slane %v6578_v40, 1  ;;  %v13958_v7 = vmax.f32 %v6583_v52, %v6584_v58  ;;  %v13960_v32 = vmax.f32 %v6590_v3, %v6591_v25 }
 0x56e   : > { %v13952_v46 = vmax.f32 %v14823_v9, %v5745_v54  ;;  %v13962_v8 = vmax.f32 %v6557_v49, %v6558_v23  ;;  %v6598_v56 = vrot.slane %v13931_v57, 2  ;;  %v5918_v15 = vrot.slane %v5910_v60, %v14817_v17 }
 0x56f   : > { %v5925_v44 = vrot.slane %v5911_v28, %v14817_v17  ;;  %v13967_v13 = vmax.f32 %v6564_v6, %v6565_v43  ;;  %v14824_v1 = vmax.f32 %v13669_v42, 0.0  ;;  %v9129_v62 = vpack.c.bf16 %v6785_v22, %v6784_v18 }
 0x570   : > { %v5926_v52 = vcombine.high %v5918_v15, %v5918_v15  ;;  %v6144_v4 = vrot.slane %v5918_v15, %v14817_v17  ;;  %v13974_v49 = vmax.f32 %v6578_v40, %v6579_v0  ;;  %v9165_v6 = vpack.c.bf16 %v7047_v63, %v7046_v34 }
 0x571   : > { %v5784_v59 = vmax.f32 %v14824_v1, %v5753_v20  ;;  %v5927_v3 = vcombine.high %v5925_v44, %v5925_v44  ;;  %v6160_v21 = vrot.slane %v5925_v44, %v14817_v17  ;;  %9130 = vmatpush1.bf16.msra.mxu1 %v9129_v62 }
 0x572   : > { %14825 = vst [vmem:[#allocation50_spill] sm:$0xff] %v13974_v49  ;;  %v6145_v25 = vcombine.high %v6144_v4, %v6144_v4  ;;  %v6152_v60 = vrot.slane %v5926_v52, %v14817_v17  ;;  %9167 = vmatprep.subr.bf16.mxu1 %v14492_v10  ;;  %v6602_v36 = vsel %vm3280_vm12, %v6144_v4, -inf  ;;  %9166 = vmatpush1.bf16.msra.mxu0 %v9165_v6 }
 0x573   : > { %v6161_v42 = vcombine.high %v6160_v21, %v6160_v21  ;;  %v6168_v54 = vrot.slane %v5927_v3, %v14817_v17  ;;  %v6630_v53 = vsel %vm3280_vm12, %v6160_v21, -inf  ;;  %v5928_v40 = vcombine.low %v5784_v59, %v13952_v46  ;;  %9203 = vmatprep.subr.bf16.mxu0 %v14492_v10 }
 0x574   : > { %v5929_v23 = vcombine.high %v5784_v59, %v13952_v46  ;;  %v6153_v28 = vcombine.high %v6152_v60, %v6152_v60  ;;  %v6603_v43 = vrot.slane %v6602_v36, 4  ;;  %v6609_v9 = vsel %vm3288_vm13, %v6145_v25, -inf }
 0x575   : > { %v6169_v16 = vcombine.high %v6168_v54, %v6168_v54  ;;  %v6610_v20 = vrot.slane %v6609_v9, 4  ;;  %v6616_v18 = vsel %vm3280_vm12, %v6152_v60, -inf  ;;  %v6631_v22 = vrot.slane %v6630_v53, 4 }
 0x576   : > { %v6637_v0 = vsel %vm3288_vm13, %v6161_v42, -inf  ;;  %v6604_v15 = vmax.f32 %v6602_v36, %v6603_v43  ;;  %v6617_v44 = vrot.slane %v6616_v18, 4  ;;  %v6623_v34 = vsel %vm3288_vm13, %v6153_v28, -inf }
 0x577   : > { %v6638_v63 = vrot.slane %v6637_v0, 4  ;;  %v6611_v46 = vmax.f32 %v6609_v9, %v6610_v20  ;;  %v6624_v1 = vrot.slane %v6623_v34, 4  ;;  %v6632_v59 = vmax.f32 %v6630_v53, %v6631_v22 }
 0x578   : > { %v6644_v62 = vsel %vm3280_vm12, %v6168_v54, -inf  ;;  %v6605_v52 = vrot.slane %v6604_v15, 2  ;;  %v6618_v3 = vmax.f32 %v6616_v18, %v6617_v44  ;;  %v6651_v58 = vsel %vm3288_vm13, %v6169_v16, -inf }
 0x579   : > { %v6639_v4 = vmax.f32 %v6637_v0, %v6638_v63  ;;  %v6645_v21 = vrot.slane %v6644_v62, 4  ;;  %v6612_v6 = vrot.slane %v6611_v46, 2  ;;  %v6625_v25 = vmax.f32 %v6623_v34, %v6624_v1 }
 0x57a   : > { %v6633_v60 = vrot.slane %v6632_v59, 2  ;;  %v6606_v42 = vmax.f32 %v6604_v15, %v6605_v52  ;;  %v6619_v36 = vrot.slane %v6618_v3, 2  ;;  %v6652_v20 = vrot.slane %v6651_v58, 4 }
 0x57b   : > { %v6640_v43 = vrot.slane %v6639_v4, 2  ;;  %v6646_v31 = vmax.f32 %v6644_v62, %v6645_v21  ;;  %v6613_v28 = vmax.f32 %v6611_v46, %v6612_v6  ;;  %v6626_v33 = vrot.slane %v6625_v25, 2 }
 0x57c   : > { %v6634_v9 = vmax.f32 %v6632_v59, %v6633_v60  ;;  %v6620_v53 = vmax.f32 %v6618_v3, %v6619_v36  ;;  %v5936_v18 = vrot.slane %v5928_v40, %v14817_v17  ;;  %v13996_v0 = vmax.f32 %v13931_v57, %v6598_v56 }
 0x57d   : > { %v6641_v22 = vmax.f32 %v6639_v4, %v6640_v43  ;;  %v6647_v54 = vrot.slane %v6646_v31, 2  ;;  %v6627_v44 = vmax.f32 %v6625_v25, %v6626_v33  ;;  %v6653_v16 = vmax.f32 %v6651_v58, %v6652_v20 }
 0x57e   : > { %v5943_v15 = vrot.slane %v5929_v23, %v14817_v17  ;;  %v6607_v34 = vrot.slane %v6606_v42, 1  ;;  %v6614_v63 = vrot.slane %v6613_v28, 1  ;;  %v6621_v46 = vrot.slane %v6620_v53, 1 }
 0x57f   : > { %v6648_v1 = vmax.f32 %v6646_v31, %v6647_v54  ;;  %v6628_v59 = vrot.slane %v6627_v44, 1  ;;  %v6635_v62 = vrot.slane %v6634_v9, 1  ;;  %v6642_v52 = vrot.slane %v6641_v22, 1 }
 0x580   : > { %v6654_v3 = vrot.slane %v6653_v16, 2  ;;  %v14826_v4 = vrot.slane %v13940_v50, 1  ;;  %v6622_v21 = vmax.f32 %v6620_v53, %v6621_v46  ;;  %v5944_v56 = vcombine.high %v5936_v18, %v5936_v18 }
 0x581   : > { %v6649_v57 = vrot.slane %v6648_v1, 1  ;;  %v5945_v23 = vcombine.high %v5943_v15, %v5943_v15  ;;  %v6176_v6 = vrot.slane %v5936_v18, %v14817_v17  ;;  %v6608_v31 = vmax.f32 %v6606_v42, %v6607_v34 }
 0x582   : > { %v14002_v40 = vmax.f32 %v13940_v50, %v14826_v4  ;;  %v14005_v58 = vmax.f32 %v6653_v16, %v6654_v3  ;;  %v6615_v25 = vmax.f32 %v6613_v28, %v6614_v63  ;;  %v6184_v60 = vrot.slane %v5944_v56, %v14817_v17 }
 0x583   : > { %v6192_v36 = vrot.slane %v5943_v15, %v14817_v17  ;;  %v6629_v43 = vmax.f32 %v6627_v44, %v6628_v59  ;;  %v6636_v20 = vmax.f32 %v6634_v9, %v6635_v62  ;;  %v6643_v50 = vmax.f32 %v6641_v22, %v6642_v52 }
 0x584   : > { %v6177_v54 = vcombine.high %v6176_v6, %v6176_v6  ;;  %v6650_v53 = vmax.f32 %v6648_v1, %v6649_v57  ;;  %v6892_v46 = vsel %vm4492_vm14, %v6622_v21, %v6608_v31  ;;  %v6185_v4 = vcombine.high %v6184_v60, %v6184_v60 }
 0x585   : > { %v6193_v33 = vcombine.high %v6192_v36, %v6192_v36  ;;  %v6656_v16 = vrot.slane %v14005_v58, 1  ;;  %v6200_v3 = vrot.slane %v5945_v23, %v14817_v17  ;;  %v6658_v42 = vsel %vm3280_vm12, %v6176_v6, -inf }
 0x586   : > { %v6665_v28 = vsel %vm3288_vm13, %v6177_v54, -inf  ;;  %v6659_v18 = vrot.slane %v6658_v42, 4  ;;  %v6672_v44 = vsel %vm3280_vm12, %v6184_v60, -inf  ;;  %v6679_v9 = vsel %vm3288_vm13, %v6185_v4, -inf }
 0x587   : > { %v6666_v34 = vrot.slane %v6665_v28, 4  ;;  %v6893_v22 = vsel %vm4494_vm15, %v6636_v20, %v6892_v46  ;;  %v6201_v15 = vcombine.high %v6200_v3, %v6200_v3  ;;  %v6673_v63 = vrot.slane %v6672_v44, 4 }
 0x588   : > { %v6680_v1 = vrot.slane %v6679_v9, 4  ;;  %v6660_v59 = vmax.f32 %v6658_v42, %v6659_v18  ;;  %v6686_v52 = vsel %vm3280_vm12, %v6192_v36, -inf  ;;  %v6693_v17 = vsel %vm3288_vm13, %v6193_v33, -inf }
 0x589   : > { %v6667_v62 = vmax.f32 %v6665_v28, %v6666_v34  ;;  %v6674_v21 = vmax.f32 %v6672_v44, %v6673_v63  ;;  %v6687_v56 = vrot.slane %v6686_v52, 4  ;;  %v6694_v23 = vrot.slane %v6693_v17, 4 }
 0x58a   : > { %v6681_v57 = vmax.f32 %v6679_v9, %v6680_v1  ;;  %v6661_v6 = vrot.slane %v6660_v59, 2  ;;  %v6700_v60 = vsel %vm3280_vm12, %v6200_v3, -inf  ;;  %v6707_v54 = vsel %vm3288_vm13, %v6201_v15, -inf }
 0x58b   : > { %v6668_v31 = vrot.slane %v6667_v62, 2  ;;  %v6675_v20 = vrot.slane %v6674_v21, 2  ;;  %v6688_v4 = vmax.f32 %v6686_v52, %v6687_v56  ;;  %v6695_v41 = vmax.f32 %v6693_v17, %v6694_v23 }
 0x58c   : > { %v6682_v46 = vrot.slane %v6681_v57, 2  ;;  %v6662_v42 = vmax.f32 %v6660_v59, %v6661_v6  ;;  %v6701_v18 = vrot.slane %v6700_v60, 4  ;;  %v6708_v36 = vrot.slane %v6707_v54, 4 }
 0x58d   : > { %v6669_v28 = vmax.f32 %v6667_v62, %v6668_v31  ;;  %v6899_v33 = vsel %vm4492_vm14, %v6629_v43, %v6615_v25  ;;  %v6676_v34 = vmax.f32 %v6674_v21, %v6675_v20  ;;  %v6689_v9 = vrot.slane %v6688_v4, 2  ;;  %v7284_v20 = vld [vmem:[#allocation2 + $0x240] sm:$0xff] }
 0x58e   : > { %v6683_v44 = vmax.f32 %v6681_v57, %v6682_v46  ;;  %v6663_v63 = vrot.slane %v6662_v42, 1  ;;  %v6696_v1 = vrot.slane %v6695_v41, 2  ;;  %v6702_v5 = vmax.f32 %v6700_v60, %v6701_v18  ;;  %v7154_v60 = vld [vmem:[#allocation2 + $0x180] sm:$0xff]  ;;  %v7285_v46 = vld [vmem:[#allocation2 + $0x248] sm:$0xff]  ;;  %v7156_v18 = vld [vmem:[#allocation2 + $0x190] sm:$0xff] }
 0x58f   : > { %v6709_v49 = vmax.f32 %v6707_v54, %v6708_v36  ;;  %v14827_v3 = vrot.slane %v13958_v7, 1  ;;  %v14828_v52 = vrot.slane %v13960_v32, 1  ;;  %v6894_v62 = vsel %vm4496_vm0, %v6650_v53, %v6893_v22  ;;  %v7155_v22 = vld [vmem:[#allocation2 + $0x188] sm:$0xff]  ;;  %v7157_v36 = vld [vmem:[#allocation2 + $0x198] sm:$0xff] }
 0x590   : > { %v6670_v25 = vrot.slane %v6669_v28, 1  ;;  %v6900_v43 = vsel %vm4494_vm15, %v6643_v50, %v6899_v33  ;;  %v6664_v17 = vmax.f32 %v6662_v42, %v6663_v63  ;;  %v6690_v21 = vmax.f32 %v6688_v4, %v6689_v9 }
 0x591   : > { %v14026_v15 = vmax.f32 %v13958_v7, %v14827_v3  ;;  %v14031_v59 = vmax.f32 %v13960_v32, %v14828_v52  ;;  %v6703_v57 = vrot.slane %v6702_v5, 2  ;;  %v14829_v56 = vrot.slane %v13996_v0, 1  ;;  %v7158_v3 = vld [vmem:[#allocation2 + $0x1a0] sm:$0xff]  ;;  %v7159_v52 = vld [vmem:[#allocation2 + $0x1a8] sm:$0xff] }
 0x592   : > { %v6657_v7 = vmax.f32 %v14005_v58, %v6656_v16  ;;  %v6677_v6 = vrot.slane %v6676_v34, 1  ;;  %v6684_v31 = vrot.slane %v6683_v44, 1  ;;  %v6697_v32 = vmax.f32 %v6695_v41, %v6696_v1 }
 0x593   : > { %v14038_v23 = vmax.f32 %v13996_v0, %v14829_v56  ;;  %v6710_v54 = vrot.slane %v6709_v49, 2  ;;  %v14042_v53 = vsel %vm4498_vm2, %v6664_v17, %v6894_v62  ;;  %v6860_v50 = vsel %vm4498_vm2, %v13752_v48, %v13748_v14  ;;  %v7161_v56 = vld [vmem:[#allocation2 + $0x1b8] sm:$0xff] }
 0x594   : > { %v14048_v0 = vsel %vm4496_vm0, %v6657_v7, %v6900_v43  ;;  %v14050_v4 = vmax.f32 %v6669_v28, %v6670_v25  ;;  %v6861_v58 = vsel %vm4500_vm3, %v13766_v30, %v6860_v50  ;;  %v6854_v41 = vsel %vm4500_vm3, %v13764_v55, %v13744_v2  ;;  %v7286_v55 = vld [vmem:[#allocation2 + $0x250] sm:$0xff] }
 0x595   : > { %v6691_v16 = vrot.slane %v6690_v21, 1  ;;  %v6704_v42 = vmax.f32 %v6702_v5, %v6703_v57  ;;  %v6862_v14 = vsel %vm4502_vm4, %v13778_v27, %v6861_v58  ;;  %v6855_v48 = vsel %vm4502_vm4, %v13770_v39, %v6854_v41  ;;  %v7287_v5 = vld [vmem:[#allocation2 + $0x258] sm:$0xff]  ;;  %v7160_v57 = vld [vmem:[#allocation2 + $0x1b0] sm:$0xff] }
 0x596   : > { %v14063_v28 = vsel %vm4504_vm5, %v13782_v61, %v6862_v14  ;;  %v14067_v30 = vsel %vm4504_vm5, %v13780_v29, %v6855_v48  ;;  %v9168_v33 = vpack.c.bf16 %v7155_v22, %v7154_v60  ;;  %v9204_v2 = vpack.c.bf16 %v7285_v46, %v7284_v20  ;;  %v7162_v22 = vld [vmem:[#allocation2 + $0x1c0] sm:$0xff]  ;;  %v7165_v14 = vld [vmem:[#allocation2 + $0x1d8] sm:$0xff]  ;;  %v7294_v48 = vld [vmem:[#allocation2 + $0x290] sm:$0xff] }
 0x597   : > { %v6678_v9 = vmax.f32 %v6676_v34, %v6677_v6  ;;  %v6685_v63 = vmax.f32 %v6683_v44, %v6684_v31  ;;  %v6698_v27 = vrot.slane %v6697_v32, 1  ;;  %v6711_v1 = vmax.f32 %v6709_v49, %v6710_v54  ;;  %8434 = vmatprep.mubr.msk.f32.mxu1 %vm2239_vm11, %v14063_v28  ;;  %8438 = vmatprep.mubr.msk.f32.mxu0 %vm2239_vm11, %v14063_v28  ;;  %v7291_v31 = vld [vmem:[#allocation2 + $0x278] sm:$0xff] }
 0x598   : > { %6983 = vmatmul.mubr.f32.vlgmr.msra.gmra.mrb[112].mxu1 %v14067_v30  ;;  %7113 = vmatmul.mubr.f32.vlgmr.msra.gmra.mrb[128].mxu0 %v14067_v30  ;;  %v9171_v39 = vpack.c.bf16 %v7157_v36, %v7156_v18  ;;  %v6874_v29 = vsel %vm4498_vm2, %v13857_v35, %v13841_v19  ;;  %v6868_v61 = vsel %vm4500_vm3, %v13859_v45, %v13853_v11  ;;  %v6705_v25 = vrot.slane %v6704_v42, 1  ;;  %v7288_v35 = vld [vmem:[#allocation2 + $0x260] sm:$0xff]  ;;  %v7289_v45 = vld [vmem:[#allocation2 + $0x268] sm:$0xff]  ;;  %v7295_v18 = vld [vmem:[#allocation2 + $0x298] sm:$0xff] }
 0x599   : > { %9169 = vmatpush1.bf16.msra.mxu1 %v9168_v33  ;;  %9205 = vmatpush1.bf16.msra.mxu0 %v9204_v2  ;;  %v9207_v49 = vpack.c.bf16 %v7287_v5, %v7286_v55  ;;  %v6875_v34 = vsel %vm4500_vm3, %v13864_v26, %v6874_v29  ;;  %v6869_v44 = vsel %vm4502_vm4, %v13899_v38, %v6868_v61  ;;  %v6712_v43 = vrot.slane %v6711_v1, 1  ;;  %v7166_v2 = vld [vmem:[#allocation2 + $0x1e0] sm:$0xff]  ;;  %v7167_v55 = vld [vmem:[#allocation2 + $0x1e8] sm:$0xff]  ;;  %v7298_v29 = vld [vmem:[#allocation2 + $0x2b0] sm:$0xff] }
 0x59a   : > { %v6692_v62 = vmax.f32 %v6690_v21, %v6691_v16  ;;  %9170 = vmatprep.subr.bf16.mxu1 %v14492_v10  ;;  %9206 = vmatprep.subr.bf16.mxu0 %v14492_v10  ;;  %v6876_v19 = vsel %vm4502_vm4, %v13904_v12, %v6875_v34  ;;  %v14091_v11 = vsel %vm4504_vm5, %v13937_v24, %v6869_v44  ;;  %v7296_v5 = vld [vmem:[#allocation2 + $0x2a0] sm:$0xff]  ;;  %v7299_v61 = vld [vmem:[#allocation2 + $0x2b8] sm:$0xff] }
 0x59b   : > { %v6699_v26 = vmax.f32 %v6697_v32, %v6698_v27  ;;  %v14095_v38 = vsel %vm4504_vm5, %v13945_v47, %v6876_v19  ;;  %v6888_v17 = vsel %vm4498_vm2, %v13962_v8, %v13956_v37  ;;  %v9174_v12 = vpack.c.bf16 %v7159_v52, %v7158_v3  ;;  %v14830_v8 = vld [vmem:[#allocation50_spill] sm:$0xff]  ;;  %v7170_v44 = vld [vmem:[#allocation2 + $0x200] sm:$0xff]  ;;  %v7171_v3 = vld [vmem:[#allocation2 + $0x208] sm:$0xff] }
 0x59c   : > { %8435 = vmatprep.mubr.msk.f32.mxu1 %vm2239_vm11, %v14095_v38  ;;  %8439 = vmatprep.mubr.msk.f32.mxu0 %vm2239_vm11, %v14095_v38  ;;  %v6889_v24 = vsel %vm4500_vm3, %v14002_v40, %v6888_v17  ;;  %v6882_v21 = vsel %vm4500_vm3, %v13967_v13, %v13948_v51  ;;  %v9210_v47 = vpack.c.bf16 %v7289_v45, %v7288_v35  ;;  %v7290_v40 = vld [vmem:[#allocation2 + $0x270] sm:$0xff]  ;;  %v7300_v52 = vld [vmem:[#allocation2 + $0x2c0] sm:$0xff]  ;;  %v7173_v45 = vld [vmem:[#allocation2 + $0x218] sm:$0xff] }
 0x59d   : > { %9172 = vmatpush1.bf16.msra.mxu1 %v9171_v39  ;;  %9208 = vmatpush1.bf16.msra.mxu0 %v9207_v49  ;;  %v6890_v37 = vsel %vm4502_vm4, %v14026_v15, %v6889_v24  ;;  %v6883_v7 = vsel %vm4502_vm4, %v14830_v8, %v6882_v21  ;;  %v6706_v6 = vmax.f32 %v6704_v42, %v6705_v25  ;;  %v7164_v42 = vld [vmem:[#allocation2 + $0x1d0] sm:$0xff]  ;;  %v7169_v39 = vld [vmem:[#allocation2 + $0x1f8] sm:$0xff]  ;;  %v7174_v24 = vld [vmem:[#allocation2 + $0x220] sm:$0xff] }
 0x59e   : > { %9173 = vmatprep.subr.bf16.mxu1 %v14492_v10  ;;  %9209 = vmatprep.subr.bf16.mxu0 %v14492_v10  ;;  %v14117_v51 = vsel %vm4504_vm5, %v14038_v23, %v6890_v37  ;;  %v14121_v13 = vsel %vm4504_vm5, %v14031_v59, %v6883_v7  ;;  %v6713_v60 = vmax.f32 %v6711_v1, %v6712_v43  ;;  %v7168_v1 = vld [vmem:[#allocation2 + $0x1f0] sm:$0xff]  ;;  %v7303_v43 = vld [vmem:[#allocation2 + $0x2d8] sm:$0xff]  ;;  %v7175_v21 = vld [vmem:[#allocation2 + $0x228] sm:$0xff] }
 0x59f   : > { %6988 = vmatmul.mubr.f32.gmra.mrb[114].mxu1 %v14091_v11  ;;  %7118 = vmatmul.mubr.f32.gmra.mrb[130].mxu0 %v14091_v11  ;;  %v6902_v15 = vsel %vm4498_vm2, %v14050_v4, %v14048_v0  ;;  %v6896_v32 = vsel %vm4500_vm3, %v6678_v9, %v14042_v53  ;;  %v9177_v54 = vpack.c.bf16 %v7161_v56, %v7160_v57  ;;  %v7163_v53 = vld [vmem:[#allocation2 + $0x1c8] sm:$0xff]  ;;  %v7292_v0 = vld [vmem:[#allocation2 + $0x280] sm:$0xff]  ;;  %v7172_v35 = vld [vmem:[#allocation2 + $0x210] sm:$0xff] }
 0x5a0   : > { %8436 = vmatprep.mubr.msk.f32.mxu1 %vm2239_vm11, %v14117_v51  ;;  %8440 = vmatprep.mubr.msk.f32.mxu0 %vm2239_vm11, %v14117_v51  ;;  %v6903_v59 = vsel %vm4500_vm3, %v6685_v63, %v6902_v15  ;;  %v6897_v23 = vsel %vm4502_vm4, %v6692_v62, %v6896_v32  ;;  %v9213_v50 = vpack.c.bf16 %v7291_v31, %v7290_v40  ;;  %v7293_v4 = vld [vmem:[#allocation2 + $0x288] sm:$0xff]  ;;  %v7176_v8 = vld [vmem:[#allocation2 + $0x230] sm:$0xff]  ;;  %v7177_v7 = vld [vmem:[#allocation2 + $0x238] sm:$0xff] }
 0x5a1   : > { %9175 = vmatpush1.bf16.msra.mxu1 %v9174_v12  ;;  %9211 = vmatpush1.bf16.msra.mxu0 %v9210_v47  ;;  %v6904_v20 = vsel %vm4502_vm4, %v6699_v26, %v6903_v59  ;;  %v14138_v46 = vsel %vm4504_vm5, %v6706_v6, %v6897_v23  ;;  %v9180_v41 = vpack.c.bf16 %v7163_v53, %v7162_v22  ;;  %v7297_v9 = vld [vmem:[#allocation2 + $0x2a8] sm:$0xff]  ;;  %v7302_v26 = vld [vmem:[#allocation2 + $0x2d0] sm:$0xff]  ;;  %v7304_v47 = vld [vmem:[#allocation2 + $0x2e0] sm:$0xff] }
 0x5a2   : > { %9176 = vmatprep.subr.bf16.mxu1 %v14492_v10  ;;  %9212 = vmatprep.subr.bf16.mxu0 %v14492_v10  ;;  %v14143_v58 = vsel %vm4504_vm5, %v6713_v60, %v6904_v20  ;;  %v9216_v16 = vpack.c.bf16 %v7293_v4, %v7292_v0  ;;  %v9183_v36 = vpack.c.bf16 %v7165_v14, %v7164_v42  ;;  %v7301_v62 = vld [vmem:[#allocation2 + $0x2c8] sm:$0xff]  ;;  %v7306_v6 = vld [vmem:[#allocation2 + $0x2f0] sm:$0xff]  ;;  %v7307_v40 = vld [vmem:[#allocation2 + $0x2f8] sm:$0xff] }
 0x5a3   : > { %6993 = vmatmul.mubr.f32.gmra.mrb[116].mxu1 %v14121_v13  ;;  %7123 = vmatmul.mubr.f32.gmra.mrb[132].mxu0 %v14121_v13  ;;  %v9219_v33 = vpack.c.bf16 %v7295_v18, %v7294_v48  ;;  %v9186_v63 = vpack.c.bf16 %v7167_v55, %v7166_v2  ;;  %v9222_v27 = vpack.c.bf16 %v7297_v9, %v7296_v5  ;;  %v7305_v57 = vld [vmem:[#allocation2 + $0x2e8] sm:$0xff]  ;;  %v7414_v15 = vld [vmem:[#allocation2 + $0x300] sm:$0xff]  ;;  %v7416_v22 = vld [vmem:[#allocation2 + $0x310] sm:$0xff] }
 0x5a4   : > { %8437 = vmatprep.mubr.msk.f32.mxu1 %vm2239_vm11, %v14143_v58  ;;  %8441 = vmatprep.mubr.msk.f32.mxu0 %vm2239_vm11, %v14143_v58  ;;  %v9189_v49 = vpack.c.bf16 %v7169_v39, %v7168_v1  ;;  %v9225_v34 = vpack.c.bf16 %v7299_v61, %v7298_v29  ;;  %v9192_v25 = vpack.c.bf16 %v7171_v3, %v7170_v44  ;;  %v7415_v32 = vld [vmem:[#allocation2 + $0x308] sm:$0xff]  ;;  %v7417_v20 = vld [vmem:[#allocation2 + $0x318] sm:$0xff]  ;;  %v7546_v53 = vld [vmem:[#allocation2 + $0x3d0] sm:$0xff] }
 0x5a5   : > { %9178 = vmatpush1.bf16.msra.mxu1 %v9177_v54  ;;  %9214 = vmatpush1.bf16.msra.mxu0 %v9213_v50  ;;  %v9228_v19 = vpack.c.bf16 %v7301_v62, %v7300_v52  ;;  %v9195_v17 = vpack.c.bf16 %v7173_v45, %v7172_v35  ;;  %v9231_v12 = vpack.c.bf16 %v7303_v43, %v7302_v26  ;;  %v7544_v54 = vld [vmem:[#allocation2 + $0x3c0] sm:$0xff]  ;;  %v7545_v59 = vld [vmem:[#allocation2 + $0x3c8] sm:$0xff]  ;;  %v7547_v0 = vld [vmem:[#allocation2 + $0x3d8] sm:$0xff] }
 0x5a6   : > { %9179 = vmatprep.subr.bf16.mxu1 %v14492_v10  ;;  %9215 = vmatprep.subr.bf16.mxu0 %v14492_v10  ;;  %v9198_v56 = vpack.c.bf16 %v7175_v21, %v7174_v24  ;;  %v9234_v37 = vpack.c.bf16 %v7305_v57, %v7304_v47  ;;  %v9201_v31 = vpack.c.bf16 %v7177_v7, %v7176_v8  ;;  %v7419_v42 = vld [vmem:[#allocation2 + $0x328] sm:$0xff]  ;;  %v7548_v14 = vld [vmem:[#allocation2 + $0x3e0] sm:$0xff]  ;;  %v7421_v2 = vld [vmem:[#allocation2 + $0x338] sm:$0xff] }
 0x5a7   : > { %6998 = vmatmul.mubr.f32.gmra.mrb[118].mxu1 %v14138_v46  ;;  %7128 = vmatmul.mubr.f32.gmra.mrb[134].mxu0 %v14138_v46  ;;  %v9237_v60 = vpack.c.bf16 %v7307_v40, %v7306_v6  ;;  %v9240_v23 = vpack.c.bf16 %v7415_v32, %v7414_v15  ;;  %v9276_v50 = vpack.c.bf16 %v7545_v59, %v7544_v54  ;;  %v7549_v48 = vld [vmem:[#allocation2 + $0x3e8] sm:$0xff]  ;;  %v7550_v55 = vld [vmem:[#allocation2 + $0x3f0] sm:$0xff]  ;;  %v7551_v5 = vld [vmem:[#allocation2 + $0x3f8] sm:$0xff] }
 0x5a8   : > { %8442 = vmatprep.mubr.msk.f32.mxu1 %vm2239_vm11, %v14063_v28  ;;  %8446 = vmatprep.mubr.msk.f32.mxu0 %vm2239_vm11, %v14063_v28  ;;  %v9243_v4 = vpack.c.bf16 %v7417_v20, %v7416_v22  ;;  %v7423_v1 = vld [vmem:[#allocation2 + $0x348] sm:$0xff]  ;;  %v7552_v39 = vld [vmem:[#allocation2 + $0x400] sm:$0xff]  ;;  %v7425_v44 = vld [vmem:[#allocation2 + $0x358] sm:$0xff] }
 0x5a9   : > { %9181 = vmatpush1.bf16.msra.mxu1 %v9180_v41  ;;  %9217 = vmatpush1.bf16.msra.mxu0 %v9216_v16  ;;  %v9279_v41 = vpack.c.bf16 %v7547_v0, %v7546_v53  ;;  %v7418_v16 = vld [vmem:[#allocation2 + $0x320] sm:$0xff]  ;;  %v7553_v29 = vld [vmem:[#allocation2 + $0x408] sm:$0xff]  ;;  %v7554_v3 = vld [vmem:[#allocation2 + $0x410] sm:$0xff] }
 0x5aa   : > { %9182 = vmatprep.subr.bf16.mxu1 %v14492_v10  ;;  %9218 = vmatprep.subr.bf16.mxu0 %v14492_v10  ;;  %v9246_v18 = vpack.c.bf16 %v7419_v42, %v7418_v16  ;;  %v7555_v52 = vld [vmem:[#allocation2 + $0x418] sm:$0xff]  ;;  %v7427_v35 = vld [vmem:[#allocation2 + $0x368] sm:$0xff]  ;;  %v7556_v45 = vld [vmem:[#allocation2 + $0x420] sm:$0xff] }
 0x5ab   : > { %v7557_v26 = vld [vmem:[#allocation2 + $0x428] sm:$0xff]  ;;  %v7429_v24 = vld [vmem:[#allocation2 + $0x378] sm:$0xff]  ;;  %v7558_v21 = vld [vmem:[#allocation2 + $0x430] sm:$0xff] }
 0x5ac   : > { %v7559_v47 = vld [vmem:[#allocation2 + $0x438] sm:$0xff]  ;;  %v7431_v8 = vld [vmem:[#allocation2 + $0x388] sm:$0xff]  ;;  %v7560_v7 = vld [vmem:[#allocation2 + $0x440] sm:$0xff] }
 0x5ad   : > { %9184 = vmatpush1.bf16.msra.mxu1 %v9183_v36  ;;  %9220 = vmatpush1.bf16.msra.mxu0 %v9219_v33  ;;  %v9282_v36 = vpack.c.bf16 %v7549_v48, %v7548_v14  ;;  %v7420_v33 = vld [vmem:[#allocation2 + $0x330] sm:$0xff]  ;;  %v7561_v6 = vld [vmem:[#allocation2 + $0x448] sm:$0xff]  ;;  %v7433_v15 = vld [vmem:[#allocation2 + $0x398] sm:$0xff] }
 0x5ae   : > { %9185 = vmatprep.subr.bf16.mxu1 %v14492_v10  ;;  %9221 = vmatprep.subr.bf16.mxu0 %v14492_v10  ;;  %v9249_v9 = vpack.c.bf16 %v7421_v2, %v7420_v33  ;;  %v7562_v32 = vld [vmem:[#allocation2 + $0x450] sm:$0xff]  ;;  %v7563_v54 = vld [vmem:[#allocation2 + $0x458] sm:$0xff]  ;;  %v7435_v22 = vld [vmem:[#allocation2 + $0x3a8] sm:$0xff] }
 0x5af   : > { %v7564_v20 = vld [vmem:[#allocation2 + $0x460] sm:$0xff]  ;;  %v7565_v53 = vld [vmem:[#allocation2 + $0x468] sm:$0xff]  ;;  %v7437_v16 = vld [vmem:[#allocation2 + $0x3b8] sm:$0xff] }
 0x5b0   : > { %v7566_v42 = vld [vmem:[#allocation2 + $0x470] sm:$0xff]  ;;  %v7567_v14 = vld [vmem:[#allocation2 + $0x478] sm:$0xff]  ;;  %v7675_v33 = vld [vmem:[#allocation2 + $0x488] sm:$0xff] }
 0x5b1   : > { %9187 = vmatpush1.bf16.msra.mxu1 %v9186_v63  ;;  %9223 = vmatpush1.bf16.msra.mxu0 %v9222_v27  ;;  %v9285_v63 = vpack.c.bf16 %v7551_v5, %v7550_v55  ;;  %v7422_v27 = vld [vmem:[#allocation2 + $0x340] sm:$0xff]  ;;  %v7805_v55 = vld [vmem:[#allocation2 + $0x548] sm:$0xff] }
 0x5b2   : > { %9188 = vmatprep.subr.bf16.mxu1 %v14492_v10  ;;  %9224 = vmatprep.subr.bf16.mxu0 %v14492_v10  ;;  %v9252_v61 = vpack.c.bf16 %v7423_v1, %v7422_v27  ;;  %v7804_v2 = vld [vmem:[#allocation2 + $0x540] sm:$0xff]  ;;  %v7677_v27 = vld [vmem:[#allocation2 + $0x498] sm:$0xff]  ;;  %v7806_v1 = vld [vmem:[#allocation2 + $0x550] sm:$0xff] }
 0x5b5   : > { %9190 = vmatpush1.bf16.msra.mxu1 %v9189_v49  ;;  %9226 = vmatpush1.bf16.msra.mxu0 %v9225_v34  ;;  %v9288_v49 = vpack.c.bf16 %v7553_v29, %v7552_v39  ;;  %v7424_v34 = vld [vmem:[#allocation2 + $0x350] sm:$0xff]  ;;  %v7807_v39 = vld [vmem:[#allocation2 + $0x558] sm:$0xff] }
 0x5b6   : > { %9191 = vmatprep.subr.bf16.mxu1 %v14492_v10  ;;  %9227 = vmatprep.subr.bf16.mxu0 %v14492_v10  ;;  %v9255_v62 = vpack.c.bf16 %v7425_v44, %v7424_v34  ;;  %v7679_v34 = vld [vmem:[#allocation2 + $0x4a8] sm:$0xff]  ;;  %v7808_v44 = vld [vmem:[#allocation2 + $0x560] sm:$0xff] }
 0x5b9   : > { %9193 = vmatpush1.bf16.msra.mxu1 %v9192_v25  ;;  %9229 = vmatpush1.bf16.msra.mxu0 %v9228_v19  ;;  %v9291_v25 = vpack.c.bf16 %v7555_v52, %v7554_v3  ;;  %v7426_v19 = vld [vmem:[#allocation2 + $0x360] sm:$0xff]  ;;  %v7809_v3 = vld [vmem:[#allocation2 + $0x568] sm:$0xff] }
 0x5ba   : > { %9194 = vmatprep.subr.bf16.mxu1 %v14492_v10  ;;  %9230 = vmatprep.subr.bf16.mxu0 %v14492_v10  ;;  %v9258_v43 = vpack.c.bf16 %v7427_v35, %v7426_v19  ;;  %v7681_v19 = vld [vmem:[#allocation2 + $0x4b8] sm:$0xff]  ;;  %v7810_v35 = vld [vmem:[#allocation2 + $0x570] sm:$0xff] }
 0x5bd   : > { %9196 = vmatpush1.bf16.msra.mxu1 %v9195_v17  ;;  %9232 = vmatpush1.bf16.msra.mxu0 %v9231_v12  ;;  %v9294_v17 = vpack.c.bf16 %v7557_v26, %v7556_v45  ;;  %v7428_v12 = vld [vmem:[#allocation2 + $0x370] sm:$0xff]  ;;  %v7811_v45 = vld [vmem:[#allocation2 + $0x578] sm:$0xff] }
 0x5be   : > { %9197 = vmatprep.subr.bf16.mxu1 %v14492_v10  ;;  %9233 = vmatprep.subr.bf16.mxu0 %v14492_v10  ;;  %v9261_v57 = vpack.c.bf16 %v7429_v24, %v7428_v12  ;;  %v7683_v12 = vld [vmem:[#allocation2 + $0x4c8] sm:$0xff]  ;;  %v7812_v24 = vld [vmem:[#allocation2 + $0x580] sm:$0xff] }
 0x5c1   : > { %9199 = vmatpush1.bf16.msra.mxu1 %v9198_v56  ;;  %9235 = vmatpush1.bf16.msra.mxu0 %v9234_v37  ;;  %v9297_v56 = vpack.c.bf16 %v7559_v47, %v7558_v21  ;;  %v7430_v37 = vld [vmem:[#allocation2 + $0x380] sm:$0xff]  ;;  %v7813_v21 = vld [vmem:[#allocation2 + $0x588] sm:$0xff] }
 0x5c2   : > { %9200 = vmatprep.subr.bf16.mxu1 %v14492_v10  ;;  %9236 = vmatprep.subr.bf16.mxu0 %v14492_v10  ;;  %v9264_v40 = vpack.c.bf16 %v7431_v8, %v7430_v37  ;;  %v7685_v37 = vld [vmem:[#allocation2 + $0x4d8] sm:$0xff]  ;;  %v7814_v8 = vld [vmem:[#allocation2 + $0x590] sm:$0xff] }
 0x5c5   : > { %9202 = vmatpush1.bf16.msra.mxu1 %v9201_v31  ;;  %9238 = vmatpush1.bf16.msra.mxu0 %v9237_v60  ;;  %v9300_v31 = vpack.c.bf16 %v7561_v6, %v7560_v7  ;;  %v7432_v60 = vld [vmem:[#allocation2 + $0x390] sm:$0xff]  ;;  %v7815_v7 = vld [vmem:[#allocation2 + $0x598] sm:$0xff] }
 0x5c6   : > { %9239 = vmatprep.subr.bf16.mxu1 %v14492_v10  ;;  %9275 = vmatprep.subr.bf16.mxu0 %v14492_v10  ;;  %v9267_v59 = vpack.c.bf16 %v7433_v15, %v7432_v60  ;;  %v7816_v60 = vld [vmem:[#allocation2 + $0x5a0] sm:$0xff]  ;;  %v7817_v15 = vld [vmem:[#allocation2 + $0x5a8] sm:$0xff] }
 0x5c8   : > { %7243 = vmatmul.mubr.f32.vlgmr.msra.gmra.mrb[120].mxu1 %v14067_v30  ;;  %7373 = vmatmul.mubr.f32.vlgmr.msra.gmra.mrb[136].mxu0 %v14067_v30 }
 0x5c9   : > { %8443 = vmatprep.mubr.msk.f32.mxu1 %vm2239_vm11, %v14095_v38  ;;  %8447 = vmatprep.mubr.msk.f32.mxu0 %vm2239_vm11, %v14095_v38 }
 0x5ca   : > { %9241 = vmatpush1.bf16.msra.mxu1 %v9240_v23  ;;  %9277 = vmatpush1.bf16.msra.mxu0 %v9276_v50  ;;  %v9303_v23 = vpack.c.bf16 %v7563_v54, %v7562_v32  ;;  %v7434_v50 = vld [vmem:[#allocation2 + $0x3a0] sm:$0xff]  ;;  %v9366_v54 = vpack.c.bf16 %v7817_v15, %v7816_v60 }
 0x5cb   : > { %9242 = vmatprep.subr.bf16.mxu1 %v14492_v10  ;;  %9278 = vmatprep.subr.bf16.mxu0 %v14492_v10  ;;  %v9270_v0 = vpack.c.bf16 %v7435_v22, %v7434_v50  ;;  %v7818_v50 = vld [vmem:[#allocation2 + $0x5b0] sm:$0xff]  ;;  %v7819_v22 = vld [vmem:[#allocation2 + $0x5b8] sm:$0xff] }
 0x5cc   : > { %7248 = vmatmul.mubr.f32.gmra.mrb[122].mxu1 %v14091_v11  ;;  %7378 = vmatmul.mubr.f32.gmra.mrb[138].mxu0 %v14091_v11 }
 0x5cd   : > { %8444 = vmatprep.mubr.msk.f32.mxu1 %vm2239_vm11, %v14117_v51  ;;  %8448 = vmatprep.mubr.msk.f32.mxu0 %vm2239_vm11, %v14117_v51 }
 0x5ce   : > { %9244 = vmatpush1.bf16.msra.mxu1 %v9243_v4  ;;  %9280 = vmatpush1.bf16.msra.mxu0 %v9279_v41  ;;  %v9306_v4 = vpack.c.bf16 %v7565_v53, %v7564_v20  ;;  %v7436_v41 = vld [vmem:[#allocation2 + $0x3b0] sm:$0xff]  ;;  %v9369_v53 = vpack.c.bf16 %v7819_v22, %v7818_v50 }
 0x5cf   : > { %9245 = vmatprep.subr.bf16.mxu1 %v14492_v10  ;;  %9281 = vmatprep.subr.bf16.mxu0 %v14492_v10  ;;  %v9273_v48 = vpack.c.bf16 %v7437_v16, %v7436_v41  ;;  %v7820_v41 = vld [vmem:[#allocation2 + $0x5c0] sm:$0xff]  ;;  %v7821_v16 = vld [vmem:[#allocation2 + $0x5c8] sm:$0xff] }
 0x5d0   : > { %7253 = vmatmul.mubr.f32.gmra.mrb[124].mxu1 %v14121_v13  ;;  %7383 = vmatmul.mubr.f32.gmra.mrb[140].mxu0 %v14121_v13 }
 0x5d1   : > { %8445 = vmatprep.mubr.msk.f32.mxu1 %vm2239_vm11, %v14143_v58  ;;  %8449 = vmatprep.mubr.msk.f32.mxu0 %vm2239_vm11, %v14143_v58 }
 0x5d2   : > { %9247 = vmatpush1.bf16.msra.mxu1 %v9246_v18  ;;  %9283 = vmatpush1.bf16.msra.mxu0 %v9282_v36  ;;  %v9309_v18 = vpack.c.bf16 %v7567_v14, %v7566_v42  ;;  %v7674_v36 = vld [vmem:[#allocation2 + $0x480] sm:$0xff]  ;;  %v9372_v14 = vpack.c.bf16 %v7821_v16, %v7820_v41 }
 0x5d3   : > { %9248 = vmatprep.subr.bf16.mxu1 %v14492_v10  ;;  %9284 = vmatprep.subr.bf16.mxu0 %v14492_v10  ;;  %v9312_v5 = vpack.c.bf16 %v7675_v33, %v7674_v36  ;;  %v7822_v36 = vld [vmem:[#allocation2 + $0x5d0] sm:$0xff]  ;;  %v7823_v33 = vld [vmem:[#allocation2 + $0x5d8] sm:$0xff] }
 0x5d4   : > { %7258 = vmatmul.mubr.f32.gmra.mrb[126].mxu1 %v14138_v46  ;;  %7388 = vmatmul.mubr.f32.gmra.mrb[142].mxu0 %v14138_v46 }
 0x5d5   : > { %8450 = vmatprep.mubr.msk.f32.mxu1 %vm2239_vm11, %v14063_v28  ;;  %8454 = vmatprep.mubr.msk.f32.mxu0 %vm2239_vm11, %v14063_v28 }
 0x5d6   : > { %9250 = vmatpush1.bf16.msra.mxu1 %v9249_v9  ;;  %9286 = vmatpush1.bf16.msra.mxu0 %v9285_v63  ;;  %v9348_v9 = vpack.c.bf16 %v7805_v55, %v7804_v2  ;;  %v7676_v63 = vld [vmem:[#allocation2 + $0x490] sm:$0xff]  ;;  %v9375_v55 = vpack.c.bf16 %v7823_v33, %v7822_v36 }
 0x5d7   : > { %9251 = vmatprep.subr.bf16.mxu1 %v14492_v10  ;;  %9287 = vmatprep.subr.bf16.mxu0 %v14492_v10  ;;  %v9315_v29 = vpack.c.bf16 %v7677_v27, %v7676_v63  ;;  %v7824_v63 = vld [vmem:[#allocation2 + $0x5e0] sm:$0xff]  ;;  %v7825_v27 = vld [vmem:[#allocation2 + $0x5e8] sm:$0xff] }
 0x5da   : > { %9253 = vmatpush1.bf16.msra.mxu1 %v9252_v61  ;;  %9289 = vmatpush1.bf16.msra.mxu0 %v9288_v49  ;;  %v9351_v61 = vpack.c.bf16 %v7807_v39, %v7806_v1  ;;  %v7678_v49 = vld [vmem:[#allocation2 + $0x4a0] sm:$0xff]  ;;  %v9378_v39 = vpack.c.bf16 %v7825_v27, %v7824_v63 }
 0x5db   : > { %9254 = vmatprep.subr.bf16.mxu1 %v14492_v10  ;;  %9290 = vmatprep.subr.bf16.mxu0 %v14492_v10  ;;  %v9318_v52 = vpack.c.bf16 %v7679_v34, %v7678_v49  ;;  %v7826_v49 = vld [vmem:[#allocation2 + $0x5f0] sm:$0xff]  ;;  %v7827_v34 = vld [vmem:[#allocation2 + $0x5f8] sm:$0xff] }
 0x5de   : > { %9256 = vmatpush1.bf16.msra.mxu1 %v9255_v62  ;;  %9292 = vmatpush1.bf16.msra.mxu0 %v9291_v25  ;;  %v9354_v62 = vpack.c.bf16 %v7809_v3, %v7808_v44  ;;  %v7680_v25 = vld [vmem:[#allocation2 + $0x4b0] sm:$0xff]  ;;  %v9381_v3 = vpack.c.bf16 %v7827_v34, %v7826_v49 }
 0x5df   : > { %9257 = vmatprep.subr.bf16.mxu1 %v14492_v10  ;;  %9293 = vmatprep.subr.bf16.mxu0 %v14492_v10  ;;  %v9321_v26 = vpack.c.bf16 %v7681_v19, %v7680_v25 }
 0x5e2   : > { %9259 = vmatpush1.bf16.msra.mxu1 %v9258_v43  ;;  %9295 = vmatpush1.bf16.msra.mxu0 %v9294_v17  ;;  %v9357_v43 = vpack.c.bf16 %v7811_v45, %v7810_v35  ;;  %v7682_v17 = vld [vmem:[#allocation2 + $0x4c0] sm:$0xff] }
 0x5e3   : > { %9260 = vmatprep.subr.bf16.mxu1 %v14492_v10  ;;  %9296 = vmatprep.subr.bf16.mxu0 %v14492_v10  ;;  %v9324_v47 = vpack.c.bf16 %v7683_v12, %v7682_v17  ;;  %v14833_v35 = vld [vmem:[#allocation55_spill] sm:$0xff] }
 0x5e4   : > { %v14298_v45 = vand.u32 7, %v14833_v35 }
 0x5e6   : > { %9262 = vmatpush1.bf16.msra.mxu1 %v9261_v57  ;;  %9298 = vmatpush1.bf16.msra.mxu0 %v9297_v56  ;;  %v9360_v57 = vpack.c.bf16 %v7813_v21, %v7812_v24  ;;  %v7684_v56 = vld [vmem:[#allocation2 + $0x4d0] sm:$0xff]  ;;  %v14834_v21 = vld [vmem:[#allocation24_spill] sm:$0xff]  ;;  %vm7005_vm2 = vcmp.eq.s32.totalorder %v14298_v45, 0  ;;  %vm7135_vm3 = vcmp.eq.s32.totalorder %v14298_v45, 1  ;;  %vm7265_vm9 = vcmp.eq.s32.totalorder %v14298_v45, 2 }
 0x5e7   : > { %9263 = vmatprep.subr.bf16.mxu1 %v14492_v10  ;;  %9299 = vmatprep.subr.bf16.mxu0 %v14492_v10  ;;  %v9327_v6 = vpack.c.bf16 %v7685_v37, %v7684_v56 }
 0x5ea   : > { %9265 = vmatpush1.bf16.msra.mxu1 %v9264_v40  ;;  %9301 = vmatpush1.bf16.msra.mxu0 %v9300_v31  ;;  %v9363_v40 = vpack.c.bf16 %v7815_v7, %v7814_v8  ;;  %v7686_v31 = vld [vmem:[#allocation2 + $0x4e0] sm:$0xff] }
 0x5eb   : > { %9266 = vmatprep.subr.bf16.mxu1 %v14492_v10  ;;  %9302 = vmatprep.subr.bf16.mxu0 %v14492_v10 }
 0x5ee   : > { %9268 = vmatpush1.bf16.msra.mxu1 %v9267_v59  ;;  %9304 = vmatpush1.bf16.msra.mxu0 %v9303_v23  ;;  %v7688_v59 = vld [vmem:[#allocation2 + $0x4f0] sm:$0xff]  ;;  %v7689_v23 = vld [vmem:[#allocation2 + $0x4f8] sm:$0xff] }
 0x5ef   : > { %9269 = vmatprep.subr.bf16.mxu1 %v14492_v10  ;;  %9305 = vmatprep.subr.bf16.mxu0 %v14492_v10  ;;  %v9333_v20 = vpack.c.bf16 %v7689_v23, %v7688_v59 }
 0x5f2   : > { %9271 = vmatpush1.bf16.msra.mxu1 %v9270_v0  ;;  %9307 = vmatpush1.bf16.msra.mxu0 %v9306_v4  ;;  %v7690_v0 = vld [vmem:[#allocation2 + $0x500] sm:$0xff]  ;;  %v7691_v4 = vld [vmem:[#allocation2 + $0x508] sm:$0xff] }
 0x5f3   : > { %9272 = vmatprep.subr.bf16.mxu1 %v14492_v10  ;;  %9308 = vmatprep.subr.bf16.mxu0 %v14492_v10  ;;  %v9336_v42 = vpack.c.bf16 %v7691_v4, %v7690_v0 }
 0x5f6   : > { %9274 = vmatpush1.bf16.msra.mxu1 %v9273_v48  ;;  %9310 = vmatpush1.bf16.msra.mxu0 %v9309_v18  ;;  %v7692_v48 = vld [vmem:[#allocation2 + $0x510] sm:$0xff]  ;;  %v7693_v18 = vld [vmem:[#allocation2 + $0x518] sm:$0xff] }
 0x5f7   : > { %9311 = vmatprep.subr.bf16.mxu1 %v14492_v10  ;;  %9347 = vmatprep.subr.bf16.mxu0 %v14492_v10  ;;  %v9339_v2 = vpack.c.bf16 %v7693_v18, %v7692_v48 }
 0x5f9   : > { %7503 = vmatmul.mubr.f32.vlgmr.msra.gmra.mrb[128].mxu1 %v14067_v30  ;;  %7633 = vmatmul.mubr.f32.vlgmr.msra.gmra.mrb[144].mxu0 %v14067_v30 }
 0x5fa   : > { %8451 = vmatprep.mubr.msk.f32.mxu1 %vm2239_vm11, %v14095_v38  ;;  %8455 = vmatprep.mubr.msk.f32.mxu0 %vm2239_vm11, %v14095_v38 }
 0x5fb   : > { %9313 = vmatpush1.bf16.msra.mxu1 %v9312_v5  ;;  %9349 = vmatpush1.bf16.msra.mxu0 %v9348_v9  ;;  %v7694_v5 = vld [vmem:[#allocation2 + $0x520] sm:$0xff]  ;;  %v7695_v9 = vld [vmem:[#allocation2 + $0x528] sm:$0xff] }
 0x5fc   : > { %9314 = vmatprep.subr.bf16.mxu1 %v14492_v10  ;;  %9350 = vmatprep.subr.bf16.mxu0 %v14492_v10  ;;  %v9342_v1 = vpack.c.bf16 %v7695_v9, %v7694_v5 }
 0x5fd   : > { %7508 = vmatmul.mubr.f32.gmra.mrb[130].mxu1 %v14091_v11  ;;  %7638 = vmatmul.mubr.f32.gmra.mrb[146].mxu0 %v14091_v11 }
 0x5fe   : > { %8452 = vmatprep.mubr.msk.f32.mxu1 %vm2239_vm11, %v14117_v51  ;;  %8456 = vmatprep.mubr.msk.f32.mxu0 %vm2239_vm11, %v14117_v51 }
 0x5ff   : > { %9316 = vmatpush1.bf16.msra.mxu1 %v9315_v29  ;;  %9352 = vmatpush1.bf16.msra.mxu0 %v9351_v61  ;;  %v7696_v29 = vld [vmem:[#allocation2 + $0x530] sm:$0xff]  ;;  %v7697_v61 = vld [vmem:[#allocation2 + $0x538] sm:$0xff] }
 0x600   : > { %9317 = vmatprep.subr.bf16.mxu1 %v14492_v10  ;;  %9353 = vmatprep.subr.bf16.mxu0 %v14492_v10  ;;  %v9345_v44 = vpack.c.bf16 %v7697_v61, %v7696_v29 }
 0x601   : > { %7513 = vmatmul.mubr.f32.gmra.mrb[132].mxu1 %v14121_v13  ;;  %7643 = vmatmul.mubr.f32.gmra.mrb[148].mxu0 %v14121_v13 }
 0x602   : > { %8453 = vmatprep.mubr.msk.f32.mxu1 %vm2239_vm11, %v14143_v58  ;;  %8457 = vmatprep.mubr.msk.f32.mxu0 %vm2239_vm11, %v14143_v58 }
 0x603   : > { %9319 = vmatpush1.bf16.msra.mxu1 %v9318_v52  ;;  %9355 = vmatpush1.bf16.msra.mxu0 %v9354_v62 }
 0x604   : > { %9320 = vmatprep.subr.bf16.mxu1 %v14492_v10  ;;  %9356 = vmatprep.subr.bf16.mxu0 %v14492_v10 }
 0x605   : > { %7518 = vmatmul.mubr.f32.gmra.mrb[134].mxu1 %v14138_v46  ;;  %7648 = vmatmul.mubr.f32.gmra.mrb[150].mxu0 %v14138_v46 }
 0x606   : > { %8458 = vmatprep.mubr.msk.f32.mxu1 %vm2239_vm11, %v14063_v28  ;;  %8462 = vmatprep.mubr.msk.f32.mxu0 %vm2239_vm11, %v14063_v28  ;;  %v7687_v28 = vld [vmem:[#allocation2 + $0x4e8] sm:$0xff] }
 0x607   : > { %9322 = vmatpush1.bf16.msra.mxu1 %v9321_v26  ;;  %9358 = vmatpush1.bf16.msra.mxu0 %v9357_v43  ;;  %v9330_v32 = vpack.c.bf16 %v7687_v28, %v7686_v31 }
 0x608   : > { %9323 = vmatprep.subr.bf16.mxu1 %v14492_v10  ;;  %9359 = vmatprep.subr.bf16.mxu0 %v14492_v10 }
 0x60b   : > { %9325 = vmatpush1.bf16.msra.mxu1 %v9324_v47  ;;  %9361 = vmatpush1.bf16.msra.mxu0 %v9360_v57  ;;  %v14303_v47 = vand.u32 7, %v14834_v21 }
 0x60c   : > { %9326 = vmatprep.subr.bf16.mxu1 %v14492_v10  ;;  %9362 = vmatprep.subr.bf16.mxu0 %v14492_v10 }
 0x60d   : > { %vm7006_vm4 = vcmp.eq.s32.totalorder %v14303_v47, 0  ;;  %vm7136_vm5 = vcmp.eq.s32.totalorder %v14303_v47, 1 }
 0x60f   : > { %9328 = vmatpush1.bf16.msra.mxu1 %v9327_v6  ;;  %9364 = vmatpush1.bf16.msra.mxu0 %v9363_v40 }
 0x610   : > { %9329 = vmatprep.subr.bf16.mxu1 %v14492_v10  ;;  %9365 = vmatprep.subr.bf16.mxu0 %v14492_v10 }
 0x613   : > { %9331 = vmatpush1.bf16.msra.mxu1 %v9330_v32  ;;  %9367 = vmatpush1.bf16.msra.mxu0 %v9366_v54 }
 0x614   : > { %9332 = vmatprep.subr.bf16.mxu1 %v14492_v10  ;;  %9368 = vmatprep.subr.bf16.mxu0 %v14492_v10 }
 0x617   : > { %9334 = vmatpush1.bf16.msra.mxu1 %v9333_v20  ;;  %9370 = vmatpush1.bf16.msra.mxu0 %v9369_v53 }
 0x618   : > { %9335 = vmatprep.subr.bf16.mxu1 %v14492_v10  ;;  %9371 = vmatprep.subr.bf16.mxu0 %v14492_v10 }
 0x61b   : > { %9337 = vmatpush1.bf16.msra.mxu1 %v9336_v42  ;;  %9373 = vmatpush1.bf16.msra.mxu0 %v9372_v14 }
 0x61c   : > { %9338 = vmatprep.subr.bf16.mxu1 %v14492_v10  ;;  %9374 = vmatprep.subr.bf16.mxu0 %v14492_v10 }
 0x61f   : > { %9340 = vmatpush1.bf16.msra.mxu1 %v9339_v2  ;;  %9376 = vmatpush1.bf16.msra.mxu0 %v9375_v55 }
 0x620   : > { %9341 = vmatprep.subr.bf16.mxu1 %v14492_v10  ;;  %9377 = vmatprep.subr.bf16.mxu0 %v14492_v10 }
 0x623   : > { %9343 = vmatpush1.bf16.msra.mxu1 %v9342_v1  ;;  %9379 = vmatpush1.bf16.msra.mxu0 %v9378_v39 }
 0x624   : > { %9344 = vmatprep.subr.bf16.mxu1 %v14492_v10  ;;  %9380 = vmatprep.subr.bf16.mxu0 %v14492_v10  ;;  %v14831_v10 = vld [vmem:[#allocation8_spill] sm:$0xff] }
 0x627   : > { %9346 = vmatpush1.bf16.msra.mxu1 %v9345_v44  ;;  %9382 = vmatpush1.bf16.msra.mxu0 %v9381_v3 }
 0x62a   : > { %7763 = vmatmul.mubr.f32.vlgmr.msra.gmra.mrb[136].mxu1 %v14067_v30  ;;  %7893 = vmatmul.mubr.f32.vlgmr.msra.gmra.mrb[152].mxu0 %v14067_v30  ;;  %v14290_v30 = vand.u32 7, %v14831_v10 }
 0x62b   : > { %8459 = vmatprep.mubr.msk.f32.mxu1 %vm2239_vm11, %v14095_v38  ;;  %8463 = vmatprep.mubr.msk.f32.mxu0 %vm2239_vm11, %v14095_v38 }
 0x62c   : > { %vm7003_vm6 = vcmp.eq.s32.totalorder %v14290_v30, 0  ;;  %vm7133_vm12 = vcmp.eq.s32.totalorder %v14290_v30, 1  ;;  %vm7263_vm10 = vcmp.eq.s32.totalorder %v14290_v30, 2  ;;  %vm7393_vm1 = vcmp.eq.s32.totalorder %v14290_v30, 3 }
 0x62e   : > { %7768 = vmatmul.mubr.f32.gmra.mrb[138].mxu1 %v14091_v11  ;;  %7898 = vmatmul.mubr.f32.gmra.mrb[154].mxu0 %v14091_v11 }
 0x62f   : > { %8460 = vmatprep.mubr.msk.f32.mxu1 %vm2239_vm11, %v14117_v51  ;;  %8464 = vmatprep.mubr.msk.f32.mxu0 %vm2239_vm11, %v14117_v51  ;;  %v14832_v51 = vld [vmem:[#allocation54_spill] sm:$0xff] }
 0x632   : > { %7773 = vmatmul.mubr.f32.gmra.mrb[140].mxu1 %v14121_v13  ;;  %7903 = vmatmul.mubr.f32.gmra.mrb[156].mxu0 %v14121_v13  ;;  %v14295_v13 = vand.u32 7, %v14832_v51 }
 0x633   : > { %8461 = vmatprep.mubr.msk.f32.mxu1 %vm2239_vm11, %v14143_v58  ;;  %8465 = vmatprep.mubr.msk.f32.mxu0 %vm2239_vm11, %v14143_v58 }
 0x634   : > { %vm7004_vm11 = vcmp.eq.s32.totalorder %v14295_v13, 0  ;;  %vm7134_vm13 = vcmp.eq.s32.totalorder %v14295_v13, 1  ;;  %vm7264_vm7 = vcmp.eq.s32.totalorder %v14295_v13, 2  ;;  %vm7394_vm8 = vcmp.eq.s32.totalorder %v14295_v13, 3 }
 0x636   : > { %7778 = vmatmul.mubr.f32.gmra.mrb[142].mxu1 %v14138_v46  ;;  %7908 = vmatmul.mubr.f32.gmra.mrb[158].mxu0 %v14138_v46 }
 0x66b   : > { %v6984_v11 = vpop.f32.mrb[112].mxu1  ;;  %v7114_v38 = vpop.f32.mrb[128].mxu0 }
 0x66c   : > { %v7015_v52 = vsel %vm7003_vm6, %v6984_v11, 0.0  ;;  %v7145_v62 = vsel %vm7133_vm12, %v7114_v38, 0.0  ;;  %v6986_v25 = vpop.f32.mrb[113].mxu1  ;;  %v7116_v58 = vpop.f32.mrb[129].mxu0  ;;  %vm7395_vm6 = vcmp.eq.s32.totalorder %v14298_v45, 3  ;;  %vm7266_vm12 = vcmp.eq.s32.totalorder %v14303_v47, 2 }
 0x66d   : > { %v7149_v19 = vadd.f32 %v7145_v62, %v7015_v52 }
 0x672   : > { %v6989_v46 = vpop.f32.mrb[114].mxu1  ;;  %v7119_v26 = vpop.f32.mrb[130].mxu0 }
 0x673   : > { %v7016_v43 = vsel %vm7004_vm11, %v6989_v46, 0.0  ;;  %v7146_v17 = vsel %vm7134_vm13, %v7119_v26, 0.0  ;;  %v6991_v12 = vpop.f32.mrb[115].mxu1  ;;  %v7121_v24 = vpop.f32.mrb[131].mxu0  ;;  %vm7396_vm11 = vcmp.eq.s32.totalorder %v14303_v47, 3  ;;  %vm7523_vm13 = vcmp.eq.s32.totalorder %v14290_v30, 4 }
 0x674   : > { %v7150_v57 = vadd.f32 %v7146_v17, %v7016_v43 }
 0x676   : > { %v6994_v56 = vpop.f32.mrb[116].mxu1  ;;  %v7124_v37 = vpop.f32.mrb[132].mxu0 }
 0x677   : > { %v7017_v8 = vsel %vm7005_vm2, %v6994_v56, 0.0  ;;  %v7147_v7 = vsel %vm7135_vm3, %v7124_v37, 0.0  ;;  %v6996_v6 = vpop.f32.mrb[117].mxu1  ;;  %v7126_v40 = vpop.f32.mrb[133].mxu0  ;;  %vm7653_vm2 = vcmp.eq.s32.totalorder %v14290_v30, 5  ;;  %vm7524_vm3 = vcmp.eq.s32.totalorder %v14295_v13, 4 }
 0x678   : > { %v7151_v31 = vadd.f32 %v7147_v7, %v7017_v8 }
 0x67a   : > { %v6999_v28 = vpop.f32.mrb[118].mxu1  ;;  %v7129_v60 = vpop.f32.mrb[134].mxu0 }
 0x67b   : > { %v7018_v15 = vsel %vm7006_vm4, %v6999_v28, 0.0  ;;  %v7148_v32 = vsel %vm7136_vm5, %v7129_v60, 0.0  ;;  %v7001_v54 = vpop.f32.mrb[119].mxu1  ;;  %v7131_v59 = vpop.f32.mrb[135].mxu0  ;;  %vm7654_vm4 = vcmp.eq.s32.totalorder %v14295_v13, 5  ;;  %vm7525_vm5 = vcmp.eq.s32.totalorder %v14298_v45, 4 }
 0x67c   : > { %v7152_v23 = vadd.f32 %v7148_v32, %v7018_v15 }
 0x69b   : > { %v7244_v50 = vpop.f32.mrb[120].mxu1  ;;  %v7374_v22 = vpop.f32.mrb[136].mxu0 }
 0x69c   : > { %v7275_v20 = vsel %vm7263_vm10, %v7244_v50, 0.0  ;;  %v7246_v53 = vpop.f32.mrb[121].mxu1  ;;  %v7376_v0 = vpop.f32.mrb[137].mxu0  ;;  %v7405_v41 = vsel %vm7393_vm1, %v7374_v22, 0.0  ;;  %vm7655_vm10 = vcmp.eq.s32.totalorder %v14298_v45, 5  ;;  %vm7526_vm1 = vcmp.eq.s32.totalorder %v14303_v47, 4 }
 0x69d   : > { %v7279_v4 = vadd.f32 %v7275_v20, %v7149_v19 }
 0x69f   : > { %v7409_v16 = vadd.f32 %v7405_v41, %v7279_v4  ;;  %v7249_v42 = vpop.f32.mrb[122].mxu1  ;;  %v7379_v14 = vpop.f32.mrb[138].mxu0 }
 0x6a0   : > { %v7276_v48 = vsel %vm7264_vm7, %v7249_v42, 0.0  ;;  %v7406_v18 = vsel %vm7394_vm8, %v7379_v14, 0.0  ;;  %v7251_v36 = vpop.f32.mrb[123].mxu1  ;;  %v7381_v33 = vpop.f32.mrb[139].mxu0  ;;  %vm7656_vm7 = vcmp.eq.s32.totalorder %v14303_v47, 5  ;;  %vm7783_vm8 = vcmp.eq.s32.totalorder %v14290_v30, 6 }
 0x6a1   : > { %v7280_v2 = vadd.f32 %v7276_v48, %v7150_v57 }
 0x6a3   : > { %v7410_v55 = vadd.f32 %v7406_v18, %v7280_v2  ;;  %v7254_v5 = vpop.f32.mrb[124].mxu1  ;;  %v7384_v9 = vpop.f32.mrb[140].mxu0 }
 0x6a4   : > { %v7277_v63 = vsel %vm7265_vm9, %v7254_v5, 0.0  ;;  %v7407_v27 = vsel %vm7395_vm6, %v7384_v9, 0.0  ;;  %v7256_v1 = vpop.f32.mrb[125].mxu1  ;;  %v7386_v39 = vpop.f32.mrb[141].mxu0  ;;  %vm7913_vm9 = vcmp.eq.s32.totalorder %v14290_v30, 7  ;;  %vm7784_vm6 = vcmp.eq.s32.totalorder %v14295_v13, 6 }
 0x6a5   : > { %v7281_v29 = vadd.f32 %v7277_v63, %v7151_v31 }
 0x6a7   : > { %v7411_v61 = vadd.f32 %v7407_v27, %v7281_v29  ;;  %v7259_v49 = vpop.f32.mrb[126].mxu1  ;;  %v7389_v34 = vpop.f32.mrb[142].mxu0 }
 0x6a8   : > { %v7278_v44 = vsel %vm7266_vm12, %v7259_v49, 0.0  ;;  %v7261_v3 = vpop.f32.mrb[127].mxu1  ;;  %v7391_v10 = vpop.f32.mrb[143].mxu0  ;;  %v7408_v38 = vsel %vm7396_vm11, %v7389_v34, 0.0  ;;  %vm7914_vm12 = vcmp.eq.s32.totalorder %v14295_v13, 7  ;;  %vm7785_vm11 = vcmp.eq.s32.totalorder %v14298_v45, 6 }
 0x6a9   : > { %v7282_v11 = vadd.f32 %v7278_v44, %v7152_v23 }
 0x6ab   : > { %v7412_v51 = vadd.f32 %v7408_v38, %v7282_v11 }
 0x6cc   : > { %v7504_v52 = vpop.f32.mrb[128].mxu1  ;;  %v7634_v62 = vpop.f32.mrb[144].mxu0 }
 0x6cd   : > { %v7535_v25 = vsel %vm7523_vm13, %v7504_v52, 0.0  ;;  %v7506_v58 = vpop.f32.mrb[129].mxu1  ;;  %v7636_v19 = vpop.f32.mrb[145].mxu0  ;;  %v7665_v46 = vsel %vm7653_vm2, %v7634_v62, 0.0  ;;  %vm7915_vm13 = vcmp.eq.s32.totalorder %v14298_v45, 7  ;;  %vm7786_vm2 = vcmp.eq.s32.totalorder %v14303_v47, 6 }
 0x6ce   : > { %v7539_v35 = vadd.f32 %v7535_v25, %v7409_v16 }
 0x6d0   : > { %v7669_v26 = vadd.f32 %v7665_v46, %v7539_v35  ;;  %v7509_v43 = vpop.f32.mrb[130].mxu1  ;;  %v7639_v17 = vpop.f32.mrb[146].mxu0 }
 0x6d1   : > { %v7536_v12 = vsel %vm7524_vm3, %v7509_v43, 0.0  ;;  %v7666_v24 = vsel %vm7654_vm4, %v7639_v17, 0.0  ;;  %v7511_v21 = vpop.f32.mrb[131].mxu1  ;;  %v7641_v57 = vpop.f32.mrb[147].mxu0  ;;  %vm7916_vm3 = vcmp.eq.s32.totalorder %v14303_v47, 7 }
 0x6d2   : > { %v7540_v56 = vadd.f32 %v7536_v12, %v7410_v55  ;;  %v8466_v47 = vld [vmem:[%s14392_s6] ss:$0 sm:$0xff] }
 0x6d4   : > { %v7670_v37 = vadd.f32 %v7666_v24, %v7540_v56  ;;  %v7514_v8 = vpop.f32.mrb[132].mxu1  ;;  %v7644_v7 = vpop.f32.mrb[148].mxu0 }
 0x6d5   : > { %v7537_v6 = vsel %vm7525_vm5, %v7514_v8, 0.0  ;;  %v7667_v40 = vsel %vm7655_vm10, %v7644_v7, 0.0  ;;  %v7516_v31 = vpop.f32.mrb[133].mxu1  ;;  %v7646_v28 = vpop.f32.mrb[149].mxu0 }
 0x6d6   : > { %v7541_v60 = vadd.f32 %v7537_v6, %v7411_v61 }
 0x6d8   : > { %v7671_v15 = vadd.f32 %v7667_v40, %v7541_v60  ;;  %v7519_v32 = vpop.f32.mrb[134].mxu1  ;;  %v7649_v54 = vpop.f32.mrb[150].mxu0 }
 0x6d9   : > { %v7538_v59 = vsel %vm7526_vm1, %v7519_v32, 0.0  ;;  %v7521_v23 = vpop.f32.mrb[135].mxu1  ;;  %v7651_v50 = vpop.f32.mrb[151].mxu0  ;;  %v7668_v20 = vsel %vm7656_vm7, %v7649_v54, 0.0 }
 0x6da   : > { %v7542_v22 = vadd.f32 %v7538_v59, %v7412_v51 }
 0x6dc   : > { %v7672_v53 = vadd.f32 %v7668_v20, %v7542_v22 }
 0x6fd   : > { %v7764_v0 = vpop.f32.mrb[136].mxu1  ;;  %v7894_v4 = vpop.f32.mrb[152].mxu0 }
 0x6fe   : > { %v7795_v41 = vsel %vm7783_vm8, %v7764_v0, 0.0  ;;  %v7766_v16 = vpop.f32.mrb[137].mxu1  ;;  %v7896_v42 = vpop.f32.mrb[153].mxu0  ;;  %v7925_v48 = vsel %vm7913_vm9, %v7894_v4, 0.0 }
 0x6ff   : > { %v7799_v14 = vadd.f32 %v7795_v41, %v7669_v26 }
 0x701   : > { %v7929_v18 = vadd.f32 %v7925_v48, %v7799_v14  ;;  %v7769_v36 = vpop.f32.mrb[138].mxu1  ;;  %v7899_v33 = vpop.f32.mrb[154].mxu0 }
 0x702   : > { %v7796_v2 = vsel %vm7784_vm6, %v7769_v36, 0.0  ;;  %v7926_v55 = vsel %vm7914_vm12, %v7899_v33, 0.0  ;;  %v7771_v5 = vpop.f32.mrb[139].mxu1  ;;  %v7901_v9 = vpop.f32.mrb[155].mxu0 }
 0x703   : > { %v7933_v63 = vrot.slane %v7929_v18, 4  ;;  %v7800_v27 = vadd.f32 %v7796_v2, %v7670_v37 }
 0x705   : > { %v7934_v30 = vadd.f32 %v7933_v63, %v7929_v18  ;;  %v7930_v1 = vadd.f32 %v7926_v55, %v7800_v27  ;;  %v7774_v39 = vpop.f32.mrb[140].mxu1  ;;  %v7904_v29 = vpop.f32.mrb[156].mxu0 }
 0x706   : > { %v7797_v61 = vsel %vm7785_vm11, %v7774_v39, 0.0  ;;  %v7927_v13 = vsel %vm7915_vm13, %v7904_v29, 0.0  ;;  %v7776_v49 = vpop.f32.mrb[141].mxu1  ;;  %v7906_v34 = vpop.f32.mrb[157].mxu0 }
 0x707   : > { %v7935_v44 = vrot.slane %v7934_v30, 2  ;;  %v7939_v3 = vrot.slane %v7930_v1, 4  ;;  %v7801_v10 = vadd.f32 %v7797_v61, %v7671_v15 }
 0x709   : > { %v7936_v11 = vadd.f32 %v7935_v44, %v7934_v30  ;;  %v7940_v38 = vadd.f32 %v7939_v3, %v7930_v1  ;;  %v7931_v51 = vadd.f32 %v7927_v13, %v7801_v10  ;;  %v7779_v52 = vpop.f32.mrb[142].mxu1  ;;  %v7909_v62 = vpop.f32.mrb[158].mxu0 }
 0x70a   : > { %v7798_v45 = vsel %vm7786_vm2, %v7779_v52, 0.0  ;;  %v7781_v25 = vpop.f32.mrb[143].mxu1  ;;  %v7911_v58 = vpop.f32.mrb[159].mxu0  ;;  %v7928_v26 = vsel %vm7916_vm3, %v7909_v62, 0.0 }
 0x70b   : > { %v7941_v19 = vrot.slane %v7940_v38, 2  ;;  %v7945_v35 = vrot.slane %v7931_v51, 4  ;;  %v7802_v46 = vadd.f32 %v7798_v45, %v7672_v53  ;;  %v7937_v43 = vrot.slane %v7936_v11, 1 }
 0x70d   : > { %v7942_v17 = vadd.f32 %v7941_v19, %v7940_v38  ;;  %v7946_v12 = vadd.f32 %v7945_v35, %v7931_v51  ;;  %v7932_v24 = vadd.f32 %v7928_v26, %v7802_v46  ;;  %v7938_v37 = vadd.f32 %v7937_v43, %v7936_v11 }
 0x70f   : > { %v7943_v21 = vrot.slane %v7942_v17, 1  ;;  %v7947_v57 = vrot.slane %v7946_v12, 2  ;;  %v7951_v56 = vrot.slane %v7932_v24, 4  ;;  %v7964_v60 = vadd.f32 %v8466_v47, %v7938_v37 }
 0x711   : > { %v7944_v8 = vadd.f32 %v7943_v21, %v7942_v17  ;;  %v7948_v7 = vadd.f32 %v7947_v57, %v7946_v12  ;;  %v7952_v6 = vadd.f32 %v7951_v56, %v7932_v24 }
 0x713   : > { %v7965_v40 = vadd.f32 %v8466_v47, %v7944_v8  ;;  %v7949_v31 = vrot.slane %v7948_v7, 1  ;;  %v7953_v28 = vrot.slane %v7952_v6, 2 }
 0x715   : > { %v7972_v15 = vrot.slane %v7965_v40, 7  ;;  %v7950_v32 = vadd.f32 %v7949_v31, %v7948_v7  ;;  %v7954_v54 = vadd.f32 %v7953_v28, %v7952_v6 }
 0x717   : > { %v7966_v59 = vadd.f32 %v8466_v47, %v7950_v32  ;;  %v7955_v23 = vrot.slane %v7954_v54, 1  ;;  %v7973_v50 = vsel %vm4492_vm14, %v7972_v15, %v7964_v60 }
 0x719   : > { %v7974_v22 = vrot.slane %v7966_v59, 6  ;;  %v7956_v20 = vadd.f32 %v7955_v23, %v7954_v54 }
 0x71b   : > { %v7967_v53 = vadd.f32 %v8466_v47, %v7956_v20  ;;  %v7975_v0 = vsel %vm4494_vm15, %v7974_v22, %v7973_v50 }
 0x71d   : > { %v7976_v4 = vrot.slane %v7967_v53, 5 }
 0x71f   : > { %v7977_v41 = vsel %vm4496_vm0, %v7976_v4, %v7975_v0 }
 0x720   : > { %7979 = vst [vmem:[%s287_s20] sm:$0xf] %v7977_v41 }
 0x721   : > { %9480 = shalt.err (!%p9477_p7)
}
 0x722   : > { %s9481_s14 = scalar_lea.hbm %s14343_s23, 64  ;;  %s9485_s16 = scalar_lea.hbm %s14393_s7, 128 }
 0x723   : > { %p9482_p8 = scmp.ne.s32.totalorder %s14343_s23, %s9481_s14  ;;  %p9486_p1 = scmp.lt.u32.totalorder %s14343_s23, %s14393_s7 }
 0x724   : > { %p9487_p0 = scmp.lt.u32.totalorder %s9485_s16, %s9481_s14  ;;  %p9489_p6 = scmp.lt.u32.totalorder %s9481_s14, %s14343_s23 }
 0x725   : > { %p9483_p11 = pnand %p9482_p8, %p14835_p9 }
 0x726   : > { %p9488_p5 = por %p9487_p0, %p9486_p1 }
 0x727   : > { %p9484_p13 = pneg %p9483_p11 }
 0x728   : > { %p9490_p10 = por %p9489_p6, %p9488_p5 }
 0x72a   : > { %p9491_p12 = pnand %p9490_p10, %p9484_p13 }
 0x72c   : > { %9494 = shalt.err (!%p9491_p12)
}
 0x72d   : > { %9387 = dma.vmem_to_hbm [thread:$0]  (%p14835_p9), %s14345_s13, 64, %s14343_s23, %s7981_s19  }
 0x72e PF: > { %p9399_p2 = scmp.ge.s32.totalorder %s9533_s27, 2  ;;  %s8006_s21 = sand.u32 1, %s9521_s24  }
 0x72f   : > { %p14836_p3 = scmp.ne.s32.totalorder %s14479_s12, 0  ;;  %s8007_s22 = scalar_lea.sflag [#allocation4], %s8006_s21 }
 0x731   : > { %p9394_p4 = pnand %p9399_p2, %p14836_p3 }
 0x733   : > { %9516 = dma.done.wait (!%p9394_p4), %s8007_s22, 64  }
 0x734   : > { %9518 = vsyncadd (!%p9394_p4), %s8007_s22, 4294967232  ;;  %p18_p7 = scmp.ge.s32.totalorder %s9608_s30, 4   ;;  %s14837_s24 = smov %s9525_s25 }
 0x735   : > { %s14838_s25 = smov %s9529_s26  ;;  %s14839_s26 = smov %s9619_s10 }
 0x736   : > { %s14840_s27 = smov %s9608_s30  ;;  %20 = sbr.rel (!%p18_p7) target bundleno = 4 (0x4), region = 99 }
 0x73d   :  { %8012 = vsyncpa [#allocation3], 1 }
 0x73e   :  { %8014 = vsyncpa [#allocation3 + $0x1], 1 }
 0x73f   :  { %8015 = vsyncpa [#allocation4], 1 }
 0x740   :  { %8017 = vsyncpa [#allocation4 + $0x1], 1 }

</bundles_post_ra>
